<compile_context>
chip_gen: v7x
topology: tpu7x:2x2x1
jax: 0.10.0
libtpu: 0.0.40
codegen_flags: <defaults>
</compile_context>

<pallas_src>
import functools

import jax
import jax.numpy as jnp
from jax import lax
from jax.experimental import pallas as pl
from jax.experimental.pallas import tpu as pltpu


# ------------------------------- fused kernel ------------------------------ #

def _decoder2_kernel(x_ref, ind_ref, w1_ref, b1_ref, w2_ref, b2_ref,
                     w3_ref, b3_ref, out_ref, pad_a, pad_b):
    # x_ref   : (1, H, W, Cin)       pooled activation (NHWC)
    # ind_ref : (1, H, W, Cin)       MaxPool flat indices into the (Ho, Wo) plane
    # wK_ref  : (9*Cin_k, Cout_k)    im2col weights, tap-major, BN scale folded in
    # bK_ref  : (1, Cout_k)          folded conv-bias + BN shift
    # out_ref : (1, 4, H, W, Cout)   conv3 output in quadrant (space-to-depth) form
    # pad_a/b : (4, H+2, W+2, Cin)   zero-padded quadrant planes (VMEM scratch, ping-pong)
    H, W, cin0 = x_ref.shape[1], x_ref.shape[2], x_ref.shape[3]
    Wo = 2 * W

    # Zero the scratch planes; the never-written 1-element border is the conv padding=1.
    pad_a[...] = jnp.zeros_like(pad_a)
    pad_b[...] = jnp.zeros_like(pad_b)

    # ---- MaxUnpool2d(2,2): compare-select, written straight into quadrant planes ----
    x = x_ref[0]
    ind = ind_ref[0]
    ih = lax.broadcasted_iota(jnp.int32, (H, W, cin0), 0)
    iw = lax.broadcasted_iota(jnp.int32, (H, W, cin0), 1)
    for qh in range(2):
        for qw in range(2):
            pos = (2 * ih + qh) * Wo + (2 * iw + qw)       # flat output index of quadrant
            pad_a[2 * qh + qw, 1:1 + H, 1:1 + W, :] = jnp.where(ind == pos, x, 0.0)

    # ---- Conv3x3(pad=1) + folded BN + ReLU; one im2col matmul per layer ----
    def conv_bn_relu(src, w_ref, b_ref, dst):
        cin = w_ref.shape[0] // 9
        cout = w_ref.shape[1]
        pieces = []
        for qh in range(2):                                # output quadrant parity
            for qw in range(2):
                taps = []
                for dy in range(3):                        # 3x3 taps at full resolution
                    for dx in range(3):
                        ry = qh + dy - 1                   # full-res row offset: 2i + ry
                        rx = qw + dx - 1
                        src_q = 2 * (ry % 2) + (rx % 2)    # source quadrant plane
                        r0 = ry // 2 + 1                   # offset inside padded plane
                        c0 = rx // 2 + 1
                        taps.append(src[src_q, r0:r0 + H, c0:c0 + W, :])
                pieces.append(jnp.concatenate(taps, axis=-1))          # (H, W, 9*cin)
        patches = jnp.concatenate(pieces, axis=0).reshape(4 * H * W, 9 * cin)
        y = jnp.dot(patches, w_ref[...], preferred_element_type=jnp.float32)
        y = jnp.maximum(y + b_ref[...], 0.0)               # folded bias + ReLU
        for q in range(4):
            yq = y[q * H * W:(q + 1) * H * W, :].reshape(H, W, cout)
            if dst is None:
                out_ref[0, q] = yq.astype(out_ref.dtype)
            else:
                dst[q, 1:1 + H, 1:1 + W, :] = yq

    conv_bn_relu(pad_a, w1_ref, b1_ref, pad_b)   # conv1: Cin -> Cin
    conv_bn_relu(pad_b, w2_ref, b2_ref, pad_a)   # conv2: Cin -> Cin
    conv_bn_relu(pad_a, w3_ref, b3_ref, None)    # conv3: Cin -> Cout, straight to output


# ------------------------------ parameters --------------------------------- #

def init_cbr_params(key, cin, cout):
    kw, kb, kg, kbe, km, kv = jax.random.split(key, 6)
    return dict(
        w=jax.random.normal(kw, (cout, cin, 3, 3), jnp.float32) * 0.1,   # PyTorch OIHW
        b=jax.random.normal(kb, (cout,), jnp.float32) * 0.1,
        gamma=1.0 + 0.1 * jax.random.normal(kg, (cout,), jnp.float32),
        beta=0.1 * jax.random.normal(kbe, (cout,), jnp.float32),
        mean=0.1 * jax.random.normal(km, (cout,), jnp.float32),
        var=jax.random.uniform(kv, (cout,), jnp.float32, 0.5, 1.5),
    )


def _fold_cbr(p, eps=1e-5):
    """Fold conv bias + BatchNorm (inference) into (im2col weight, bias)."""
    cout, cin = p["w"].shape[0], p["w"].shape[1]
    scale = p["gamma"] / jnp.sqrt(p["var"] + eps)                      # (cout,)
    w = p["w"] * scale[:, None, None, None]                            # BN scale in weights
    wmat = jnp.transpose(w, (2, 3, 1, 0)).reshape(9 * cin, cout)       # (tap*cin, cout)
    bias = (p["b"] - p["mean"]) * scale + p["beta"]
    return wmat.astype(jnp.float32), bias[None, :].astype(jnp.float32)


# ------------------------------ decoder2 forward --------------------------- #

def decoder2_forward(params, x_nchw, ind_nchw, out_shape):
    """x, ind: NCHW (PyTorch convention). out_shape: (N, C, Ho, Wo)."""
    N, Cin, H, W = x_nchw.shape
    Ho, Wo = int(out_shape[2]), int(out_shape[3])
    assert Ho == 2 * H and Wo == 2 * W, "decoder2 expects output_size == 2 * input size"

    x = jnp.transpose(x_nchw, (0, 2, 3, 1)).astype(jnp.float32)        # NHWC
    ind = jnp.transpose(ind_nchw, (0, 2, 3, 1)).astype(jnp.int32)

    w1, b1 = _fold_cbr(params["conv1"])
    w2, b2 = _fold_cbr(params["conv2"])
    w3, b3 = _fold_cbr(params["conv3"])
    Cout = w3.shape[1]

    quad = pl.pallas_call(
        _decoder2_kernel,
        out_shape=jax.ShapeDtypeStruct((N, 4, H, W, Cout), jnp.float32),
        grid=(N,),
        in_specs=[
            pl.BlockSpec((1, H, W, Cin), lambda n: (n, 0, 0, 0)),
            pl.BlockSpec((1, H, W, Cin), lambda n: (n, 0, 0, 0)),
            pl.BlockSpec(w1.shape, lambda n: (0, 0)),
            pl.BlockSpec(b1.shape, lambda n: (0, 0)),
            pl.BlockSpec(w2.shape, lambda n: (0, 0)),
            pl.BlockSpec(b2.shape, lambda n: (0, 0)),
            pl.BlockSpec(w3.shape, lambda n: (0, 0)),
            pl.BlockSpec(b3.shape, lambda n: (0, 0)),
        ],
        out_specs=pl.BlockSpec((1, 4, H, W, Cout), lambda n: (n, 0, 0, 0, 0)),
        scratch_shapes=[pltpu.VMEM((4, H + 2, W + 2, Cin), jnp.float32),
                        pltpu.VMEM((4, H + 2, W + 2, Cin), jnp.float32)],
        compiler_params=pltpu.CompilerParams(dimension_semantics=("parallel",)),
    )(x, ind, w1, b1, w2, b2, w3, b3)

    # Reassemble quadrants -> NCHW: quad[n, 2*qh+qw, i, j, c] == out[n, c, 2i+qh, 2j+qw].
    q = quad.reshape(N, 2, 2, H, W, Cout)
    return jnp.transpose(q, (0, 5, 3, 1, 4, 2)).reshape(N, Cout, Ho, Wo)


# ------------------------------ pure-JAX reference ------------------------- #

def _reference_forward(params, x_nchw, ind_nchw, out_shape, eps=1e-5):
    N, C, H, W = x_nchw.shape
    Ho, Wo = int(out_shape[2]), int(out_shape[3])
    up = jnp.zeros((N, C, Ho * Wo), jnp.float32)
    n_idx = jnp.arange(N)[:, None, None]
    c_idx = jnp.arange(C)[None, :, None]
    up = up.at[n_idx, c_idx, ind_nchw.reshape(N, C, H * W)].set(x_nchw.reshape(N, C, H * W))
    y = up.reshape(N, C, Ho, Wo)
    for name in ("conv1", "conv2", "conv3"):
        p = params[name]
        y = lax.conv_general_dilated(
            y, p["w"], (1, 1), ((1, 1), (1, 1)),
            dimension_numbers=("NCHW", "OIHW", "NCHW"),
            precision=lax.Precision.HIGHEST)
        y = y + p["b"][None, :, None, None]
        y = (y - p["mean"][None, :, None, None]) / jnp.sqrt(p["var"][None, :, None, None] + eps)
        y = y * p["gamma"][None, :, None, None] + p["beta"][None, :, None, None]
        y = jnp.maximum(y, 0.0)
    return y


if __name__ == "__main__":
    key = jax.random.PRNGKey(0)
    N, C_in, C_out, H, W = 2, 4, 8, 8, 8
    Ho, Wo = 2 * H, 2 * W
    out_shape = (N, C_in, Ho, Wo)

    kx, kh, kw_, k1, k2, k3 = jax.random.split(key, 6)
    x = jax.random.normal(kx, (N, C_in, H, W), jnp.float32)

    # Synthesize MaxPool2d(2,2) indices: flat position inside the (Ho, Wo) map, each
    # index lying inside its own 2x2 window (as real return_indices=True values do).
    dh = jax.random.randint(kh, (N, C_in, H, W), 0, 2)
    dw = jax.random.randint(kw_, (N, C_in, H, W), 0, 2)
    i_grid = jnp.arange(H)[None, None, :, None]
    j_grid = jnp.arange(W)[None, None, None, :]
    ind = ((2 * i_grid + dh) * Wo + (2 * j_grid + dw)).astype(jnp.int32)

    params = {
        "conv1": init_cbr_params(k1, C_in, C_in),
        "conv2": init_cbr_params(k2, C_in, C_in),
        "conv3": init_cbr_params(k3, C_in, C_out),
    }

    fwd = jax.jit(functools.partial(decoder2_forward, params),
                  static_argnames=("out_shape",))
    out = fwd(x, ind, out_shape=out_shape)
    jax.block_until_ready(out)
    assert out.shape == (N, C_out, Ho, Wo), out.shape

    ref = _reference_forward(params, x, ind, out_shape)
    err = float(jnp.max(jnp.abs(out - ref)))
    assert jnp.allclose(out, ref, atol=1e-2, rtol=1e-2), err
    print("KERNEL_OK")
</pallas_src>

<mosaic_0001>
module attributes {stable_mosaic.version = 11 : i64} {
  func.func @_decoder2_kernel(%arg0: i32, %arg1: memref<1x8x8x4xf32, #tpu.memory_space<vmem>>, %arg2: memref<1x8x8x4xi32, #tpu.memory_space<vmem>>, %arg3: memref<36x4xf32, #tpu.memory_space<vmem>>, %arg4: memref<1x4xf32, #tpu.memory_space<vmem>>, %arg5: memref<36x4xf32, #tpu.memory_space<vmem>>, %arg6: memref<1x4xf32, #tpu.memory_space<vmem>>, %arg7: memref<36x8xf32, #tpu.memory_space<vmem>>, %arg8: memref<1x8xf32, #tpu.memory_space<vmem>>, %arg9: memref<1x4x8x8x8xf32, #tpu.memory_space<vmem>>, %arg10: memref<4x10x10x4xf32, #tpu.memory_space<vmem>>, %arg11: memref<4x10x10x4xf32, #tpu.memory_space<vmem>>) attributes {dimension_semantics = [#tpu.dimension_semantics<parallel>], iteration_bounds = array<i64: 2>, scalar_prefetch = 0 : i64, scratch_operands = 2 : i64, tpu.core_type = #tpu.core_type<tc>, window_params = [{transform_indices = @transform_0, window_bounds = array<i64: 1, 8, 8, 4>}, {transform_indices = @transform_1, window_bounds = array<i64: 1, 8, 8, 4>}, {pipeline_mode = #tpu.pipeline_mode<synchronous>, transform_indices = @transform_2, window_bounds = array<i64: 36, 4>}, {pipeline_mode = #tpu.pipeline_mode<synchronous>, transform_indices = @transform_3, window_bounds = array<i64: 1, 4>}, {pipeline_mode = #tpu.pipeline_mode<synchronous>, transform_indices = @transform_4, window_bounds = array<i64: 36, 4>}, {pipeline_mode = #tpu.pipeline_mode<synchronous>, transform_indices = @transform_5, window_bounds = array<i64: 1, 4>}, {pipeline_mode = #tpu.pipeline_mode<synchronous>, transform_indices = @transform_6, window_bounds = array<i64: 36, 8>}, {pipeline_mode = #tpu.pipeline_mode<synchronous>, transform_indices = @transform_7, window_bounds = array<i64: 1, 8>}, {transform_indices = @transform_8, window_bounds = array<i64: 1, 4, 8, 8, 8>}]} {
    %cst = arith.constant 0.000000e+00 : f32
    %0 = vector.broadcast %cst : f32 to vector<4x10x10x4xf32>
    %c0 = arith.constant 0 : index
    %c0_0 = arith.constant 0 : index
    %c0_1 = arith.constant 0 : index
    %c0_2 = arith.constant 0 : index
    %1 = vector.load %arg10[%c0, %c0_0, %c0_1, %c0_2] : memref<4x10x10x4xf32, #tpu.memory_space<vmem>>, vector<4x10x10x4xf32>
    tpu.vector_store %arg10[%c0, %c0_0, %c0_1, %c0_2], %0 {strides = array<i32>} : memref<4x10x10x4xf32, #tpu.memory_space<vmem>>, vector<4x10x10x4xf32>,
    %cst_3 = arith.constant 0.000000e+00 : f32
    %2 = vector.broadcast %cst_3 : f32 to vector<4x10x10x4xf32>
    %c0_4 = arith.constant 0 : index
    %c0_5 = arith.constant 0 : index
    %c0_6 = arith.constant 0 : index
    %c0_7 = arith.constant 0 : index
    %3 = vector.load %arg11[%c0_4, %c0_5, %c0_6, %c0_7] : memref<4x10x10x4xf32, #tpu.memory_space<vmem>>, vector<4x10x10x4xf32>
    tpu.vector_store %arg11[%c0_4, %c0_5, %c0_6, %c0_7], %2 {strides = array<i32>} : memref<4x10x10x4xf32, #tpu.memory_space<vmem>>, vector<4x10x10x4xf32>,
    %c0_8 = arith.constant 0 : index
    %c0_9 = arith.constant 0 : index
    %c0_10 = arith.constant 0 : index
    %c0_11 = arith.constant 0 : index
    %4 = vector.load %arg1[%c0_8, %c0_9, %c0_10, %c0_11] : memref<1x8x8x4xf32, #tpu.memory_space<vmem>>, vector<1x8x8x4xf32>
    %5 = vector.shape_cast %4 : vector<1x8x8x4xf32> to vector<8x8x4xf32>
    %c0_12 = arith.constant 0 : index
    %c0_13 = arith.constant 0 : index
    %c0_14 = arith.constant 0 : index
    %c0_15 = arith.constant 0 : index
    %6 = vector.load %arg2[%c0_12, %c0_13, %c0_14, %c0_15] : memref<1x8x8x4xi32, #tpu.memory_space<vmem>>, vector<1x8x8x4xi32>
    %7 = vector.shape_cast %6 : vector<1x8x8x4xi32> to vector<8x8x4xi32>
    %8 = tpu.iota {dimensions = array<i32: 0>} : vector<8x8x4xi32>
    %9 = tpu.iota {dimensions = array<i32: 1>} : vector<8x8x4xi32>
    %c2_i32 = arith.constant 2 : i32
    %10 = vector.broadcast %c2_i32 : i32 to vector<8x8x4xi32>
    %11 = arith.muli %10, %8 : vector<8x8x4xi32>
    %c0_i32 = arith.constant 0 : i32
    %12 = vector.broadcast %c0_i32 : i32 to vector<8x8x4xi32>
    %13 = arith.addi %11, %12 : vector<8x8x4xi32>
    %c16_i32 = arith.constant 16 : i32
    %14 = vector.broadcast %c16_i32 : i32 to vector<8x8x4xi32>
    %15 = arith.muli %13, %14 : vector<8x8x4xi32>
    %c2_i32_16 = arith.constant 2 : i32
    %16 = vector.broadcast %c2_i32_16 : i32 to vector<8x8x4xi32>
    %17 = arith.muli %16, %9 : vector<8x8x4xi32>
    %c0_i32_17 = arith.constant 0 : i32
    %18 = vector.broadcast %c0_i32_17 : i32 to vector<8x8x4xi32>
    %19 = arith.addi %17, %18 : vector<8x8x4xi32>
    %20 = arith.addi %15, %19 : vector<8x8x4xi32>
    %21 = arith.cmpi eq, %7, %20 : vector<8x8x4xi32>
    %cst_18 = arith.constant 0.000000e+00 : f32
    %22 = vector.broadcast %cst_18 : f32 to vector<8x8x4xf32>
    %23 = arith.select %21, %5, %22 : vector<8x8x4xi1>, vector<8x8x4xf32>
    %c0_19 = arith.constant 0 : index
    %c1 = arith.constant 1 : index
    %c1_20 = arith.constant 1 : index
    %c0_21 = arith.constant 0 : index
    %24 = vector.load %arg10[%c0_19, %c1, %c1_20, %c0_21] : memref<4x10x10x4xf32, #tpu.memory_space<vmem>>, vector<1x8x8x4xf32>
    %25 = vector.shape_cast %24 : vector<1x8x8x4xf32> to vector<8x8x4xf32>
    %26 = vector.shape_cast %23 : vector<8x8x4xf32> to vector<1x8x8x4xf32>
    tpu.vector_store %arg10[%c0_19, %c1, %c1_20, %c0_21], %26 {strides = array<i32>} : memref<4x10x10x4xf32, #tpu.memory_space<vmem>>, vector<1x8x8x4xf32>,
    %c2_i32_22 = arith.constant 2 : i32
    %27 = vector.broadcast %c2_i32_22 : i32 to vector<8x8x4xi32>
    %28 = arith.muli %27, %8 : vector<8x8x4xi32>
    %c0_i32_23 = arith.constant 0 : i32
    %29 = vector.broadcast %c0_i32_23 : i32 to vector<8x8x4xi32>
    %30 = arith.addi %28, %29 : vector<8x8x4xi32>
    %c16_i32_24 = arith.constant 16 : i32
    %31 = vector.broadcast %c16_i32_24 : i32 to vector<8x8x4xi32>
    %32 = arith.muli %30, %31 : vector<8x8x4xi32>
    %c2_i32_25 = arith.constant 2 : i32
    %33 = vector.broadcast %c2_i32_25 : i32 to vector<8x8x4xi32>
    %34 = arith.muli %33, %9 : vector<8x8x4xi32>
    %c1_i32 = arith.constant 1 : i32
    %35 = vector.broadcast %c1_i32 : i32 to vector<8x8x4xi32>
    %36 = arith.addi %34, %35 : vector<8x8x4xi32>
    %37 = arith.addi %32, %36 : vector<8x8x4xi32>
    %38 = arith.cmpi eq, %7, %37 : vector<8x8x4xi32>
    %cst_26 = arith.constant 0.000000e+00 : f32
    %39 = vector.broadcast %cst_26 : f32 to vector<8x8x4xf32>
    %40 = arith.select %38, %5, %39 : vector<8x8x4xi1>, vector<8x8x4xf32>
    %c1_27 = arith.constant 1 : index
    %c1_28 = arith.constant 1 : index
    %c1_29 = arith.constant 1 : index
    %c0_30 = arith.constant 0 : index
    %41 = vector.load %arg10[%c1_27, %c1_28, %c1_29, %c0_30] : memref<4x10x10x4xf32, #tpu.memory_space<vmem>>, vector<1x8x8x4xf32>
    %42 = vector.shape_cast %41 : vector<1x8x8x4xf32> to vector<8x8x4xf32>
    %43 = vector.shape_cast %40 : vector<8x8x4xf32> to vector<1x8x8x4xf32>
    tpu.vector_store %arg10[%c1_27, %c1_28, %c1_29, %c0_30], %43 {strides = array<i32>} : memref<4x10x10x4xf32, #tpu.memory_space<vmem>>, vector<1x8x8x4xf32>,
    %c2_i32_31 = arith.constant 2 : i32
    %44 = vector.broadcast %c2_i32_31 : i32 to vector<8x8x4xi32>
    %45 = arith.muli %44, %8 : vector<8x8x4xi32>
    %c1_i32_32 = arith.constant 1 : i32
    %46 = vector.broadcast %c1_i32_32 : i32 to vector<8x8x4xi32>
    %47 = arith.addi %45, %46 : vector<8x8x4xi32>
    %c16_i32_33 = arith.constant 16 : i32
    %48 = vector.broadcast %c16_i32_33 : i32 to vector<8x8x4xi32>
    %49 = arith.muli %47, %48 : vector<8x8x4xi32>
    %c2_i32_34 = arith.constant 2 : i32
    %50 = vector.broadcast %c2_i32_34 : i32 to vector<8x8x4xi32>
    %51 = arith.muli %50, %9 : vector<8x8x4xi32>
    %c0_i32_35 = arith.constant 0 : i32
    %52 = vector.broadcast %c0_i32_35 : i32 to vector<8x8x4xi32>
    %53 = arith.addi %51, %52 : vector<8x8x4xi32>
    %54 = arith.addi %49, %53 : vector<8x8x4xi32>
    %55 = arith.cmpi eq, %7, %54 : vector<8x8x4xi32>
    %cst_36 = arith.constant 0.000000e+00 : f32
    %56 = vector.broadcast %cst_36 : f32 to vector<8x8x4xf32>
    %57 = arith.select %55, %5, %56 : vector<8x8x4xi1>, vector<8x8x4xf32>
    %c2 = arith.constant 2 : index
    %c1_37 = arith.constant 1 : index
    %c1_38 = arith.constant 1 : index
    %c0_39 = arith.constant 0 : index
    %58 = vector.load %arg10[%c2, %c1_37, %c1_38, %c0_39] : memref<4x10x10x4xf32, #tpu.memory_space<vmem>>, vector<1x8x8x4xf32>
    %59 = vector.shape_cast %58 : vector<1x8x8x4xf32> to vector<8x8x4xf32>
    %60 = vector.shape_cast %57 : vector<8x8x4xf32> to vector<1x8x8x4xf32>
    tpu.vector_store %arg10[%c2, %c1_37, %c1_38, %c0_39], %60 {strides = array<i32>} : memref<4x10x10x4xf32, #tpu.memory_space<vmem>>, vector<1x8x8x4xf32>,
    %c2_i32_40 = arith.constant 2 : i32
    %61 = vector.broadcast %c2_i32_40 : i32 to vector<8x8x4xi32>
    %62 = arith.muli %61, %8 : vector<8x8x4xi32>
    %c1_i32_41 = arith.constant 1 : i32
    %63 = vector.broadcast %c1_i32_41 : i32 to vector<8x8x4xi32>
    %64 = arith.addi %62, %63 : vector<8x8x4xi32>
    %c16_i32_42 = arith.constant 16 : i32
    %65 = vector.broadcast %c16_i32_42 : i32 to vector<8x8x4xi32>
    %66 = arith.muli %64, %65 : vector<8x8x4xi32>
    %c2_i32_43 = arith.constant 2 : i32
    %67 = vector.broadcast %c2_i32_43 : i32 to vector<8x8x4xi32>
    %68 = arith.muli %67, %9 : vector<8x8x4xi32>
    %c1_i32_44 = arith.constant 1 : i32
    %69 = vector.broadcast %c1_i32_44 : i32 to vector<8x8x4xi32>
    %70 = arith.addi %68, %69 : vector<8x8x4xi32>
    %71 = arith.addi %66, %70 : vector<8x8x4xi32>
    %72 = arith.cmpi eq, %7, %71 : vector<8x8x4xi32>
    %cst_45 = arith.constant 0.000000e+00 : f32
    %73 = vector.broadcast %cst_45 : f32 to vector<8x8x4xf32>
    %74 = arith.select %72, %5, %73 : vector<8x8x4xi1>, vector<8x8x4xf32>
    %c3 = arith.constant 3 : index
    %c1_46 = arith.constant 1 : index
    %c1_47 = arith.constant 1 : index
    %c0_48 = arith.constant 0 : index
    %75 = vector.load %arg10[%c3, %c1_46, %c1_47, %c0_48] : memref<4x10x10x4xf32, #tpu.memory_space<vmem>>, vector<1x8x8x4xf32>
    %76 = vector.shape_cast %75 : vector<1x8x8x4xf32> to vector<8x8x4xf32>
    %77 = vector.shape_cast %74 : vector<8x8x4xf32> to vector<1x8x8x4xf32>
    tpu.vector_store %arg10[%c3, %c1_46, %c1_47, %c0_48], %77 {strides = array<i32>} : memref<4x10x10x4xf32, #tpu.memory_space<vmem>>, vector<1x8x8x4xf32>,
    %c3_49 = arith.constant 3 : index
    %c0_50 = arith.constant 0 : index
    %c0_51 = arith.constant 0 : index
    %c0_52 = arith.constant 0 : index
    %78 = vector.load %arg10[%c3_49, %c0_50, %c0_51, %c0_52] : memref<4x10x10x4xf32, #tpu.memory_space<vmem>>, vector<1x8x8x4xf32>
    %79 = vector.shape_cast %78 : vector<1x8x8x4xf32> to vector<8x8x4xf32>
    %c2_53 = arith.constant 2 : index
    %c0_54 = arith.constant 0 : index
    %c1_55 = arith.constant 1 : index
    %c0_56 = arith.constant 0 : index
    %80 = vector.load %arg10[%c2_53, %c0_54, %c1_55, %c0_56] : memref<4x10x10x4xf32, #tpu.memory_space<vmem>>, vector<1x8x8x4xf32>
    %81 = vector.shape_cast %80 : vector<1x8x8x4xf32> to vector<8x8x4xf32>
    %c3_57 = arith.constant 3 : index
    %c0_58 = arith.constant 0 : index
    %c1_59 = arith.constant 1 : index
    %c0_60 = arith.constant 0 : index
    %82 = vector.load %arg10[%c3_57, %c0_58, %c1_59, %c0_60] : memref<4x10x10x4xf32, #tpu.memory_space<vmem>>, vector<1x8x8x4xf32>
    %83 = vector.shape_cast %82 : vector<1x8x8x4xf32> to vector<8x8x4xf32>
    %c1_61 = arith.constant 1 : index
    %c1_62 = arith.constant 1 : index
    %c0_63 = arith.constant 0 : index
    %c0_64 = arith.constant 0 : index
    %84 = vector.load %arg10[%c1_61, %c1_62, %c0_63, %c0_64] : memref<4x10x10x4xf32, #tpu.memory_space<vmem>>, vector<1x8x8x4xf32>
    %85 = vector.shape_cast %84 : vector<1x8x8x4xf32> to vector<8x8x4xf32>
    %c0_65 = arith.constant 0 : index
    %c1_66 = arith.constant 1 : index
    %c1_67 = arith.constant 1 : index
    %c0_68 = arith.constant 0 : index
    %86 = vector.load %arg10[%c0_65, %c1_66, %c1_67, %c0_68] : memref<4x10x10x4xf32, #tpu.memory_space<vmem>>, vector<1x8x8x4xf32>
    %87 = vector.shape_cast %86 : vector<1x8x8x4xf32> to vector<8x8x4xf32>
    %c1_69 = arith.constant 1 : index
    %c1_70 = arith.constant 1 : index
    %c1_71 = arith.constant 1 : index
    %c0_72 = arith.constant 0 : index
    %88 = vector.load %arg10[%c1_69, %c1_70, %c1_71, %c0_72] : memref<4x10x10x4xf32, #tpu.memory_space<vmem>>, vector<1x8x8x4xf32>
    %89 = vector.shape_cast %88 : vector<1x8x8x4xf32> to vector<8x8x4xf32>
    %c3_73 = arith.constant 3 : index
    %c1_74 = arith.constant 1 : index
    %c0_75 = arith.constant 0 : index
    %c0_76 = arith.constant 0 : index
    %90 = vector.load %arg10[%c3_73, %c1_74, %c0_75, %c0_76] : memref<4x10x10x4xf32, #tpu.memory_space<vmem>>, vector<1x8x8x4xf32>
    %91 = vector.shape_cast %90 : vector<1x8x8x4xf32> to vector<8x8x4xf32>
    %c2_77 = arith.constant 2 : index
    %c1_78 = arith.constant 1 : index
    %c1_79 = arith.constant 1 : index
    %c0_80 = arith.constant 0 : index
    %92 = vector.load %arg10[%c2_77, %c1_78, %c1_79, %c0_80] : memref<4x10x10x4xf32, #tpu.memory_space<vmem>>, vector<1x8x8x4xf32>
    %93 = vector.shape_cast %92 : vector<1x8x8x4xf32> to vector<8x8x4xf32>
    %c3_81 = arith.constant 3 : index
    %c1_82 = arith.constant 1 : index
    %c1_83 = arith.constant 1 : index
    %c0_84 = arith.constant 0 : index
    %94 = vector.load %arg10[%c3_81, %c1_82, %c1_83, %c0_84] : memref<4x10x10x4xf32, #tpu.memory_space<vmem>>, vector<1x8x8x4xf32>
    %95 = vector.shape_cast %94 : vector<1x8x8x4xf32> to vector<8x8x4xf32>
    %96 = tpu.concatenate %79, %81, %83, %85, %87, %89, %91, %93, %95 in 2 : vector<8x8x4xf32>, vector<8x8x4xf32>, vector<8x8x4xf32>, vector<8x8x4xf32>, vector<8x8x4xf32>, vector<8x8x4xf32>, vector<8x8x4xf32>, vector<8x8x4xf32>, vector<8x8x4xf32> -> vector<8x8x36xf32>
    %c2_85 = arith.constant 2 : index
    %c0_86 = arith.constant 0 : index
    %c1_87 = arith.constant 1 : index
    %c0_88 = arith.constant 0 : index
    %97 = vector.load %arg10[%c2_85, %c0_86, %c1_87, %c0_88] : memref<4x10x10x4xf32, #tpu.memory_space<vmem>>, vector<1x8x8x4xf32>
    %98 = vector.shape_cast %97 : vector<1x8x8x4xf32> to vector<8x8x4xf32>
    %c3_89 = arith.constant 3 : index
    %c0_90 = arith.constant 0 : index
    %c1_91 = arith.constant 1 : index
    %c0_92 = arith.constant 0 : index
    %99 = vector.load %arg10[%c3_89, %c0_90, %c1_91, %c0_92] : memref<4x10x10x4xf32, #tpu.memory_space<vmem>>, vector<1x8x8x4xf32>
    %100 = vector.shape_cast %99 : vector<1x8x8x4xf32> to vector<8x8x4xf32>
    %c2_93 = arith.constant 2 : index
    %c0_94 = arith.constant 0 : index
    %c2_95 = arith.constant 2 : index
    %c0_96 = arith.constant 0 : index
    %101 = vector.load %arg10[%c2_93, %c0_94, %c2_95, %c0_96] : memref<4x10x10x4xf32, #tpu.memory_space<vmem>>, vector<1x8x8x4xf32>
    %102 = vector.shape_cast %101 : vector<1x8x8x4xf32> to vector<8x8x4xf32>
    %c0_97 = arith.constant 0 : index
    %c1_98 = arith.constant 1 : index
    %c1_99 = arith.constant 1 : index
    %c0_100 = arith.constant 0 : index
    %103 = vector.load %arg10[%c0_97, %c1_98, %c1_99, %c0_100] : memref<4x10x10x4xf32, #tpu.memory_space<vmem>>, vector<1x8x8x4xf32>
    %104 = vector.shape_cast %103 : vector<1x8x8x4xf32> to vector<8x8x4xf32>
    %c1_101 = arith.constant 1 : index
    %c1_102 = arith.constant 1 : index
    %c1_103 = arith.constant 1 : index
    %c0_104 = arith.constant 0 : index
    %105 = vector.load %arg10[%c1_101, %c1_102, %c1_103, %c0_104] : memref<4x10x10x4xf32, #tpu.memory_space<vmem>>, vector<1x8x8x4xf32>
    %106 = vector.shape_cast %105 : vector<1x8x8x4xf32> to vector<8x8x4xf32>
    %c0_105 = arith.constant 0 : index
    %c1_106 = arith.constant 1 : index
    %c2_107 = arith.constant 2 : index
    %c0_108 = arith.constant 0 : index
    %107 = vector.load %arg10[%c0_105, %c1_106, %c2_107, %c0_108] : memref<4x10x10x4xf32, #tpu.memory_space<vmem>>, vector<1x8x8x4xf32>
    %108 = vector.shape_cast %107 : vector<1x8x8x4xf32> to vector<8x8x4xf32>
    %c2_109 = arith.constant 2 : index
    %c1_110 = arith.constant 1 : index
    %c1_111 = arith.constant 1 : index
    %c0_112 = arith.constant 0 : index
    %109 = vector.load %arg10[%c2_109, %c1_110, %c1_111, %c0_112] : memref<4x10x10x4xf32, #tpu.memory_space<vmem>>, vector<1x8x8x4xf32>
    %110 = vector.shape_cast %109 : vector<1x8x8x4xf32> to vector<8x8x4xf32>
    %c3_113 = arith.constant 3 : index
    %c1_114 = arith.constant 1 : index
    %c1_115 = arith.constant 1 : index
    %c0_116 = arith.constant 0 : index
    %111 = vector.load %arg10[%c3_113, %c1_114, %c1_115, %c0_116] : memref<4x10x10x4xf32, #tpu.memory_space<vmem>>, vector<1x8x8x4xf32>
    %112 = vector.shape_cast %111 : vector<1x8x8x4xf32> to vector<8x8x4xf32>
    %c2_117 = arith.constant 2 : index
    %c1_118 = arith.constant 1 : index
    %c2_119 = arith.constant 2 : index
    %c0_120 = arith.constant 0 : index
    %113 = vector.load %arg10[%c2_117, %c1_118, %c2_119, %c0_120] : memref<4x10x10x4xf32, #tpu.memory_space<vmem>>, vector<1x8x8x4xf32>
    %114 = vector.shape_cast %113 : vector<1x8x8x4xf32> to vector<8x8x4xf32>
    %115 = tpu.concatenate %98, %100, %102, %104, %106, %108, %110, %112, %114 in 2 : vector<8x8x4xf32>, vector<8x8x4xf32>, vector<8x8x4xf32>, vector<8x8x4xf32>, vector<8x8x4xf32>, vector<8x8x4xf32>, vector<8x8x4xf32>, vector<8x8x4xf32>, vector<8x8x4xf32> -> vector<8x8x36xf32>
    %c1_121 = arith.constant 1 : index
    %c1_122 = arith.constant 1 : index
    %c0_123 = arith.constant 0 : index
    %c0_124 = arith.constant 0 : index
    %116 = vector.load %arg10[%c1_121, %c1_122, %c0_123, %c0_124] : memref<4x10x10x4xf32, #tpu.memory_space<vmem>>, vector<1x8x8x4xf32>
    %117 = vector.shape_cast %116 : vector<1x8x8x4xf32> to vector<8x8x4xf32>
    %c0_125 = arith.constant 0 : index
    %c1_126 = arith.constant 1 : index
    %c1_127 = arith.constant 1 : index
    %c0_128 = arith.constant 0 : index
    %118 = vector.load %arg10[%c0_125, %c1_126, %c1_127, %c0_128] : memref<4x10x10x4xf32, #tpu.memory_space<vmem>>, vector<1x8x8x4xf32>
    %119 = vector.shape_cast %118 : vector<1x8x8x4xf32> to vector<8x8x4xf32>
    %c1_129 = arith.constant 1 : index
    %c1_130 = arith.constant 1 : index
    %c1_131 = arith.constant 1 : index
    %c0_132 = arith.constant 0 : index
    %120 = vector.load %arg10[%c1_129, %c1_130, %c1_131, %c0_132] : memref<4x10x10x4xf32, #tpu.memory_space<vmem>>, vector<1x8x8x4xf32>
    %121 = vector.shape_cast %120 : vector<1x8x8x4xf32> to vector<8x8x4xf32>
    %c3_133 = arith.constant 3 : index
    %c1_134 = arith.constant 1 : index
    %c0_135 = arith.constant 0 : index
    %c0_136 = arith.constant 0 : index
    %122 = vector.load %arg10[%c3_133, %c1_134, %c0_135, %c0_136] : memref<4x10x10x4xf32, #tpu.memory_space<vmem>>, vector<1x8x8x4xf32>
    %123 = vector.shape_cast %122 : vector<1x8x8x4xf32> to vector<8x8x4xf32>
    %c2_137 = arith.constant 2 : index
    %c1_138 = arith.constant 1 : index
    %c1_139 = arith.constant 1 : index
    %c0_140 = arith.constant 0 : index
    %124 = vector.load %arg10[%c2_137, %c1_138, %c1_139, %c0_140] : memref<4x10x10x4xf32, #tpu.memory_space<vmem>>, vector<1x8x8x4xf32>
    %125 = vector.shape_cast %124 : vector<1x8x8x4xf32> to vector<8x8x4xf32>
    %c3_141 = arith.constant 3 : index
    %c1_142 = arith.constant 1 : index
    %c1_143 = arith.constant 1 : index
    %c0_144 = arith.constant 0 : index
    %126 = vector.load %arg10[%c3_141, %c1_142, %c1_143, %c0_144] : memref<4x10x10x4xf32, #tpu.memory_space<vmem>>, vector<1x8x8x4xf32>
    %127 = vector.shape_cast %126 : vector<1x8x8x4xf32> to vector<8x8x4xf32>
    %c1_145 = arith.constant 1 : index
    %c2_146 = arith.constant 2 : index
    %c0_147 = arith.constant 0 : index
    %c0_148 = arith.constant 0 : index
    %128 = vector.load %arg10[%c1_145, %c2_146, %c0_147, %c0_148] : memref<4x10x10x4xf32, #tpu.memory_space<vmem>>, vector<1x8x8x4xf32>
    %129 = vector.shape_cast %128 : vector<1x8x8x4xf32> to vector<8x8x4xf32>
    %c0_149 = arith.constant 0 : index
    %c2_150 = arith.constant 2 : index
    %c1_151 = arith.constant 1 : index
    %c0_152 = arith.constant 0 : index
    %130 = vector.load %arg10[%c0_149, %c2_150, %c1_151, %c0_152] : memref<4x10x10x4xf32, #tpu.memory_space<vmem>>, vector<1x8x8x4xf32>
    %131 = vector.shape_cast %130 : vector<1x8x8x4xf32> to vector<8x8x4xf32>
    %c1_153 = arith.constant 1 : index
    %c2_154 = arith.constant 2 : index
    %c1_155 = arith.constant 1 : index
    %c0_156 = arith.constant 0 : index
    %132 = vector.load %arg10[%c1_153, %c2_154, %c1_155, %c0_156] : memref<4x10x10x4xf32, #tpu.memory_space<vmem>>, vector<1x8x8x4xf32>
    %133 = vector.shape_cast %132 : vector<1x8x8x4xf32> to vector<8x8x4xf32>
    %134 = tpu.concatenate %117, %119, %121, %123, %125, %127, %129, %131, %133 in 2 : vector<8x8x4xf32>, vector<8x8x4xf32>, vector<8x8x4xf32>, vector<8x8x4xf32>, vector<8x8x4xf32>, vector<8x8x4xf32>, vector<8x8x4xf32>, vector<8x8x4xf32>, vector<8x8x4xf32> -> vector<8x8x36xf32>
    %c0_157 = arith.constant 0 : index
    %c1_158 = arith.constant 1 : index
    %c1_159 = arith.constant 1 : index
    %c0_160 = arith.constant 0 : index
    %135 = vector.load %arg10[%c0_157, %c1_158, %c1_159, %c0_160] : memref<4x10x10x4xf32, #tpu.memory_space<vmem>>, vector<1x8x8x4xf32>
    %136 = vector.shape_cast %135 : vector<1x8x8x4xf32> to vector<8x8x4xf32>
    %c1_161 = arith.constant 1 : index
    %c1_162 = arith.constant 1 : index
    %c1_163 = arith.constant 1 : index
    %c0_164 = arith.constant 0 : index
    %137 = vector.load %arg10[%c1_161, %c1_162, %c1_163, %c0_164] : memref<4x10x10x4xf32, #tpu.memory_space<vmem>>, vector<1x8x8x4xf32>
    %138 = vector.shape_cast %137 : vector<1x8x8x4xf32> to vector<8x8x4xf32>
    %c0_165 = arith.constant 0 : index
    %c1_166 = arith.constant 1 : index
    %c2_167 = arith.constant 2 : index
    %c0_168 = arith.constant 0 : index
    %139 = vector.load %arg10[%c0_165, %c1_166, %c2_167, %c0_168] : memref<4x10x10x4xf32, #tpu.memory_space<vmem>>, vector<1x8x8x4xf32>
    %140 = vector.shape_cast %139 : vector<1x8x8x4xf32> to vector<8x8x4xf32>
    %c2_169 = arith.constant 2 : index
    %c1_170 = arith.constant 1 : index
    %c1_171 = arith.constant 1 : index
    %c0_172 = arith.constant 0 : index
    %141 = vector.load %arg10[%c2_169, %c1_170, %c1_171, %c0_172] : memref<4x10x10x4xf32, #tpu.memory_space<vmem>>, vector<1x8x8x4xf32>
    %142 = vector.shape_cast %141 : vector<1x8x8x4xf32> to vector<8x8x4xf32>
    %c3_173 = arith.constant 3 : index
    %c1_174 = arith.constant 1 : index
    %c1_175 = arith.constant 1 : index
    %c0_176 = arith.constant 0 : index
    %143 = vector.load %arg10[%c3_173, %c1_174, %c1_175, %c0_176] : memref<4x10x10x4xf32, #tpu.memory_space<vmem>>, vector<1x8x8x4xf32>
    %144 = vector.shape_cast %143 : vector<1x8x8x4xf32> to vector<8x8x4xf32>
    %c2_177 = arith.constant 2 : index
    %c1_178 = arith.constant 1 : index
    %c2_179 = arith.constant 2 : index
    %c0_180 = arith.constant 0 : index
    %145 = vector.load %arg10[%c2_177, %c1_178, %c2_179, %c0_180] : memref<4x10x10x4xf32, #tpu.memory_space<vmem>>, vector<1x8x8x4xf32>
    %146 = vector.shape_cast %145 : vector<1x8x8x4xf32> to vector<8x8x4xf32>
    %c0_181 = arith.constant 0 : index
    %c2_182 = arith.constant 2 : index
    %c1_183 = arith.constant 1 : index
    %c0_184 = arith.constant 0 : index
    %147 = vector.load %arg10[%c0_181, %c2_182, %c1_183, %c0_184] : memref<4x10x10x4xf32, #tpu.memory_space<vmem>>, vector<1x8x8x4xf32>
    %148 = vector.shape_cast %147 : vector<1x8x8x4xf32> to vector<8x8x4xf32>
    %c1_185 = arith.constant 1 : index
    %c2_186 = arith.constant 2 : index
    %c1_187 = arith.constant 1 : index
    %c0_188 = arith.constant 0 : index
    %149 = vector.load %arg10[%c1_185, %c2_186, %c1_187, %c0_188] : memref<4x10x10x4xf32, #tpu.memory_space<vmem>>, vector<1x8x8x4xf32>
    %150 = vector.shape_cast %149 : vector<1x8x8x4xf32> to vector<8x8x4xf32>
    %c0_189 = arith.constant 0 : index
    %c2_190 = arith.constant 2 : index
    %c2_191 = arith.constant 2 : index
    %c0_192 = arith.constant 0 : index
    %151 = vector.load %arg10[%c0_189, %c2_190, %c2_191, %c0_192] : memref<4x10x10x4xf32, #tpu.memory_space<vmem>>, vector<1x8x8x4xf32>
    %152 = vector.shape_cast %151 : vector<1x8x8x4xf32> to vector<8x8x4xf32>
    %153 = tpu.concatenate %136, %138, %140, %142, %144, %146, %148, %150, %152 in 2 : vector<8x8x4xf32>, vector<8x8x4xf32>, vector<8x8x4xf32>, vector<8x8x4xf32>, vector<8x8x4xf32>, vector<8x8x4xf32>, vector<8x8x4xf32>, vector<8x8x4xf32>, vector<8x8x4xf32> -> vector<8x8x36xf32>
    %154 = tpu.concatenate %96, %115, %134, %153 in 0 : vector<8x8x36xf32>, vector<8x8x36xf32>, vector<8x8x36xf32>, vector<8x8x36xf32> -> vector<32x8x36xf32>
    %155 = vector.shape_cast %154 : vector<32x8x36xf32> to vector<256x36xf32>
    %c0_193 = arith.constant 0 : index
    %c0_194 = arith.constant 0 : index
    %156 = vector.load %arg3[%c0_193, %c0_194] : memref<36x4xf32, #tpu.memory_space<vmem>>, vector<36x4xf32>
    %cst_195 = arith.constant dense<0.000000e+00> : vector<256x4xf32>
    %157 = tpu.matmul %155, %156, %cst_195 {dimension_numbers = #tpu.dot_dimension_numbers<[1], [0], [0], [1], [0, 0, 1, 1], [], []>} : vector<256x36xf32>, vector<36x4xf32>, vector<256x4xf32> -> vector<256x4xf32>
    %c0_196 = arith.constant 0 : index
    %c0_197 = arith.constant 0 : index
    %158 = vector.load %arg4[%c0_196, %c0_197] : memref<1x4xf32, #tpu.memory_space<vmem>>, vector<1x4xf32>
    %159 = vector.broadcast %158 : vector<1x4xf32> to vector<256x4xf32>
    %160 = arith.addf %157, %159 : vector<256x4xf32>
    %cst_198 = arith.constant 0.000000e+00 : f32
    %161 = vector.broadcast %cst_198 : f32 to vector<256x4xf32>
    %162 = arith.maximumf %160, %161 : vector<256x4xf32>
    %163 = vector.extract_strided_slice %162 {offsets = [0, 0], sizes = [64, 4], strides = [1, 1]} : vector<256x4xf32> to vector<64x4xf32>
    %164 = vector.shape_cast %163 : vector<64x4xf32> to vector<8x8x4xf32>
    %c0_199 = arith.constant 0 : index
    %c1_200 = arith.constant 1 : index
    %c1_201 = arith.constant 1 : index
    %c0_202 = arith.constant 0 : index
    %165 = vector.load %arg11[%c0_199, %c1_200, %c1_201, %c0_202] : memref<4x10x10x4xf32, #tpu.memory_space<vmem>>, vector<1x8x8x4xf32>
    %166 = vector.shape_cast %165 : vector<1x8x8x4xf32> to vector<8x8x4xf32>
    %167 = vector.shape_cast %164 : vector<8x8x4xf32> to vector<1x8x8x4xf32>
    tpu.vector_store %arg11[%c0_199, %c1_200, %c1_201, %c0_202], %167 {strides = array<i32>} : memref<4x10x10x4xf32, #tpu.memory_space<vmem>>, vector<1x8x8x4xf32>,
    %168 = vector.extract_strided_slice %162 {offsets = [64, 0], sizes = [64, 4], strides = [1, 1]} : vector<256x4xf32> to vector<64x4xf32>
    %169 = vector.shape_cast %168 : vector<64x4xf32> to vector<8x8x4xf32>
    %c1_203 = arith.constant 1 : index
    %c1_204 = arith.constant 1 : index
    %c1_205 = arith.constant 1 : index
    %c0_206 = arith.constant 0 : index
    %170 = vector.load %arg11[%c1_203, %c1_204, %c1_205, %c0_206] : memref<4x10x10x4xf32, #tpu.memory_space<vmem>>, vector<1x8x8x4xf32>
    %171 = vector.shape_cast %170 : vector<1x8x8x4xf32> to vector<8x8x4xf32>
    %172 = vector.shape_cast %169 : vector<8x8x4xf32> to vector<1x8x8x4xf32>
    tpu.vector_store %arg11[%c1_203, %c1_204, %c1_205, %c0_206], %172 {strides = array<i32>} : memref<4x10x10x4xf32, #tpu.memory_space<vmem>>, vector<1x8x8x4xf32>,
    %173 = vector.extract_strided_slice %162 {offsets = [128, 0], sizes = [64, 4], strides = [1, 1]} : vector<256x4xf32> to vector<64x4xf32>
    %174 = vector.shape_cast %173 : vector<64x4xf32> to vector<8x8x4xf32>
    %c2_207 = arith.constant 2 : index
    %c1_208 = arith.constant 1 : index
    %c1_209 = arith.constant 1 : index
    %c0_210 = arith.constant 0 : index
    %175 = vector.load %arg11[%c2_207, %c1_208, %c1_209, %c0_210] : memref<4x10x10x4xf32, #tpu.memory_space<vmem>>, vector<1x8x8x4xf32>
    %176 = vector.shape_cast %175 : vector<1x8x8x4xf32> to vector<8x8x4xf32>
    %177 = vector.shape_cast %174 : vector<8x8x4xf32> to vector<1x8x8x4xf32>
    tpu.vector_store %arg11[%c2_207, %c1_208, %c1_209, %c0_210], %177 {strides = array<i32>} : memref<4x10x10x4xf32, #tpu.memory_space<vmem>>, vector<1x8x8x4xf32>,
    %178 = vector.extract_strided_slice %162 {offsets = [192, 0], sizes = [64, 4], strides = [1, 1]} : vector<256x4xf32> to vector<64x4xf32>
    %179 = vector.shape_cast %178 : vector<64x4xf32> to vector<8x8x4xf32>
    %c3_211 = arith.constant 3 : index
    %c1_212 = arith.constant 1 : index
    %c1_213 = arith.constant 1 : index
    %c0_214 = arith.constant 0 : index
    %180 = vector.load %arg11[%c3_211, %c1_212, %c1_213, %c0_214] : memref<4x10x10x4xf32, #tpu.memory_space<vmem>>, vector<1x8x8x4xf32>
    %181 = vector.shape_cast %180 : vector<1x8x8x4xf32> to vector<8x8x4xf32>
    %182 = vector.shape_cast %179 : vector<8x8x4xf32> to vector<1x8x8x4xf32>
    tpu.vector_store %arg11[%c3_211, %c1_212, %c1_213, %c0_214], %182 {strides = array<i32>} : memref<4x10x10x4xf32, #tpu.memory_space<vmem>>, vector<1x8x8x4xf32>,
    %c3_215 = arith.constant 3 : index
    %c0_216 = arith.constant 0 : index
    %c0_217 = arith.constant 0 : index
    %c0_218 = arith.constant 0 : index
    %183 = vector.load %arg11[%c3_215, %c0_216, %c0_217, %c0_218] : memref<4x10x10x4xf32, #tpu.memory_space<vmem>>, vector<1x8x8x4xf32>
    %184 = vector.shape_cast %183 : vector<1x8x8x4xf32> to vector<8x8x4xf32>
    %c2_219 = arith.constant 2 : index
    %c0_220 = arith.constant 0 : index
    %c1_221 = arith.constant 1 : index
    %c0_222 = arith.constant 0 : index
    %185 = vector.load %arg11[%c2_219, %c0_220, %c1_221, %c0_222] : memref<4x10x10x4xf32, #tpu.memory_space<vmem>>, vector<1x8x8x4xf32>
    %186 = vector.shape_cast %185 : vector<1x8x8x4xf32> to vector<8x8x4xf32>
    %c3_223 = arith.constant 3 : index
    %c0_224 = arith.constant 0 : index
    %c1_225 = arith.constant 1 : index
    %c0_226 = arith.constant 0 : index
    %187 = vector.load %arg11[%c3_223, %c0_224, %c1_225, %c0_226] : memref<4x10x10x4xf32, #tpu.memory_space<vmem>>, vector<1x8x8x4xf32>
    %188 = vector.shape_cast %187 : vector<1x8x8x4xf32> to vector<8x8x4xf32>
    %c1_227 = arith.constant 1 : index
    %c1_228 = arith.constant 1 : index
    %c0_229 = arith.constant 0 : index
    %c0_230 = arith.constant 0 : index
    %189 = vector.load %arg11[%c1_227, %c1_228, %c0_229, %c0_230] : memref<4x10x10x4xf32, #tpu.memory_space<vmem>>, vector<1x8x8x4xf32>
    %190 = vector.shape_cast %189 : vector<1x8x8x4xf32> to vector<8x8x4xf32>
    %c0_231 = arith.constant 0 : index
    %c1_232 = arith.constant 1 : index
    %c1_233 = arith.constant 1 : index
    %c0_234 = arith.constant 0 : index
    %191 = vector.load %arg11[%c0_231, %c1_232, %c1_233, %c0_234] : memref<4x10x10x4xf32, #tpu.memory_space<vmem>>, vector<1x8x8x4xf32>
    %192 = vector.shape_cast %191 : vector<1x8x8x4xf32> to vector<8x8x4xf32>
    %c1_235 = arith.constant 1 : index
    %c1_236 = arith.constant 1 : index
    %c1_237 = arith.constant 1 : index
    %c0_238 = arith.constant 0 : index
    %193 = vector.load %arg11[%c1_235, %c1_236, %c1_237, %c0_238] : memref<4x10x10x4xf32, #tpu.memory_space<vmem>>, vector<1x8x8x4xf32>
    %194 = vector.shape_cast %193 : vector<1x8x8x4xf32> to vector<8x8x4xf32>
    %c3_239 = arith.constant 3 : index
    %c1_240 = arith.constant 1 : index
    %c0_241 = arith.constant 0 : index
    %c0_242 = arith.constant 0 : index
    %195 = vector.load %arg11[%c3_239, %c1_240, %c0_241, %c0_242] : memref<4x10x10x4xf32, #tpu.memory_space<vmem>>, vector<1x8x8x4xf32>
    %196 = vector.shape_cast %195 : vector<1x8x8x4xf32> to vector<8x8x4xf32>
    %c2_243 = arith.constant 2 : index
    %c1_244 = arith.constant 1 : index
    %c1_245 = arith.constant 1 : index
    %c0_246 = arith.constant 0 : index
    %197 = vector.load %arg11[%c2_243, %c1_244, %c1_245, %c0_246] : memref<4x10x10x4xf32, #tpu.memory_space<vmem>>, vector<1x8x8x4xf32>
    %198 = vector.shape_cast %197 : vector<1x8x8x4xf32> to vector<8x8x4xf32>
    %c3_247 = arith.constant 3 : index
    %c1_248 = arith.constant 1 : index
    %c1_249 = arith.constant 1 : index
    %c0_250 = arith.constant 0 : index
    %199 = vector.load %arg11[%c3_247, %c1_248, %c1_249, %c0_250] : memref<4x10x10x4xf32, #tpu.memory_space<vmem>>, vector<1x8x8x4xf32>
    %200 = vector.shape_cast %199 : vector<1x8x8x4xf32> to vector<8x8x4xf32>
    %201 = tpu.concatenate %184, %186, %188, %190, %192, %194, %196, %198, %200 in 2 : vector<8x8x4xf32>, vector<8x8x4xf32>, vector<8x8x4xf32>, vector<8x8x4xf32>, vector<8x8x4xf32>, vector<8x8x4xf32>, vector<8x8x4xf32>, vector<8x8x4xf32>, vector<8x8x4xf32> -> vector<8x8x36xf32>
    %c2_251 = arith.constant 2 : index
    %c0_252 = arith.constant 0 : index
    %c1_253 = arith.constant 1 : index
    %c0_254 = arith.constant 0 : index
    %202 = vector.load %arg11[%c2_251, %c0_252, %c1_253, %c0_254] : memref<4x10x10x4xf32, #tpu.memory_space<vmem>>, vector<1x8x8x4xf32>
    %203 = vector.shape_cast %202 : vector<1x8x8x4xf32> to vector<8x8x4xf32>
    %c3_255 = arith.constant 3 : index
    %c0_256 = arith.constant 0 : index
    %c1_257 = arith.constant 1 : index
    %c0_258 = arith.constant 0 : index
    %204 = vector.load %arg11[%c3_255, %c0_256, %c1_257, %c0_258] : memref<4x10x10x4xf32, #tpu.memory_space<vmem>>, vector<1x8x8x4xf32>
    %205 = vector.shape_cast %204 : vector<1x8x8x4xf32> to vector<8x8x4xf32>
    %c2_259 = arith.constant 2 : index
    %c0_260 = arith.constant 0 : index
    %c2_261 = arith.constant 2 : index
    %c0_262 = arith.constant 0 : index
    %206 = vector.load %arg11[%c2_259, %c0_260, %c2_261, %c0_262] : memref<4x10x10x4xf32, #tpu.memory_space<vmem>>, vector<1x8x8x4xf32>
    %207 = vector.shape_cast %206 : vector<1x8x8x4xf32> to vector<8x8x4xf32>
    %c0_263 = arith.constant 0 : index
    %c1_264 = arith.constant 1 : index
    %c1_265 = arith.constant 1 : index
    %c0_266 = arith.constant 0 : index
    %208 = vector.load %arg11[%c0_263, %c1_264, %c1_265, %c0_266] : memref<4x10x10x4xf32, #tpu.memory_space<vmem>>, vector<1x8x8x4xf32>
    %209 = vector.shape_cast %208 : vector<1x8x8x4xf32> to vector<8x8x4xf32>
    %c1_267 = arith.constant 1 : index
    %c1_268 = arith.constant 1 : index
    %c1_269 = arith.constant 1 : index
    %c0_270 = arith.constant 0 : index
    %210 = vector.load %arg11[%c1_267, %c1_268, %c1_269, %c0_270] : memref<4x10x10x4xf32, #tpu.memory_space<vmem>>, vector<1x8x8x4xf32>
    %211 = vector.shape_cast %210 : vector<1x8x8x4xf32> to vector<8x8x4xf32>
    %c0_271 = arith.constant 0 : index
    %c1_272 = arith.constant 1 : index
    %c2_273 = arith.constant 2 : index
    %c0_274 = arith.constant 0 : index
    %212 = vector.load %arg11[%c0_271, %c1_272, %c2_273, %c0_274] : memref<4x10x10x4xf32, #tpu.memory_space<vmem>>, vector<1x8x8x4xf32>
    %213 = vector.shape_cast %212 : vector<1x8x8x4xf32> to vector<8x8x4xf32>
    %c2_275 = arith.constant 2 : index
    %c1_276 = arith.constant 1 : index
    %c1_277 = arith.constant 1 : index
    %c0_278 = arith.constant 0 : index
    %214 = vector.load %arg11[%c2_275, %c1_276, %c1_277, %c0_278] : memref<4x10x10x4xf32, #tpu.memory_space<vmem>>, vector<1x8x8x4xf32>
    %215 = vector.shape_cast %214 : vector<1x8x8x4xf32> to vector<8x8x4xf32>
    %c3_279 = arith.constant 3 : index
    %c1_280 = arith.constant 1 : index
    %c1_281 = arith.constant 1 : index
    %c0_282 = arith.constant 0 : index
    %216 = vector.load %arg11[%c3_279, %c1_280, %c1_281, %c0_282] : memref<4x10x10x4xf32, #tpu.memory_space<vmem>>, vector<1x8x8x4xf32>
    %217 = vector.shape_cast %216 : vector<1x8x8x4xf32> to vector<8x8x4xf32>
    %c2_283 = arith.constant 2 : index
    %c1_284 = arith.constant 1 : index
    %c2_285 = arith.constant 2 : index
    %c0_286 = arith.constant 0 : index
    %218 = vector.load %arg11[%c2_283, %c1_284, %c2_285, %c0_286] : memref<4x10x10x4xf32, #tpu.memory_space<vmem>>, vector<1x8x8x4xf32>
    %219 = vector.shape_cast %218 : vector<1x8x8x4xf32> to vector<8x8x4xf32>
    %220 = tpu.concatenate %203, %205, %207, %209, %211, %213, %215, %217, %219 in 2 : vector<8x8x4xf32>, vector<8x8x4xf32>, vector<8x8x4xf32>, vector<8x8x4xf32>, vector<8x8x4xf32>, vector<8x8x4xf32>, vector<8x8x4xf32>, vector<8x8x4xf32>, vector<8x8x4xf32> -> vector<8x8x36xf32>
    %c1_287 = arith.constant 1 : index
    %c1_288 = arith.constant 1 : index
    %c0_289 = arith.constant 0 : index
    %c0_290 = arith.constant 0 : index
    %221 = vector.load %arg11[%c1_287, %c1_288, %c0_289, %c0_290] : memref<4x10x10x4xf32, #tpu.memory_space<vmem>>, vector<1x8x8x4xf32>
    %222 = vector.shape_cast %221 : vector<1x8x8x4xf32> to vector<8x8x4xf32>
    %c0_291 = arith.constant 0 : index
    %c1_292 = arith.constant 1 : index
    %c1_293 = arith.constant 1 : index
    %c0_294 = arith.constant 0 : index
    %223 = vector.load %arg11[%c0_291, %c1_292, %c1_293, %c0_294] : memref<4x10x10x4xf32, #tpu.memory_space<vmem>>, vector<1x8x8x4xf32>
    %224 = vector.shape_cast %223 : vector<1x8x8x4xf32> to vector<8x8x4xf32>
    %c1_295 = arith.constant 1 : index
    %c1_296 = arith.constant 1 : index
    %c1_297 = arith.constant 1 : index
    %c0_298 = arith.constant 0 : index
    %225 = vector.load %arg11[%c1_295, %c1_296, %c1_297, %c0_298] : memref<4x10x10x4xf32, #tpu.memory_space<vmem>>, vector<1x8x8x4xf32>
    %226 = vector.shape_cast %225 : vector<1x8x8x4xf32> to vector<8x8x4xf32>
    %c3_299 = arith.constant 3 : index
    %c1_300 = arith.constant 1 : index
    %c0_301 = arith.constant 0 : index
    %c0_302 = arith.constant 0 : index
    %227 = vector.load %arg11[%c3_299, %c1_300, %c0_301, %c0_302] : memref<4x10x10x4xf32, #tpu.memory_space<vmem>>, vector<1x8x8x4xf32>
    %228 = vector.shape_cast %227 : vector<1x8x8x4xf32> to vector<8x8x4xf32>
    %c2_303 = arith.constant 2 : index
    %c1_304 = arith.constant 1 : index
    %c1_305 = arith.constant 1 : index
    %c0_306 = arith.constant 0 : index
    %229 = vector.load %arg11[%c2_303, %c1_304, %c1_305, %c0_306] : memref<4x10x10x4xf32, #tpu.memory_space<vmem>>, vector<1x8x8x4xf32>
    %230 = vector.shape_cast %229 : vector<1x8x8x4xf32> to vector<8x8x4xf32>
    %c3_307 = arith.constant 3 : index
    %c1_308 = arith.constant 1 : index
    %c1_309 = arith.constant 1 : index
    %c0_310 = arith.constant 0 : index
    %231 = vector.load %arg11[%c3_307, %c1_308, %c1_309, %c0_310] : memref<4x10x10x4xf32, #tpu.memory_space<vmem>>, vector<1x8x8x4xf32>
    %232 = vector.shape_cast %231 : vector<1x8x8x4xf32> to vector<8x8x4xf32>
    %c1_311 = arith.constant 1 : index
    %c2_312 = arith.constant 2 : index
    %c0_313 = arith.constant 0 : index
    %c0_314 = arith.constant 0 : index
    %233 = vector.load %arg11[%c1_311, %c2_312, %c0_313, %c0_314] : memref<4x10x10x4xf32, #tpu.memory_space<vmem>>, vector<1x8x8x4xf32>
    %234 = vector.shape_cast %233 : vector<1x8x8x4xf32> to vector<8x8x4xf32>
    %c0_315 = arith.constant 0 : index
    %c2_316 = arith.constant 2 : index
    %c1_317 = arith.constant 1 : index
    %c0_318 = arith.constant 0 : index
    %235 = vector.load %arg11[%c0_315, %c2_316, %c1_317, %c0_318] : memref<4x10x10x4xf32, #tpu.memory_space<vmem>>, vector<1x8x8x4xf32>
    %236 = vector.shape_cast %235 : vector<1x8x8x4xf32> to vector<8x8x4xf32>
    %c1_319 = arith.constant 1 : index
    %c2_320 = arith.constant 2 : index
    %c1_321 = arith.constant 1 : index
    %c0_322 = arith.constant 0 : index
    %237 = vector.load %arg11[%c1_319, %c2_320, %c1_321, %c0_322] : memref<4x10x10x4xf32, #tpu.memory_space<vmem>>, vector<1x8x8x4xf32>
    %238 = vector.shape_cast %237 : vector<1x8x8x4xf32> to vector<8x8x4xf32>
    %239 = tpu.concatenate %222, %224, %226, %228, %230, %232, %234, %236, %238 in 2 : vector<8x8x4xf32>, vector<8x8x4xf32>, vector<8x8x4xf32>, vector<8x8x4xf32>, vector<8x8x4xf32>, vector<8x8x4xf32>, vector<8x8x4xf32>, vector<8x8x4xf32>, vector<8x8x4xf32> -> vector<8x8x36xf32>
    %c0_323 = arith.constant 0 : index
    %c1_324 = arith.constant 1 : index
    %c1_325 = arith.constant 1 : index
    %c0_326 = arith.constant 0 : index
    %240 = vector.load %arg11[%c0_323, %c1_324, %c1_325, %c0_326] : memref<4x10x10x4xf32, #tpu.memory_space<vmem>>, vector<1x8x8x4xf32>
    %241 = vector.shape_cast %240 : vector<1x8x8x4xf32> to vector<8x8x4xf32>
    %c1_327 = arith.constant 1 : index
    %c1_328 = arith.constant 1 : index
    %c1_329 = arith.constant 1 : index
    %c0_330 = arith.constant 0 : index
    %242 = vector.load %arg11[%c1_327, %c1_328, %c1_329, %c0_330] : memref<4x10x10x4xf32, #tpu.memory_space<vmem>>, vector<1x8x8x4xf32>
    %243 = vector.shape_cast %242 : vector<1x8x8x4xf32> to vector<8x8x4xf32>
    %c0_331 = arith.constant 0 : index
    %c1_332 = arith.constant 1 : index
    %c2_333 = arith.constant 2 : index
    %c0_334 = arith.constant 0 : index
    %244 = vector.load %arg11[%c0_331, %c1_332, %c2_333, %c0_334] : memref<4x10x10x4xf32, #tpu.memory_space<vmem>>, vector<1x8x8x4xf32>
    %245 = vector.shape_cast %244 : vector<1x8x8x4xf32> to vector<8x8x4xf32>
    %c2_335 = arith.constant 2 : index
    %c1_336 = arith.constant 1 : index
    %c1_337 = arith.constant 1 : index
    %c0_338 = arith.constant 0 : index
    %246 = vector.load %arg11[%c2_335, %c1_336, %c1_337, %c0_338] : memref<4x10x10x4xf32, #tpu.memory_space<vmem>>, vector<1x8x8x4xf32>
    %247 = vector.shape_cast %246 : vector<1x8x8x4xf32> to vector<8x8x4xf32>
    %c3_339 = arith.constant 3 : index
    %c1_340 = arith.constant 1 : index
    %c1_341 = arith.constant 1 : index
    %c0_342 = arith.constant 0 : index
    %248 = vector.load %arg11[%c3_339, %c1_340, %c1_341, %c0_342] : memref<4x10x10x4xf32, #tpu.memory_space<vmem>>, vector<1x8x8x4xf32>
    %249 = vector.shape_cast %248 : vector<1x8x8x4xf32> to vector<8x8x4xf32>
    %c2_343 = arith.constant 2 : index
    %c1_344 = arith.constant 1 : index
    %c2_345 = arith.constant 2 : index
    %c0_346 = arith.constant 0 : index
    %250 = vector.load %arg11[%c2_343, %c1_344, %c2_345, %c0_346] : memref<4x10x10x4xf32, #tpu.memory_space<vmem>>, vector<1x8x8x4xf32>
    %251 = vector.shape_cast %250 : vector<1x8x8x4xf32> to vector<8x8x4xf32>
    %c0_347 = arith.constant 0 : index
    %c2_348 = arith.constant 2 : index
    %c1_349 = arith.constant 1 : index
    %c0_350 = arith.constant 0 : index
    %252 = vector.load %arg11[%c0_347, %c2_348, %c1_349, %c0_350] : memref<4x10x10x4xf32, #tpu.memory_space<vmem>>, vector<1x8x8x4xf32>
    %253 = vector.shape_cast %252 : vector<1x8x8x4xf32> to vector<8x8x4xf32>
    %c1_351 = arith.constant 1 : index
    %c2_352 = arith.constant 2 : index
    %c1_353 = arith.constant 1 : index
    %c0_354 = arith.constant 0 : index
    %254 = vector.load %arg11[%c1_351, %c2_352, %c1_353, %c0_354] : memref<4x10x10x4xf32, #tpu.memory_space<vmem>>, vector<1x8x8x4xf32>
    %255 = vector.shape_cast %254 : vector<1x8x8x4xf32> to vector<8x8x4xf32>
    %c0_355 = arith.constant 0 : index
    %c2_356 = arith.constant 2 : index
    %c2_357 = arith.constant 2 : index
    %c0_358 = arith.constant 0 : index
    %256 = vector.load %arg11[%c0_355, %c2_356, %c2_357, %c0_358] : memref<4x10x10x4xf32, #tpu.memory_space<vmem>>, vector<1x8x8x4xf32>
    %257 = vector.shape_cast %256 : vector<1x8x8x4xf32> to vector<8x8x4xf32>
    %258 = tpu.concatenate %241, %243, %245, %247, %249, %251, %253, %255, %257 in 2 : vector<8x8x4xf32>, vector<8x8x4xf32>, vector<8x8x4xf32>, vector<8x8x4xf32>, vector<8x8x4xf32>, vector<8x8x4xf32>, vector<8x8x4xf32>, vector<8x8x4xf32>, vector<8x8x4xf32> -> vector<8x8x36xf32>
    %259 = tpu.concatenate %201, %220, %239, %258 in 0 : vector<8x8x36xf32>, vector<8x8x36xf32>, vector<8x8x36xf32>, vector<8x8x36xf32> -> vector<32x8x36xf32>
    %260 = vector.shape_cast %259 : vector<32x8x36xf32> to vector<256x36xf32>
    %c0_359 = arith.constant 0 : index
    %c0_360 = arith.constant 0 : index
    %261 = vector.load %arg5[%c0_359, %c0_360] : memref<36x4xf32, #tpu.memory_space<vmem>>, vector<36x4xf32>
    %cst_361 = arith.constant dense<0.000000e+00> : vector<256x4xf32>
    %262 = tpu.matmul %260, %261, %cst_361 {dimension_numbers = #tpu.dot_dimension_numbers<[1], [0], [0], [1], [0, 0, 1, 1], [], []>} : vector<256x36xf32>, vector<36x4xf32>, vector<256x4xf32> -> vector<256x4xf32>
    %c0_362 = arith.constant 0 : index
    %c0_363 = arith.constant 0 : index
    %263 = vector.load %arg6[%c0_362, %c0_363] : memref<1x4xf32, #tpu.memory_space<vmem>>, vector<1x4xf32>
    %264 = vector.broadcast %263 : vector<1x4xf32> to vector<256x4xf32>
    %265 = arith.addf %262, %264 : vector<256x4xf32>
    %cst_364 = arith.constant 0.000000e+00 : f32
    %266 = vector.broadcast %cst_364 : f32 to vector<256x4xf32>
    %267 = arith.maximumf %265, %266 : vector<256x4xf32>
    %268 = vector.extract_strided_slice %267 {offsets = [0, 0], sizes = [64, 4], strides = [1, 1]} : vector<256x4xf32> to vector<64x4xf32>
    %269 = vector.shape_cast %268 : vector<64x4xf32> to vector<8x8x4xf32>
    %c0_365 = arith.constant 0 : index
    %c1_366 = arith.constant 1 : index
    %c1_367 = arith.constant 1 : index
    %c0_368 = arith.constant 0 : index
    %270 = vector.load %arg10[%c0_365, %c1_366, %c1_367, %c0_368] : memref<4x10x10x4xf32, #tpu.memory_space<vmem>>, vector<1x8x8x4xf32>
    %271 = vector.shape_cast %270 : vector<1x8x8x4xf32> to vector<8x8x4xf32>
    %272 = vector.shape_cast %269 : vector<8x8x4xf32> to vector<1x8x8x4xf32>
    tpu.vector_store %arg10[%c0_365, %c1_366, %c1_367, %c0_368], %272 {strides = array<i32>} : memref<4x10x10x4xf32, #tpu.memory_space<vmem>>, vector<1x8x8x4xf32>,
    %273 = vector.extract_strided_slice %267 {offsets = [64, 0], sizes = [64, 4], strides = [1, 1]} : vector<256x4xf32> to vector<64x4xf32>
    %274 = vector.shape_cast %273 : vector<64x4xf32> to vector<8x8x4xf32>
    %c1_369 = arith.constant 1 : index
    %c1_370 = arith.constant 1 : index
    %c1_371 = arith.constant 1 : index
    %c0_372 = arith.constant 0 : index
    %275 = vector.load %arg10[%c1_369, %c1_370, %c1_371, %c0_372] : memref<4x10x10x4xf32, #tpu.memory_space<vmem>>, vector<1x8x8x4xf32>
    %276 = vector.shape_cast %275 : vector<1x8x8x4xf32> to vector<8x8x4xf32>
    %277 = vector.shape_cast %274 : vector<8x8x4xf32> to vector<1x8x8x4xf32>
    tpu.vector_store %arg10[%c1_369, %c1_370, %c1_371, %c0_372], %277 {strides = array<i32>} : memref<4x10x10x4xf32, #tpu.memory_space<vmem>>, vector<1x8x8x4xf32>,
    %278 = vector.extract_strided_slice %267 {offsets = [128, 0], sizes = [64, 4], strides = [1, 1]} : vector<256x4xf32> to vector<64x4xf32>
    %279 = vector.shape_cast %278 : vector<64x4xf32> to vector<8x8x4xf32>
    %c2_373 = arith.constant 2 : index
    %c1_374 = arith.constant 1 : index
    %c1_375 = arith.constant 1 : index
    %c0_376 = arith.constant 0 : index
    %280 = vector.load %arg10[%c2_373, %c1_374, %c1_375, %c0_376] : memref<4x10x10x4xf32, #tpu.memory_space<vmem>>, vector<1x8x8x4xf32>
    %281 = vector.shape_cast %280 : vector<1x8x8x4xf32> to vector<8x8x4xf32>
    %282 = vector.shape_cast %279 : vector<8x8x4xf32> to vector<1x8x8x4xf32>
    tpu.vector_store %arg10[%c2_373, %c1_374, %c1_375, %c0_376], %282 {strides = array<i32>} : memref<4x10x10x4xf32, #tpu.memory_space<vmem>>, vector<1x8x8x4xf32>,
    %283 = vector.extract_strided_slice %267 {offsets = [192, 0], sizes = [64, 4], strides = [1, 1]} : vector<256x4xf32> to vector<64x4xf32>
    %284 = vector.shape_cast %283 : vector<64x4xf32> to vector<8x8x4xf32>
    %c3_377 = arith.constant 3 : index
    %c1_378 = arith.constant 1 : index
    %c1_379 = arith.constant 1 : index
    %c0_380 = arith.constant 0 : index
    %285 = vector.load %arg10[%c3_377, %c1_378, %c1_379, %c0_380] : memref<4x10x10x4xf32, #tpu.memory_space<vmem>>, vector<1x8x8x4xf32>
    %286 = vector.shape_cast %285 : vector<1x8x8x4xf32> to vector<8x8x4xf32>
    %287 = vector.shape_cast %284 : vector<8x8x4xf32> to vector<1x8x8x4xf32>
    tpu.vector_store %arg10[%c3_377, %c1_378, %c1_379, %c0_380], %287 {strides = array<i32>} : memref<4x10x10x4xf32, #tpu.memory_space<vmem>>, vector<1x8x8x4xf32>,
    %c3_381 = arith.constant 3 : index
    %c0_382 = arith.constant 0 : index
    %c0_383 = arith.constant 0 : index
    %c0_384 = arith.constant 0 : index
    %288 = vector.load %arg10[%c3_381, %c0_382, %c0_383, %c0_384] : memref<4x10x10x4xf32, #tpu.memory_space<vmem>>, vector<1x8x8x4xf32>
    %289 = vector.shape_cast %288 : vector<1x8x8x4xf32> to vector<8x8x4xf32>
    %c2_385 = arith.constant 2 : index
    %c0_386 = arith.constant 0 : index
    %c1_387 = arith.constant 1 : index
    %c0_388 = arith.constant 0 : index
    %290 = vector.load %arg10[%c2_385, %c0_386, %c1_387, %c0_388] : memref<4x10x10x4xf32, #tpu.memory_space<vmem>>, vector<1x8x8x4xf32>
    %291 = vector.shape_cast %290 : vector<1x8x8x4xf32> to vector<8x8x4xf32>
    %c3_389 = arith.constant 3 : index
    %c0_390 = arith.constant 0 : index
    %c1_391 = arith.constant 1 : index
    %c0_392 = arith.constant 0 : index
    %292 = vector.load %arg10[%c3_389, %c0_390, %c1_391, %c0_392] : memref<4x10x10x4xf32, #tpu.memory_space<vmem>>, vector<1x8x8x4xf32>
    %293 = vector.shape_cast %292 : vector<1x8x8x4xf32> to vector<8x8x4xf32>
    %c1_393 = arith.constant 1 : index
    %c1_394 = arith.constant 1 : index
    %c0_395 = arith.constant 0 : index
    %c0_396 = arith.constant 0 : index
    %294 = vector.load %arg10[%c1_393, %c1_394, %c0_395, %c0_396] : memref<4x10x10x4xf32, #tpu.memory_space<vmem>>, vector<1x8x8x4xf32>
    %295 = vector.shape_cast %294 : vector<1x8x8x4xf32> to vector<8x8x4xf32>
    %c0_397 = arith.constant 0 : index
    %c1_398 = arith.constant 1 : index
    %c1_399 = arith.constant 1 : index
    %c0_400 = arith.constant 0 : index
    %296 = vector.load %arg10[%c0_397, %c1_398, %c1_399, %c0_400] : memref<4x10x10x4xf32, #tpu.memory_space<vmem>>, vector<1x8x8x4xf32>
    %297 = vector.shape_cast %296 : vector<1x8x8x4xf32> to vector<8x8x4xf32>
    %c1_401 = arith.constant 1 : index
    %c1_402 = arith.constant 1 : index
    %c1_403 = arith.constant 1 : index
    %c0_404 = arith.constant 0 : index
    %298 = vector.load %arg10[%c1_401, %c1_402, %c1_403, %c0_404] : memref<4x10x10x4xf32, #tpu.memory_space<vmem>>, vector<1x8x8x4xf32>
    %299 = vector.shape_cast %298 : vector<1x8x8x4xf32> to vector<8x8x4xf32>
    %c3_405 = arith.constant 3 : index
    %c1_406 = arith.constant 1 : index
    %c0_407 = arith.constant 0 : index
    %c0_408 = arith.constant 0 : index
    %300 = vector.load %arg10[%c3_405, %c1_406, %c0_407, %c0_408] : memref<4x10x10x4xf32, #tpu.memory_space<vmem>>, vector<1x8x8x4xf32>
    %301 = vector.shape_cast %300 : vector<1x8x8x4xf32> to vector<8x8x4xf32>
    %c2_409 = arith.constant 2 : index
    %c1_410 = arith.constant 1 : index
    %c1_411 = arith.constant 1 : index
    %c0_412 = arith.constant 0 : index
    %302 = vector.load %arg10[%c2_409, %c1_410, %c1_411, %c0_412] : memref<4x10x10x4xf32, #tpu.memory_space<vmem>>, vector<1x8x8x4xf32>
    %303 = vector.shape_cast %302 : vector<1x8x8x4xf32> to vector<8x8x4xf32>
    %c3_413 = arith.constant 3 : index
    %c1_414 = arith.constant 1 : index
    %c1_415 = arith.constant 1 : index
    %c0_416 = arith.constant 0 : index
    %304 = vector.load %arg10[%c3_413, %c1_414, %c1_415, %c0_416] : memref<4x10x10x4xf32, #tpu.memory_space<vmem>>, vector<1x8x8x4xf32>
    %305 = vector.shape_cast %304 : vector<1x8x8x4xf32> to vector<8x8x4xf32>
    %306 = tpu.concatenate %289, %291, %293, %295, %297, %299, %301, %303, %305 in 2 : vector<8x8x4xf32>, vector<8x8x4xf32>, vector<8x8x4xf32>, vector<8x8x4xf32>, vector<8x8x4xf32>, vector<8x8x4xf32>, vector<8x8x4xf32>, vector<8x8x4xf32>, vector<8x8x4xf32> -> vector<8x8x36xf32>
    %c2_417 = arith.constant 2 : index
    %c0_418 = arith.constant 0 : index
    %c1_419 = arith.constant 1 : index
    %c0_420 = arith.constant 0 : index
    %307 = vector.load %arg10[%c2_417, %c0_418, %c1_419, %c0_420] : memref<4x10x10x4xf32, #tpu.memory_space<vmem>>, vector<1x8x8x4xf32>
    %308 = vector.shape_cast %307 : vector<1x8x8x4xf32> to vector<8x8x4xf32>
    %c3_421 = arith.constant 3 : index
    %c0_422 = arith.constant 0 : index
    %c1_423 = arith.constant 1 : index
    %c0_424 = arith.constant 0 : index
    %309 = vector.load %arg10[%c3_421, %c0_422, %c1_423, %c0_424] : memref<4x10x10x4xf32, #tpu.memory_space<vmem>>, vector<1x8x8x4xf32>
    %310 = vector.shape_cast %309 : vector<1x8x8x4xf32> to vector<8x8x4xf32>
    %c2_425 = arith.constant 2 : index
    %c0_426 = arith.constant 0 : index
    %c2_427 = arith.constant 2 : index
    %c0_428 = arith.constant 0 : index
    %311 = vector.load %arg10[%c2_425, %c0_426, %c2_427, %c0_428] : memref<4x10x10x4xf32, #tpu.memory_space<vmem>>, vector<1x8x8x4xf32>
    %312 = vector.shape_cast %311 : vector<1x8x8x4xf32> to vector<8x8x4xf32>
    %c0_429 = arith.constant 0 : index
    %c1_430 = arith.constant 1 : index
    %c1_431 = arith.constant 1 : index
    %c0_432 = arith.constant 0 : index
    %313 = vector.load %arg10[%c0_429, %c1_430, %c1_431, %c0_432] : memref<4x10x10x4xf32, #tpu.memory_space<vmem>>, vector<1x8x8x4xf32>
    %314 = vector.shape_cast %313 : vector<1x8x8x4xf32> to vector<8x8x4xf32>
    %c1_433 = arith.constant 1 : index
    %c1_434 = arith.constant 1 : index
    %c1_435 = arith.constant 1 : index
    %c0_436 = arith.constant 0 : index
    %315 = vector.load %arg10[%c1_433, %c1_434, %c1_435, %c0_436] : memref<4x10x10x4xf32, #tpu.memory_space<vmem>>, vector<1x8x8x4xf32>
    %316 = vector.shape_cast %315 : vector<1x8x8x4xf32> to vector<8x8x4xf32>
    %c0_437 = arith.constant 0 : index
    %c1_438 = arith.constant 1 : index
    %c2_439 = arith.constant 2 : index
    %c0_440 = arith.constant 0 : index
    %317 = vector.load %arg10[%c0_437, %c1_438, %c2_439, %c0_440] : memref<4x10x10x4xf32, #tpu.memory_space<vmem>>, vector<1x8x8x4xf32>
    %318 = vector.shape_cast %317 : vector<1x8x8x4xf32> to vector<8x8x4xf32>
    %c2_441 = arith.constant 2 : index
    %c1_442 = arith.constant 1 : index
    %c1_443 = arith.constant 1 : index
    %c0_444 = arith.constant 0 : index
    %319 = vector.load %arg10[%c2_441, %c1_442, %c1_443, %c0_444] : memref<4x10x10x4xf32, #tpu.memory_space<vmem>>, vector<1x8x8x4xf32>
    %320 = vector.shape_cast %319 : vector<1x8x8x4xf32> to vector<8x8x4xf32>
    %c3_445 = arith.constant 3 : index
    %c1_446 = arith.constant 1 : index
    %c1_447 = arith.constant 1 : index
    %c0_448 = arith.constant 0 : index
    %321 = vector.load %arg10[%c3_445, %c1_446, %c1_447, %c0_448] : memref<4x10x10x4xf32, #tpu.memory_space<vmem>>, vector<1x8x8x4xf32>
    %322 = vector.shape_cast %321 : vector<1x8x8x4xf32> to vector<8x8x4xf32>
    %c2_449 = arith.constant 2 : index
    %c1_450 = arith.constant 1 : index
    %c2_451 = arith.constant 2 : index
    %c0_452 = arith.constant 0 : index
    %323 = vector.load %arg10[%c2_449, %c1_450, %c2_451, %c0_452] : memref<4x10x10x4xf32, #tpu.memory_space<vmem>>, vector<1x8x8x4xf32>
    %324 = vector.shape_cast %323 : vector<1x8x8x4xf32> to vector<8x8x4xf32>
    %325 = tpu.concatenate %308, %310, %312, %314, %316, %318, %320, %322, %324 in 2 : vector<8x8x4xf32>, vector<8x8x4xf32>, vector<8x8x4xf32>, vector<8x8x4xf32>, vector<8x8x4xf32>, vector<8x8x4xf32>, vector<8x8x4xf32>, vector<8x8x4xf32>, vector<8x8x4xf32> -> vector<8x8x36xf32>
    %c1_453 = arith.constant 1 : index
    %c1_454 = arith.constant 1 : index
    %c0_455 = arith.constant 0 : index
    %c0_456 = arith.constant 0 : index
    %326 = vector.load %arg10[%c1_453, %c1_454, %c0_455, %c0_456] : memref<4x10x10x4xf32, #tpu.memory_space<vmem>>, vector<1x8x8x4xf32>
    %327 = vector.shape_cast %326 : vector<1x8x8x4xf32> to vector<8x8x4xf32>
    %c0_457 = arith.constant 0 : index
    %c1_458 = arith.constant 1 : index
    %c1_459 = arith.constant 1 : index
    %c0_460 = arith.constant 0 : index
    %328 = vector.load %arg10[%c0_457, %c1_458, %c1_459, %c0_460] : memref<4x10x10x4xf32, #tpu.memory_space<vmem>>, vector<1x8x8x4xf32>
    %329 = vector.shape_cast %328 : vector<1x8x8x4xf32> to vector<8x8x4xf32>
    %c1_461 = arith.constant 1 : index
    %c1_462 = arith.constant 1 : index
    %c1_463 = arith.constant 1 : index
    %c0_464 = arith.constant 0 : index
    %330 = vector.load %arg10[%c1_461, %c1_462, %c1_463, %c0_464] : memref<4x10x10x4xf32, #tpu.memory_space<vmem>>, vector<1x8x8x4xf32>
    %331 = vector.shape_cast %330 : vector<1x8x8x4xf32> to vector<8x8x4xf32>
    %c3_465 = arith.constant 3 : index
    %c1_466 = arith.constant 1 : index
    %c0_467 = arith.constant 0 : index
    %c0_468 = arith.constant 0 : index
    %332 = vector.load %arg10[%c3_465, %c1_466, %c0_467, %c0_468] : memref<4x10x10x4xf32, #tpu.memory_space<vmem>>, vector<1x8x8x4xf32>
    %333 = vector.shape_cast %332 : vector<1x8x8x4xf32> to vector<8x8x4xf32>
    %c2_469 = arith.constant 2 : index
    %c1_470 = arith.constant 1 : index
    %c1_471 = arith.constant 1 : index
    %c0_472 = arith.constant 0 : index
    %334 = vector.load %arg10[%c2_469, %c1_470, %c1_471, %c0_472] : memref<4x10x10x4xf32, #tpu.memory_space<vmem>>, vector<1x8x8x4xf32>
    %335 = vector.shape_cast %334 : vector<1x8x8x4xf32> to vector<8x8x4xf32>
    %c3_473 = arith.constant 3 : index
    %c1_474 = arith.constant 1 : index
    %c1_475 = arith.constant 1 : index
    %c0_476 = arith.constant 0 : index
    %336 = vector.load %arg10[%c3_473, %c1_474, %c1_475, %c0_476] : memref<4x10x10x4xf32, #tpu.memory_space<vmem>>, vector<1x8x8x4xf32>
    %337 = vector.shape_cast %336 : vector<1x8x8x4xf32> to vector<8x8x4xf32>
    %c1_477 = arith.constant 1 : index
    %c2_478 = arith.constant 2 : index
    %c0_479 = arith.constant 0 : index
    %c0_480 = arith.constant 0 : index
    %338 = vector.load %arg10[%c1_477, %c2_478, %c0_479, %c0_480] : memref<4x10x10x4xf32, #tpu.memory_space<vmem>>, vector<1x8x8x4xf32>
    %339 = vector.shape_cast %338 : vector<1x8x8x4xf32> to vector<8x8x4xf32>
    %c0_481 = arith.constant 0 : index
    %c2_482 = arith.constant 2 : index
    %c1_483 = arith.constant 1 : index
    %c0_484 = arith.constant 0 : index
    %340 = vector.load %arg10[%c0_481, %c2_482, %c1_483, %c0_484] : memref<4x10x10x4xf32, #tpu.memory_space<vmem>>, vector<1x8x8x4xf32>
    %341 = vector.shape_cast %340 : vector<1x8x8x4xf32> to vector<8x8x4xf32>
    %c1_485 = arith.constant 1 : index
    %c2_486 = arith.constant 2 : index
    %c1_487 = arith.constant 1 : index
    %c0_488 = arith.constant 0 : index
    %342 = vector.load %arg10[%c1_485, %c2_486, %c1_487, %c0_488] : memref<4x10x10x4xf32, #tpu.memory_space<vmem>>, vector<1x8x8x4xf32>
    %343 = vector.shape_cast %342 : vector<1x8x8x4xf32> to vector<8x8x4xf32>
    %344 = tpu.concatenate %327, %329, %331, %333, %335, %337, %339, %341, %343 in 2 : vector<8x8x4xf32>, vector<8x8x4xf32>, vector<8x8x4xf32>, vector<8x8x4xf32>, vector<8x8x4xf32>, vector<8x8x4xf32>, vector<8x8x4xf32>, vector<8x8x4xf32>, vector<8x8x4xf32> -> vector<8x8x36xf32>
    %c0_489 = arith.constant 0 : index
    %c1_490 = arith.constant 1 : index
    %c1_491 = arith.constant 1 : index
    %c0_492 = arith.constant 0 : index
    %345 = vector.load %arg10[%c0_489, %c1_490, %c1_491, %c0_492] : memref<4x10x10x4xf32, #tpu.memory_space<vmem>>, vector<1x8x8x4xf32>
    %346 = vector.shape_cast %345 : vector<1x8x8x4xf32> to vector<8x8x4xf32>
    %c1_493 = arith.constant 1 : index
    %c1_494 = arith.constant 1 : index
    %c1_495 = arith.constant 1 : index
    %c0_496 = arith.constant 0 : index
    %347 = vector.load %arg10[%c1_493, %c1_494, %c1_495, %c0_496] : memref<4x10x10x4xf32, #tpu.memory_space<vmem>>, vector<1x8x8x4xf32>
    %348 = vector.shape_cast %347 : vector<1x8x8x4xf32> to vector<8x8x4xf32>
    %c0_497 = arith.constant 0 : index
    %c1_498 = arith.constant 1 : index
    %c2_499 = arith.constant 2 : index
    %c0_500 = arith.constant 0 : index
    %349 = vector.load %arg10[%c0_497, %c1_498, %c2_499, %c0_500] : memref<4x10x10x4xf32, #tpu.memory_space<vmem>>, vector<1x8x8x4xf32>
    %350 = vector.shape_cast %349 : vector<1x8x8x4xf32> to vector<8x8x4xf32>
    %c2_501 = arith.constant 2 : index
    %c1_502 = arith.constant 1 : index
    %c1_503 = arith.constant 1 : index
    %c0_504 = arith.constant 0 : index
    %351 = vector.load %arg10[%c2_501, %c1_502, %c1_503, %c0_504] : memref<4x10x10x4xf32, #tpu.memory_space<vmem>>, vector<1x8x8x4xf32>
    %352 = vector.shape_cast %351 : vector<1x8x8x4xf32> to vector<8x8x4xf32>
    %c3_505 = arith.constant 3 : index
    %c1_506 = arith.constant 1 : index
    %c1_507 = arith.constant 1 : index
    %c0_508 = arith.constant 0 : index
    %353 = vector.load %arg10[%c3_505, %c1_506, %c1_507, %c0_508] : memref<4x10x10x4xf32, #tpu.memory_space<vmem>>, vector<1x8x8x4xf32>
    %354 = vector.shape_cast %353 : vector<1x8x8x4xf32> to vector<8x8x4xf32>
    %c2_509 = arith.constant 2 : index
    %c1_510 = arith.constant 1 : index
    %c2_511 = arith.constant 2 : index
    %c0_512 = arith.constant 0 : index
    %355 = vector.load %arg10[%c2_509, %c1_510, %c2_511, %c0_512] : memref<4x10x10x4xf32, #tpu.memory_space<vmem>>, vector<1x8x8x4xf32>
    %356 = vector.shape_cast %355 : vector<1x8x8x4xf32> to vector<8x8x4xf32>
    %c0_513 = arith.constant 0 : index
    %c2_514 = arith.constant 2 : index
    %c1_515 = arith.constant 1 : index
    %c0_516 = arith.constant 0 : index
    %357 = vector.load %arg10[%c0_513, %c2_514, %c1_515, %c0_516] : memref<4x10x10x4xf32, #tpu.memory_space<vmem>>, vector<1x8x8x4xf32>
    %358 = vector.shape_cast %357 : vector<1x8x8x4xf32> to vector<8x8x4xf32>
    %c1_517 = arith.constant 1 : index
    %c2_518 = arith.constant 2 : index
    %c1_519 = arith.constant 1 : index
    %c0_520 = arith.constant 0 : index
    %359 = vector.load %arg10[%c1_517, %c2_518, %c1_519, %c0_520] : memref<4x10x10x4xf32, #tpu.memory_space<vmem>>, vector<1x8x8x4xf32>
    %360 = vector.shape_cast %359 : vector<1x8x8x4xf32> to vector<8x8x4xf32>
    %c0_521 = arith.constant 0 : index
    %c2_522 = arith.constant 2 : index
    %c2_523 = arith.constant 2 : index
    %c0_524 = arith.constant 0 : index
    %361 = vector.load %arg10[%c0_521, %c2_522, %c2_523, %c0_524] : memref<4x10x10x4xf32, #tpu.memory_space<vmem>>, vector<1x8x8x4xf32>
    %362 = vector.shape_cast %361 : vector<1x8x8x4xf32> to vector<8x8x4xf32>
    %363 = tpu.concatenate %346, %348, %350, %352, %354, %356, %358, %360, %362 in 2 : vector<8x8x4xf32>, vector<8x8x4xf32>, vector<8x8x4xf32>, vector<8x8x4xf32>, vector<8x8x4xf32>, vector<8x8x4xf32>, vector<8x8x4xf32>, vector<8x8x4xf32>, vector<8x8x4xf32> -> vector<8x8x36xf32>
    %364 = tpu.concatenate %306, %325, %344, %363 in 0 : vector<8x8x36xf32>, vector<8x8x36xf32>, vector<8x8x36xf32>, vector<8x8x36xf32> -> vector<32x8x36xf32>
    %365 = vector.shape_cast %364 : vector<32x8x36xf32> to vector<256x36xf32>
    %c0_525 = arith.constant 0 : index
    %c0_526 = arith.constant 0 : index
    %366 = vector.load %arg7[%c0_525, %c0_526] : memref<36x8xf32, #tpu.memory_space<vmem>>, vector<36x8xf32>
    %cst_527 = arith.constant dense<0.000000e+00> : vector<256x8xf32>
    %367 = tpu.matmul %365, %366, %cst_527 {dimension_numbers = #tpu.dot_dimension_numbers<[1], [0], [0], [1], [0, 0, 1, 1], [], []>} : vector<256x36xf32>, vector<36x8xf32>, vector<256x8xf32> -> vector<256x8xf32>
    %c0_528 = arith.constant 0 : index
    %c0_529 = arith.constant 0 : index
    %368 = vector.load %arg8[%c0_528, %c0_529] : memref<1x8xf32, #tpu.memory_space<vmem>>, vector<1x8xf32>
    %369 = vector.broadcast %368 : vector<1x8xf32> to vector<256x8xf32>
    %370 = arith.addf %367, %369 : vector<256x8xf32>
    %cst_530 = arith.constant 0.000000e+00 : f32
    %371 = vector.broadcast %cst_530 : f32 to vector<256x8xf32>
    %372 = arith.maximumf %370, %371 : vector<256x8xf32>
    %373 = vector.extract_strided_slice %372 {offsets = [0, 0], sizes = [64, 8], strides = [1, 1]} : vector<256x8xf32> to vector<64x8xf32>
    %374 = vector.shape_cast %373 : vector<64x8xf32> to vector<8x8x8xf32>
    %c0_531 = arith.constant 0 : index
    %c0_532 = arith.constant 0 : index
    %c0_533 = arith.constant 0 : index
    %c0_534 = arith.constant 0 : index
    %c0_535 = arith.constant 0 : index
    %375 = vector.load %arg9[%c0_531, %c0_532, %c0_533, %c0_534, %c0_535] : memref<1x4x8x8x8xf32, #tpu.memory_space<vmem>>, vector<1x1x8x8x8xf32>
    %376 = vector.shape_cast %375 : vector<1x1x8x8x8xf32> to vector<8x8x8xf32>
    %377 = vector.shape_cast %374 : vector<8x8x8xf32> to vector<1x1x8x8x8xf32>
    tpu.vector_store %arg9[%c0_531, %c0_532, %c0_533, %c0_534, %c0_535], %377 {strides = array<i32>} : memref<1x4x8x8x8xf32, #tpu.memory_space<vmem>>, vector<1x1x8x8x8xf32>,
    %378 = vector.extract_strided_slice %372 {offsets = [64, 0], sizes = [64, 8], strides = [1, 1]} : vector<256x8xf32> to vector<64x8xf32>
    %379 = vector.shape_cast %378 : vector<64x8xf32> to vector<8x8x8xf32>
    %c0_536 = arith.constant 0 : index
    %c1_537 = arith.constant 1 : index
    %c0_538 = arith.constant 0 : index
    %c0_539 = arith.constant 0 : index
    %c0_540 = arith.constant 0 : index
    %380 = vector.load %arg9[%c0_536, %c1_537, %c0_538, %c0_539, %c0_540] : memref<1x4x8x8x8xf32, #tpu.memory_space<vmem>>, vector<1x1x8x8x8xf32>
    %381 = vector.shape_cast %380 : vector<1x1x8x8x8xf32> to vector<8x8x8xf32>
    %382 = vector.shape_cast %379 : vector<8x8x8xf32> to vector<1x1x8x8x8xf32>
    tpu.vector_store %arg9[%c0_536, %c1_537, %c0_538, %c0_539, %c0_540], %382 {strides = array<i32>} : memref<1x4x8x8x8xf32, #tpu.memory_space<vmem>>, vector<1x1x8x8x8xf32>,
    %383 = vector.extract_strided_slice %372 {offsets = [128, 0], sizes = [64, 8], strides = [1, 1]} : vector<256x8xf32> to vector<64x8xf32>
    %384 = vector.shape_cast %383 : vector<64x8xf32> to vector<8x8x8xf32>
    %c0_541 = arith.constant 0 : index
    %c2_542 = arith.constant 2 : index
    %c0_543 = arith.constant 0 : index
    %c0_544 = arith.constant 0 : index
    %c0_545 = arith.constant 0 : index
    %385 = vector.load %arg9[%c0_541, %c2_542, %c0_543, %c0_544, %c0_545] : memref<1x4x8x8x8xf32, #tpu.memory_space<vmem>>, vector<1x1x8x8x8xf32>
    %386 = vector.shape_cast %385 : vector<1x1x8x8x8xf32> to vector<8x8x8xf32>
    %387 = vector.shape_cast %384 : vector<8x8x8xf32> to vector<1x1x8x8x8xf32>
    tpu.vector_store %arg9[%c0_541, %c2_542, %c0_543, %c0_544, %c0_545], %387 {strides = array<i32>} : memref<1x4x8x8x8xf32, #tpu.memory_space<vmem>>, vector<1x1x8x8x8xf32>,
    %388 = vector.extract_strided_slice %372 {offsets = [192, 0], sizes = [64, 8], strides = [1, 1]} : vector<256x8xf32> to vector<64x8xf32>
    %389 = vector.shape_cast %388 : vector<64x8xf32> to vector<8x8x8xf32>
    %c0_546 = arith.constant 0 : index
    %c3_547 = arith.constant 3 : index
    %c0_548 = arith.constant 0 : index
    %c0_549 = arith.constant 0 : index
    %c0_550 = arith.constant 0 : index
    %390 = vector.load %arg9[%c0_546, %c3_547, %c0_548, %c0_549, %c0_550] : memref<1x4x8x8x8xf32, #tpu.memory_space<vmem>>, vector<1x1x8x8x8xf32>
    %391 = vector.shape_cast %390 : vector<1x1x8x8x8xf32> to vector<8x8x8xf32>
    %392 = vector.shape_cast %389 : vector<8x8x8xf32> to vector<1x1x8x8x8xf32>
    tpu.vector_store %arg9[%c0_546, %c3_547, %c0_548, %c0_549, %c0_550], %392 {strides = array<i32>} : memref<1x4x8x8x8xf32, #tpu.memory_space<vmem>>, vector<1x1x8x8x8xf32>,
    return
  }
  func.func @transform_0(%arg0: i32) -> (i32, i32, i32, i32) {
    %c0_i32 = arith.constant 0 : i32
    %c0_i32_0 = arith.constant 0 : i32
    %c0_i32_1 = arith.constant 0 : i32
    %c0_i32_2 = arith.constant 0 : i32
    return %arg0, %c0_i32, %c0_i32_0, %c0_i32_1 : i32, i32, i32, i32
  }
  func.func @transform_1(%arg0: i32) -> (i32, i32, i32, i32) {
    %c0_i32 = arith.constant 0 : i32
    %c0_i32_0 = arith.constant 0 : i32
    %c0_i32_1 = arith.constant 0 : i32
    %c0_i32_2 = arith.constant 0 : i32
    return %arg0, %c0_i32, %c0_i32_0, %c0_i32_1 : i32, i32, i32, i32
  }
  func.func @transform_2(%arg0: i32) -> (i32, i32) {
    %c0_i32 = arith.constant 0 : i32
    %c0_i32_0 = arith.constant 0 : i32
    %c0_i32_1 = arith.constant 0 : i32
    return %c0_i32, %c0_i32_0 : i32, i32
  }
  func.func @transform_3(%arg0: i32) -> (i32, i32) {
    %c0_i32 = arith.constant 0 : i32
    %c0_i32_0 = arith.constant 0 : i32
    %c0_i32_1 = arith.constant 0 : i32
    return %c0_i32, %c0_i32_0 : i32, i32
  }
  func.func @transform_4(%arg0: i32) -> (i32, i32) {
    %c0_i32 = arith.constant 0 : i32
    %c0_i32_0 = arith.constant 0 : i32
    %c0_i32_1 = arith.constant 0 : i32
    return %c0_i32, %c0_i32_0 : i32, i32
  }
  func.func @transform_5(%arg0: i32) -> (i32, i32) {
    %c0_i32 = arith.constant 0 : i32
    %c0_i32_0 = arith.constant 0 : i32
    %c0_i32_1 = arith.constant 0 : i32
    return %c0_i32, %c0_i32_0 : i32, i32
  }
  func.func @transform_6(%arg0: i32) -> (i32, i32) {
    %c0_i32 = arith.constant 0 : i32
    %c0_i32_0 = arith.constant 0 : i32
    %c0_i32_1 = arith.constant 0 : i32
    return %c0_i32, %c0_i32_0 : i32, i32
  }
  func.func @transform_7(%arg0: i32) -> (i32, i32) {
    %c0_i32 = arith.constant 0 : i32
    %c0_i32_0 = arith.constant 0 : i32
    %c0_i32_1 = arith.constant 0 : i32
    return %c0_i32, %c0_i32_0 : i32, i32
  }
  func.func @transform_8(%arg0: i32) -> (i32, i32, i32, i32, i32) {
    %c0_i32 = arith.constant 0 : i32
    %c0_i32_0 = arith.constant 0 : i32
    %c0_i32_1 = arith.constant 0 : i32
    %c0_i32_2 = arith.constant 0 : i32
    %c0_i32_3 = arith.constant 0 : i32
    return %arg0, %c0_i32, %c0_i32_0, %c0_i32_1, %c0_i32_2 : i32, i32, i32, i32, i32
  }
}

</mosaic_0001>

<bundles_post_ra>
// kernel: decoder2_forward.1
= control target key start
LH: loop header
LB: loop body
LE: loop exit
PB: predicated region body
PF: predicated region fallthrough
CT: control target
= control target key end

     0   :  { %s6409_s27 = smov 0   ;;  %s11521_s0 = inlined_call_operand.vmem [shape: f32[2,8,8,4], index: 0, kind: input, shape index: {}]   ;;  %s11522_s1 = inlined_call_operand.vmem [shape: s32[2,8,8,4], index: 1, kind: input, shape index: {}]   ;;  %s11523_s2 = inlined_call_operand.vmem [shape: f32[36,4], index: 2, kind: input, shape index: {}]   ;;  %s11524_s3 = inlined_call_operand.vmem [shape: f32[1,4], index: 3, kind: input, shape index: {}]   ;;  %s11525_s4 = inlined_call_operand.vmem [shape: f32[36,4], index: 4, kind: input, shape index: {}]   ;;  %s11526_s5 = inlined_call_operand.vmem [shape: f32[1,4], index: 5, kind: input, shape index: {}]   ;;  %s11527_s6 = inlined_call_operand.vmem [shape: f32[36,8], index: 6, kind: input, shape index: {}]   ;;  %s11528_s7 = inlined_call_operand.vmem [shape: f32[1,8], index: 7, kind: input, shape index: {}]   ;;  %s11529_s8 = inlined_call_operand.vmem [shape: f32[2,4,8,8,8], index: 8, kind: output, shape index: {}]  }
   0x1 LB: > { %s5745_s28 = sadd.s32 4294967295, %s6353_s27   ;;  %p5749_p0 = scmp.ge.s32.totalorder %s6353_s27, 1  ;;  %s6353_s27 = sphi %s6409_s27, %s18_s27  }
   0x2   : > { %p272_p1 = scmp.lt.s32.totalorder %s6353_s27, 3 }
   0x4   : > { %p273_p2 = pnand %p5749_p0, %p272_p1 }
   0x6   : > { %276 = sbr.rel (%p273_p2) target bundleno = 2578 (0xa12), region = 52 }
   0xd   : > { %vm326_vm0 = vcmask 31744   ;;  %vm328_vm1 = vcmask 25600   ;;  %v504_v0 = vlaneseq  ;;  %v6355_v1 = vmov 0.0   ;;  %p311_p3 = scmp.lt.s32.totalorder %s5745_s28, 1  ;;  %s6356_s14 = smov 4  }
   0xe   : > { %368 = vst.msk [vmem:[#allocation2 + $0x140] sm:$0xff] %vm326_vm0, %v6355_v1  ;;  %330 = vst.msk [vmem:[#allocation2 + $0x10] sm:$0xff] %vm326_vm0, %v6355_v1  ;;  %s6357_s15 = smov 8   ;;  %s6358_s16 = smov 12  }
   0xf   : > { %369 = vst.msk [vmem:[#allocation2 + $0x148] sm:$0x3] %vm328_vm1, %v6355_v1  ;;  %331 = vst.msk [vmem:[#allocation2 + $0x18] sm:$0x3] %vm328_vm1, %v6355_v1  ;;  %v505_v2 = vshrl.u32 %v504_v0, 7  ;;  %s12134_s28 = smov (!%p311_p3, %s5745_s28), 1 }
  0x10   : > { %332 = vst.msk [vmem:[#allocation2 + $0x20] sm:$0xff] %vm326_vm0, %v6355_v1  ;;  %334 = vst.msk [vmem:[#allocation2 + $0x30] sm:$0xff] %vm326_vm0, %v6355_v1  ;;  %s5884_s29 = sshll.u32 %s12134_s28, 6  ;;  %s6359_s17 = smov 16  }
  0x11   : > { %333 = vst.msk [vmem:[#allocation2 + $0x28] sm:$0x3] %vm328_vm1, %v6355_v1  ;;  %335 = vst.msk [vmem:[#allocation2 + $0x38] sm:$0x3] %vm328_vm1, %v6355_v1  ;;  %v6712_v3 = vmul.u32 2, %v505_v2  ;;  %s6718_s10 = scalar_lea.vmem %s11521_s0, %s5884_s29  ;;  %s6723_s13 = scalar_lea.vmem %s11522_s1, %s5884_s29 }
  0x12   : > { %336 = vst.msk [vmem:[#allocation2 + $0x40] sm:$0xff] %vm326_vm0, %v6355_v1  ;;  %338 = vst.msk [vmem:[#allocation2 + $0x50] sm:$0xff] %vm326_vm0, %v6355_v1  ;;  %v6729_v7 = vld [vmem:[%s6718_s10 + $0x8] sm:$0xff]  ;;  %v6735_v9 = vld [vmem:[%s6718_s10] sm:$0xff]  ;;  %s6360_s18 = smov 20   ;;  %s6361_s19 = smov 24  }
  0x13   : > { %337 = vst.msk [vmem:[#allocation2 + $0x48] sm:$0x3] %vm328_vm1, %v6355_v1  ;;  %339 = vst.msk [vmem:[#allocation2 + $0x58] sm:$0x3] %vm328_vm1, %v6355_v1  ;;  %v573_v4 = vadd.s32 48, %v6712_v3  ;;  %v572_v5 = vadd.s32 16, %v6712_v3 }
  0x14   : > { %340 = vst.msk [vmem:[#allocation2 + $0x60] sm:$0xff] %vm326_vm0, %v6355_v1  ;;  %342 = vst.msk [vmem:[#allocation2 + $0x70] sm:$0xff] %vm326_vm0, %v6355_v1  ;;  %v574_v6 = vadd.s32 80, %v6712_v3  ;;  %v6732_v8 = vld [vmem:[%s6723_s13 + $0x8] sm:$0xff]  ;;  %v575_v10 = vadd.s32 112, %v6712_v3  ;;  %v576_v11 = vadd.s32 144, %v6712_v3 }
  0x15   : > { %341 = vst.msk [vmem:[#allocation2 + $0x68] sm:$0x3] %vm328_vm1, %v6355_v1  ;;  %343 = vst.msk [vmem:[#allocation2 + $0x78] sm:$0x3] %vm328_vm1, %v6355_v1  ;;  %v577_v12 = vadd.s32 176, %v6712_v3  ;;  %vm581_vm2 = vcmp.eq.s32.totalorder %v6732_v8, %v573_v4  ;;  %v6744_v15 = vld [vmem:[%s6723_s13] sm:$0xff] }
  0x16   : > { %344 = vst.msk [vmem:[#allocation2 + $0x80] sm:$0xff] %vm326_vm0, %v6355_v1  ;;  %346 = vst.msk [vmem:[#allocation2 + $0x90] sm:$0xff] %vm326_vm0, %v6355_v1  ;;  %v648_v13 = vld [vmem:[#allocation2 + $0x141] sm:$0xff]  ;;  %v578_v16 = vadd.s32 208, %v6712_v3  ;;  %v6748_v17 = vadd.s32 1, %v6712_v3  ;;  %v6751_v18 = vadd.s32 64, %v6712_v3  ;;  %vm580_vm3 = vcmp.eq.s32.totalorder %v6744_v15, %v572_v5 }
  0x17   : > { %345 = vst.msk [vmem:[#allocation2 + $0x88] sm:$0x3] %vm328_vm1, %v6355_v1  ;;  %347 = vst.msk [vmem:[#allocation2 + $0x98] sm:$0x3] %vm328_vm1, %v6355_v1  ;;  %720 = vrot.lane.b32.xlu0 %v648_v13, %s6356_s14  ;;  %v589_v19 = vsel %vm581_vm2, %v6729_v7, 0.0  ;;  %v6757_v20 = vld [vmem:[%s6718_s10 + $0x10] sm:$0xff]  ;;  %vm514_vm5 = vcmp.eq.s32.totalorder %v6744_v15, %v6712_v3 }
  0x18   : > { %350 = vst.msk [vmem:[#allocation2 + $0xb0] sm:$0xff] %vm326_vm0, %v6355_v1  ;;  %352 = vst.msk [vmem:[#allocation2 + $0xc0] sm:$0xff] %vm326_vm0, %v6355_v1  ;;  %v6760_v21 = vld [vmem:[%s6723_s13 + $0x10] sm:$0xff]  ;;  %v6763_v22 = vld [vmem:[%s6718_s10 + $0x18] sm:$0xff]  ;;  %v6766_v23 = vadd.s32 32, %v6712_v3  ;;  %v6769_v24 = vadd.s32 128, %v6712_v3  ;;  %vm547_vm13 = vcmp.eq.s32.totalorder %v6744_v15, %v6748_v17 }
  0x19   : > { %351 = vst.msk [vmem:[#allocation2 + $0xb8] sm:$0x3] %vm328_vm1, %v6355_v1  ;;  %353 = vst.msk [vmem:[#allocation2 + $0xc8] sm:$0x3] %vm328_vm1, %v6355_v1  ;;  %v588_v25 = vsel %vm580_vm3, %v6735_v9, 0.0  ;;  %vm582_vm4 = vcmp.eq.s32.totalorder %v6760_v21, %v574_v6  ;;  %v6775_v26 = vld [vmem:[%s6723_s13 + $0x18] sm:$0xff] }
  0x1a   : > { %354 = vst.msk [vmem:[#allocation2 + $0xd0] sm:$0xff] %vm326_vm0, %v6355_v1  ;;  %356 = vst.msk [vmem:[#allocation2 + $0xe0] sm:$0xff] %vm326_vm0, %v6355_v1  ;;  %v6778_v27 = vld [vmem:[%s6718_s10 + $0x20] sm:$0xff]  ;;  %v606_v29 = vadd.s32 48, %v6748_v17  ;;  %v605_v30 = vadd.s32 16, %v6748_v17  ;;  %v590_v31 = vsel %vm582_vm4, %v6757_v20, 0.0  ;;  %vm583_vm6 = vcmp.eq.s32.totalorder %v6775_v26, %v575_v10 }
  0x1b   : > { %355 = vst.msk [vmem:[#allocation2 + $0xd8] sm:$0x3] %vm328_vm1, %v6355_v1  ;;  %357 = vst.msk [vmem:[#allocation2 + $0xe8] sm:$0x3] %vm328_vm1, %v6355_v1  ;;  %v6781_v28 = vld [vmem:[%s6723_s13 + $0x20] sm:$0xff]  ;;  %v6792_v32 = vld [vmem:[%s6718_s10 + $0x28] sm:$0xff] }
  0x1c   : > { %358 = vst.msk [vmem:[#allocation2 + $0xf0] sm:$0xff] %vm326_vm0, %v6355_v1  ;;  %360 = vst.msk [vmem:[#allocation2 + $0x100] sm:$0xff] %vm326_vm0, %v6355_v1  ;;  %vm584_vm7 = vcmp.eq.s32.totalorder %v6781_v28, %v576_v11  ;;  %v6795_v33 = vld [vmem:[%s6723_s13 + $0x28] sm:$0xff]  ;;  %v6798_v34 = vld [vmem:[%s6718_s10 + $0x30] sm:$0xff]  ;;  %v608_v35 = vadd.s32 112, %v6748_v17  ;;  %v591_v36 = vsel %vm583_vm6, %v6763_v22, 0.0  ;;  %vm614_vm9 = vcmp.eq.s32.totalorder %v6732_v8, %v606_v29 }
  0x1d   : > { %359 = vst.msk [vmem:[#allocation2 + $0xf8] sm:$0x3] %vm328_vm1, %v6355_v1  ;;  %361 = vst.msk [vmem:[#allocation2 + $0x108] sm:$0x3] %vm328_vm1, %v6355_v1  ;;  %v592_v37 = vsel %vm584_vm7, %v6778_v27, 0.0  ;;  %vm585_vm8 = vcmp.eq.s32.totalorder %v6795_v33, %v577_v12  ;;  %v6806_v38 = vld [vmem:[%s6723_s13 + $0x30] sm:$0xff]  ;;  %vm613_vm11 = vcmp.eq.s32.totalorder %v6744_v15, %v605_v30  ;;  %vm516_vm7 = vcmp.eq.s32.totalorder %v6760_v21, %v6751_v18 }
  0x1e   : > { %362 = vst.msk [vmem:[#allocation2 + $0x110] sm:$0xff] %vm326_vm0, %v6355_v1  ;;  %364 = vst.msk [vmem:[#allocation2 + $0x120] sm:$0xff] %vm326_vm0, %v6355_v1  ;;  %v593_v39 = vsel %vm585_vm8, %v6792_v32, 0.0  ;;  %vm586_vm10 = vcmp.eq.s32.totalorder %v6806_v38, %v578_v16  ;;  %v622_v40 = vsel %vm614_vm9, %v6729_v7, 0.0  ;;  %v621_v42 = vsel %vm613_vm11, %v6735_v9, 0.0  ;;  %v495_v4 = vld [vmem:[%s6718_s10 + $0x38] sm:$0xff] }
  0x1f   : > { %363 = vst.msk [vmem:[#allocation2 + $0x118] sm:$0x3] %vm328_vm1, %v6355_v1  ;;  %365 = vst.msk [vmem:[#allocation2 + $0x128] sm:$0x3] %vm328_vm1, %v6355_v1  ;;  %v594_v41 = vsel %vm586_vm10, %v6798_v34, 0.0  ;;  %vm616_vm12 = vcmp.eq.s32.totalorder %v6775_v26, %v608_v35  ;;  %v607_v43 = vadd.s32 80, %v6748_v17  ;;  %vm515_vm11 = vcmp.eq.s32.totalorder %v6732_v8, %v6766_v23 }
  0x20   : > { %366 = vst.msk [vmem:[#allocation2 + $0x130] sm:$0xff] %vm326_vm0, %v6355_v1  ;;  %370 = vst.msk [vmem:[#allocation2 + $0x150] sm:$0xff] %vm326_vm0, %v6355_v1  ;;  %v624_v44 = vsel %vm616_vm12, %v6763_v22, 0.0  ;;  %v610_v45 = vadd.s32 176, %v6748_v17  ;;  %v609_v46 = vadd.s32 144, %v6748_v17  ;;  %v555_v47 = vsel %vm547_vm13, %v6735_v9, 0.0 }
  0x21   : > { %367 = vst.msk [vmem:[#allocation2 + $0x138] sm:$0x3] %vm328_vm1, %v6355_v1  ;;  %371 = vst.msk [vmem:[#allocation2 + $0x158] sm:$0x3] %vm328_vm1, %v6355_v1  ;;  %vm615_vm14 = vcmp.eq.s32.totalorder %v6760_v21, %v607_v43  ;;  %v611_v48 = vadd.s32 208, %v6748_v17  ;;  %v541_v49 = vadd.s32 64, %v6748_v17  ;;  %vm518_vm12 = vcmp.eq.s32.totalorder %v6781_v28, %v6769_v24 }
  0x22   : > { %372 = vst.msk [vmem:[#allocation2 + $0x160] sm:$0xff] %vm326_vm0, %v6355_v1  ;;  %374 = vst.msk [vmem:[#allocation2 + $0x170] sm:$0xff] %vm326_vm0, %v6355_v1  ;;  %v623_v51 = vsel %vm615_vm14, %v6757_v20, 0.0  ;;  %vm618_vm15 = vcmp.eq.s32.totalorder %v6795_v33, %v610_v45  ;;  %v540_v52 = vadd.s32 32, %v6748_v17  ;;  %v543_v59 = vadd.s32 128, %v6748_v17  ;;  %s6362_s24 = smov 28  }
  0x23   : > { %373 = vst.msk [vmem:[#allocation2 + $0x168] sm:$0x3] %vm328_vm1, %v6355_v1  ;;  %375 = vst.msk [vmem:[#allocation2 + $0x178] sm:$0x3] %vm328_vm1, %v6355_v1  ;;  %v626_v54 = vsel %vm618_vm15, %v6792_v32, 0.0  ;;  %vm619_vm2 = vcmp.eq.s32.totalorder %v6806_v38, %v611_v48  ;;  %vm549_vm3 = vcmp.eq.s32.totalorder %v6760_v21, %v541_v49  ;;  %v542_v62 = vadd.s32 96, %v6748_v17 }
  0x24   : > { %376 = vst.msk [vmem:[#allocation2 + $0x180] sm:$0xff] %vm326_vm0, %v6355_v1  ;;  %378 = vst.msk [vmem:[#allocation2 + $0x190] sm:$0xff] %vm326_vm0, %v6355_v1  ;;  %v627_v57 = vsel %vm619_vm2, %v6798_v34, 0.0  ;;  %v557_v58 = vsel %vm549_vm3, %v6757_v20, 0.0  ;;  %vm548_vm4 = vcmp.eq.s32.totalorder %v6732_v8, %v540_v52  ;;  %v545_v63 = vadd.s32 192, %v6748_v17  ;;  %s6363_s11 = smov 32  }
  0x25   : > { %377 = vst.msk [vmem:[#allocation2 + $0x188] sm:$0x3] %vm328_vm1, %v6355_v1  ;;  %379 = vst.msk [vmem:[#allocation2 + $0x198] sm:$0x3] %vm328_vm1, %v6355_v1  ;;  %v556_v61 = vsel %vm548_vm4, %v6729_v7, 0.0  ;;  %v544_v0 = vadd.s32 160, %v6748_v17  ;;  %vm551_vm6 = vcmp.eq.s32.totalorder %v6781_v28, %v543_v59  ;;  %vm550_vm8 = vcmp.eq.s32.totalorder %v6775_v26, %v542_v62 }
  0x26   : > { %380 = vst.msk [vmem:[#allocation2 + $0x1a0] sm:$0xff] %vm326_vm0, %v6355_v1  ;;  %382 = vst.msk [vmem:[#allocation2 + $0x1b0] sm:$0xff] %vm326_vm0, %v6355_v1  ;;  %v522_v2 = vsel %vm514_vm5, %v6735_v9, 0.0  ;;  %v546_v5 = vadd.s32 224, %v6748_v17  ;;  %v559_v6 = vsel %vm551_vm6, %v6778_v27, 0.0  ;;  %vm553_vm9 = vcmp.eq.s32.totalorder %v6806_v38, %v545_v63  ;;  %s5886_s20 = sshll.u32 %s12134_s28, 8 }
  0x27   : > { %381 = vst.msk [vmem:[#allocation2 + $0x1a8] sm:$0x3] %vm328_vm1, %v6355_v1  ;;  %383 = vst.msk [vmem:[#allocation2 + $0x1b8] sm:$0x3] %vm328_vm1, %v6355_v1  ;;  %vm552_vm10 = vcmp.eq.s32.totalorder %v6795_v33, %v544_v0  ;;  %v558_v10 = vsel %vm550_vm8, %v6763_v22, 0.0  ;;  %v561_v11 = vsel %vm553_vm9, %v6798_v34, 0.0  ;;  %s11151_s22 = scalar_lea.vmem %s11529_s8, %s5886_s20 }
  0x28   : > { %384 = vst.msk [vmem:[#allocation2 + $0x1c0] sm:$0xff] %vm326_vm0, %v6355_v1  ;;  %388 = vst.msk [vmem:[#allocation2 + $0x1e0] sm:$0xff] %vm326_vm0, %v6355_v1  ;;  %v560_v12 = vsel %vm552_vm10, %v6792_v32, 0.0  ;;  %v524_v16 = vsel %vm516_vm7, %v6757_v20, 0.0  ;;  %v509_v29 = vadd.s32 96, %v6712_v3  ;;  %v512_v30 = vadd.s32 192, %v6712_v3 }
  0x29   : > { %385 = vst.msk [vmem:[#allocation2 + $0x1c8] sm:$0x3] %vm328_vm1, %v6355_v1  ;;  %389 = vst.msk [vmem:[#allocation2 + $0x1e8] sm:$0x3] %vm328_vm1, %v6355_v1  ;;  %v511_v8 = vadd.s32 160, %v6712_v3  ;;  %v513_v18 = vadd.s32 224, %v6712_v3 }
  0x2a   : > { %390 = vst.msk [vmem:[#allocation2 + $0x1f0] sm:$0xff] %vm326_vm0, %v6355_v1  ;;  %392 = vst.msk [vmem:[#allocation2 + $0x200] sm:$0xff] %vm326_vm0, %v6355_v1  ;;  %v612_v20 = vadd.s32 240, %v6748_v17  ;;  %vm517_vm13 = vcmp.eq.s32.totalorder %v6775_v26, %v509_v29  ;;  %vm520_vm14 = vcmp.eq.s32.totalorder %v6806_v38, %v512_v30  ;;  %v579_v21 = vadd.s32 240, %v6712_v3  ;;  %v1925_v30 = vld [vmem:[%s11523_s2 + $0x20] sm:$0xf] }
  0x2b   : > { %391 = vst.msk [vmem:[#allocation2 + $0x1f8] sm:$0x3] %vm328_vm1, %v6355_v1  ;;  %393 = vst.msk [vmem:[#allocation2 + $0x208] sm:$0x3] %vm328_vm1, %v6355_v1  ;;  %v525_v24 = vsel %vm517_vm13, %v6763_v22, 0.0  ;;  %vm519_vm15 = vcmp.eq.s32.totalorder %v6795_v33, %v511_v8  ;;  %vm2030_vm4 = vcmask 1043456  }
  0x2c   : > { %394 = vst.msk [vmem:[#allocation2 + $0x210] sm:$0xff] %vm326_vm0, %v6355_v1  ;;  %396 = vst.msk [vmem:[#allocation2 + $0x220] sm:$0xff] %vm326_vm0, %v6355_v1  ;;  %v527_v17 = vsel %vm519_vm15, %v6792_v32, 0.0  ;;  %vm976_vm6 = vcmask 64512   ;;  %vm985_vm7 = vcmask 97280   ;;  %vm994_vm8 = vcmask 130048  }
  0x2d   : > { %395 = vst.msk [vmem:[#allocation2 + $0x218] sm:$0x3] %vm328_vm1, %v6355_v1  ;;  %397 = vst.msk [vmem:[#allocation2 + $0x228] sm:$0x3] %vm328_vm1, %v6355_v1  ;;  %vm1003_vm9 = vcmask 162816   ;;  %vm1012_vm10 = vcmask 195584  }
  0x2e   : > { %398 = vst.msk [vmem:[#allocation2 + $0x230] sm:$0xff] %vm326_vm0, %v6355_v1  ;;  %400 = vst.msk [vmem:[#allocation2 + $0x240] sm:$0xff] %vm326_vm0, %v6355_v1 }
  0x2f   : > { %399 = vst.msk [vmem:[#allocation2 + $0x238] sm:$0x3] %vm328_vm1, %v6355_v1  ;;  %401 = vst.msk [vmem:[#allocation2 + $0x248] sm:$0x3] %vm328_vm1, %v6355_v1 }
  0x30   : > { %402 = vst.msk [vmem:[#allocation2 + $0x250] sm:$0xff] %vm326_vm0, %v6355_v1  ;;  %404 = vst.msk [vmem:[#allocation2 + $0x260] sm:$0xff] %vm326_vm0, %v6355_v1  ;;  %v6740_v14 = vld [vmem:[#allocation2 + $0x1e1] sm:$0xff] }
  0x31   : > { %403 = vst.msk [vmem:[#allocation2 + $0x258] sm:$0x3] %vm328_vm1, %v6355_v1  ;;  %405 = vst.msk [vmem:[#allocation2 + $0x268] sm:$0x3] %vm328_vm1, %v6355_v1  ;;  %752 = vrot.lane.b32.xlu0 %v6740_v14, %s6357_s15 }
  0x32   : > { %410 = vst.msk [vmem:[#allocation3 + $0x10] sm:$0xff] %vm326_vm0, %v6355_v1  ;;  %412 = vst.msk [vmem:[#allocation3 + $0x20] sm:$0xff] %vm326_vm0, %v6355_v1 }
  0x33   : > { %411 = vst.msk [vmem:[#allocation3 + $0x18] sm:$0x3] %vm328_vm1, %v6355_v1  ;;  %413 = vst.msk [vmem:[#allocation3 + $0x28] sm:$0x3] %vm328_vm1, %v6355_v1 }
  0x34   : > { %414 = vst.msk [vmem:[#allocation3 + $0x30] sm:$0xff] %vm326_vm0, %v6355_v1  ;;  %416 = vst.msk [vmem:[#allocation3 + $0x40] sm:$0xff] %vm326_vm0, %v6355_v1 }
  0x35   : > { %415 = vst.msk [vmem:[#allocation3 + $0x38] sm:$0x3] %vm328_vm1, %v6355_v1  ;;  %417 = vst.msk [vmem:[#allocation3 + $0x48] sm:$0x3] %vm328_vm1, %v6355_v1 }
  0x36   : > { %418 = vst.msk [vmem:[#allocation3 + $0x50] sm:$0xff] %vm326_vm0, %v6355_v1  ;;  %420 = vst.msk [vmem:[#allocation3 + $0x60] sm:$0xff] %vm326_vm0, %v6355_v1 }
  0x37   : > { %419 = vst.msk [vmem:[#allocation3 + $0x58] sm:$0x3] %vm328_vm1, %v6355_v1  ;;  %421 = vst.msk [vmem:[#allocation3 + $0x68] sm:$0x3] %vm328_vm1, %v6355_v1 }
  0x38   : > { %422 = vst.msk [vmem:[#allocation3 + $0x70] sm:$0xff] %vm326_vm0, %v6355_v1  ;;  %424 = vst.msk [vmem:[#allocation3 + $0x80] sm:$0xff] %vm326_vm0, %v6355_v1 }
  0x39   : > { %423 = vst.msk [vmem:[#allocation3 + $0x78] sm:$0x3] %vm328_vm1, %v6355_v1  ;;  %425 = vst.msk [vmem:[#allocation3 + $0x88] sm:$0x3] %vm328_vm1, %v6355_v1 }
  0x3a   : > { %426 = vst.msk [vmem:[#allocation3 + $0x90] sm:$0xff] %vm326_vm0, %v6355_v1  ;;  %430 = vst.msk [vmem:[#allocation3 + $0xb0] sm:$0xff] %vm326_vm0, %v6355_v1 }
  0x3b   : > { %427 = vst.msk [vmem:[#allocation3 + $0x98] sm:$0x3] %vm328_vm1, %v6355_v1  ;;  %431 = vst.msk [vmem:[#allocation3 + $0xb8] sm:$0x3] %vm328_vm1, %v6355_v1 }
  0x3c   : > { %432 = vst.msk [vmem:[#allocation3 + $0xc0] sm:$0xff] %vm326_vm0, %v6355_v1  ;;  %434 = vst.msk [vmem:[#allocation3 + $0xd0] sm:$0xff] %vm326_vm0, %v6355_v1 }
  0x3d   : > { %433 = vst.msk [vmem:[#allocation3 + $0xc8] sm:$0x3] %vm328_vm1, %v6355_v1  ;;  %435 = vst.msk [vmem:[#allocation3 + $0xd8] sm:$0x3] %vm328_vm1, %v6355_v1 }
  0x3e   : > { %436 = vst.msk [vmem:[#allocation3 + $0xe0] sm:$0xff] %vm326_vm0, %v6355_v1  ;;  %438 = vst.msk [vmem:[#allocation3 + $0xf0] sm:$0xff] %vm326_vm0, %v6355_v1 }
  0x3f   : > { %437 = vst.msk [vmem:[#allocation3 + $0xe8] sm:$0x3] %vm328_vm1, %v6355_v1  ;;  %439 = vst.msk [vmem:[#allocation3 + $0xf8] sm:$0x3] %vm328_vm1, %v6355_v1 }
  0x40   : > { %440 = vst.msk [vmem:[#allocation3 + $0x100] sm:$0xff] %vm326_vm0, %v6355_v1  ;;  %442 = vst.msk [vmem:[#allocation3 + $0x110] sm:$0xff] %vm326_vm0, %v6355_v1 }
  0x41   : > { %441 = vst.msk [vmem:[#allocation3 + $0x108] sm:$0x3] %vm328_vm1, %v6355_v1  ;;  %443 = vst.msk [vmem:[#allocation3 + $0x118] sm:$0x3] %vm328_vm1, %v6355_v1 }
  0x42   : > { %444 = vst.msk [vmem:[#allocation3 + $0x120] sm:$0xff] %vm326_vm0, %v6355_v1  ;;  %446 = vst.msk [vmem:[#allocation3 + $0x130] sm:$0xff] %vm326_vm0, %v6355_v1 }
  0x43   : > { %445 = vst.msk [vmem:[#allocation3 + $0x128] sm:$0x3] %vm328_vm1, %v6355_v1  ;;  %447 = vst.msk [vmem:[#allocation3 + $0x138] sm:$0x3] %vm328_vm1, %v6355_v1 }
  0x44   : > { %448 = vst.msk [vmem:[#allocation3 + $0x140] sm:$0xff] %vm326_vm0, %v6355_v1  ;;  %450 = vst.msk [vmem:[#allocation3 + $0x150] sm:$0xff] %vm326_vm0, %v6355_v1 }
  0x45   : > { %449 = vst.msk [vmem:[#allocation3 + $0x148] sm:$0x3] %vm328_vm1, %v6355_v1  ;;  %451 = vst.msk [vmem:[#allocation3 + $0x158] sm:$0x3] %vm328_vm1, %v6355_v1 }
  0x46   : > { %452 = vst.msk [vmem:[#allocation3 + $0x160] sm:$0xff] %vm326_vm0, %v6355_v1  ;;  %454 = vst.msk [vmem:[#allocation3 + $0x170] sm:$0xff] %vm326_vm0, %v6355_v1 }
  0x47   : > { %453 = vst.msk [vmem:[#allocation3 + $0x168] sm:$0x3] %vm328_vm1, %v6355_v1  ;;  %455 = vst.msk [vmem:[#allocation3 + $0x178] sm:$0x3] %vm328_vm1, %v6355_v1 }
  0x48   : > { %456 = vst.msk [vmem:[#allocation3 + $0x180] sm:$0xff] %vm326_vm0, %v6355_v1  ;;  %458 = vst.msk [vmem:[#allocation3 + $0x190] sm:$0xff] %vm326_vm0, %v6355_v1 }
  0x49   : > { %457 = vst.msk [vmem:[#allocation3 + $0x188] sm:$0x3] %vm328_vm1, %v6355_v1  ;;  %459 = vst.msk [vmem:[#allocation3 + $0x198] sm:$0x3] %vm328_vm1, %v6355_v1 }
  0x4a   : > { %460 = vst.msk [vmem:[#allocation3 + $0x1a0] sm:$0xff] %vm326_vm0, %v6355_v1  ;;  %462 = vst.msk [vmem:[#allocation3 + $0x1b0] sm:$0xff] %vm326_vm0, %v6355_v1 }
  0x4b   : > { %461 = vst.msk [vmem:[#allocation3 + $0x1a8] sm:$0x3] %vm328_vm1, %v6355_v1  ;;  %463 = vst.msk [vmem:[#allocation3 + $0x1b8] sm:$0x3] %vm328_vm1, %v6355_v1 }
  0x4c   : > { %464 = vst.msk [vmem:[#allocation3 + $0x1c0] sm:$0xff] %vm326_vm0, %v6355_v1  ;;  %468 = vst.msk [vmem:[#allocation3 + $0x1e0] sm:$0xff] %vm326_vm0, %v6355_v1 }
  0x4d   : > { %465 = vst.msk [vmem:[#allocation3 + $0x1c8] sm:$0x3] %vm328_vm1, %v6355_v1  ;;  %469 = vst.msk [vmem:[#allocation3 + $0x1e8] sm:$0x3] %vm328_vm1, %v6355_v1 }
  0x4e   : > { %470 = vst.msk [vmem:[#allocation3 + $0x1f0] sm:$0xff] %vm326_vm0, %v6355_v1  ;;  %472 = vst.msk [vmem:[#allocation3 + $0x200] sm:$0xff] %vm326_vm0, %v6355_v1 }
  0x4f   : > { %471 = vst.msk [vmem:[#allocation3 + $0x1f8] sm:$0x3] %vm328_vm1, %v6355_v1  ;;  %473 = vst.msk [vmem:[#allocation3 + $0x208] sm:$0x3] %vm328_vm1, %v6355_v1 }
  0x50   : > { %474 = vst.msk [vmem:[#allocation3 + $0x210] sm:$0xff] %vm326_vm0, %v6355_v1  ;;  %476 = vst.msk [vmem:[#allocation3 + $0x220] sm:$0xff] %vm326_vm0, %v6355_v1 }
  0x51   : > { %475 = vst.msk [vmem:[#allocation3 + $0x218] sm:$0x3] %vm328_vm1, %v6355_v1  ;;  %477 = vst.msk [vmem:[#allocation3 + $0x228] sm:$0x3] %vm328_vm1, %v6355_v1 }
  0x52   : > { %478 = vst.msk [vmem:[#allocation3 + $0x230] sm:$0xff] %vm326_vm0, %v6355_v1  ;;  %480 = vst.msk [vmem:[#allocation3 + $0x240] sm:$0xff] %vm326_vm0, %v6355_v1 }
  0x53   : > { %479 = vst.msk [vmem:[#allocation3 + $0x238] sm:$0x3] %vm328_vm1, %v6355_v1  ;;  %481 = vst.msk [vmem:[#allocation3 + $0x248] sm:$0x3] %vm328_vm1, %v6355_v1 }
  0x54   : > { %482 = vst.msk [vmem:[#allocation3 + $0x250] sm:$0xff] %vm326_vm0, %v6355_v1  ;;  %484 = vst.msk [vmem:[#allocation3 + $0x260] sm:$0xff] %vm326_vm0, %v6355_v1 }
  0x55   : > { %483 = vst.msk [vmem:[#allocation3 + $0x258] sm:$0x3] %vm328_vm1, %v6355_v1  ;;  %485 = vst.msk [vmem:[#allocation3 + $0x268] sm:$0x3] %vm328_vm1, %v6355_v1  ;;  %vm617_vm1 = vcmp.eq.s32.totalorder %v6781_v28, %v609_v46  ;;  %v503_v1 = vld [vmem:[%s6723_s13 + $0x38] sm:$0xff] }
  0x56   : > { %598 = vst.msk [vmem:[#allocation2 + $0x161] sm:$0xff] %vm326_vm0, %v589_v19  ;;  %597 = vst.msk [vmem:[#allocation2 + $0x151] sm:$0xff] %vm326_vm0, %v588_v25  ;;  %v625_v55 = vsel %vm617_vm1, %v6778_v27, 0.0  ;;  %vm554_vm5 = vcmp.eq.s32.totalorder %v503_v1, %v546_v5  ;;  %v523_v19 = vsel %vm515_vm11, %v6729_v7, 0.0  ;;  %v526_v25 = vsel %vm518_vm12, %v6778_v27, 0.0 }
  0x57   : > { %599 = vst.msk [vmem:[#allocation2 + $0x171] sm:$0xff] %vm326_vm0, %v590_v31  ;;  %600 = vst.msk [vmem:[#allocation2 + $0x181] sm:$0xff] %vm326_vm0, %v591_v36  ;;  %v562_v15 = vsel %vm554_vm5, %v495_v4, 0.0  ;;  %v528_v27 = vsel %vm520_vm14, %v6798_v34, 0.0  ;;  %vm521_vm1 = vcmp.eq.s32.totalorder %v503_v1, %v513_v18  ;;  %vm620_vm2 = vcmp.eq.s32.totalorder %v503_v1, %v612_v20 }
  0x58   : > { %601 = vst.msk [vmem:[#allocation2 + $0x191] sm:$0xff] %vm326_vm0, %v592_v37  ;;  %602 = vst.msk [vmem:[#allocation2 + $0x1a1] sm:$0xff] %vm326_vm0, %v593_v39  ;;  %v529_v26 = vsel %vm521_vm1, %v495_v4, 0.0  ;;  %vm587_vm3 = vcmp.eq.s32.totalorder %v503_v1, %v579_v21  ;;  %v628_v3 = vsel %vm620_vm2, %v495_v4, 0.0  ;;  %vm1021_vm5 = vcmask 228352  }
  0x59   : > { %631 = vst.msk [vmem:[#allocation2 + $0x201] sm:$0xff] %vm326_vm0, %v622_v40  ;;  %603 = vst.msk [vmem:[#allocation2 + $0x1b1] sm:$0xff] %vm326_vm0, %v594_v41  ;;  %v595_v22 = vsel %vm587_vm3, %v495_v4, 0.0  ;;  %vm1030_vm11 = vcmask 261120   ;;  %vm1933_vm12 = vcmask 293888  }
  0x5a   : > { %630 = vst.msk [vmem:[#allocation2 + $0x1f1] sm:$0xff] %vm326_vm0, %v621_v42  ;;  %633 = vst.msk [vmem:[#allocation2 + $0x221] sm:$0xff] %vm326_vm0, %v624_v44 }
  0x5b   : > { %564 = vst.msk [vmem:[#allocation2 + $0xb1] sm:$0xff] %vm326_vm0, %v555_v47  ;;  %632 = vst.msk [vmem:[#allocation2 + $0x211] sm:$0xff] %vm326_vm0, %v623_v51 }
  0x5c   : > { %635 = vst.msk [vmem:[#allocation2 + $0x241] sm:$0xff] %vm326_vm0, %v626_v54  ;;  %634 = vst.msk [vmem:[#allocation2 + $0x231] sm:$0xff] %vm326_vm0, %v625_v55 }
  0x5d   : > { %v6835_v50 = vld [vmem:[#allocation2 + $0x161] sm:$0xff]  ;;  %v6844_v53 = vld [vmem:[#allocation2 + $0x151] sm:$0xff]  ;;  %636 = vst.msk [vmem:[#allocation2 + $0x251] sm:$0xff] %vm326_vm0, %v627_v57  ;;  %566 = vst.msk [vmem:[#allocation2 + $0xd1] sm:$0xff] %vm326_vm0, %v557_v58 }
  0x5e   : > { %11735 = vst [vmem:[#allocation4_spill] sm:$0xff] %v6835_v50  ;;  %724 = vrot.lane.b32.xlu1 %v6835_v50, %s6356_s14  ;;  %11736 = vst [vmem:[#allocation5_spill] sm:$0xff] %v6844_v53  ;;  %722 = vrot.lane.b32.xlu0 %v6844_v53, %s6356_s14  ;;  %v6853_v56 = vld [vmem:[#allocation2 + $0x171] sm:$0xff]  ;;  %v6861_v60 = vld [vmem:[#allocation2 + $0x181] sm:$0xff] }
  0x5f   : > { %565 = vst.msk [vmem:[#allocation2 + $0xc1] sm:$0xff] %vm326_vm0, %v556_v61  ;;  %531 = vst.msk [vmem:[#allocation2 + $0x11] sm:$0xff] %vm326_vm0, %v522_v2  ;;  %v6889_v9 = vld [vmem:[#allocation2 + $0x191] sm:$0xff]  ;;  %v6895_v13 = vld [vmem:[#allocation2 + $0x1a1] sm:$0xff] }
  0x60   : > { %11737 = vst [vmem:[#allocation6_spill] sm:$0xff] %v6889_v9  ;;  %568 = vst.msk [vmem:[#allocation2 + $0xf1] sm:$0xff] %vm326_vm0, %v559_v6  ;;  %v6923_v7 = vld [vmem:[#allocation2 + $0x1b1] sm:$0xff]  ;;  %v6928_v23 = vld [vmem:[#allocation2 + $0x201] sm:$0xff] }
  0x61   : > { %567 = vst.msk [vmem:[#allocation2 + $0xe1] sm:$0xff] %vm326_vm0, %v558_v10  ;;  %570 = vst.msk [vmem:[#allocation2 + $0x111] sm:$0xff] %vm326_vm0, %v561_v11  ;;  %v6942_v28 = vld [vmem:[#allocation2 + $0x1f1] sm:$0xff]  ;;  %v6946_v31 = vld [vmem:[#allocation2 + $0x221] sm:$0xff] }
  0x62   : > { %726 = vrot.lane.b32.xlu1 %v6853_v56, %s6356_s14  ;;  %728 = vrot.lane.b32.xlu0 %v6861_v60, %s6356_s14  ;;  %569 = vst.msk [vmem:[#allocation2 + $0x101] sm:$0xff] %vm326_vm0, %v560_v12  ;;  %571 = vst.msk [vmem:[#allocation2 + $0x121] sm:$0xff] %vm326_vm0, %v562_v15  ;;  %v6952_v32 = vld [vmem:[#allocation2 + $0x211] sm:$0xff]  ;;  %v7048_v2 = vld [vmem:[#allocation2 + $0x200] sm:$0xff] }
  0x63   : > { %533 = vst.msk [vmem:[#allocation2 + $0x31] sm:$0xff] %vm326_vm0, %v524_v16  ;;  %532 = vst.msk [vmem:[#allocation2 + $0x21] sm:$0xff] %vm326_vm0, %v523_v19  ;;  %v6954_v33 = vld [vmem:[#allocation2 + $0x241] sm:$0xff]  ;;  %v6960_v34 = vld [vmem:[#allocation2 + $0x231] sm:$0xff] }
  0x64   : > { %535 = vst.msk [vmem:[#allocation2 + $0x51] sm:$0xff] %vm326_vm0, %v526_v25  ;;  %11738 = vst [vmem:[#allocation7_spill] sm:$0xff] %v6923_v7  ;;  %v664_v35 = vld [vmem:[#allocation2 + $0xb0] sm:$0xff]  ;;  %v7056_v5 = vld [vmem:[#allocation2 + $0x220] sm:$0xff] }
  0x65   : > { %534 = vst.msk [vmem:[#allocation2 + $0x41] sm:$0xff] %vm326_vm0, %v525_v24  ;;  %537 = vst.msk [vmem:[#allocation2 + $0x71] sm:$0xff] %vm326_vm0, %v528_v27  ;;  %v6965_v36 = vld [vmem:[#allocation2 + $0x251] sm:$0xff]  ;;  %v7064_v10 = vld [vmem:[#allocation2 + $0x240] sm:$0xff] }
  0x66   : > { %730 = vrot.lane.b32.xlu1 %v6889_v9, %s6356_s14  ;;  %732 = vrot.lane.b32.xlu0 %v6895_v13, %s6356_s14  ;;  %536 = vst.msk [vmem:[#allocation2 + $0x61] sm:$0xff] %vm326_vm0, %v527_v17  ;;  %538 = vst.msk [vmem:[#allocation2 + $0x81] sm:$0xff] %vm326_vm0, %v529_v26  ;;  %v666_v37 = vld [vmem:[#allocation2 + $0xd0] sm:$0xff]  ;;  %v665_v38 = vld [vmem:[#allocation2 + $0xc0] sm:$0xff] }
  0x67   : > { %637 = vst.msk [vmem:[#allocation2 + $0x261] sm:$0xff] %vm326_vm0, %v628_v3  ;;  %604 = vst.msk [vmem:[#allocation2 + $0x1c1] sm:$0xff] %vm326_vm0, %v595_v22  ;;  %v668_v39 = vld [vmem:[#allocation2 + $0xf0] sm:$0xff]  ;;  %v7016_v57 = vld [vmem:[#allocation2 + $0xc1] sm:$0xff] }
  0x68   : > { %11739 = vst [vmem:[#allocation8_spill] sm:$0xff] %v6954_v33  ;;  %v667_v40 = vld [vmem:[#allocation2 + $0xe0] sm:$0xff]  ;;  %v670_v41 = vld [vmem:[#allocation2 + $0x110] sm:$0xff]  ;;  %11750 = vst [vmem:[#allocation19_spill] sm:$0xff] %v7016_v57 }
  0x69   : > { %v669_v42 = vld [vmem:[#allocation2 + $0x100] sm:$0xff]  ;;  %v6974_v43 = vld [vmem:[#allocation2 + $0x11] sm:$0xff]  ;;  %v1922_v12 = vld [vmem:[%s11523_s2 + $0x8] sm:$0xff] }
  0x6a   : > { %734 = vrot.lane.b32.xlu1 %v6923_v7, %s6356_s14  ;;  %756 = vrot.lane.b32.xlu0 %v6928_v23, %s6357_s15  ;;  %11740 = vst [vmem:[#allocation9_spill] sm:$0xff] %v6974_v43  ;;  %v671_v44 = vld [vmem:[#allocation2 + $0x120] sm:$0xff]  ;;  %v6979_v45 = vld [vmem:[#allocation2 + $0x31] sm:$0xff] }
  0x6b   : > { %11741 = vst [vmem:[#allocation10_spill] sm:$0xff] %v6979_v45  ;;  %v6984_v46 = vld [vmem:[#allocation2 + $0x21] sm:$0xff]  ;;  %v6986_v47 = vld [vmem:[#allocation2 + $0x51] sm:$0xff] }
  0x6c   : > { %11742 = vst [vmem:[#allocation11_spill] sm:$0xff] %v6984_v46  ;;  %11743 = vst [vmem:[#allocation12_spill] sm:$0xff] %v6986_v47  ;;  %v6992_v48 = vld [vmem:[#allocation2 + $0x41] sm:$0xff]  ;;  %v6994_v49 = vld [vmem:[#allocation2 + $0x71] sm:$0xff] }
  0x6d   : > { %11744 = vst [vmem:[#allocation13_spill] sm:$0xff] %v6992_v48  ;;  %11745 = vst [vmem:[#allocation14_spill] sm:$0xff] %v6994_v49  ;;  %v7000_v51 = vld [vmem:[#allocation2 + $0x61] sm:$0xff]  ;;  %v7002_v52 = vld [vmem:[#allocation2 + $0xb1] sm:$0xff] }
  0x6e   : > { %754 = vrot.lane.b32.xlu1 %v6942_v28, %s6357_s15  ;;  %760 = vrot.lane.b32.xlu0 %v6946_v31, %s6357_s15  ;;  %11746 = vst [vmem:[#allocation15_spill] sm:$0xff] %v7000_v51  ;;  %11747 = vst [vmem:[#allocation16_spill] sm:$0xff] %v7002_v52  ;;  %v7008_v54 = vld [vmem:[#allocation2 + $0x81] sm:$0xff]  ;;  %v7010_v55 = vld [vmem:[#allocation2 + $0xd1] sm:$0xff] }
  0x6f   : > { %11748 = vst [vmem:[#allocation17_spill] sm:$0xff] %v7008_v54  ;;  %11749 = vst [vmem:[#allocation18_spill] sm:$0xff] %v7010_v55  ;;  %v7018_v58 = vld [vmem:[#allocation2 + $0xf1] sm:$0xff]  ;;  %v7024_v59 = vld [vmem:[#allocation2 + $0xe1] sm:$0xff] }
  0x70   : > { %11751 = vst [vmem:[#allocation20_spill] sm:$0xff] %v7018_v58  ;;  %11752 = vst [vmem:[#allocation21_spill] sm:$0xff] %v7024_v59  ;;  %v7026_v61 = vld [vmem:[#allocation2 + $0x111] sm:$0xff]  ;;  %v7032_v62 = vld [vmem:[#allocation2 + $0x101] sm:$0xff] }
  0x71   : > { %11753 = vst [vmem:[#allocation22_spill] sm:$0xff] %v7026_v61  ;;  %11754 = vst [vmem:[#allocation23_spill] sm:$0xff] %v7032_v62  ;;  %v7034_v63 = vld [vmem:[#allocation2 + $0x1f0] sm:$0xff]  ;;  %v7040_v0 = vld [vmem:[#allocation2 + $0x121] sm:$0xff] }
  0x72   : > { %758 = vrot.lane.b32.xlu1 %v6952_v32, %s6357_s15  ;;  %764 = vrot.lane.b32.xlu0 %v6954_v33, %s6357_s15  ;;  %11755 = vst [vmem:[#allocation24_spill] sm:$0xff] %v7040_v0  ;;  %v7042_v1 = vld [vmem:[#allocation2 + $0x210] sm:$0xff]  ;;  %v1921_v11 = vld [vmem:[%s11523_s2] sm:$0xff]  ;;  %v1924_v25 = vld [vmem:[%s11523_s2 + $0x18] sm:$0xff] }
  0x73   : > { %v7050_v4 = vld [vmem:[#allocation2 + $0x230] sm:$0xff]  ;;  %v7076_v15 = vld [vmem:[#allocation2 + $0x260] sm:$0xff]  ;;  %v6172_v16 = vpack.c.bf16 %v1922_v12, %v1921_v11 }
  0x74   : > { %v7058_v6 = vld [vmem:[#allocation2 + $0x250] sm:$0xff]  ;;  %11756 = vst [vmem:[#allocation25_spill] sm:$0xff] %v7076_v15  ;;  %v7109_v18 = vld [vmem:[#allocation2 + $0x1c1] sm:$0xff] }
  0x75   : > { %6173 = vmatprep.subr.bf16.mxu0 %v6172_v16  ;;  %6196 = vmatprep.subr.bf16.mxu1 %v6172_v16  ;;  %v1923_v19 = vld [vmem:[%s11523_s2 + $0x10] sm:$0xff]  ;;  %v7137_v26 = vld [vmem:[#allocation2 + $0x261] sm:$0xff] }
  0x76   : > { %762 = vrot.lane.b32.xlu1 %v6960_v34, %s6357_s15  ;;  %784 = vrot.lane.b32.xlu0 %v664_v35, %s6358_s16  ;;  %v6176_v29 = vpack.c.bf16 %v1924_v25, %v1923_v19  ;;  %11757 = vst [vmem:[#allocation26_spill] sm:$0xff] %v7137_v26  ;;  %v7180_v12 = vld [vmem:[#allocation2 + $0x152] sm:$0xff]  ;;  %v7184_v19 = vld [vmem:[#allocation2 + $0x182] sm:$0xff] }
  0x77   : > { %6175 = vmatpush3.bf16.msra.mxu0 %v6172_v16  ;;  %6199 = vmatpush3.bf16.msra.mxu1 %v6172_v16  ;;  %11759 = vst [vmem:[#allocation28_spill] sm:$0xff] %v7180_v12  ;;  %11761 = vst [vmem:[#allocation30_spill] sm:$0xff] %v7184_v19 }
  0x78   : > { %6177 = vmatprep.subr.bf16.mxu0 %v6176_v29  ;;  %6197 = vmatprep.subr.bf16.mxu1 %v6176_v29 }
  0x7a   : > { %766 = vrot.lane.b32.xlu1 %v6965_v36, %s6357_s15  ;;  %788 = vrot.lane.b32.xlu0 %v666_v37, %s6358_s16 }
  0x7b   : > { %6179 = vmatpush3.bf16.msra.mxu0 %v6176_v29  ;;  %6200 = vmatpush3.bf16.msra.mxu1 %v6176_v29  ;;  %v7192_v29 = vld [vmem:[#allocation2 + $0x172] sm:$0xff] }
  0x7c   : > { %6006 = vmatprep.subr.msk.mxu0 %vm2030_vm4, %v1925_v30  ;;  %6198 = vmatprep.subr.msk.mxu1 %vm2030_vm4, %v1925_v30  ;;  %11762 = vst [vmem:[#allocation31_spill] sm:$0xff] %v7192_v29 }
  0x7e   : > { %786 = vrot.lane.b32.xlu1 %v665_v38, %s6358_s16  ;;  %792 = vrot.lane.b32.xlu0 %v668_v39, %s6358_s16 }
  0x7f   : > { %6007 = vmatpush3.msk.msra.mxu0 %vm2030_vm4, %v1925_v30  ;;  %6201 = vmatpush3.msk.msra.mxu1 %vm2030_vm4, %v1925_v30 }
  0x82   : > { %790 = vrot.lane.b32.xlu1 %v667_v40, %s6358_s16  ;;  %796 = vrot.lane.b32.xlu0 %v670_v41, %s6358_s16  ;;  %v1039_v40 = vld [vmem:[#allocation2 + $0x142] sm:$0xff] }
  0x86   : > { %794 = vrot.lane.b32.xlu1 %v669_v42, %s6358_s16  ;;  %816 = vrot.lane.b32.xlu0 %v6974_v43, %s6359_s17 }
  0x89   : > { %v7107_v8 = vpop.permute.xlu0 %720 }
  0x8a   : > { %798 = vrot.lane.b32.xlu1 %v671_v44, %s6358_s16  ;;  %820 = vrot.lane.b32.xlu0 %v6979_v45, %s6359_s17  ;;  %v7172_v44 = vld [vmem:[#allocation2 + $0x162] sm:$0xff] }
  0x8b   : > { %11758 = vst [vmem:[#allocation27_spill] sm:$0xff] %v7172_v44 }
  0x8e   : > { %818 = vrot.lane.b32.xlu1 %v6984_v46, %s6359_s17  ;;  %824 = vrot.lane.b32.xlu0 %v6986_v47, %s6359_s17 }
  0x92   : > { %822 = vrot.lane.b32.xlu1 %v6992_v48, %s6359_s17  ;;  %828 = vrot.lane.b32.xlu0 %v6994_v49, %s6359_s17 }
  0x96   : > { %826 = vrot.lane.b32.xlu1 %v7000_v51, %s6359_s17  ;;  %848 = vrot.lane.b32.xlu0 %v7002_v52, %s6360_s18 }
  0x9a   : > { %830 = vrot.lane.b32.xlu1 %v7008_v54, %s6359_s17  ;;  %852 = vrot.lane.b32.xlu0 %v7010_v55, %s6360_s18 }
  0x9e   : > { %850 = vrot.lane.b32.xlu1 %v7016_v57, %s6360_s18  ;;  %856 = vrot.lane.b32.xlu0 %v7018_v58, %s6360_s18 }
  0xa2   : > { %854 = vrot.lane.b32.xlu1 %v7024_v59, %s6360_s18  ;;  %860 = vrot.lane.b32.xlu0 %v7026_v61, %s6360_s18 }
  0xa3   : > { %v7115_v20 = vpop.permute.xlu0 %752 }
  0xa6   : > { %858 = vrot.lane.b32.xlu1 %v7032_v62, %s6360_s18  ;;  %880 = vrot.lane.b32.xlu0 %v7034_v63, %s6361_s19 }
  0xaa   : > { %862 = vrot.lane.b32.xlu1 %v7040_v0, %s6360_s18  ;;  %884 = vrot.lane.b32.xlu0 %v7042_v1, %s6361_s19 }
  0xae   : > { %882 = vrot.lane.b32.xlu1 %v7048_v2, %s6361_s19  ;;  %888 = vrot.lane.b32.xlu0 %v7050_v4, %s6361_s19 }
  0xb2   : > { %886 = vrot.lane.b32.xlu1 %v7056_v5, %s6361_s19  ;;  %892 = vrot.lane.b32.xlu0 %v7058_v6, %s6361_s19 }
  0xb6   : > { %890 = vrot.lane.b32.xlu1 %v7064_v10, %s6361_s19  ;;  %912 = vrot.lane.b32.xlu0 %v6844_v53, %s6362_s24 }
  0xba   : > { %894 = vrot.lane.b32.xlu1 %v7076_v15, %s6361_s19  ;;  %916 = vrot.lane.b32.xlu0 %v6853_v56, %s6362_s24 }
  0xbe   : > { %914 = vrot.lane.b32.xlu1 %v6835_v50, %s6362_s24  ;;  %920 = vrot.lane.b32.xlu0 %v6889_v9, %s6362_s24 }
  0xc2   : > { %918 = vrot.lane.b32.xlu1 %v6861_v60, %s6362_s24  ;;  %924 = vrot.lane.b32.xlu0 %v6923_v7, %s6362_s24 }
  0xc6   : > { %922 = vrot.lane.b32.xlu1 %v6895_v13, %s6362_s24  ;;  %944 = vrot.lane.b32.xlu0 %v6942_v28, %s6363_s11 }
  0xca   : > { %926 = vrot.lane.b32.xlu1 %v7109_v18, %s6362_s24  ;;  %948 = vrot.lane.b32.xlu0 %v6952_v32, %s6363_s11 }
  0xce   : > { %946 = vrot.lane.b32.xlu1 %v6928_v23, %s6363_s11  ;;  %952 = vrot.lane.b32.xlu0 %v6960_v34, %s6363_s11 }
  0xd0   : > { %v7121_v21 = vpop.permute.xlu1 %724  ;;  %v7123_v24 = vpop.permute.xlu0 %722 }
  0xd2   : > { %950 = vrot.lane.b32.xlu1 %v6946_v31, %s6363_s11  ;;  %956 = vrot.lane.b32.xlu0 %v6965_v36, %s6363_s11 }
  0xd4   : > { %v7129_v27 = vpop.permute.xlu1 %726  ;;  %v7131_v17 = vpop.permute.xlu0 %728 }
  0xd6   : > { %954 = vrot.lane.b32.xlu1 %v6954_v33, %s6363_s11  ;;  %1063 = vrot.lane.b32.xlu0 %v6740_v14, %s6356_s14 }
  0xd8   : > { %v7139_v3 = vpop.permute.xlu1 %730  ;;  %v7141_v22 = vpop.permute.xlu0 %732 }
  0xda   : > { %958 = vrot.lane.b32.xlu1 %v7137_v26, %s6363_s11  ;;  %1067 = vrot.lane.b32.xlu0 %v6928_v23, %s6356_s14 }
  0xdc   : > { %v7147_v35 = vpop.permute.xlu1 %734  ;;  %v7149_v37 = vpop.permute.xlu0 %756 }
  0xde   : > { %1065 = vrot.lane.b32.xlu1 %v6942_v28, %s6356_s14  ;;  %1071 = vrot.lane.b32.xlu0 %v6946_v31, %s6356_s14 }
  0xe0   : > { %v7155_v14 = vpop.permute.xlu1 %754  ;;  %v7157_v38 = vpop.permute.xlu0 %760 }
  0xe2   : > { %1069 = vrot.lane.b32.xlu1 %v6952_v32, %s6356_s14  ;;  %1075 = vrot.lane.b32.xlu0 %v6954_v33, %s6356_s14 }
  0xe4   : > { %v7163_v39 = vpop.permute.xlu1 %758  ;;  %v7165_v41 = vpop.permute.xlu0 %764 }
  0xe6   : > { %1073 = vrot.lane.b32.xlu1 %v6960_v34, %s6356_s14  ;;  %1095 = vrot.lane.b32.xlu0 %v1039_v40, %s6357_s15  ;;  %v7196_v40 = vld [vmem:[#allocation2 + $0x1a2] sm:$0xff] }
  0xe7   : > { %11763 = vst [vmem:[#allocation32_spill] sm:$0xff] %v7196_v40 }
  0xe8   : > { %v7170_v42 = vpop.permute.xlu1 %762  ;;  %v7174_v11 = vpop.permute.xlu0 %784 }
  0xea   : > { %1077 = vrot.lane.b32.xlu1 %v6965_v36, %s6356_s14  ;;  %1099 = vrot.lane.b32.xlu0 %v7172_v44, %s6357_s15  ;;  %v7204_v44 = vld [vmem:[#allocation2 + $0x192] sm:$0xff] }
  0xeb   : > { %11764 = vst [vmem:[#allocation33_spill] sm:$0xff] %v7204_v44 }
  0xec   : > { %v7182_v16 = vpop.permute.xlu1 %766  ;;  %v7186_v25 = vpop.permute.xlu0 %788 }
  0xed   : > { %11760 = vst [vmem:[#allocation29_spill] sm:$0xff] %v7182_v16 }
  0xee   : > { %1097 = vrot.lane.b32.xlu1 %v7180_v12, %s6357_s15  ;;  %1103 = vrot.lane.b32.xlu0 %v7184_v19, %s6357_s15  ;;  %v7214_v19 = vld [vmem:[#allocation2 + $0x1b2] sm:$0xff] }
  0xef   : > { %11766 = vst [vmem:[#allocation35_spill] sm:$0xff] %v7214_v19 }
  0xf0   : > { %v7194_v30 = vpop.permute.xlu1 %786  ;;  %v7198_v15 = vpop.permute.xlu0 %792 }
  0xf2   : > { %1101 = vrot.lane.b32.xlu1 %v7192_v29, %s6357_s15  ;;  %1107 = vrot.lane.b32.xlu0 %v7196_v40, %s6357_s15 }
  0xf4   : > { %v7206_v26 = vpop.permute.xlu1 %790  ;;  %v7208_v12 = vpop.permute.xlu0 %796 }
  0xf5   : > { %11765 = vst [vmem:[#allocation34_spill] sm:$0xff] %v7208_v12  ;;  %v639_v12 = vld [vmem:[#allocation2 + $0x1e0] sm:$0xff] }
  0xf6   : > { %1105 = vrot.lane.b32.xlu1 %v7204_v44, %s6357_s15  ;;  %1119 = vrot.lane.b32.xlu0 %v6974_v43, %s6358_s16 }
  0xf8   : > { %v7216_v16 = vpop.permute.xlu1 %794  ;;  %v7218_v29 = vpop.permute.xlu0 %816 }
  0xfa   : > { %1109 = vrot.lane.b32.xlu1 %v7214_v19, %s6357_s15  ;;  %1123 = vrot.lane.b32.xlu0 %v6979_v45, %s6358_s16 }
  0xfc   : > { %v7224_v40 = vpop.permute.xlu1 %798  ;;  %v7226_v33 = vpop.permute.xlu0 %820 }
  0xfd   : > { %11767 = vst [vmem:[#allocation36_spill] sm:$0xff] %v7224_v40 }
  0xfe   : > { %1121 = vrot.lane.b32.xlu1 %v6984_v46, %s6358_s16  ;;  %1127 = vrot.lane.b32.xlu0 %v6986_v47, %s6358_s16 }
 0x100   : > { %v7232_v43 = vpop.permute.xlu1 %818  ;;  %v7234_v44 = vpop.permute.xlu0 %824 }
 0x102   : > { %1125 = vrot.lane.b32.xlu1 %v6992_v48, %s6358_s16  ;;  %1131 = vrot.lane.b32.xlu0 %v6994_v49, %s6358_s16 }
 0x104   : > { %v7240_v45 = vpop.permute.xlu1 %822  ;;  %v7242_v19 = vpop.permute.xlu0 %828 }
 0x105   : > { %11768 = vst [vmem:[#allocation37_spill] sm:$0xff] %v7242_v19 }
 0x106   : > { %1129 = vrot.lane.b32.xlu1 %v7000_v51, %s6358_s16  ;;  %1143 = vrot.lane.b32.xlu0 %v7002_v52, %s6359_s17 }
 0x108   : > { %v7248_v47 = vpop.permute.xlu1 %826  ;;  %v7250_v46 = vpop.permute.xlu0 %848 }
 0x109   : > { %11769 = vst [vmem:[#allocation38_spill] sm:$0xff] %v7248_v47 }
 0x10a   : > { %1133 = vrot.lane.b32.xlu1 %v7008_v54, %s6358_s16  ;;  %1147 = vrot.lane.b32.xlu0 %v7010_v55, %s6359_s17  ;;  %v7274_v54 = vld [vmem:[#allocation2 + $0x12] sm:$0xff] }
 0x10b   : > { %11771 = vst [vmem:[#allocation40_spill] sm:$0xff] %v7274_v54 }
 0x10c   : > { %v7256_v49 = vpop.permute.xlu1 %830  ;;  %v7258_v48 = vpop.permute.xlu0 %852 }
 0x10d   : > { %11770 = vst [vmem:[#allocation39_spill] sm:$0xff] %v7256_v49 }
 0x10e   : > { %1145 = vrot.lane.b32.xlu1 %v7016_v57, %s6359_s17  ;;  %1151 = vrot.lane.b32.xlu0 %v7018_v58, %s6359_s17  ;;  %v7284_v57 = vld [vmem:[#allocation2 + $0x32] sm:$0xff] }
 0x10f   : > { %11774 = vst [vmem:[#allocation43_spill] sm:$0xff] %v7284_v57 }
 0x110   : > { %v7264_v52 = vpop.permute.xlu1 %850  ;;  %v7266_v51 = vpop.permute.xlu0 %856 }
 0x112   : > { %1149 = vrot.lane.b32.xlu1 %v7024_v59, %s6359_s17  ;;  %1155 = vrot.lane.b32.xlu0 %v7026_v61, %s6359_s17  ;;  %v7290_v61 = vld [vmem:[#allocation2 + $0x22] sm:$0xff] }
 0x113   : > { %11775 = vst [vmem:[#allocation44_spill] sm:$0xff] %v7290_v61 }
 0x114   : > { %v7272_v55 = vpop.permute.xlu1 %854  ;;  %v7276_v49 = vpop.permute.xlu0 %860 }
 0x115   : > { %11772 = vst [vmem:[#allocation41_spill] sm:$0xff] %v7276_v49  ;;  %v7294_v49 = vld [vmem:[#allocation2 + $0x52] sm:$0xff] }
 0x116   : > { %1153 = vrot.lane.b32.xlu1 %v7032_v62, %s6359_s17  ;;  %1175 = vrot.lane.b32.xlu0 %v7274_v54, %s6360_s18  ;;  %11777 = vst [vmem:[#allocation46_spill] sm:$0xff] %v7294_v49  ;;  %v7302_v54 = vld [vmem:[#allocation2 + $0x42] sm:$0xff] }
 0x117   : > { %11778 = vst [vmem:[#allocation47_spill] sm:$0xff] %v7302_v54 }
 0x118   : > { %v7282_v58 = vpop.permute.xlu1 %858  ;;  %v881_v59 = vpop.permute.xlu0 %880 }
 0x119   : > { %11773 = vst [vmem:[#allocation42_spill] sm:$0xff] %v7282_v58  ;;  %v7306_v58 = vld [vmem:[#allocation2 + $0x72] sm:$0xff] }
 0x11a   : > { %1157 = vrot.lane.b32.xlu1 %v7040_v0, %s6359_s17  ;;  %1179 = vrot.lane.b32.xlu0 %v7284_v57, %s6360_s18  ;;  %11779 = vst [vmem:[#allocation48_spill] sm:$0xff] %v7306_v58 }
 0x11c   : > { %v7292_v40 = vpop.permute.xlu1 %862  ;;  %v7296_v62 = vpop.permute.xlu0 %884 }
 0x11d   : > { %11776 = vst [vmem:[#allocation45_spill] sm:$0xff] %v7292_v40  ;;  %v7314_v40 = vld [vmem:[#allocation2 + $0x62] sm:$0xff] }
 0x11e   : > { %1177 = vrot.lane.b32.xlu1 %v7290_v61, %s6360_s18  ;;  %1183 = vrot.lane.b32.xlu0 %v7294_v49, %s6360_s18  ;;  %11780 = vst [vmem:[#allocation49_spill] sm:$0xff] %v7314_v40  ;;  %v7324_v49 = vld [vmem:[#allocation2 + $0x82] sm:$0xff] }
 0x11f   : > { %11782 = vst [vmem:[#allocation51_spill] sm:$0xff] %v7324_v49 }
 0x120   : > { %v7304_v0 = vpop.permute.xlu1 %882  ;;  %v7308_v57 = vpop.permute.xlu0 %888 }
 0x122   : > { %1181 = vrot.lane.b32.xlu1 %v7302_v54, %s6360_s18  ;;  %1187 = vrot.lane.b32.xlu0 %v7306_v58, %s6360_s18 }
 0x124   : > { %v7316_v61 = vpop.permute.xlu1 %886  ;;  %v7318_v19 = vpop.permute.xlu0 %892 }
 0x125   : > { %11781 = vst [vmem:[#allocation50_spill] sm:$0xff] %v7318_v19 }
 0x126   : > { %1185 = vrot.lane.b32.xlu1 %v7314_v40, %s6360_s18  ;;  %1199 = vrot.lane.b32.xlu0 %v6844_v53, %s6361_s19  ;;  %v968_v53 = vsel %vm326_vm0, %v639_v12, %v7107_v8 }
 0x128   : > { %v7326_v47 = vpop.permute.xlu1 %890  ;;  %v913_v54 = vpop.permute.xlu0 %912 }
 0x129   : > { %11783 = vst [vmem:[#allocation52_spill] sm:$0xff] %v7326_v47 }
 0x12a   : > { %1189 = vrot.lane.b32.xlu1 %v7324_v49, %s6360_s18  ;;  %1203 = vrot.lane.b32.xlu0 %v6853_v56, %s6361_s19  ;;  %v977_v49 = vsel %vm976_vm6, %v968_v53, %v7115_v20 }
 0x12b   : > { %v986_v8 = vsel %vm985_vm7, %v977_v49, %v7174_v11 }
 0x12c   : > { %v7332_v58 = vpop.permute.xlu1 %894  ;;  %v917_v19 = vpop.permute.xlu0 %916 }
 0x12e   : > { %1201 = vrot.lane.b32.xlu1 %v6835_v50, %s6361_s19  ;;  %1207 = vrot.lane.b32.xlu0 %v6889_v9, %s6361_s19  ;;  %v995_v50 = vsel %vm994_vm8, %v986_v8, %v7218_v29  ;;  %v969_v29 = vsel %vm326_vm0, %v7034_v63, %v7123_v24 }
 0x130   : > { %v915_v40 = vpop.permute.xlu1 %914  ;;  %v7340_v47 = vpop.permute.xlu0 %920 }
 0x132   : > { %1205 = vrot.lane.b32.xlu1 %v6861_v60, %s6361_s19  ;;  %1211 = vrot.lane.b32.xlu0 %v6923_v7, %s6361_s19  ;;  %v1004_v7 = vsel %vm1003_vm9, %v995_v50, %v7250_v46  ;;  %v970_v46 = vsel %vm326_vm0, %v7048_v2, %v7121_v21  ;;  %v971_v21 = vsel %vm326_vm0, %v7042_v1, %v7129_v27 }
 0x133   : > { %v1013_v53 = vsel %vm1012_vm10, %v1004_v7, %v881_v59  ;;  %v978_v7 = vsel %vm976_vm6, %v969_v29, %v7155_v14  ;;  %v972_v14 = vsel %vm326_vm0, %v7056_v5, %v7131_v17 }
 0x134   : > { %v7348_v9 = vpop.permute.xlu1 %918  ;;  %v7352_v12 = vpop.permute.xlu0 %924  ;;  %v1022_v20 = vsel %vm1021_vm5, %v1013_v53, %v913_v54  ;;  %v979_v54 = vsel %vm976_vm6, %v970_v46, %v7149_v37  ;;  %v987_v59 = vsel %vm985_vm7, %v978_v7, %v7194_v30  ;;  %v973_v30 = vsel %vm326_vm0, %v7050_v4, %v7139_v3  ;;  %v11784_v7 = vld [vmem:[#allocation34_spill] sm:$0xff] }
 0x135   : > { %v988_v8 = vsel %vm985_vm7, %v979_v54, %v7186_v25  ;;  %v996_v53 = vsel %vm994_vm8, %v987_v59, %v7232_v43  ;;  %v975_v43 = vsel %vm326_vm0, %v7058_v6, %v7147_v35  ;;  %v980_v3 = vsel %vm976_vm6, %v971_v21, %v7163_v39  ;;  %v11785_v54 = vld [vmem:[#allocation38_spill] sm:$0xff] }
 0x136   : > { %1209 = vrot.lane.b32.xlu1 %v6895_v13, %s6361_s19  ;;  %1223 = vrot.lane.b32.xlu0 %v6942_v28, %s6362_s24  ;;  %v997_v27 = vsel %vm994_vm8, %v988_v8, %v7226_v33  ;;  %v1005_v17 = vsel %vm1003_vm9, %v996_v53, %v7264_v52  ;;  %v981_v33 = vsel %vm976_vm6, %v972_v14, %v7157_v38 }
 0x137   : > { %v1006_v25 = vsel %vm1003_vm9, %v997_v27, %v7258_v48  ;;  %v989_v52 = vsel %vm985_vm7, %v980_v3, %v7206_v26  ;;  %v990_v48 = vsel %vm985_vm7, %v981_v33, %v7198_v15 }
 0x138   : > { %v7363_v49 = vpop.permute.xlu1 %922  ;;  %v945_v11 = vpop.permute.xlu0 %944  ;;  %v1015_v35 = vsel %vm1012_vm10, %v1006_v25, %v7296_v62  ;;  %v999_v26 = vsel %vm994_vm8, %v990_v48, %v7234_v44  ;;  %v11792_v25 = vld [vmem:[#allocation28_spill] sm:$0xff] }
 0x139   : > { %v1031_v50 = vsel %vm1030_vm11, %v1022_v20, %v945_v11  ;;  %v974_v20 = vsel %vm326_vm0, %v7064_v10, %v7141_v22  ;;  %v1014_v22 = vsel %vm1012_vm10, %v1005_v17, %v7304_v0  ;;  %v998_v0 = vsel %vm994_vm8, %v989_v52, %v7240_v45  ;;  %v11791_v17 = vld [vmem:[#allocation52_spill] sm:$0xff]  ;;  %v11794_v52 = vld [vmem:[#allocation50_spill] sm:$0xff] }
 0x13a   : > { %1213 = vrot.lane.b32.xlu1 %v7109_v18, %s6361_s19  ;;  %1227 = vrot.lane.b32.xlu0 %v6952_v32, %s6362_s24  ;;  %v1023_v39 = vsel %vm1021_vm5, %v1014_v22, %v915_v40  ;;  %v1024_v29 = vsel %vm1021_vm5, %v1015_v35, %v917_v19  ;;  %v1007_v62 = vsel %vm1003_vm9, %v998_v0, %v7272_v55  ;;  %v11793_v22 = vld [vmem:[#allocation36_spill] sm:$0xff] }
 0x13b   : > { %6008 = vmatprep.mubr.msk.f32.mxu0 %vm1933_vm12, %v1031_v50  ;;  %v982_v45 = vsel %vm976_vm6, %v973_v30, %v7170_v42  ;;  %v1008_v15 = vsel %vm1003_vm9, %v999_v26, %v7266_v51  ;;  %v1016_v19 = vsel %vm1012_vm10, %v1007_v62, %v7316_v61  ;;  %v983_v55 = vsel %vm976_vm6, %v974_v20, %v7165_v41  ;;  %v11789_v30 = vld [vmem:[#allocation29_spill] sm:$0xff] }
 0x13c   : > { %v7384_v24 = vpop.permute.xlu1 %926  ;;  %v949_v37 = vpop.permute.xlu0 %948  ;;  %v991_v44 = vsel %vm985_vm7, %v982_v45, %v7216_v16  ;;  %v1017_v42 = vsel %vm1012_vm10, %v1008_v15, %v7308_v57  ;;  %v1025_v51 = vsel %vm1021_vm5, %v1016_v19, %v7348_v9  ;;  %v992_v61 = vsel %vm985_vm7, %v983_v55, %v11784_v7  ;;  %v11786_v16 = vld [vmem:[#allocation37_spill] sm:$0xff]  ;;  %v11787_v57 = vld [vmem:[#allocation42_spill] sm:$0xff]  ;;  %v11798_v45 = vld [vmem:[#allocation31_spill] sm:$0xff] }
 0x13d   : > { %v1033_v40 = vsel %vm1030_vm11, %v1024_v29, %v949_v37  ;;  %v1000_v59 = vsel %vm994_vm8, %v991_v44, %v11785_v54  ;;  %v1026_v21 = vsel %vm1021_vm5, %v1017_v42, %v7340_v47  ;;  %v1001_v8 = vsel %vm994_vm8, %v992_v61, %v11786_v16  ;;  %v11788_v37 = vld [vmem:[#allocation8_spill] sm:$0xff]  ;;  %v11790_v47 = vld [vmem:[#allocation41_spill] sm:$0xff]  ;;  %v11799_v44 = vld [vmem:[#allocation27_spill] sm:$0xff] }
 0x13e   : > { %1225 = vrot.lane.b32.xlu1 %v6928_v23, %s6362_s24  ;;  %1231 = vrot.lane.b32.xlu0 %v6960_v34, %s6362_s24  ;;  %v1009_v53 = vsel %vm1003_vm9, %v1000_v59, %v11787_v57  ;;  %v984_v20 = vsel %vm976_vm6, %v975_v43, %v11789_v30  ;;  %v1010_v27 = vsel %vm1003_vm9, %v1001_v8, %v11790_v47  ;;  %v11803_v54 = vld [vmem:[#allocation32_spill] sm:$0xff]  ;;  %v11804_v59 = vld [vmem:[#allocation9_spill] sm:$0xff]  ;;  %v11806_v16 = vld [vmem:[#allocation10_spill] sm:$0xff] }
 0x13f   : > { %v1018_v3 = vsel %vm1012_vm10, %v1009_v53, %v11791_v17  ;;  %v993_v33 = vsel %vm985_vm7, %v984_v20, %v11793_v22  ;;  %v1019_v35 = vsel %vm1012_vm10, %v1010_v27, %v11794_v52  ;;  %v11807_v53 = vld [vmem:[#allocation11_spill] sm:$0xff]  ;;  %v11809_v47 = vld [vmem:[#allocation13_spill] sm:$0xff]  ;;  %v11810_v27 = vld [vmem:[#allocation14_spill] sm:$0xff] }
 0x140   : > { %v947_v11 = vpop.permute.xlu1 %946  ;;  %v953_v38 = vpop.permute.xlu0 %952  ;;  %v1027_v43 = vsel %vm1021_vm5, %v1018_v3, %v7363_v49  ;;  %v1028_v0 = vsel %vm1021_vm5, %v1019_v35, %v7352_v12  ;;  %v11811_v22 = vld [vmem:[#allocation15_spill] sm:$0xff] }
 0x141   : > { %v1032_v50 = vsel %vm1030_vm11, %v1023_v39, %v947_v11  ;;  %v1035_v9 = vsel %vm1030_vm11, %v1026_v21, %v953_v38  ;;  %v11795_v11 = vld [vmem:[#allocation39_spill] sm:$0xff]  ;;  %v11796_v38 = vld [vmem:[#allocation45_spill] sm:$0xff] }
 0x142   : > { %1229 = vrot.lane.b32.xlu1 %v6946_v31, %s6362_s24  ;;  %6009 = vmatmul.mubr.msk.f32.vlgmr.msra.gmra.mrb[0].mxu0 %vm1933_vm12, %v1032_v50  ;;  %v1002_v48 = vsel %vm994_vm8, %v993_v33, %v11795_v11  ;;  %v7531_v21 = vld [vmem:[#allocation2 + $0x1c2] sm:$0xff] }
 0x143   : > { %1235 = vrot.lane.b32.xlu0 %v6965_v36, %s6362_s24  ;;  %6011 = vmatprep.mubr.msk.f32.mxu0 %vm1933_vm12, %v1033_v40  ;;  %v1011_v26 = vsel %vm1003_vm9, %v1002_v48, %v11796_v38  ;;  %v11797_v40 = vld [vmem:[#allocation26_spill] sm:$0xff]  ;;  %11805 = vst [vmem:[#allocation34_spill] sm:$0xff] %v7531_v21  ;;  %v11812_v33 = vld [vmem:[#allocation16_spill] sm:$0xff] }
 0x144   : > { %v951_v46 = vpop.permute.xlu1 %950  ;;  %v957_v14 = vpop.permute.xlu0 %956  ;;  %v1020_v49 = vsel %vm1012_vm10, %v1011_v26, %v7332_v58  ;;  %v11800_v58 = vld [vmem:[#allocation33_spill] sm:$0xff] }
 0x145   : > { %v1034_v41 = vsel %vm1030_vm11, %v1025_v51, %v951_v46  ;;  %v1037_v62 = vsel %vm1030_vm11, %v1028_v0, %v957_v14  ;;  %v1029_v12 = vsel %vm1021_vm5, %v1020_v49, %v7384_v24  ;;  %v11801_v46 = vld [vmem:[#allocation30_spill] sm:$0xff]  ;;  %v11802_v24 = vld [vmem:[#allocation35_spill] sm:$0xff] }
 0x146   : > { %1233 = vrot.lane.b32.xlu1 %v11788_v37, %s6362_s24  ;;  %6012 = vmatmul.mubr.msk.f32.gmra.mrb[2].mxu0 %vm1933_vm12, %v1034_v41  ;;  %v11815_v0 = vld [vmem:[#allocation19_spill] sm:$0xff]  ;;  %v11818_v49 = vld [vmem:[#allocation22_spill] sm:$0xff] }
 0x147   : > { %1255 = vrot.lane.b32.xlu0 %v11792_v25, %s6363_s11  ;;  %6014 = vmatprep.mubr.msk.f32.mxu0 %vm1933_vm12, %v1035_v9  ;;  %v11808_v9 = vld [vmem:[#allocation12_spill] sm:$0xff] }
 0x148   : > { %v955_v39 = vpop.permute.xlu1 %954  ;;  %v7492_v50 = vpop.permute.xlu0 %1063 }
 0x149   : > { %v1036_v29 = vsel %vm1030_vm11, %v1027_v43, %v955_v39  ;;  %v11813_v43 = vld [vmem:[#allocation17_spill] sm:$0xff]  ;;  %v11814_v39 = vld [vmem:[#allocation18_spill] sm:$0xff] }
 0x14a   : > { %1237 = vrot.lane.b32.xlu1 %v11797_v40, %s6362_s24  ;;  %6015 = vmatmul.mubr.msk.f32.gmra.mrb[4].mxu0 %vm1933_vm12, %v1036_v29  ;;  %v11816_v29 = vld [vmem:[#allocation20_spill] sm:$0xff] }
 0x14b   : > { %1259 = vrot.lane.b32.xlu0 %v11798_v45, %s6363_s11  ;;  %6017 = vmatprep.mubr.msk.f32.mxu0 %vm1933_vm12, %v1037_v62  ;;  %v11817_v62 = vld [vmem:[#allocation21_spill] sm:$0xff]  ;;  %v7727_v45 = vld [vmem:[#allocation2 + $0x151] sm:$0xff] }
 0x14c   : > { %v959_v15 = vpop.permute.xlu1 %958  ;;  %v7508_v55 = vpop.permute.xlu0 %1067 }
 0x14d   : > { %v1038_v19 = vsel %vm1030_vm11, %v1029_v12, %v959_v15 }
 0x14e   : > { %1257 = vrot.lane.b32.xlu1 %v11799_v44, %s6363_s11  ;;  %6018 = vmatmul.mubr.msk.f32.gmra.mrb[6].mxu0 %vm1933_vm12, %v1038_v19  ;;  %v11819_v19 = vld [vmem:[#allocation23_spill] sm:$0xff] }
 0x14f   : > { %1263 = vrot.lane.b32.xlu0 %v11800_v58, %s6363_s11 }
 0x150   : > { %v7515_v42 = vpop.permute.xlu1 %1065  ;;  %v7517_v51 = vpop.permute.xlu0 %1071 }
 0x152   : > { %1261 = vrot.lane.b32.xlu1 %v11801_v46, %s6363_s11 }
 0x153   : > { %1267 = vrot.lane.b32.xlu0 %v11802_v24, %s6363_s11  ;;  %v11820_v24 = vld [vmem:[#allocation24_spill] sm:$0xff] }
 0x154   : > { %v7523_v7 = vpop.permute.xlu1 %1069  ;;  %v7525_v61 = vpop.permute.xlu0 %1075 }
 0x156   : > { %1265 = vrot.lane.b32.xlu1 %v11803_v54, %s6363_s11 }
 0x157   : > { %1369 = vrot.lane.b32.xlu0 %v11804_v59, %s6356_s14 }
 0x158   : > { %v7533_v41 = vpop.permute.xlu1 %1073  ;;  %v7535_v14 = vpop.permute.xlu0 %1095 }
 0x15a   : > { %1269 = vrot.lane.b32.xlu1 %v7531_v21, %s6363_s11 }
 0x15b   : > { %1373 = vrot.lane.b32.xlu0 %v11806_v16, %s6356_s14 }
 0x15c   : > { %v7541_v8 = vpop.permute.xlu1 %1077  ;;  %v7543_v57 = vpop.permute.xlu0 %1099 }
 0x15e   : > { %1371 = vrot.lane.b32.xlu1 %v11807_v53, %s6356_s14 }
 0x15f   : > { %1377 = vrot.lane.b32.xlu0 %v11808_v9, %s6356_s14 }
 0x160   : > { %v7549_v30 = vpop.permute.xlu1 %1097  ;;  %v7551_v20 = vpop.permute.xlu0 %1103 }
 0x162   : > { %1375 = vrot.lane.b32.xlu1 %v11809_v47, %s6356_s14  ;;  %v11822_v47 = vld [vmem:[#allocation25_spill] sm:$0xff] }
 0x163   : > { %1381 = vrot.lane.b32.xlu0 %v11810_v27, %s6356_s14  ;;  %v11823_v27 = vld [vmem:[#allocation4_spill] sm:$0xff] }
 0x164   : > { %v7557_v17 = vpop.permute.xlu1 %1101  ;;  %v7559_v3 = vpop.permute.xlu0 %1107 }
 0x166   : > { %1379 = vrot.lane.b32.xlu1 %v11811_v22, %s6356_s14 }
 0x167   : > { %1393 = vrot.lane.b32.xlu0 %v11812_v33, %s6357_s15 }
 0x168   : > { %v7565_v52 = vpop.permute.xlu1 %1105  ;;  %v7567_v35 = vpop.permute.xlu0 %1119 }
 0x16a   : > { %1383 = vrot.lane.b32.xlu1 %v11813_v43, %s6356_s14  ;;  %v11825_v43 = vld [vmem:[#allocation7_spill] sm:$0xff] }
 0x16b   : > { %1397 = vrot.lane.b32.xlu0 %v11814_v39, %s6357_s15 }
 0x16c   : > { %v7573_v11 = vpop.permute.xlu1 %1109  ;;  %v7575_v48 = vpop.permute.xlu0 %1123 }
 0x16e   : > { %1395 = vrot.lane.b32.xlu1 %v11815_v0, %s6357_s15 }
 0x16f   : > { %1401 = vrot.lane.b32.xlu0 %v11816_v29, %s6357_s15 }
 0x170   : > { %v7581_v38 = vpop.permute.xlu1 %1121  ;;  %v7583_v26 = vpop.permute.xlu0 %1127 }
 0x172   : > { %1399 = vrot.lane.b32.xlu1 %v11817_v62, %s6357_s15 }
 0x173   : > { %1405 = vrot.lane.b32.xlu0 %v11818_v49, %s6357_s15 }
 0x174   : > { %v7589_v12 = vpop.permute.xlu1 %1125  ;;  %v7591_v15 = vpop.permute.xlu0 %1131 }
 0x176   : > { %1403 = vrot.lane.b32.xlu1 %v11819_v19, %s6357_s15 }
 0x177   : > { %1417 = vrot.lane.b32.xlu0 %v7034_v63, %s6358_s16 }
 0x178   : > { %v7597_v44 = vpop.permute.xlu1 %1129  ;;  %v7599_v46 = vpop.permute.xlu0 %1143 }
 0x17a   : > { %1407 = vrot.lane.b32.xlu1 %v11820_v24, %s6357_s15  ;;  %v1348_v24 = vld [vmem:[#allocation2 + $0x100] sm:$0xff] }
 0x17b   : > { %1421 = vrot.lane.b32.xlu0 %v7042_v1, %s6358_s16 }
 0x17c   : > { %v7605_v54 = vpop.permute.xlu1 %1133  ;;  %v7607_v59 = vpop.permute.xlu0 %1147 }
 0x17e   : > { %1419 = vrot.lane.b32.xlu1 %v7048_v2, %s6358_s16  ;;  %v11821_v2 = vld [vmem:[#allocation5_spill] sm:$0xff] }
 0x17f   : > { %1425 = vrot.lane.b32.xlu0 %v7050_v4, %s6358_s16 }
 0x180   : > { %v7613_v63 = vpop.permute.xlu1 %1145  ;;  %v7615_v16 = vpop.permute.xlu0 %1151 }
 0x182   : > { %1423 = vrot.lane.b32.xlu1 %v7056_v5, %s6358_s16 }
 0x183   : > { %1429 = vrot.lane.b32.xlu0 %v7058_v6, %s6358_s16 }
 0x184   : > { %v7621_v1 = vpop.permute.xlu1 %1149  ;;  %v7623_v53 = vpop.permute.xlu0 %1155 }
 0x186   : > { %1427 = vrot.lane.b32.xlu1 %v7064_v10, %s6358_s16  ;;  %v11824_v10 = vld [vmem:[#allocation6_spill] sm:$0xff] }
 0x187   : > { %1441 = vrot.lane.b32.xlu0 %v11821_v2, %s6359_s17 }
 0x188   : > { %v7629_v4 = vpop.permute.xlu1 %1153  ;;  %v1176_v9 = vpop.permute.xlu0 %1175 }
 0x18a   : > { %1431 = vrot.lane.b32.xlu1 %v11822_v47, %s6358_s16 }
 0x18b   : > { %1445 = vrot.lane.b32.xlu0 %v6853_v56, %s6359_s17 }
 0x18c   : > { %v7635_v5 = vpop.permute.xlu1 %1157  ;;  %v7637_v6 = vpop.permute.xlu0 %1179 }
 0x18e   : > { %1443 = vrot.lane.b32.xlu1 %v11823_v27, %s6359_s17  ;;  %v1350_v27 = vld [vmem:[#allocation2 + $0x120] sm:$0xff] }
 0x18f   : > { %1449 = vrot.lane.b32.xlu0 %v11824_v10, %s6359_s17 }
 0x190   : > { %v7643_v22 = vpop.permute.xlu1 %1177  ;;  %v7645_v33 = vpop.permute.xlu0 %1183 }
 0x192   : > { %1447 = vrot.lane.b32.xlu1 %v6861_v60, %s6359_s17 }
 0x193   : > { %1453 = vrot.lane.b32.xlu0 %v11825_v43, %s6359_s17 }
 0x194   : > { %v7651_v56 = vpop.permute.xlu1 %1181  ;;  %v7653_v39 = vpop.permute.xlu0 %1187 }
 0x196   : > { %1451 = vrot.lane.b32.xlu1 %v6895_v13, %s6359_s17 }
 0x197   : > { %1465 = vrot.lane.b32.xlu0 %v6942_v28, %s6360_s18 }
 0x198   : > { %v7659_v0 = vpop.permute.xlu1 %1185  ;;  %v1200_v29 = vpop.permute.xlu0 %1199 }
 0x19a   : > { %1455 = vrot.lane.b32.xlu1 %v7109_v18, %s6359_s17  ;;  %v1344_v18 = vld [vmem:[#allocation2 + $0xc0] sm:$0xff] }
 0x19b   : > { %1469 = vrot.lane.b32.xlu0 %v6952_v32, %s6360_s18 }
 0x19c   : > { %v7665_v60 = vpop.permute.xlu1 %1189  ;;  %v7667_v62 = vpop.permute.xlu0 %1203 }
 0x19e   : > { %1467 = vrot.lane.b32.xlu1 %v6928_v23, %s6360_s18 }
 0x19f   : > { %1473 = vrot.lane.b32.xlu0 %v6960_v34, %s6360_s18  ;;  %v1346_v34 = vld [vmem:[#allocation2 + $0xe0] sm:$0xff] }
 0x1a0   : > { %v7673_v13 = vpop.permute.xlu1 %1201  ;;  %v7675_v28 = vpop.permute.xlu0 %1207 }
 0x1a2   : > { %1471 = vrot.lane.b32.xlu1 %v6946_v31, %s6360_s18  ;;  %v1345_v31 = vld [vmem:[#allocation2 + $0xd0] sm:$0xff] }
 0x1a3   : > { %1477 = vrot.lane.b32.xlu0 %v6965_v36, %s6360_s18 }
 0x1a4   : > { %v7681_v32 = vpop.permute.xlu1 %1205  ;;  %v7683_v49 = vpop.permute.xlu0 %1211 }
 0x1a6   : > { %1475 = vrot.lane.b32.xlu1 %v11788_v37, %s6360_s18  ;;  %v1347_v37 = vld [vmem:[#allocation2 + $0xf0] sm:$0xff] }
 0x1a7   : > { %1497 = vrot.lane.b32.xlu0 %v1344_v18, %s6361_s19  ;;  %v1349_v18 = vld [vmem:[#allocation2 + $0x110] sm:$0xff] }
 0x1a8   : > { %v7688_v23 = vpop.permute.xlu1 %1209  ;;  %v1224_v19 = vpop.permute.xlu0 %1223 }
 0x1aa   : > { %1479 = vrot.lane.b32.xlu1 %v11797_v40, %s6360_s18  ;;  %v6219_v40 = vld [vmem:[#allocation2 + $0x141] sm:$0xff] }
 0x1ab   : > { %1501 = vrot.lane.b32.xlu0 %v1346_v34, %s6361_s19  ;;  %v1279_v43 = vsel %vm326_vm0, %v6219_v40, %v7492_v50 }
 0x1ac   : > { %v7693_v36 = vpop.permute.xlu1 %1213  ;;  %v7695_v2 = vpop.permute.xlu0 %1227  ;;  %v1287_v34 = vsel %vm976_vm6, %v1279_v43, %v7535_v14  ;;  %v1351_v14 = vld [vmem:[#allocation2 + $0x130] sm:$0xff]  ;;  %v7724_v43 = vld [vmem:[#allocation2 + $0x41] sm:$0xff] }
 0x1ad   : > { %v1295_v21 = vsel %vm985_vm7, %v1287_v34, %v7567_v35 }
 0x1ae   : > { %1499 = vrot.lane.b32.xlu1 %v1345_v31, %s6361_s19 }
 0x1af   : > { %1505 = vrot.lane.b32.xlu0 %v1348_v24, %s6361_s19  ;;  %v7709_v24 = vld [vmem:[#allocation2 + $0x21] sm:$0xff] }
 0x1b0   : > { %v1226_v47 = vpop.permute.xlu1 %1225  ;;  %v7699_v10 = vpop.permute.xlu0 %1231 }
 0x1b2   : > { %1503 = vrot.lane.b32.xlu1 %v1347_v37, %s6361_s19  ;;  %v1303_v37 = vsel %vm994_vm8, %v1295_v21, %v7599_v46  ;;  %v1280_v21 = vsel %vm326_vm0, %v7727_v45, %v7515_v42 }
 0x1b3   : > { %1509 = vrot.lane.b32.xlu0 %v1350_v27, %s6361_s19  ;;  %v1311_v50 = vsel %vm1003_vm9, %v1303_v37, %v1176_v9  ;;  %v7734_v9 = vld [vmem:[#allocation2 + $0x161] sm:$0xff] }
 0x1b4   : > { %v7707_v31 = vpop.permute.xlu1 %1229  ;;  %v1319_v27 = vsel %vm1012_vm10, %v1311_v50, %v1200_v29  ;;  %v1281_v29 = vsel %vm326_vm0, %v7734_v9, %v7508_v55  ;;  %v7754_v55 = vld [vmem:[#allocation2 + $0x181] sm:$0xff] }
 0x1b5   : > { %v7713_v58 = vpop.permute.xlu0 %1235  ;;  %v1327_v35 = vsel %vm1021_vm5, %v1319_v27, %v1224_v19  ;;  %v1288_v19 = vsel %vm976_vm6, %v1280_v21, %v7549_v30  ;;  %v1289_v42 = vsel %vm976_vm6, %v1281_v29, %v7543_v57  ;;  %v1283_v30 = vsel %vm326_vm0, %v7754_v55, %v7517_v51  ;;  %v7759_v27 = vld [vmem:[#allocation2 + $0x171] sm:$0xff]  ;;  %v7768_v21 = vld [vmem:[#allocation2 + $0x1a1] sm:$0xff] }
 0x1b6   : > { %1507 = vrot.lane.b32.xlu1 %v1349_v18, %s6361_s19  ;;  %v7744_v18 = vld [vmem:[#allocation2 + $0x31] sm:$0xff]  ;;  %v1296_v37 = vsel %vm985_vm7, %v1288_v19, %v7581_v38  ;;  %v1297_v57 = vsel %vm985_vm7, %v1289_v42, %v7575_v48  ;;  %v1291_v42 = vsel %vm976_vm6, %v1283_v30, %v7551_v20 }
 0x1b7   : > { %1529 = vrot.lane.b32.xlu0 %v7709_v24, %s6362_s24  ;;  %v1304_v38 = vsel %vm994_vm8, %v1296_v37, %v7613_v63  ;;  %v7773_v51 = vld [vmem:[#allocation2 + $0x191] sm:$0xff] }
 0x1b8   : > { %v7722_v40 = vpop.permute.xlu1 %1233  ;;  %v1284_v29 = vsel %vm326_vm0, %v7773_v51, %v7533_v41  ;;  %v1312_v48 = vsel %vm1003_vm9, %v1304_v38, %v7643_v22  ;;  %v7784_v63 = vld [vmem:[#allocation2 + $0x1b1] sm:$0xff] }
 0x1b9   : > { %v1256_v34 = vpop.permute.xlu0 %1255  ;;  %v7797_v22 = vld [vmem:[#allocation2 + $0x51] sm:$0xff] }
 0x1ba   : > { %v1335_v46 = vsel %vm1030_vm11, %v1327_v35, %v1256_v34  ;;  %1511 = vrot.lane.b32.xlu1 %v1351_v14, %s6361_s19  ;;  %v7752_v14 = vld [vmem:[#allocation2 + $0x61] sm:$0xff]  ;;  %v1282_v35 = vsel %vm326_vm0, %v7759_v27, %v7523_v7  ;;  %v1305_v7 = vsel %vm994_vm8, %v1297_v57, %v7607_v59  ;;  %v1320_v59 = vsel %vm1012_vm10, %v1312_v48, %v7673_v13 }
 0x1bb   : > { %1533 = vrot.lane.b32.xlu0 %v7724_v43, %s6362_s24  ;;  %6020 = vmatprep.mubr.msk.f32.mxu0 %vm1933_vm12, %v1335_v46  ;;  %v1285_v46 = vsel %vm326_vm0, %v7768_v21, %v7525_v61  ;;  %v1286_v61 = vsel %vm326_vm0, %v7784_v63, %v7541_v8  ;;  %v1290_v19 = vsel %vm976_vm6, %v1282_v35, %v7557_v17  ;;  %v7806_v35 = vld [vmem:[#allocation2 + $0x81] sm:$0xff] }
 0x1bc   : > { %v7750_v50 = vpop.permute.xlu1 %1237  ;;  %v1313_v41 = vsel %vm1003_vm9, %v1305_v7, %v7637_v6  ;;  %v1298_v8 = vsel %vm985_vm7, %v1290_v19, %v7589_v12  ;;  %v1328_v37 = vsel %vm1021_vm5, %v1320_v59, %v1226_v47  ;;  %v1299_v13 = vsel %vm985_vm7, %v1291_v42, %v7583_v26 }
 0x1bd   : > { %v1260_v34 = vpop.permute.xlu0 %1259  ;;  %v1321_v17 = vsel %vm1012_vm10, %v1313_v41, %v7667_v62  ;;  %v1306_v57 = vsel %vm994_vm8, %v1298_v8, %v7621_v1  ;;  %v1307_v62 = vsel %vm994_vm8, %v1299_v13, %v7615_v16  ;;  %v1292_v26 = vsel %vm976_vm6, %v1284_v29, %v7565_v52  ;;  %v7832_v16 = vld [vmem:[#allocation2 + $0x71] sm:$0xff]  ;;  %v7842_v29 = vld [vmem:[#allocation2 + $0xc1] sm:$0xff] }
 0x1be   : > { %1531 = vrot.lane.b32.xlu1 %v7744_v18, %s6362_s24  ;;  %v1329_v20 = vsel %vm1021_vm5, %v1321_v17, %v7695_v2  ;;  %v1314_v47 = vsel %vm1003_vm9, %v1306_v57, %v7651_v56  ;;  %v1315_v1 = vsel %vm1003_vm9, %v1307_v62, %v7645_v33  ;;  %v1293_v56 = vsel %vm976_vm6, %v1285_v46, %v7559_v3  ;;  %v7900_v17 = vld [vmem:[#allocation2 + $0x101] sm:$0xff]  ;;  %v6227_v62 = vld [vmem:[#allocation2 + $0xb1] sm:$0xff] }
 0x1bf   : > { %1537 = vrot.lane.b32.xlu0 %v7752_v14, %s6362_s24  ;;  %v1337_v38 = vsel %vm1030_vm11, %v1329_v20, %v1260_v34  ;;  %v1322_v2 = vsel %vm1012_vm10, %v1314_v47, %v7681_v32  ;;  %v1300_v34 = vsel %vm985_vm7, %v1292_v26, %v7597_v44  ;;  %v1323_v52 = vsel %vm1012_vm10, %v1315_v1, %v7675_v28  ;;  %v7922_v20 = vld [vmem:[#allocation2 + $0x111] sm:$0xff] }
 0x1c0   : > { %v1258_v6 = vpop.permute.xlu1 %1257  ;;  %v1330_v33 = vsel %vm1021_vm5, %v1322_v2, %v7707_v31  ;;  %v1301_v7 = vsel %vm985_vm7, %v1293_v56, %v7591_v15  ;;  %v1308_v48 = vsel %vm994_vm8, %v1300_v34, %v7629_v4  ;;  %v1331_v3 = vsel %vm1021_vm5, %v1323_v52, %v7699_v10  ;;  %11826 = vst [vmem:[#allocation38_spill] sm:$0xff] %v7922_v20  ;;  %v7931_v47 = vld [vmem:[#allocation2 + $0x131] sm:$0xff]  ;;  %v6229_v34 = vld [vmem:[#allocation2 + $0xc1] sm:$0xff] }
 0x1c1   : > { %v1336_v30 = vsel %vm1030_vm11, %v1328_v37, %v1258_v6  ;;  %v1264_v12 = vpop.permute.xlu0 %1263  ;;  %v1309_v28 = vsel %vm994_vm8, %v1301_v7, %v7623_v53  ;;  %v1316_v31 = vsel %vm1003_vm9, %v1308_v48, %v7659_v0  ;;  %v1294_v15 = vsel %vm976_vm6, %v1286_v61, %v7573_v11  ;;  %v7868_v53 = vld [vmem:[#allocation2 + $0x91] sm:$0xff]  ;;  %v7876_v61 = vld [vmem:[#allocation2 + $0xe1] sm:$0xff]  ;;  %11827 = vst [vmem:[#allocation37_spill] sm:$0xff] %v7931_v47 }
 0x1c2   : > { %1535 = vrot.lane.b32.xlu1 %v7797_v22, %s6362_s24  ;;  %6021 = vmatmul.mubr.msk.f32.gmra.mrb[8].mxu0 %vm1933_vm12, %v1336_v30  ;;  %v1339_v19 = vsel %vm1030_vm11, %v1331_v3, %v1264_v12  ;;  %v1317_v4 = vsel %vm1003_vm9, %v1309_v28, %v7653_v39  ;;  %v1324_v10 = vsel %vm1012_vm10, %v1316_v31, %v7688_v23  ;;  %v6228_v1 = vld [vmem:[#allocation2 + $0xd1] sm:$0xff]  ;;  %v6231_v7 = vld [vmem:[#allocation2 + $0xe1] sm:$0xff] }
 0x1c3   : > { %1541 = vrot.lane.b32.xlu0 %v7806_v35, %s6362_s24  ;;  %6023 = vmatprep.mubr.msk.f32.mxu0 %vm1933_vm12, %v1337_v38  ;;  %v1302_v0 = vsel %vm985_vm7, %v1294_v15, %v7605_v54  ;;  %v1325_v41 = vsel %vm1012_vm10, %v1317_v4, %v7683_v49  ;;  %v1332_v11 = vsel %vm1021_vm5, %v1324_v10, %v7722_v40  ;;  %v6230_v52 = vld [vmem:[#allocation2 + $0xf1] sm:$0xff]  ;;  %v11828_v28 = vld [vmem:[#allocation40_spill] sm:$0xff] }
 0x1c4   : > { %v1262_v32 = vpop.permute.xlu1 %1261  ;;  %v1310_v23 = vsel %vm994_vm8, %v1302_v0, %v7635_v5  ;;  %v1333_v59 = vsel %vm1021_vm5, %v1325_v41, %v7713_v58  ;;  %v7896_v58 = vld [vmem:[#allocation2 + $0xd1] sm:$0xff]  ;;  %v6234_v15 = vld [vmem:[#allocation2 + $0x121] sm:$0xff] }
 0x1c5   : > { %v1338_v44 = vsel %vm1030_vm11, %v1330_v33, %v1262_v32  ;;  %v1268_v46 = vpop.permute.xlu0 %1267  ;;  %v1318_v54 = vsel %vm1003_vm9, %v1310_v23, %v7665_v60  ;;  %v6232_v48 = vld [vmem:[#allocation2 + $0x111] sm:$0xff]  ;;  %v11831_v41 = vld [vmem:[#allocation44_spill] sm:$0xff] }
 0x1c6   : > { %1539 = vrot.lane.b32.xlu1 %v7832_v16, %s6362_s24  ;;  %6024 = vmatmul.mubr.msk.f32.gmra.mrb[10].mxu0 %vm1933_vm12, %v1338_v44  ;;  %v1341_v49 = vsel %vm1030_vm11, %v1333_v59, %v1268_v46  ;;  %v1326_v5 = vsel %vm1012_vm10, %v1318_v54, %v7693_v36  ;;  %v7910_v36 = vld [vmem:[#allocation2 + $0xf1] sm:$0xff]  ;;  %v6233_v46 = vld [vmem:[#allocation2 + $0x101] sm:$0xff] }
 0x1c7   : > { %1561 = vrot.lane.b32.xlu0 %v7842_v29, %s6363_s11  ;;  %6026 = vmatprep.mubr.msk.f32.mxu0 %vm1933_vm12, %v1339_v19  ;;  %v1334_v60 = vsel %vm1021_vm5, %v1326_v5, %v7750_v50  ;;  %v7914_v50 = vld [vmem:[#allocation2 + $0x121] sm:$0xff]  ;;  %v11829_v4 = vld [vmem:[#allocation43_spill] sm:$0xff] }
 0x1c8   : > { %v1266_v39 = vpop.permute.xlu1 %1265  ;;  %v11833_v59 = vld [vmem:[#allocation47_spill] sm:$0xff]  ;;  %v11835_v5 = vld [vmem:[#allocation49_spill] sm:$0xff] }
 0x1c9   : > { %v1340_v42 = vsel %vm1030_vm11, %v1332_v11, %v1266_v39  ;;  %v7883_v8 = vpop.permute.xlu0 %1369  ;;  %v11832_v11 = vld [vmem:[#allocation46_spill] sm:$0xff] }
 0x1ca   : > { %1543 = vrot.lane.b32.xlu1 %v7868_v53, %s6362_s24  ;;  %6027 = vmatmul.mubr.msk.f32.gmra.mrb[12].mxu0 %vm1933_vm12, %v1340_v42  ;;  %v11834_v42 = vld [vmem:[#allocation48_spill] sm:$0xff] }
 0x1cb   : > { %1565 = vrot.lane.b32.xlu0 %v7876_v61, %s6363_s11  ;;  %6029 = vmatprep.mubr.msk.f32.mxu0 %vm1933_vm12, %v1341_v49 }
 0x1cc   : > { %v1270_v40 = vpop.permute.xlu1 %1269 }
 0x1cd   : > { %v1342_v37 = vsel %vm1030_vm11, %v1334_v60, %v1270_v40  ;;  %v7903_v6 = vpop.permute.xlu0 %1373 }
 0x1ce   : > { %1563 = vrot.lane.b32.xlu1 %v7896_v58, %s6363_s11  ;;  %6030 = vmatmul.mubr.msk.f32.gmra.mrb[14].mxu0 %vm1933_vm12, %v1342_v37  ;;  %v11836_v37 = vld [vmem:[#allocation51_spill] sm:$0xff] }
 0x1cf   : > { %1569 = vrot.lane.b32.xlu0 %v7900_v17, %s6363_s11 }
 0x1d0   : > { %v7912_v13 = vpop.permute.xlu1 %1371 }
 0x1d1   : > { %v7916_v57 = vpop.permute.xlu0 %1377 }
 0x1d2   : > { %1567 = vrot.lane.b32.xlu1 %v7910_v36, %s6363_s11 }
 0x1d3   : > { %1573 = vrot.lane.b32.xlu0 %v7914_v50, %s6363_s11 }
 0x1d4   : > { %v7924_v30 = vpop.permute.xlu1 %1375 }
 0x1d5   : > { %v7926_v12 = vpop.permute.xlu0 %1381 }
 0x1d6   : > { %1571 = vrot.lane.b32.xlu1 %v7922_v20, %s6363_s11 }
 0x1d7   : > { %1657 = vrot.lane.b32.xlu0 %v6227_v62, %s6356_s14 }
 0x1d8   : > { %v7933_v38 = vpop.permute.xlu1 %1379 }
 0x1d9   : > { %v7935_v26 = vpop.permute.xlu0 %1393 }
 0x1da   : > { %1575 = vrot.lane.b32.xlu1 %v7931_v47, %s6363_s11 }
 0x1db   : > { %1661 = vrot.lane.b32.xlu0 %v6228_v1, %s6356_s14 }
 0x1dc   : > { %v7940_v2 = vpop.permute.xlu1 %1383 }
 0x1dd   : > { %v7942_v56 = vpop.permute.xlu0 %1397 }
 0x1de   : > { %1659 = vrot.lane.b32.xlu1 %v6229_v34, %s6356_s14 }
 0x1df   : > { %1665 = vrot.lane.b32.xlu0 %v6230_v52, %s6356_s14 }
 0x1e0   : > { %v7946_v33 = vpop.permute.xlu1 %1395 }
 0x1e1   : > { %v7948_v32 = vpop.permute.xlu0 %1401 }
 0x1e2   : > { %1663 = vrot.lane.b32.xlu1 %v6231_v7, %s6356_s14 }
 0x1e3   : > { %1669 = vrot.lane.b32.xlu0 %v6232_v48, %s6356_s14  ;;  %v6236_v48 = vld [vmem:[#allocation2 + $0x1c1] sm:$0xff] }
 0x1e4   : > { %v7952_v3 = vpop.permute.xlu1 %1399 }
 0x1e5   : > { %v7954_v44 = vpop.permute.xlu0 %1405 }
 0x1e6   : > { %1667 = vrot.lane.b32.xlu1 %v6233_v46, %s6356_s14 }
 0x1e7   : > { %1681 = vrot.lane.b32.xlu0 %v11828_v28, %s6357_s15  ;;  %v6238_v28 = vld [vmem:[#allocation2 + $0x201] sm:$0xff] }
 0x1e8   : > { %v7959_v31 = vpop.permute.xlu1 %1403 }
 0x1e9   : > { %v7961_v19 = vpop.permute.xlu0 %1417 }
 0x1ea   : > { %1671 = vrot.lane.b32.xlu1 %v6234_v15, %s6356_s14 }
 0x1eb   : > { %1685 = vrot.lane.b32.xlu0 %v11829_v4, %s6357_s15 }
 0x1ec   : > { %v7966_v10 = vpop.permute.xlu1 %1407 }
 0x1ed   : > { %11830 = vst [vmem:[#allocation42_spill] sm:$0xff] %v7966_v10  ;;  %v7968_v0 = vpop.permute.xlu0 %1421 }
 0x1ee   : > { %1683 = vrot.lane.b32.xlu1 %v11831_v41, %s6357_s15  ;;  %v6240_v41 = vld [vmem:[#allocation2 + $0x221] sm:$0xff] }
 0x1ef   : > { %1689 = vrot.lane.b32.xlu0 %v11832_v11, %s6357_s15  ;;  %v6241_v11 = vld [vmem:[#allocation2 + $0x251] sm:$0xff] }
 0x1f0   : > { %v7974_v39 = vpop.permute.xlu1 %1419 }
 0x1f1   : > { %v7976_v23 = vpop.permute.xlu0 %1425 }
 0x1f2   : > { %1687 = vrot.lane.b32.xlu1 %v11833_v59, %s6357_s15  ;;  %v8042_v59 = vld [vmem:[%s11524_s3] ss:$0 sm:$0xff] }
 0x1f3   : > { %1693 = vrot.lane.b32.xlu0 %v11834_v42, %s6357_s15 }
 0x1f4   : > { %v7982_v54 = vpop.permute.xlu1 %1423 }
 0x1f5   : > { %v7984_v49 = vpop.permute.xlu0 %1429 }
 0x1f6   : > { %1691 = vrot.lane.b32.xlu1 %v11835_v5, %s6357_s15 }
 0x1f7   : > { %1705 = vrot.lane.b32.xlu0 %v7727_v45, %s6358_s16 }
 0x1f8   : > { %v7990_v60 = vpop.permute.xlu1 %1427 }
 0x1f9   : > { %v7992_v40 = vpop.permute.xlu0 %1441 }
 0x1fa   : > { %1695 = vrot.lane.b32.xlu1 %v11836_v37, %s6357_s15 }
 0x1fb   : > { %1709 = vrot.lane.b32.xlu0 %v7759_v27, %s6358_s16 }
 0x1fc   : > { %v7998_v62 = vpop.permute.xlu1 %1431 }
 0x1fd   : > { %11837 = vst [vmem:[#allocation8_spill] sm:$0xff] %v7998_v62  ;;  %v8000_v1 = vpop.permute.xlu0 %1445  ;;  %v6243_v62 = vld [vmem:[#allocation2 + $0x261] sm:$0xff] }
 0x1fe   : > { %1707 = vrot.lane.b32.xlu1 %v7734_v9, %s6358_s16  ;;  %v6235_v9 = vld [vmem:[#allocation2 + $0x1f1] sm:$0xff] }
 0x1ff   : > { %1713 = vrot.lane.b32.xlu0 %v7773_v51, %s6358_s16 }
 0x200   : > { %v8006_v45 = vpop.permute.xlu1 %1443 }
 0x201   : > { %v8008_v34 = vpop.permute.xlu0 %1449 }
 0x202   : > { %1711 = vrot.lane.b32.xlu1 %v7754_v55, %s6358_s16  ;;  %v6237_v55 = vld [vmem:[#allocation2 + $0x211] sm:$0xff] }
 0x203   : > { %1717 = vrot.lane.b32.xlu0 %v7784_v63, %s6358_s16 }
 0x204   : > { %v8014_v27 = vpop.permute.xlu1 %1447 }
 0x205   : > { %v8016_v52 = vpop.permute.xlu0 %1453 }
 0x206   : > { %11838 = vst [vmem:[#allocation29_spill] sm:$0xff] %v8016_v52  ;;  %1715 = vrot.lane.b32.xlu1 %v7768_v21, %s6358_s16  ;;  %v6239_v21 = vld [vmem:[#allocation2 + $0x231] sm:$0xff] }
 0x207   : > { %1729 = vrot.lane.b32.xlu0 %v6235_v9, %s6359_s17 }
 0x208   : > { %v8021_v51 = vpop.permute.xlu1 %1451 }
 0x209   : > { %v8023_v7 = vpop.permute.xlu0 %1465 }
 0x20a   : > { %1719 = vrot.lane.b32.xlu1 %v6236_v48, %s6358_s16  ;;  %v6242_v48 = vld [vmem:[#allocation2 + $0x241] sm:$0xff] }
 0x20b   : > { %1733 = vrot.lane.b32.xlu0 %v6237_v55, %s6359_s17 }
 0x20c   : > { %v8027_v63 = vpop.permute.xlu1 %1455 }
 0x20d   : > { %11839 = vst [vmem:[#allocation41_spill] sm:$0xff] %v8027_v63  ;;  %v8029_v46 = vpop.permute.xlu0 %1469 }
 0x20e   : > { %1731 = vrot.lane.b32.xlu1 %v6238_v28, %s6359_s17 }
 0x20f   : > { %1737 = vrot.lane.b32.xlu0 %v6239_v21, %s6359_s17 }
 0x210   : > { %v8033_v15 = vpop.permute.xlu1 %1467 }
 0x211   : > { %v8035_v4 = vpop.permute.xlu0 %1473 }
 0x212   : > { %1735 = vrot.lane.b32.xlu1 %v6240_v41, %s6359_s17 }
 0x213   : > { %1741 = vrot.lane.b32.xlu0 %v6241_v11, %s6359_s17 }
 0x214   : > { %v8044_v42 = vpop.permute.xlu1 %1471 }
 0x215   : > { %v8046_v5 = vpop.permute.xlu0 %1477  ;;  %v6010_v37 = vpop.f32.mrb[0].mxu0 }
 0x216   : > { %11840 = vst [vmem:[#allocation52_spill] sm:$0xff] %v8046_v5  ;;  %v2106_v9 = vadd.f32 %v6010_v37, %v8042_v59  ;;  %1739 = vrot.lane.b32.xlu1 %v6242_v48, %s6359_s17  ;;  %v2100_v55 = vpop.f32.mrb[1].mxu0 }
 0x217   : > { %v2101_v28 = vadd.f32 %v8042_v59, %v2100_v55  ;;  %1753 = vrot.lane.b32.xlu0 %v11792_v25, %s6360_s18  ;;  %v11842_v25 = vld [vmem:[#allocation31_spill] sm:$0xff] }
 0x218   : > { %v2260_v21 = vmax.f32 %v2106_v9, 0.0  ;;  %v8053_v41 = vpop.permute.xlu1 %1475 }
 0x219   : > { %11841 = vst [vmem:[#allocation28_spill] sm:$0xff] %v8053_v41  ;;  %v2259_v11 = vmax.f32 %v2101_v28, 0.0  ;;  %v8055_v47 = vpop.permute.xlu0 %1497  ;;  %v6013_v63 = vpop.f32.mrb[2].mxu0 }
 0x21a   : > { %2293 = vst.msk [vmem:[#allocation3 + $0x21] sm:$0xff] %vm326_vm0, %v2260_v21  ;;  %v2116_v37 = vadd.f32 %v6013_v63, %v8042_v59  ;;  %1743 = vrot.lane.b32.xlu1 %v6243_v62, %s6359_s17  ;;  %v2110_v48 = vpop.f32.mrb[3].mxu0  ;;  %v6244_v62 = vld [vmem:[#allocation2 + $0x162] sm:$0xff] }
 0x21b   : > { %2292 = vst.msk [vmem:[#allocation3 + $0x11] sm:$0xff] %vm326_vm0, %v2259_v11  ;;  %v2111_v55 = vadd.f32 %v8042_v59, %v2110_v48  ;;  %1757 = vrot.lane.b32.xlu0 %v11842_v25, %s6360_s18 }
 0x21c   : > { %v2262_v9 = vmax.f32 %v2116_v37, 0.0  ;;  %v8064_v28 = vpop.permute.xlu1 %1479  ;;  %v11844_v37 = vld [vmem:[#allocation33_spill] sm:$0xff] }
 0x21d   : > { %11843 = vst [vmem:[#allocation36_spill] sm:$0xff] %v8064_v28  ;;  %v2261_v5 = vmax.f32 %v2111_v55, 0.0  ;;  %v8066_v10 = vpop.permute.xlu0 %1501  ;;  %v6016_v21 = vpop.f32.mrb[4].mxu0 }
 0x21e   : > { %2295 = vst.msk [vmem:[#allocation3 + $0x41] sm:$0xff] %vm326_vm0, %v2262_v9  ;;  %v2126_v63 = vadd.f32 %v6016_v21, %v8042_v59  ;;  %1755 = vrot.lane.b32.xlu1 %v6244_v62, %s6360_s18  ;;  %v2120_v11 = vpop.f32.mrb[5].mxu0  ;;  %v6245_v62 = vld [vmem:[#allocation2 + $0x182] sm:$0xff] }
 0x21f   : > { %2294 = vst.msk [vmem:[#allocation3 + $0x31] sm:$0xff] %vm326_vm0, %v2261_v5  ;;  %v2121_v48 = vadd.f32 %v8042_v59, %v2120_v11  ;;  %1761 = vrot.lane.b32.xlu0 %v11844_v37, %s6360_s18  ;;  %v6246_v37 = vld [vmem:[#allocation2 + $0x1b2] sm:$0xff] }
 0x220   : > { %v2264_v25 = vmax.f32 %v2126_v63, 0.0  ;;  %v8075_v55 = vpop.permute.xlu1 %1499 }
 0x221   : > { %v2263_v28 = vmax.f32 %v2121_v48, 0.0  ;;  %v8077_v20 = vpop.permute.xlu0 %1505  ;;  %v6019_v9 = vpop.f32.mrb[6].mxu0 }
 0x222   : > { %2297 = vst.msk [vmem:[#allocation3 + $0x61] sm:$0xff] %vm326_vm0, %v2264_v25  ;;  %v2136_v21 = vadd.f32 %v6019_v9, %v8042_v59  ;;  %1759 = vrot.lane.b32.xlu1 %v6245_v62, %s6360_s18  ;;  %v2130_v5 = vpop.f32.mrb[7].mxu0  ;;  %v6247_v25 = vld [vmem:[#allocation2 + $0x1a2] sm:$0xff] }
 0x223   : > { %2296 = vst.msk [vmem:[#allocation3 + $0x51] sm:$0xff] %vm326_vm0, %v2263_v28  ;;  %v2131_v11 = vadd.f32 %v8042_v59, %v2130_v5  ;;  %1765 = vrot.lane.b32.xlu0 %v6246_v37, %s6360_s18 }
 0x224   : > { %v2266_v63 = vmax.f32 %v2136_v21, 0.0  ;;  %v8085_v48 = vpop.permute.xlu1 %1503  ;;  %v11845_v21 = vld [vmem:[#allocation34_spill] sm:$0xff] }
 0x225   : > { %v2265_v41 = vmax.f32 %v2131_v11, 0.0  ;;  %v8087_v52 = vpop.permute.xlu0 %1509  ;;  %v6248_v11 = vld [vmem:[#allocation2 + $0xb0] sm:$0xff] }
 0x226   : > { %2299 = vst.msk [vmem:[#allocation3 + $0x81] sm:$0xff] %vm326_vm0, %v2266_v63  ;;  %1763 = vrot.lane.b32.xlu1 %v6247_v25, %s6360_s18  ;;  %v1585_v37 = vsel %vm326_vm0, %v6248_v11, %v7883_v8  ;;  %v6251_v11 = vld [vmem:[#allocation2 + $0xf0] sm:$0xff] }
 0x227   : > { %2298 = vst.msk [vmem:[#allocation3 + $0x71] sm:$0xff] %vm326_vm0, %v2265_v41  ;;  %1777 = vrot.lane.b32.xlu0 %v7709_v24, %s6361_s19 }
 0x228   : > { %v8094_v28 = vpop.permute.xlu1 %1507 }
 0x229   : > { %v1530_v9 = vpop.permute.xlu0 %1529 }
 0x22a   : > { %1767 = vrot.lane.b32.xlu1 %v11845_v21, %s6360_s18  ;;  %v6249_v21 = vld [vmem:[#allocation2 + $0xc0] sm:$0xff] }
 0x22b   : > { %1781 = vrot.lane.b32.xlu0 %v7724_v43, %s6361_s19  ;;  %v1593_v43 = vsel %vm976_vm6, %v1585_v37, %v7935_v26  ;;  %v6252_v37 = vld [vmem:[#allocation2 + $0xe0] sm:$0xff] }
 0x22c   : > { %v8100_v62 = vpop.permute.xlu1 %1511 }
 0x22d   : > { %v1534_v5 = vpop.permute.xlu0 %1533 }
 0x22e   : > { %1779 = vrot.lane.b32.xlu1 %v7744_v18, %s6361_s19 }
 0x22f   : > { %1785 = vrot.lane.b32.xlu0 %v7752_v14, %s6361_s19  ;;  %v1601_v14 = vsel %vm985_vm7, %v1593_v43, %v7961_v19 }
 0x230   : > { %v1532_v41 = vpop.permute.xlu1 %1531 }
 0x231   : > { %v8106_v24 = vpop.permute.xlu0 %1537 }
 0x232   : > { %1783 = vrot.lane.b32.xlu1 %v7797_v22, %s6361_s19  ;;  %v1609_v22 = vsel %vm994_vm8, %v1601_v14, %v7992_v40  ;;  %v1586_v40 = vsel %vm326_vm0, %v6249_v21, %v7912_v13  ;;  %v6253_v14 = vld [vmem:[#allocation2 + $0x110] sm:$0xff] }
 0x233   : > { %1789 = vrot.lane.b32.xlu0 %v7806_v35, %s6361_s19  ;;  %v1617_v8 = vsel %vm1003_vm9, %v1609_v22, %v8023_v7  ;;  %v6250_v7 = vld [vmem:[#allocation2 + $0xd0] sm:$0xff]  ;;  %v6254_v22 = vld [vmem:[#allocation2 + $0x100] sm:$0xff] }
 0x234   : > { %v8116_v18 = vpop.permute.xlu1 %1535  ;;  %v1625_v35 = vsel %vm1012_vm10, %v1617_v8, %v8055_v47  ;;  %v1594_v47 = vsel %vm976_vm6, %v1586_v40, %v7946_v33  ;;  %v1588_v33 = vsel %vm326_vm0, %v6252_v37, %v7924_v30  ;;  %v1590_v8 = vsel %vm326_vm0, %v6254_v22, %v7933_v38  ;;  %v11846_v40 = vld [vmem:[#allocation29_spill] sm:$0xff]  ;;  %v11853_v22 = vld [vmem:[#allocation36_spill] sm:$0xff] }
 0x235   : > { %v8120_v63 = vpop.permute.xlu0 %1541  ;;  %v1633_v19 = vsel %vm1021_vm5, %v1625_v35, %v1530_v9 }
 0x236   : > { %1787 = vrot.lane.b32.xlu1 %v7832_v16, %s6361_s19 }
 0x237   : > { %1801 = vrot.lane.b32.xlu0 %v7842_v29, %s6362_s24  ;;  %v1587_v29 = vsel %vm326_vm0, %v6250_v7, %v7903_v6  ;;  %v1589_v6 = vsel %vm326_vm0, %v6251_v11, %v7916_v57 }
 0x238   : > { %v8132_v26 = vpop.permute.xlu1 %1539  ;;  %v1595_v13 = vsel %vm976_vm6, %v1587_v29, %v7942_v56  ;;  %v11848_v29 = vld [vmem:[#allocation38_spill] sm:$0xff] }
 0x239   : > { %v1562_v25 = vpop.permute.xlu0 %1561 }
 0x23a   : > { %1791 = vrot.lane.b32.xlu1 %v7868_v53, %s6361_s19  ;;  %v1641_v16 = vsel %vm1030_vm11, %v1633_v19, %v1562_v25  ;;  %v1602_v53 = vsel %vm985_vm7, %v1594_v47, %v7974_v39  ;;  %v1591_v39 = vsel %vm326_vm0, %v6253_v14, %v7926_v12  ;;  %v1596_v12 = vsel %vm976_vm6, %v1588_v33, %v7952_v3  ;;  %v1649_v25 = vld [vmem:[#allocation2 + $0x22] sm:$0xff] }
 0x23b   : > { %1805 = vrot.lane.b32.xlu0 %v7876_v61, %s6362_s24  ;;  %6032 = vmatprep.mubr.msk.f32.mxu1 %vm1933_vm12, %v1641_v16  ;;  %v1603_v61 = vsel %vm985_vm7, %v1595_v13, %v7968_v0  ;;  %v1610_v43 = vsel %vm994_vm8, %v1602_v53, %v8006_v45  ;;  %v6255_v0 = vld [vmem:[#allocation2 + $0x120] sm:$0xff] }
 0x23c   : > { %v8151_v9 = vpop.permute.xlu1 %1543  ;;  %v1611_v57 = vsel %vm994_vm8, %v1603_v61, %v8000_v1  ;;  %v1618_v30 = vsel %vm1003_vm9, %v1610_v43, %v8033_v15  ;;  %v1592_v45 = vsel %vm326_vm0, %v6255_v0, %v7940_v2  ;;  %v1597_v1 = vsel %vm976_vm6, %v1589_v6, %v7948_v32  ;;  %v11847_v16 = vld [vmem:[#allocation28_spill] sm:$0xff]  ;;  %v11852_v43 = vld [vmem:[#allocation41_spill] sm:$0xff] }
 0x23d   : > { %v1566_v56 = vpop.permute.xlu0 %1565  ;;  %v1619_v35 = vsel %vm1003_vm9, %v1611_v57, %v8029_v46  ;;  %v1626_v38 = vsel %vm1012_vm10, %v1618_v30, %v8075_v55  ;;  %v1605_v46 = vsel %vm985_vm7, %v1597_v1, %v7976_v23  ;;  %v1598_v23 = vsel %vm976_vm6, %v1590_v8, %v7959_v31  ;;  %v11851_v53 = vld [vmem:[#allocation8_spill] sm:$0xff]  ;;  %v11854_v57 = vld [vmem:[#allocation37_spill] sm:$0xff] }
 0x23e   : > { %1803 = vrot.lane.b32.xlu1 %v7896_v58, %s6362_s24  ;;  %v1604_v58 = vsel %vm985_vm7, %v1596_v12, %v7982_v54  ;;  %v1627_v2 = vsel %vm1012_vm10, %v1619_v35, %v8066_v10  ;;  %v1634_v3 = vsel %vm1021_vm5, %v1626_v38, %v1532_v41  ;;  %v1613_v54 = vsel %vm994_vm8, %v1605_v46, %v8008_v34  ;;  %v1651_v61 = vld [vmem:[#allocation2 + $0x42] sm:$0xff] }
 0x23f   : > { %1809 = vrot.lane.b32.xlu0 %v7900_v17, %s6362_s24  ;;  %v1612_v55 = vsel %vm994_vm8, %v1604_v58, %v8014_v27  ;;  %v1635_v17 = vsel %vm1021_vm5, %v1627_v2, %v1534_v5  ;;  %v1621_v27 = vsel %vm1003_vm9, %v1613_v54, %v8035_v4  ;;  %v1599_v34 = vsel %vm976_vm6, %v1591_v39, %v7954_v44  ;;  %v1655_v1 = vld [vmem:[#allocation2 + $0x82] sm:$0xff] }
 0x240   : > { %v1564_v15 = vpop.permute.xlu1 %1563  ;;  %v1620_v10 = vsel %vm1003_vm9, %v1612_v55, %v8044_v42  ;;  %v1643_v41 = vsel %vm1030_vm11, %v1635_v17, %v1566_v56  ;;  %v1629_v31 = vsel %vm1012_vm10, %v1621_v27, %v8077_v20 }
 0x241   : > { %v1642_v19 = vsel %vm1030_vm11, %v1634_v3, %v1564_v15  ;;  %v1570_v32 = vpop.permute.xlu0 %1569  ;;  %v1628_v5 = vsel %vm1012_vm10, %v1620_v10, %v8085_v48  ;;  %v1607_v48 = vsel %vm985_vm7, %v1599_v34, %v7984_v49  ;;  %v1637_v44 = vsel %vm1021_vm5, %v1629_v31, %v8106_v24  ;;  %v11849_v49 = vld [vmem:[#allocation42_spill] sm:$0xff]  ;;  %v11850_v24 = vld [vmem:[#allocation52_spill] sm:$0xff] }
 0x242   : > { %1807 = vrot.lane.b32.xlu1 %v7910_v36, %s6362_s24  ;;  %6033 = vmatmul.mubr.msk.f32.vlgmr.msra.gmra.mrb[0].mxu1 %vm1933_vm12, %v1642_v19  ;;  %v1606_v36 = vsel %vm985_vm7, %v1598_v23, %v7990_v60  ;;  %v1636_v4 = vsel %vm1021_vm5, %v1628_v5, %v8116_v18  ;;  %v1615_v20 = vsel %vm994_vm8, %v1607_v48, %v11846_v40  ;;  %v1656_v15 = vld [vmem:[#allocation2 + $0x92] sm:$0xff] }
 0x243   : > { %1813 = vrot.lane.b32.xlu0 %v7914_v50, %s6362_s24  ;;  %6035 = vmatprep.mubr.msk.f32.mxu1 %vm1933_vm12, %v1643_v41  ;;  %v1614_v50 = vsel %vm994_vm8, %v1606_v36, %v8021_v51  ;;  %v1645_v7 = vsel %vm1030_vm11, %v1637_v44, %v1570_v32  ;;  %v1600_v51 = vsel %vm976_vm6, %v1592_v45, %v11849_v49  ;;  %v1653_v45 = vld [vmem:[#allocation2 + $0x62] sm:$0xff] }
 0x244   : > { %v1568_v42 = vpop.permute.xlu1 %1567  ;;  %v1622_v18 = vsel %vm1003_vm9, %v1614_v50, %v11847_v16  ;;  %v1623_v47 = vsel %vm1003_vm9, %v1615_v20, %v11850_v24  ;;  %v1608_v11 = vsel %vm985_vm7, %v1600_v51, %v11851_v53 }
 0x245   : > { %v1644_v21 = vsel %vm1030_vm11, %v1636_v4, %v1568_v42  ;;  %v1574_v60 = vpop.permute.xlu0 %1573  ;;  %v1630_v13 = vsel %vm1012_vm10, %v1622_v18, %v8094_v28  ;;  %v1631_v6 = vsel %vm1012_vm10, %v1623_v47, %v8087_v52  ;;  %v1616_v56 = vsel %vm994_vm8, %v1608_v11, %v11852_v43 }
 0x246   : > { %1811 = vrot.lane.b32.xlu1 %v11848_v29, %s6362_s24  ;;  %6036 = vmatmul.mubr.msk.f32.gmra.mrb[2].mxu1 %vm1933_vm12, %v1644_v21  ;;  %v1638_v37 = vsel %vm1021_vm5, %v1630_v13, %v8132_v26  ;;  %v1639_v28 = vsel %vm1021_vm5, %v1631_v6, %v8120_v63  ;;  %v1624_v8 = vsel %vm1003_vm9, %v1616_v56, %v11853_v22  ;;  %v1650_v63 = vld [vmem:[#allocation2 + $0x32] sm:$0xff] }
 0x247   : > { %1833 = vrot.lane.b32.xlu0 %v1649_v25, %s6363_s11  ;;  %6038 = vmatprep.mubr.msk.f32.mxu1 %vm1933_vm12, %v1645_v7  ;;  %v1647_v52 = vsel %vm1030_vm11, %v1639_v28, %v1574_v60  ;;  %v1632_v26 = vsel %vm1012_vm10, %v1624_v8, %v8100_v62  ;;  %v1652_v62 = vld [vmem:[#allocation2 + $0x52] sm:$0xff] }
 0x248   : > { %v1572_v33 = vpop.permute.xlu1 %1571  ;;  %v1640_v30 = vsel %vm1021_vm5, %v1632_v26, %v8151_v9  ;;  %v1654_v9 = vld [vmem:[#allocation2 + $0x72] sm:$0xff] }
 0x249   : > { %v1646_v14 = vsel %vm1030_vm11, %v1638_v37, %v1572_v33  ;;  %v8253_v39 = vpop.permute.xlu0 %1657 }
 0x24a   : > { %1815 = vrot.lane.b32.xlu1 %v11854_v57, %s6362_s24  ;;  %6039 = vmatmul.mubr.msk.f32.gmra.mrb[4].mxu1 %vm1933_vm12, %v1646_v14 }
 0x24b   : > { %1837 = vrot.lane.b32.xlu0 %v1651_v61, %s6363_s11  ;;  %6041 = vmatprep.mubr.msk.f32.mxu1 %vm1933_vm12, %v1647_v52 }
 0x24c   : > { %v1576_v0 = vpop.permute.xlu1 %1575 }
 0x24d   : > { %v1648_v12 = vsel %vm1030_vm11, %v1640_v30, %v1576_v0  ;;  %v8268_v35 = vpop.permute.xlu0 %1661 }
 0x24e   : > { %1835 = vrot.lane.b32.xlu1 %v1650_v63, %s6363_s11  ;;  %6042 = vmatmul.mubr.msk.f32.gmra.mrb[6].mxu1 %vm1933_vm12, %v1648_v12 }
 0x24f   : > { %1841 = vrot.lane.b32.xlu0 %v1653_v45, %s6363_s11  ;;  %v2337_v45 = vld [vmem:[#allocation3 + $0x141] sm:$0xff] }
 0x250   : > { %v8273_v38 = vpop.permute.xlu1 %1659 }
 0x251   : > { %v8275_v58 = vpop.permute.xlu0 %1665 }
 0x252   : > { %1839 = vrot.lane.b32.xlu1 %v1652_v62, %s6363_s11 }
 0x253   : > { %1845 = vrot.lane.b32.xlu0 %v1655_v1, %s6363_s11 }
 0x254   : > { %v8279_v2 = vpop.permute.xlu1 %1663 }
 0x255   : > { %v8281_v3 = vpop.permute.xlu0 %1669 }
 0x256   : > { %1843 = vrot.lane.b32.xlu1 %v1654_v9, %s6363_s11 }
 0x257   : > { %2409 = vrot.lane.b32.xlu0 %v2337_v45, %s6356_s14 }
 0x258   : > { %v8284_v46 = vpop.permute.xlu1 %1667 }
 0x259   : > { %v8286_v55 = vpop.permute.xlu0 %1681 }
 0x25a   : > { %1847 = vrot.lane.b32.xlu1 %v1656_v15, %s6363_s11 }
 0x25c   : > { %v8289_v17 = vpop.permute.xlu1 %1671 }
 0x25d   : > { %v8291_v19 = vpop.permute.xlu0 %1685 }
 0x260   : > { %v8293_v32 = vpop.permute.xlu1 %1683 }
 0x261   : > { %v8295_v54 = vpop.permute.xlu0 %1689 }
 0x264   : > { %v8297_v10 = vpop.permute.xlu1 %1687 }
 0x265   : > { %v8299_v41 = vpop.permute.xlu0 %1693 }
 0x268   : > { %v8301_v23 = vpop.permute.xlu1 %1691 }
 0x269   : > { %v8303_v27 = vpop.permute.xlu0 %1705 }
 0x26c   : > { %v8305_v5 = vpop.permute.xlu1 %1695 }
 0x26d   : > { %v8307_v34 = vpop.permute.xlu0 %1709 }
 0x270   : > { %v8309_v36 = vpop.permute.xlu1 %1707 }
 0x271   : > { %v8311_v31 = vpop.permute.xlu0 %1713 }
 0x274   : > { %v8313_v4 = vpop.permute.xlu1 %1711 }
 0x275   : > { %v8315_v42 = vpop.permute.xlu0 %1717 }
 0x278   : > { %v8317_v25 = vpop.permute.xlu1 %1715 }
 0x279   : > { %v8319_v48 = vpop.permute.xlu0 %1729 }
 0x27c   : > { %v8321_v50 = vpop.permute.xlu1 %1719 }
 0x27d   : > { %v8323_v44 = vpop.permute.xlu0 %1733 }
 0x280   : > { %v8325_v21 = vpop.permute.xlu1 %1731 }
 0x281   : > { %v8327_v60 = vpop.permute.xlu0 %1737 }
 0x284   : > { %v8329_v40 = vpop.permute.xlu1 %1735 }
 0x285   : > { %v8331_v20 = vpop.permute.xlu0 %1741 }
 0x288   : > { %v8333_v16 = vpop.permute.xlu1 %1739 }
 0x289   : > { %v8335_v18 = vpop.permute.xlu0 %1753 }
 0x28c   : > { %v8337_v7 = vpop.permute.xlu1 %1743 }
 0x28d   : > { %v8339_v29 = vpop.permute.xlu0 %1757 }
 0x290   : > { %v8341_v49 = vpop.permute.xlu1 %1755 }
 0x291   : > { %v8343_v51 = vpop.permute.xlu0 %1761 }
 0x294   : > { %v8345_v24 = vpop.permute.xlu1 %1759 }
 0x295   : > { %v8347_v47 = vpop.permute.xlu0 %1765  ;;  %v6022_v13 = vpop.f32.mrb[8].mxu0 }
 0x296   : > { %v2146_v53 = vadd.f32 %v6022_v13, %v8042_v59  ;;  %v2140_v11 = vpop.f32.mrb[9].mxu0 }
 0x297   : > { %v2141_v6 = vadd.f32 %v8042_v59, %v2140_v11 }
 0x298   : > { %v2268_v37 = vmax.f32 %v2146_v53, 0.0  ;;  %v8351_v33 = vpop.permute.xlu1 %1763 }
 0x299   : > { %v2267_v61 = vmax.f32 %v2141_v6, 0.0  ;;  %v1778_v43 = vpop.permute.xlu0 %1777  ;;  %v6025_v56 = vpop.f32.mrb[10].mxu0 }
 0x29a   : > { %2302 = vst.msk [vmem:[#allocation3 + $0xc1] sm:$0xff] %vm326_vm0, %v2268_v37  ;;  %v2156_v28 = vadd.f32 %v6025_v56, %v8042_v59  ;;  %v2150_v14 = vpop.f32.mrb[11].mxu0 }
 0x29b   : > { %2301 = vst.msk [vmem:[#allocation3 + $0xb1] sm:$0xff] %vm326_vm0, %v2267_v61  ;;  %v2151_v22 = vadd.f32 %v8042_v59, %v2150_v14 }
 0x29c   : > { %v2270_v8 = vmax.f32 %v2156_v28, 0.0  ;;  %v8357_v52 = vpop.permute.xlu1 %1767 }
 0x29d   : > { %v2269_v57 = vmax.f32 %v2151_v22, 0.0  ;;  %v8359_v26 = vpop.permute.xlu0 %1781  ;;  %v6028_v63 = vpop.f32.mrb[12].mxu0 }
 0x29e   : > { %2304 = vst.msk [vmem:[#allocation3 + $0xe1] sm:$0xff] %vm326_vm0, %v2270_v8  ;;  %v2166_v30 = vadd.f32 %v6028_v63, %v8042_v59  ;;  %v2160_v0 = vpop.f32.mrb[13].mxu0 }
 0x29f   : > { %2303 = vst.msk [vmem:[#allocation3 + $0xd1] sm:$0xff] %vm326_vm0, %v2269_v57  ;;  %v2161_v12 = vadd.f32 %v8042_v59, %v2160_v0  ;;  %v6256_v0 = vld [vmem:[#allocation2 + $0x11] sm:$0xff] }
 0x2a0   : > { %v2272_v62 = vmax.f32 %v2166_v30, 0.0  ;;  %v1780_v1 = vpop.permute.xlu1 %1779  ;;  %v1857_v45 = vsel %vm326_vm0, %v6256_v0, %v8253_v39 }
 0x2a1   : > { %v2271_v9 = vmax.f32 %v2161_v12, 0.0  ;;  %v8366_v15 = vpop.permute.xlu0 %1785  ;;  %v6031_v13 = vpop.f32.mrb[14].mxu0  ;;  %v1865_v12 = vsel %vm976_vm6, %v1857_v45, %v8286_v55  ;;  %v6257_v55 = vld [vmem:[#allocation2 + $0x21] sm:$0xff]  ;;  %v6258_v45 = vld [vmem:[#allocation2 + $0x31] sm:$0xff] }
 0x2a2   : > { %2306 = vst.msk [vmem:[#allocation3 + $0x101] sm:$0xff] %vm326_vm0, %v2272_v62  ;;  %v2176_v53 = vadd.f32 %v6031_v13, %v8042_v59  ;;  %v2170_v11 = vpop.f32.mrb[15].mxu0  ;;  %v1858_v0 = vsel %vm326_vm0, %v6257_v55, %v8273_v38 }
 0x2a3   : > { %2305 = vst.msk [vmem:[#allocation3 + $0xf1] sm:$0xff] %vm326_vm0, %v2271_v9  ;;  %v2171_v6 = vadd.f32 %v8042_v59, %v2170_v11  ;;  %v1873_v9 = vsel %vm985_vm7, %v1865_v12, %v8303_v27 }
 0x2a4   : > { %v2274_v37 = vmax.f32 %v2176_v53, 0.0  ;;  %v8372_v61 = vpop.permute.xlu1 %1783  ;;  %v1881_v53 = vsel %vm994_vm8, %v1873_v9, %v8319_v48  ;;  %v1859_v48 = vsel %vm326_vm0, %v6258_v45, %v8268_v35 }
 0x2a5   : > { %v2273_v56 = vmax.f32 %v2171_v6, 0.0  ;;  %v8374_v28 = vpop.permute.xlu0 %1789  ;;  %v1889_v11 = vsel %vm1003_vm9, %v1881_v53, %v8335_v18  ;;  %v1866_v18 = vsel %vm976_vm6, %v1858_v0, %v8293_v32  ;;  %v6259_v53 = vld [vmem:[#allocation2 + $0x41] sm:$0xff] }
 0x2a6   : > { %2308 = vst.msk [vmem:[#allocation3 + $0x121] sm:$0xff] %vm326_vm0, %v2274_v37  ;;  %v1897_v6 = vsel %vm1012_vm10, %v1889_v11, %v1778_v43  ;;  %v1867_v43 = vsel %vm976_vm6, %v1859_v48, %v8291_v19  ;;  %v1860_v32 = vsel %vm326_vm0, %v6259_v53, %v8279_v2  ;;  %v6261_v0 = vld [vmem:[#allocation2 + $0x61] sm:$0xff] }
 0x2a7   : > { %2307 = vst.msk [vmem:[#allocation3 + $0x111] sm:$0xff] %vm326_vm0, %v2273_v56  ;;  %v1875_v38 = vsel %vm985_vm7, %v1867_v43, %v8307_v34  ;;  %v1868_v34 = vsel %vm976_vm6, %v1860_v32, %v8297_v10  ;;  %v6263_v43 = vld [vmem:[#allocation2 + $0x81] sm:$0xff] }
 0x2a8   : > { %v8378_v14 = vpop.permute.xlu1 %1787  ;;  %v1883_v11 = vsel %vm994_vm8, %v1875_v38, %v8323_v44  ;;  %v1876_v44 = vsel %vm985_vm7, %v1868_v34, %v8313_v4  ;;  %v1862_v4 = vsel %vm326_vm0, %v6261_v0, %v8284_v46 }
 0x2a9   : > { %v1802_v22 = vpop.permute.xlu0 %1801 }
 0x2aa   : > { %v1905_v39 = vsel %vm1021_vm5, %v1897_v6, %v1802_v22  ;;  %v1874_v22 = vsel %vm985_vm7, %v1866_v18, %v8309_v36  ;;  %v6260_v36 = vld [vmem:[#allocation2 + $0x51] sm:$0xff] }
 0x2ab   : > { %v1882_v9 = vsel %vm994_vm8, %v1874_v22, %v8325_v21  ;;  %v1861_v6 = vsel %vm326_vm0, %v6260_v36, %v8275_v58  ;;  %v1891_v21 = vsel %vm1003_vm9, %v1883_v11, %v8339_v29  ;;  %v1884_v29 = vsel %vm994_vm8, %v1876_v44, %v8329_v40  ;;  %v6262_v40 = vld [vmem:[#allocation2 + $0x71] sm:$0xff] }
 0x2ac   : > { %v8380_v8 = vpop.permute.xlu1 %1791  ;;  %v1890_v19 = vsel %vm1003_vm9, %v1882_v9, %v8341_v49  ;;  %v1869_v2 = vsel %vm976_vm6, %v1861_v6, %v8295_v54  ;;  %v1899_v49 = vsel %vm1012_vm10, %v1891_v21, %v8359_v26 }
 0x2ad   : > { %v1806_v57 = vpop.permute.xlu0 %1805  ;;  %v1877_v10 = vsel %vm985_vm7, %v1869_v2, %v8311_v31 }
 0x2ae   : > { %v1885_v26 = vsel %vm994_vm8, %v1877_v10, %v8327_v60 }
 0x2af   : > { %v1893_v46 = vsel %vm1003_vm9, %v1885_v26, %v8343_v51 }
 0x2b0   : > { %v1804_v63 = vpop.permute.xlu1 %1803 }
 0x2b1   : > { %v8382_v30 = vpop.permute.xlu0 %1809 }
 0x2b4   : > { %v1808_v62 = vpop.permute.xlu1 %1807 }
 0x2b5   : > { %v8390_v13 = vpop.permute.xlu0 %1813 }
 0x2b8   : > { %v8397_v37 = vpop.permute.xlu1 %1811 }
 0x2b9   : > { %v1834_v56 = vpop.permute.xlu0 %1833 }
 0x2ba   : > { %v1913_v27 = vsel %vm1030_vm11, %v1905_v39, %v1834_v56  ;;  %v1898_v39 = vsel %vm1012_vm10, %v1890_v19, %v1780_v1  ;;  %v1907_v1 = vsel %vm1021_vm5, %v1899_v49, %v1806_v57  ;;  %v1863_v57 = vsel %vm326_vm0, %v6262_v40, %v8281_v3 }
 0x2bb   : > { %6044 = vmatprep.mubr.msk.f32.mxu1 %vm1933_vm12, %v1913_v27  ;;  %v1906_v56 = vsel %vm1021_vm5, %v1898_v39, %v1804_v63  ;;  %v1892_v63 = vsel %vm1003_vm9, %v1884_v29, %v8345_v24  ;;  %v1870_v27 = vsel %vm976_vm6, %v1862_v4, %v8301_v23  ;;  %v1871_v24 = vsel %vm976_vm6, %v1863_v57, %v8299_v41 }
 0x2bc   : > { %v8412_v12 = vpop.permute.xlu1 %1815  ;;  %v1900_v60 = vsel %vm1012_vm10, %v1892_v63, %v8372_v61  ;;  %v1878_v45 = vsel %vm985_vm7, %v1870_v27, %v8317_v25  ;;  %v1901_v3 = vsel %vm1012_vm10, %v1893_v46, %v8366_v15  ;;  %v1879_v51 = vsel %vm985_vm7, %v1871_v24, %v8315_v42  ;;  %v8552_v46 = vld [vmem:[#allocation3 + $0x1e1] sm:$0xff] }
 0x2bd   : > { %v1838_v35 = vpop.permute.xlu0 %1837  ;;  %v1908_v48 = vsel %vm1021_vm5, %v1900_v60, %v1808_v62  ;;  %v1886_v61 = vsel %vm994_vm8, %v1878_v45, %v8333_v16  ;;  %v1909_v18 = vsel %vm1021_vm5, %v1901_v3, %v8382_v30  ;;  %v1864_v25 = vsel %vm326_vm0, %v6263_v43, %v8289_v17 }
 0x2be   : > { %v1915_v31 = vsel %vm1030_vm11, %v1907_v1, %v1838_v35  ;;  %v1887_v15 = vsel %vm994_vm8, %v1879_v51, %v8331_v20  ;;  %v1894_v62 = vsel %vm1003_vm9, %v1886_v61, %v8351_v33  ;;  %v1872_v16 = vsel %vm976_vm6, %v1864_v25, %v8305_v5 }
 0x2bf   : > { %v1895_v30 = vsel %vm1003_vm9, %v1887_v15, %v8347_v47  ;;  %v1902_v22 = vsel %vm1012_vm10, %v1894_v62, %v8378_v14  ;;  %v1880_v20 = vsel %vm985_vm7, %v1872_v16, %v8321_v50 }
 0x2c0   : > { %v1836_v58 = vpop.permute.xlu1 %1835  ;;  %v1903_v33 = vsel %vm1012_vm10, %v1895_v30, %v8374_v28  ;;  %v1910_v38 = vsel %vm1021_vm5, %v1902_v22, %v8397_v37  ;;  %v1888_v5 = vsel %vm994_vm8, %v1880_v20, %v8337_v7 }
 0x2c1   : > { %v1914_v55 = vsel %vm1030_vm11, %v1906_v56, %v1836_v58  ;;  %v1842_v54 = vpop.permute.xlu0 %1841  ;;  %v1911_v47 = vsel %vm1021_vm5, %v1903_v33, %v8390_v13  ;;  %v1896_v35 = vsel %vm1003_vm9, %v1888_v5, %v8357_v52 }
 0x2c2   : > { %6045 = vmatmul.mubr.msk.f32.gmra.mrb[8].mxu1 %vm1933_vm12, %v1914_v55  ;;  %v1917_v42 = vsel %vm1030_vm11, %v1909_v18, %v1842_v54  ;;  %v1904_v28 = vsel %vm1012_vm10, %v1896_v35, %v8380_v8 }
 0x2c3   : > { %6047 = vmatprep.mubr.msk.f32.mxu1 %vm1933_vm12, %v1915_v31  ;;  %v1912_v7 = vsel %vm1021_vm5, %v1904_v28, %v8412_v12 }
 0x2c4   : > { %v1840_v23 = vpop.permute.xlu1 %1839 }
 0x2c5   : > { %v1916_v41 = vsel %vm1030_vm11, %v1908_v48, %v1840_v23  ;;  %v1846_v17 = vpop.permute.xlu0 %1845 }
 0x2c6   : > { %6048 = vmatmul.mubr.msk.f32.gmra.mrb[10].mxu1 %vm1933_vm12, %v1916_v41  ;;  %v1919_v50 = vsel %vm1030_vm11, %v1911_v47, %v1846_v17 }
 0x2c7   : > { %6050 = vmatprep.mubr.msk.f32.mxu1 %vm1933_vm12, %v1917_v42 }
 0x2c8   : > { %v1844_v9 = vpop.permute.xlu1 %1843 }
 0x2c9   : > { %v1918_v14 = vsel %vm1030_vm11, %v1910_v38, %v1844_v9 }
 0x2ca   : > { %6051 = vmatmul.mubr.msk.f32.gmra.mrb[12].mxu1 %vm1933_vm12, %v1918_v14 }
 0x2cb   : > { %6053 = vmatprep.mubr.msk.f32.mxu1 %vm1933_vm12, %v1919_v50 }
 0x2cc   : > { %v1848_v37 = vpop.permute.xlu1 %1847 }
 0x2cd   : > { %v1920_v13 = vsel %vm1030_vm11, %v1912_v7, %v1848_v37  ;;  %v2353_v37 = vld [vmem:[#allocation3 + $0xb0] sm:$0xff] }
 0x2ce   : > { %6054 = vmatmul.mubr.msk.f32.gmra.mrb[14].mxu1 %vm1933_vm12, %v1920_v13 }
 0x315   : > { %v6034_v53 = vpop.f32.mrb[0].mxu1 }
 0x316   : > { %v2186_v52 = vadd.f32 %v6034_v53, %v8042_v59  ;;  %v2180_v32 = vpop.f32.mrb[1].mxu1  ;;  %v8605_v53 = vld [vmem:[#allocation3 + $0xd0] sm:$0xff] }
 0x317   : > { %v2181_v11 = vadd.f32 %v8042_v59, %v2180_v32  ;;  %11862 = vst [vmem:[#allocation32_spill] sm:$0xff] %v8605_v53  ;;  %v8613_v32 = vld [vmem:[#allocation3 + $0xf0] sm:$0xff] }
 0x318   : > { %v2276_v19 = vmax.f32 %v2186_v52, 0.0  ;;  %v8609_v52 = vld [vmem:[#allocation3 + $0xc0] sm:$0xff]  ;;  %11864 = vst [vmem:[#allocation10_spill] sm:$0xff] %v8613_v32 }
 0x319   : > { %v2275_v36 = vmax.f32 %v2181_v11, 0.0  ;;  %v6037_v6 = vpop.f32.mrb[2].mxu1  ;;  %11863 = vst [vmem:[#allocation9_spill] sm:$0xff] %v8609_v52  ;;  %v8617_v11 = vld [vmem:[#allocation3 + $0xe0] sm:$0xff] }
 0x31a   : > { %2311 = vst.msk [vmem:[#allocation3 + $0x161] sm:$0xff] %vm326_vm0, %v2276_v19  ;;  %v2196_v8 = vadd.f32 %v6037_v6, %v8042_v59  ;;  %v2190_v34 = vpop.f32.mrb[3].mxu1  ;;  %11865 = vst [vmem:[#allocation11_spill] sm:$0xff] %v8617_v11  ;;  %v8621_v19 = vld [vmem:[#allocation3 + $0x110] sm:$0xff] }
 0x31b   : > { %2310 = vst.msk [vmem:[#allocation3 + $0x151] sm:$0xff] %vm326_vm0, %v2275_v36  ;;  %v2191_v12 = vadd.f32 %v8042_v59, %v2190_v34  ;;  %11866 = vst [vmem:[#allocation12_spill] sm:$0xff] %v8621_v19  ;;  %v8625_v36 = vld [vmem:[#allocation3 + $0x100] sm:$0xff]  ;;  %v8629_v6 = vld [vmem:[#allocation3 + $0x11] sm:$0xff] }
 0x31c   : > { %v2278_v21 = vmax.f32 %v2196_v8, 0.0  ;;  %11867 = vst [vmem:[#allocation13_spill] sm:$0xff] %v8625_v36  ;;  %11868 = vst [vmem:[#allocation14_spill] sm:$0xff] %v8629_v6  ;;  %v8633_v8 = vld [vmem:[#allocation3 + $0x120] sm:$0xff]  ;;  %v8637_v34 = vld [vmem:[#allocation3 + $0x31] sm:$0xff] }
 0x31d   : > { %v2277_v39 = vmax.f32 %v2191_v12, 0.0  ;;  %v6040_v2 = vpop.f32.mrb[4].mxu1  ;;  %11869 = vst [vmem:[#allocation15_spill] sm:$0xff] %v8633_v8  ;;  %11870 = vst [vmem:[#allocation16_spill] sm:$0xff] %v8637_v34  ;;  %v8641_v12 = vld [vmem:[#allocation3 + $0x21] sm:$0xff] }
 0x31e   : > { %2313 = vst.msk [vmem:[#allocation3 + $0x181] sm:$0xff] %vm326_vm0, %v2278_v21  ;;  %v2206_v44 = vadd.f32 %v6040_v2, %v8042_v59  ;;  %v2200_v49 = vpop.f32.mrb[5].mxu1  ;;  %11871 = vst [vmem:[#allocation17_spill] sm:$0xff] %v8641_v12  ;;  %v8645_v21 = vld [vmem:[#allocation3 + $0x51] sm:$0xff] }
 0x31f   : > { %2312 = vst.msk [vmem:[#allocation3 + $0x171] sm:$0xff] %vm326_vm0, %v2277_v39  ;;  %v2201_v56 = vadd.f32 %v8042_v59, %v2200_v49  ;;  %11872 = vst [vmem:[#allocation18_spill] sm:$0xff] %v8645_v21  ;;  %v8649_v39 = vld [vmem:[#allocation3 + $0x41] sm:$0xff]  ;;  %v8653_v2 = vld [vmem:[#allocation3 + $0x71] sm:$0xff] }
 0x320   : > { %v2280_v58 = vmax.f32 %v2206_v44, 0.0  ;;  %11873 = vst [vmem:[#allocation19_spill] sm:$0xff] %v8649_v39  ;;  %11874 = vst [vmem:[#allocation20_spill] sm:$0xff] %v8653_v2  ;;  %v8657_v44 = vld [vmem:[#allocation3 + $0x61] sm:$0xff]  ;;  %v8661_v49 = vld [vmem:[#allocation3 + $0xb1] sm:$0xff] }
 0x321   : > { %v2279_v10 = vmax.f32 %v2201_v56, 0.0  ;;  %v6043_v29 = vpop.f32.mrb[6].mxu1  ;;  %v8522_v1 = vld [vmem:[#allocation3 + $0x161] sm:$0xff]  ;;  %11875 = vst [vmem:[#allocation21_spill] sm:$0xff] %v8657_v44  ;;  %11876 = vst [vmem:[#allocation22_spill] sm:$0xff] %v8661_v49 }
 0x322   : > { %11855 = vst [vmem:[#allocation50_spill] sm:$0xff] %v8522_v1  ;;  %2315 = vst.msk [vmem:[#allocation3 + $0x1a1] sm:$0xff] %vm326_vm0, %v2280_v58  ;;  %v2216_v55 = vadd.f32 %v6043_v29, %v8042_v59  ;;  %2413 = vrot.lane.b32.xlu0 %v8522_v1, %s6356_s14  ;;  %v2210_v54 = vpop.f32.mrb[7].mxu1  ;;  %v8528_v0 = vld [vmem:[#allocation3 + $0x151] sm:$0xff]  ;;  %v8665_v56 = vld [vmem:[#allocation3 + $0x81] sm:$0xff] }
 0x323   : > { %11856 = vst [vmem:[#allocation39_spill] sm:$0xff] %v8528_v0  ;;  %2314 = vst.msk [vmem:[#allocation3 + $0x191] sm:$0xff] %vm326_vm0, %v2279_v10  ;;  %v2211_v4 = vadd.f32 %v8042_v59, %v2210_v54  ;;  %2411 = vrot.lane.b32.xlu1 %v8528_v0, %s6356_s14  ;;  %v8669_v58 = vld [vmem:[#allocation3 + $0xd1] sm:$0xff]  ;;  %v8673_v10 = vld [vmem:[#allocation3 + $0xc1] sm:$0xff] }
 0x324   : > { %v2282_v26 = vmax.f32 %v2216_v55, 0.0  ;;  %11877 = vst [vmem:[#allocation23_spill] sm:$0xff] %v8665_v56  ;;  %11878 = vst [vmem:[#allocation24_spill] sm:$0xff] %v8669_v58  ;;  %v8677_v29 = vld [vmem:[#allocation3 + $0xf1] sm:$0xff]  ;;  %v8681_v55 = vld [vmem:[#allocation3 + $0xe1] sm:$0xff] }
 0x325   : > { %v2281_v63 = vmax.f32 %v2211_v4, 0.0  ;;  %v8534_v31 = vld [vmem:[#allocation3 + $0x181] sm:$0xff]  ;;  %11879 = vst [vmem:[#allocation5_spill] sm:$0xff] %v8673_v10  ;;  %11880 = vst [vmem:[#allocation25_spill] sm:$0xff] %v8677_v29  ;;  %v8685_v54 = vld [vmem:[#allocation3 + $0x111] sm:$0xff] }
 0x326   : > { %11857 = vst [vmem:[#allocation45_spill] sm:$0xff] %v8534_v31  ;;  %2317 = vst.msk [vmem:[#allocation3 + $0x1c1] sm:$0xff] %vm326_vm0, %v2282_v26  ;;  %2417 = vrot.lane.b32.xlu0 %v8534_v31, %s6356_s14  ;;  %v8539_v40 = vld [vmem:[#allocation3 + $0x171] sm:$0xff]  ;;  %v8689_v4 = vld [vmem:[#allocation3 + $0x101] sm:$0xff] }
 0x327   : > { %11858 = vst [vmem:[#allocation26_spill] sm:$0xff] %v8539_v40  ;;  %2316 = vst.msk [vmem:[#allocation3 + $0x1b1] sm:$0xff] %vm326_vm0, %v2281_v63  ;;  %2415 = vrot.lane.b32.xlu1 %v8539_v40, %s6356_s14  ;;  %v8697_v63 = vld [vmem:[#allocation3 + $0x121] sm:$0xff] }
 0x328   : > { %11881 = vst [vmem:[#allocation4_spill] sm:$0xff] %v8681_v55  ;;  %11882 = vst [vmem:[#allocation6_spill] sm:$0xff] %v8685_v54 }
 0x329   : > { %v8544_v57 = vld [vmem:[#allocation3 + $0x1a1] sm:$0xff]  ;;  %11883 = vst [vmem:[#allocation7_spill] sm:$0xff] %v8689_v4  ;;  %11884 = vst [vmem:[#allocation40_spill] sm:$0xff] %v8697_v63 }
 0x32a   : > { %2421 = vrot.lane.b32.xlu0 %v8544_v57, %s6356_s14  ;;  %v8548_v27 = vld [vmem:[#allocation3 + $0x191] sm:$0xff] }
 0x32b   : > { %11859 = vst [vmem:[#allocation27_spill] sm:$0xff] %v8548_v27  ;;  %2419 = vrot.lane.b32.xlu1 %v8548_v27, %s6356_s14 }
 0x32e   : > { %v8554_v60 = vld [vmem:[#allocation3 + $0x1b1] sm:$0xff]  ;;  %2441 = vrot.lane.b32.xlu0 %v8552_v46, %s6357_s15 }
 0x32f   : > { %2423 = vrot.lane.b32.xlu1 %v8554_v60, %s6356_s14 }
 0x395   : > { %v6046_v24 = vpop.f32.mrb[8].mxu1 }
 0x396   : > { %v2226_v45 = vadd.f32 %v6046_v24, %v8042_v59  ;;  %v2220_v3 = vpop.f32.mrb[9].mxu1 }
 0x397   : > { %v2221_v48 = vadd.f32 %v8042_v59, %v2220_v3 }
 0x398   : > { %v2284_v23 = vmax.f32 %v2226_v45, 0.0 }
 0x399   : > { %v2283_v51 = vmax.f32 %v2221_v48, 0.0  ;;  %v6049_v61 = vpop.f32.mrb[10].mxu1 }
 0x39a   : > { %2320 = vst.msk [vmem:[#allocation3 + $0x201] sm:$0xff] %vm326_vm0, %v2284_v23  ;;  %v2236_v18 = vadd.f32 %v6049_v61, %v8042_v59  ;;  %v2230_v41 = vpop.f32.mrb[11].mxu1  ;;  %v3603_v61 = vld [vmem:[%s11525_s4] sm:$0xff] }
 0x39b   : > { %2319 = vst.msk [vmem:[#allocation3 + $0x1f1] sm:$0xff] %vm326_vm0, %v2283_v51  ;;  %v2231_v43 = vadd.f32 %v8042_v59, %v2230_v41 }
 0x39c   : > { %v2286_v25 = vmax.f32 %v2236_v18, 0.0  ;;  %v3604_v18 = vld [vmem:[%s11525_s4 + $0x8] sm:$0xff] }
 0x39d   : > { %v2285_v15 = vmax.f32 %v2231_v43, 0.0  ;;  %v6052_v62 = vpop.f32.mrb[12].mxu1  ;;  %v6180_v41 = vpack.c.bf16 %v3604_v18, %v3603_v61 }
 0x39e   : > { %2322 = vst.msk [vmem:[#allocation3 + $0x221] sm:$0xff] %vm326_vm0, %v2286_v25  ;;  %v2246_v42 = vadd.f32 %v6052_v62, %v8042_v59  ;;  %v2240_v16 = vpop.f32.mrb[13].mxu1  ;;  %v3605_v25 = vld [vmem:[%s11525_s4 + $0x10] sm:$0xff] }
 0x39f   : > { %2321 = vst.msk [vmem:[#allocation3 + $0x211] sm:$0xff] %vm326_vm0, %v2285_v15  ;;  %v2241_v30 = vadd.f32 %v8042_v59, %v2240_v16  ;;  %6181 = vmatprep.subr.bf16.mxu1 %v6180_v41  ;;  %v3606_v15 = vld [vmem:[%s11525_s4 + $0x18] sm:$0xff]  ;;  %v8756_v16 = vpop.permute.xlu0 %2409 }
 0x3a0   : > { %v2288_v22 = vmax.f32 %v2246_v42, 0.0  ;;  %6183 = vmatpush3.bf16.msra.mxu1 %v6180_v41  ;;  %v6184_v62 = vpack.c.bf16 %v3606_v15, %v3605_v25  ;;  %v3607_v42 = vld [vmem:[%s11525_s4 + $0x20] sm:$0xf] }
 0x3a1   : > { %v2287_v17 = vmax.f32 %v2241_v30, 0.0  ;;  %v6055_v20 = vpop.f32.mrb[14].mxu1  ;;  %v8570_v33 = vld [vmem:[#allocation3 + $0x201] sm:$0xff] }
 0x3a2   : > { %2324 = vst.msk [vmem:[#allocation3 + $0x241] sm:$0xff] %vm326_vm0, %v2288_v22  ;;  %v2256_v38 = vadd.f32 %v6055_v20, %v8042_v59  ;;  %2445 = vrot.lane.b32.xlu0 %v8570_v33, %s6357_s15  ;;  %v2250_v9 = vpop.f32.mrb[15].mxu1  ;;  %v8576_v5 = vld [vmem:[#allocation3 + $0x1f1] sm:$0xff]  ;;  %v8705_v45 = vld [vmem:[#allocation3 + $0x200] sm:$0xff]  ;;  %6185 = vmatprep.subr.bf16.mxu1 %v6184_v62  ;;  %v8766_v22 = vpop.permute.xlu1 %2411 }
 0x3a3   : > { %2323 = vst.msk [vmem:[#allocation3 + $0x231] sm:$0xff] %vm326_vm0, %v2287_v17  ;;  %v2251_v47 = vadd.f32 %v8042_v59, %v2250_v9  ;;  %2443 = vrot.lane.b32.xlu1 %v8576_v5, %s6357_s15  ;;  %v8693_v26 = vld [vmem:[#allocation3 + $0x1f0] sm:$0xff]  ;;  %v8764_v30 = vld [vmem:[#allocation3 + $0x1c1] sm:$0xff]  ;;  %v8770_v17 = vpop.permute.xlu0 %2413 }
 0x3a4   : > { %v2290_v14 = vmax.f32 %v2256_v38, 0.0  ;;  %6187 = vmatpush3.bf16.msra.mxu1 %v6184_v62  ;;  %v2721_v25 = vld [vmem:[#allocation3 + $0x142] sm:$0xff] }
 0x3a5   : > { %v2289_v35 = vmax.f32 %v2251_v47, 0.0  ;;  %v8582_v50 = vld [vmem:[#allocation3 + $0x221] sm:$0xff]  ;;  %6064 = vmatprep.subr.msk.mxu1 %vm2030_vm4, %v3607_v42 }
 0x3a6   : > { %2326 = vst.msk [vmem:[#allocation3 + $0x261] sm:$0xff] %vm326_vm0, %v2290_v14  ;;  %2449 = vrot.lane.b32.xlu0 %v8582_v50, %s6357_s15  ;;  %v8587_v28 = vld [vmem:[#allocation3 + $0x211] sm:$0xff]  ;;  %v8713_v48 = vld [vmem:[#allocation3 + $0x220] sm:$0xff]  ;;  %v8776_v20 = vpop.permute.xlu1 %2415 }
 0x3a7   : > { %2325 = vst.msk [vmem:[#allocation3 + $0x251] sm:$0xff] %vm326_vm0, %v2289_v35  ;;  %2447 = vrot.lane.b32.xlu1 %v8587_v28, %s6357_s15  ;;  %v8701_v24 = vld [vmem:[#allocation3 + $0x210] sm:$0xff]  ;;  %v8778_v38 = vpop.permute.xlu0 %2417 }
 0x3a8   : > { %6065 = vmatpush3.msk.msra.mxu1 %vm2030_vm4, %v3607_v42 }
 0x3a9   : > { %v8592_v59 = vld [vmem:[#allocation3 + $0x241] sm:$0xff] }
 0x3aa   : > { %11860 = vst [vmem:[#allocation30_spill] sm:$0xff] %v8592_v59  ;;  %2453 = vrot.lane.b32.xlu0 %v8592_v59, %s6357_s15  ;;  %v8596_v7 = vld [vmem:[#allocation3 + $0x231] sm:$0xff]  ;;  %v8721_v51 = vld [vmem:[#allocation3 + $0x240] sm:$0xff]  ;;  %v8786_v9 = vpop.permute.xlu1 %2419 }
 0x3ab   : > { %2451 = vrot.lane.b32.xlu1 %v8596_v7, %s6357_s15  ;;  %v8709_v3 = vld [vmem:[#allocation3 + $0x230] sm:$0xff]  ;;  %v8790_v47 = vpop.permute.xlu0 %2421 }
 0x3ad   : > { %v8733_v43 = vld [vmem:[#allocation3 + $0x260] sm:$0xff] }
 0x3ae   : > { %2473 = vrot.lane.b32.xlu0 %v2353_v37, %s6358_s16  ;;  %v8601_v13 = vld [vmem:[#allocation3 + $0x251] sm:$0xff]  ;;  %11885 = vst [vmem:[#allocation43_spill] sm:$0xff] %v8733_v43  ;;  %v8794_v14 = vld [vmem:[#allocation3 + $0x261] sm:$0xff]  ;;  %v8800_v37 = vpop.permute.xlu1 %2423 }
 0x3af   : > { %11861 = vst [vmem:[#allocation35_spill] sm:$0xff] %v8601_v13  ;;  %2455 = vrot.lane.b32.xlu1 %v8601_v13, %s6357_s15  ;;  %v8717_v23 = vld [vmem:[#allocation3 + $0x250] sm:$0xff]  ;;  %11886 = vst [vmem:[#allocation44_spill] sm:$0xff] %v8794_v14  ;;  %v8798_v35 = vpop.permute.xlu0 %2441 }
 0x3b2   : > { %2477 = vrot.lane.b32.xlu0 %v8605_v53, %s6358_s16  ;;  %v8845_v53 = vld [vmem:[#allocation3 + $0x182] sm:$0xff] }
 0x3b3   : > { %2475 = vrot.lane.b32.xlu1 %v8609_v52, %s6358_s16  ;;  %11890 = vst [vmem:[#allocation49_spill] sm:$0xff] %v8845_v53 }
 0x3b6   : > { %2481 = vrot.lane.b32.xlu0 %v8613_v32, %s6358_s16  ;;  %v8837_v32 = vld [vmem:[#allocation3 + $0x152] sm:$0xff] }
 0x3b7   : > { %2479 = vrot.lane.b32.xlu1 %v8617_v11, %s6358_s16  ;;  %11889 = vst [vmem:[#allocation48_spill] sm:$0xff] %v8837_v32  ;;  %v8849_v11 = vld [vmem:[#allocation3 + $0x172] sm:$0xff] }
 0x3b8   : > { %11891 = vst [vmem:[#allocation51_spill] sm:$0xff] %v8849_v11 }
 0x3ba   : > { %2485 = vrot.lane.b32.xlu0 %v8621_v19, %s6358_s16 }
 0x3bb   : > { %2483 = vrot.lane.b32.xlu1 %v8625_v36, %s6358_s16 }
 0x3be   : > { %2505 = vrot.lane.b32.xlu0 %v8629_v6, %s6359_s17 }
 0x3bf   : > { %2487 = vrot.lane.b32.xlu1 %v8633_v8, %s6358_s16  ;;  %v8833_v8 = vld [vmem:[#allocation3 + $0x162] sm:$0xff] }
 0x3c0   : > { %11888 = vst [vmem:[#allocation47_spill] sm:$0xff] %v8833_v8 }
 0x3c2   : > { %2509 = vrot.lane.b32.xlu0 %v8637_v34, %s6359_s17 }
 0x3c3   : > { %2507 = vrot.lane.b32.xlu1 %v8641_v12, %s6359_s17 }
 0x3c6   : > { %2513 = vrot.lane.b32.xlu0 %v8645_v21, %s6359_s17 }
 0x3c7   : > { %2511 = vrot.lane.b32.xlu1 %v8649_v39, %s6359_s17 }
 0x3ca   : > { %2517 = vrot.lane.b32.xlu0 %v8653_v2, %s6359_s17 }
 0x3cb   : > { %2515 = vrot.lane.b32.xlu1 %v8657_v44, %s6359_s17 }
 0x3ce   : > { %2537 = vrot.lane.b32.xlu0 %v8661_v49, %s6360_s18 }
 0x3cf   : > { %2519 = vrot.lane.b32.xlu1 %v8665_v56, %s6359_s17 }
 0x3d2   : > { %2541 = vrot.lane.b32.xlu0 %v8669_v58, %s6360_s18 }
 0x3d3   : > { %2539 = vrot.lane.b32.xlu1 %v8673_v10, %s6360_s18 }
 0x3d6   : > { %2545 = vrot.lane.b32.xlu0 %v8677_v29, %s6360_s18 }
 0x3d7   : > { %2543 = vrot.lane.b32.xlu1 %v8681_v55, %s6360_s18 }
 0x3da   : > { %2549 = vrot.lane.b32.xlu0 %v8685_v54, %s6360_s18 }
 0x3db   : > { %2547 = vrot.lane.b32.xlu1 %v8689_v4, %s6360_s18 }
 0x3de   : > { %2569 = vrot.lane.b32.xlu0 %v8693_v26, %s6361_s19 }
 0x3df   : > { %2551 = vrot.lane.b32.xlu1 %v8697_v63, %s6360_s18 }
 0x3e2   : > { %2573 = vrot.lane.b32.xlu0 %v8701_v24, %s6361_s19 }
 0x3e3   : > { %2571 = vrot.lane.b32.xlu1 %v8705_v45, %s6361_s19 }
 0x3e6   : > { %2577 = vrot.lane.b32.xlu0 %v8709_v3, %s6361_s19 }
 0x3e7   : > { %2575 = vrot.lane.b32.xlu1 %v8713_v48, %s6361_s19 }
 0x3ea   : > { %2581 = vrot.lane.b32.xlu0 %v8717_v23, %s6361_s19 }
 0x3eb   : > { %2579 = vrot.lane.b32.xlu1 %v8721_v51, %s6361_s19 }
 0x3ee   : > { %2601 = vrot.lane.b32.xlu0 %v8528_v0, %s6362_s24 }
 0x3ef   : > { %2583 = vrot.lane.b32.xlu1 %v8733_v43, %s6361_s19 }
 0x3f2   : > { %2605 = vrot.lane.b32.xlu0 %v8539_v40, %s6362_s24 }
 0x3f3   : > { %2603 = vrot.lane.b32.xlu1 %v8522_v1, %s6362_s24 }
 0x3f6   : > { %2609 = vrot.lane.b32.xlu0 %v8548_v27, %s6362_s24 }
 0x3f7   : > { %2607 = vrot.lane.b32.xlu1 %v8534_v31, %s6362_s24 }
 0x3fa   : > { %2613 = vrot.lane.b32.xlu0 %v8554_v60, %s6362_s24 }
 0x3fb   : > { %2611 = vrot.lane.b32.xlu1 %v8544_v57, %s6362_s24 }
 0x3fe   : > { %2633 = vrot.lane.b32.xlu0 %v8576_v5, %s6363_s11 }
 0x3ff   : > { %2615 = vrot.lane.b32.xlu1 %v8764_v30, %s6362_s24 }
 0x402   : > { %2637 = vrot.lane.b32.xlu0 %v8587_v28, %s6363_s11 }
 0x403   : > { %2635 = vrot.lane.b32.xlu1 %v8570_v33, %s6363_s11 }
 0x406   : > { %2641 = vrot.lane.b32.xlu0 %v8596_v7, %s6363_s11 }
 0x407   : > { %2639 = vrot.lane.b32.xlu1 %v8582_v50, %s6363_s11 }
 0x40a   : > { %2645 = vrot.lane.b32.xlu0 %v8601_v13, %s6363_s11 }
 0x40b   : > { %2643 = vrot.lane.b32.xlu1 %v8592_v59, %s6363_s11 }
 0x40e   : > { %2745 = vrot.lane.b32.xlu0 %v8552_v46, %s6356_s14 }
 0x40f   : > { %2647 = vrot.lane.b32.xlu1 %v8794_v14, %s6363_s11  ;;  %v8861_v14 = vld [vmem:[#allocation3 + $0x192] sm:$0xff] }
 0x410   : > { %11893 = vst [vmem:[#allocation33_spill] sm:$0xff] %v8861_v14 }
 0x412   : > { %2749 = vrot.lane.b32.xlu0 %v8570_v33, %s6356_s14 }
 0x413   : > { %2747 = vrot.lane.b32.xlu1 %v8576_v5, %s6356_s14 }
 0x414   : > { %v8806_v61 = vpop.permute.xlu0 %2445 }
 0x415   : > { %v8808_v18 = vpop.permute.xlu1 %2443 }
 0x416   : > { %2753 = vrot.lane.b32.xlu0 %v8582_v50, %s6356_s14 }
 0x417   : > { %2751 = vrot.lane.b32.xlu1 %v8587_v28, %s6356_s14 }
 0x418   : > { %v8814_v46 = vpop.permute.xlu0 %2449 }
 0x419   : > { %v8816_v41 = vpop.permute.xlu1 %2447 }
 0x41a   : > { %2757 = vrot.lane.b32.xlu0 %v8592_v59, %s6356_s14 }
 0x41b   : > { %2755 = vrot.lane.b32.xlu1 %v8596_v7, %s6356_s14 }
 0x41c   : > { %v8822_v15 = vpop.permute.xlu0 %2453 }
 0x41d   : > { %v8824_v62 = vpop.permute.xlu1 %2451 }
 0x41e   : > { %2777 = vrot.lane.b32.xlu0 %v2721_v25, %s6357_s15 }
 0x41f   : > { %2759 = vrot.lane.b32.xlu1 %v8601_v13, %s6356_s14 }
 0x420   : > { %v8829_v42 = vpop.permute.xlu0 %2473 }
 0x421   : > { %v8831_v19 = vpop.permute.xlu1 %2455 }
 0x422   : > { %11887 = vst [vmem:[#allocation46_spill] sm:$0xff] %v8831_v19  ;;  %2781 = vrot.lane.b32.xlu0 %v8833_v8, %s6357_s15  ;;  %v8857_v8 = vld [vmem:[#allocation3 + $0x1a2] sm:$0xff] }
 0x423   : > { %2779 = vrot.lane.b32.xlu1 %v8837_v32, %s6357_s15  ;;  %11892 = vst [vmem:[#allocation31_spill] sm:$0xff] %v8857_v8 }
 0x424   : > { %v8841_v36 = vpop.permute.xlu0 %2477 }
 0x425   : > { %v8843_v25 = vpop.permute.xlu1 %2475 }
 0x426   : > { %2785 = vrot.lane.b32.xlu0 %v8845_v53, %s6357_s15 }
 0x427   : > { %2783 = vrot.lane.b32.xlu1 %v8849_v11, %s6357_s15  ;;  %v8871_v11 = vld [vmem:[#allocation3 + $0x1b2] sm:$0xff] }
 0x428   : > { %v8853_v52 = vpop.permute.xlu0 %2481  ;;  %11894 = vst [vmem:[#allocation34_spill] sm:$0xff] %v8871_v11 }
 0x429   : > { %v8855_v43 = vpop.permute.xlu1 %2479 }
 0x42a   : > { %2789 = vrot.lane.b32.xlu0 %v8857_v8, %s6357_s15 }
 0x42b   : > { %2787 = vrot.lane.b32.xlu1 %v8861_v14, %s6357_s15 }
 0x42c   : > { %v8865_v53 = vpop.permute.xlu0 %2485 }
 0x42d   : > { %v8867_v32 = vpop.permute.xlu1 %2483 }
 0x42e   : > { %2801 = vrot.lane.b32.xlu0 %v8629_v6, %s6358_s16 }
 0x42f   : > { %2791 = vrot.lane.b32.xlu1 %v8871_v11, %s6357_s15 }
 0x430   : > { %v8875_v19 = vpop.permute.xlu0 %2505 }
 0x431   : > { %v8877_v8 = vpop.permute.xlu1 %2487 }
 0x432   : > { %11895 = vst [vmem:[#allocation29_spill] sm:$0xff] %v8877_v8  ;;  %2805 = vrot.lane.b32.xlu0 %v8637_v34, %s6358_s16  ;;  %v8941_v8 = vld [vmem:[#allocation3 + $0x32] sm:$0xff] }
 0x433   : > { %2803 = vrot.lane.b32.xlu1 %v8641_v12, %s6358_s16  ;;  %11903 = vst [vmem:[#allocation37_spill] sm:$0xff] %v8941_v8 }
 0x434   : > { %v8883_v14 = vpop.permute.xlu0 %2509 }
 0x435   : > { %v8885_v59 = vpop.permute.xlu1 %2507 }
 0x436   : > { %2809 = vrot.lane.b32.xlu0 %v8645_v21, %s6358_s16 }
 0x437   : > { %2807 = vrot.lane.b32.xlu1 %v8649_v39, %s6358_s16 }
 0x438   : > { %v8891_v6 = vpop.permute.xlu0 %2513 }
 0x439   : > { %v8893_v11 = vpop.permute.xlu1 %2511 }
 0x43a   : > { %2813 = vrot.lane.b32.xlu0 %v8653_v2, %s6358_s16 }
 0x43b   : > { %2811 = vrot.lane.b32.xlu1 %v8657_v44, %s6358_s16 }
 0x43c   : > { %v8899_v12 = vpop.permute.xlu0 %2517 }
 0x43d   : > { %11896 = vst [vmem:[#allocation28_spill] sm:$0xff] %v8899_v12  ;;  %v8901_v34 = vpop.permute.xlu1 %2515 }
 0x43e   : > { %11897 = vst [vmem:[#allocation38_spill] sm:$0xff] %v8901_v34  ;;  %2825 = vrot.lane.b32.xlu0 %v8661_v49, %s6359_s17 }
 0x43f   : > { %2815 = vrot.lane.b32.xlu1 %v8665_v56, %s6358_s16 }
 0x440   : > { %v2538_v39 = vpop.permute.xlu0 %2537 }
 0x441   : > { %v8907_v21 = vpop.permute.xlu1 %2519 }
 0x442   : > { %11898 = vst [vmem:[#allocation42_spill] sm:$0xff] %v8907_v21  ;;  %2829 = vrot.lane.b32.xlu0 %v8669_v58, %s6359_s17  ;;  %v8933_v21 = vld [vmem:[#allocation3 + $0x12] sm:$0xff] }
 0x443   : > { %2827 = vrot.lane.b32.xlu1 %v8673_v10, %s6359_s17  ;;  %11901 = vst [vmem:[#allocation41_spill] sm:$0xff] %v8933_v21 }
 0x444   : > { %v8913_v44 = vpop.permute.xlu0 %2541 }
 0x445   : > { %v8915_v2 = vpop.permute.xlu1 %2539 }
 0x446   : > { %2833 = vrot.lane.b32.xlu0 %v8677_v29, %s6359_s17 }
 0x447   : > { %2831 = vrot.lane.b32.xlu1 %v8681_v55, %s6359_s17 }
 0x448   : > { %v8921_v56 = vpop.permute.xlu0 %2545 }
 0x449   : > { %v8923_v49 = vpop.permute.xlu1 %2543 }
 0x44a   : > { %2837 = vrot.lane.b32.xlu0 %v8685_v54, %s6359_s17 }
 0x44b   : > { %2835 = vrot.lane.b32.xlu1 %v8689_v4, %s6359_s17  ;;  %v8945_v4 = vld [vmem:[#allocation3 + $0x22] sm:$0xff] }
 0x44c   : > { %v8929_v10 = vpop.permute.xlu0 %2549  ;;  %11904 = vst [vmem:[#allocation53_spill] sm:$0xff] %v8945_v4 }
 0x44d   : > { %11899 = vst [vmem:[#allocation52_spill] sm:$0xff] %v8929_v10  ;;  %v8931_v58 = vpop.permute.xlu1 %2547 }
 0x44e   : > { %11900 = vst [vmem:[#allocation8_spill] sm:$0xff] %v8931_v58  ;;  %2857 = vrot.lane.b32.xlu0 %v8933_v21, %s6360_s18  ;;  %v8951_v21 = vld [vmem:[#allocation3 + $0x52] sm:$0xff] }
 0x44f   : > { %2839 = vrot.lane.b32.xlu1 %v8697_v63, %s6359_s17  ;;  %11905 = vst [vmem:[#allocation54_spill] sm:$0xff] %v8951_v21  ;;  %v8955_v63 = vld [vmem:[#allocation3 + $0x42] sm:$0xff]  ;;  %v8963_v58 = vld [vmem:[#allocation3 + $0x72] sm:$0xff] }
 0x450   : > { %v2570_v55 = vpop.permute.xlu0 %2569  ;;  %11906 = vst [vmem:[#allocation55_spill] sm:$0xff] %v8955_v63  ;;  %11907 = vst [vmem:[#allocation56_spill] sm:$0xff] %v8963_v58 }
 0x451   : > { %v8939_v29 = vpop.permute.xlu1 %2551 }
 0x452   : > { %11902 = vst [vmem:[#allocation36_spill] sm:$0xff] %v8939_v29  ;;  %2861 = vrot.lane.b32.xlu0 %v8941_v8, %s6360_s18 }
 0x453   : > { %2859 = vrot.lane.b32.xlu1 %v8945_v4, %s6360_s18  ;;  %v8967_v4 = vld [vmem:[#allocation3 + $0x62] sm:$0xff] }
 0x454   : > { %v8949_v54 = vpop.permute.xlu0 %2573  ;;  %11908 = vst [vmem:[#allocation57_spill] sm:$0xff] %v8967_v4 }
 0x455   : > { %v2572_v10 = vpop.permute.xlu1 %2571 }
 0x456   : > { %2865 = vrot.lane.b32.xlu0 %v8951_v21, %s6360_s18 }
 0x457   : > { %2863 = vrot.lane.b32.xlu1 %v8955_v63, %s6360_s18  ;;  %v8977_v63 = vld [vmem:[#allocation3 + $0x82] sm:$0xff] }
 0x458   : > { %v8959_v29 = vpop.permute.xlu0 %2577  ;;  %11910 = vst [vmem:[#allocation59_spill] sm:$0xff] %v8977_v63 }
 0x459   : > { %v8961_v8 = vpop.permute.xlu1 %2575 }
 0x45a   : > { %2869 = vrot.lane.b32.xlu0 %v8963_v58, %s6360_s18 }
 0x45b   : > { %2867 = vrot.lane.b32.xlu1 %v8967_v4, %s6360_s18  ;;  %v2328_v4 = vld [vmem:[#allocation3 + $0x1e0] sm:$0xff] }
 0x45c   : > { %v8971_v21 = vpop.permute.xlu0 %2581 }
 0x45d   : > { %11909 = vst [vmem:[#allocation58_spill] sm:$0xff] %v8971_v21  ;;  %v8973_v12 = vpop.permute.xlu1 %2579 }
 0x45e   : > { %2881 = vrot.lane.b32.xlu0 %v8528_v0, %s6361_s19 }
 0x45f   : > { %2871 = vrot.lane.b32.xlu1 %v8977_v63, %s6360_s18  ;;  %v2657_v63 = vsel %vm326_vm0, %v2328_v4, %v8756_v16 }
 0x460   : > { %v2602_v13 = vpop.permute.xlu0 %2601 }
 0x461   : > { %v8981_v34 = vpop.permute.xlu1 %2583 }
 0x462   : > { %11911 = vst [vmem:[#allocation60_spill] sm:$0xff] %v8981_v34  ;;  %2885 = vrot.lane.b32.xlu0 %v8539_v40, %s6361_s19 }
 0x463   : > { %2883 = vrot.lane.b32.xlu1 %v8522_v1, %s6361_s19  ;;  %v2665_v1 = vsel %vm976_vm6, %v2657_v63, %v8798_v35  ;;  %v2658_v63 = vsel %vm326_vm0, %v8693_v26, %v8766_v22 }
 0x464   : > { %v2606_v58 = vpop.permute.xlu0 %2605 }
 0x465   : > { %v2604_v21 = vpop.permute.xlu1 %2603 }
 0x466   : > { %2889 = vrot.lane.b32.xlu0 %v8548_v27, %s6361_s19  ;;  %v2673_v27 = vsel %vm985_vm7, %v2665_v1, %v8829_v42  ;;  %v2659_v1 = vsel %vm326_vm0, %v8705_v45, %v8770_v17  ;;  %v2661_v17 = vsel %vm326_vm0, %v8713_v48, %v8778_v38 }
 0x467   : > { %2887 = vrot.lane.b32.xlu1 %v8534_v31, %s6361_s19  ;;  %v2681_v4 = vsel %vm994_vm8, %v2673_v27, %v8875_v19  ;;  %v2666_v27 = vsel %vm976_vm6, %v2658_v63, %v8808_v18  ;;  %v2667_v42 = vsel %vm976_vm6, %v2659_v1, %v8806_v61  ;;  %v2660_v61 = vsel %vm326_vm0, %v8701_v24, %v8776_v20 }
 0x468   : > { %v8993_v0 = vpop.permute.xlu0 %2609  ;;  %v2689_v31 = vsel %vm1003_vm9, %v2681_v4, %v2538_v39  ;;  %v2674_v22 = vsel %vm985_vm7, %v2666_v27, %v8843_v25  ;;  %v2675_v18 = vsel %vm985_vm7, %v2667_v42, %v8841_v36  ;;  %v2663_v25 = vsel %vm326_vm0, %v8721_v51, %v8790_v47  ;;  %v11912_v42 = vld [vmem:[#allocation38_spill] sm:$0xff] }
 0x469   : > { %v2608_v34 = vpop.permute.xlu1 %2607  ;;  %v2697_v35 = vsel %vm1012_vm10, %v2689_v31, %v2570_v55  ;;  %v2683_v38 = vsel %vm994_vm8, %v2675_v18, %v8883_v14  ;;  %v2662_v20 = vsel %vm326_vm0, %v8709_v3, %v8786_v9  ;;  %v2669_v14 = vsel %vm976_vm6, %v2661_v17, %v8814_v46  ;;  %v11915_v17 = vld [vmem:[#allocation8_spill] sm:$0xff] }
 0x46a   : > { %2893 = vrot.lane.b32.xlu0 %v8554_v60, %s6361_s19  ;;  %v2705_v19 = vsel %vm1021_vm5, %v2697_v35, %v2602_v13  ;;  %v2682_v13 = vsel %vm994_vm8, %v2674_v22, %v8885_v59  ;;  %v2668_v59 = vsel %vm976_vm6, %v2660_v61, %v8816_v41  ;;  %v2691_v4 = vsel %vm1003_vm9, %v2683_v38, %v8913_v44  ;;  %v11918_v61 = vld [vmem:[#allocation52_spill] sm:$0xff] }
 0x46b   : > { %2891 = vrot.lane.b32.xlu1 %v8544_v57, %s6361_s19  ;;  %v2690_v36 = vsel %vm1003_vm9, %v2682_v13, %v8915_v2  ;;  %v2676_v2 = vsel %vm985_vm7, %v2668_v59, %v8855_v43  ;;  %v2699_v35 = vsel %vm1012_vm10, %v2691_v4, %v8949_v54  ;;  %v2677_v9 = vsel %vm985_vm7, %v2669_v14, %v8853_v52  ;;  %v11917_v13 = vld [vmem:[#allocation46_spill] sm:$0xff]  ;;  %v11919_v59 = vld [vmem:[#allocation29_spill] sm:$0xff] }
 0x46c   : > { %v9003_v40 = vpop.permute.xlu0 %2613  ;;  %v2698_v47 = vsel %vm1012_vm10, %v2690_v36, %v2572_v10  ;;  %v2684_v44 = vsel %vm994_vm8, %v2676_v2, %v8893_v11  ;;  %v2707_v10 = vsel %vm1021_vm5, %v2699_v35, %v2606_v58  ;;  %v2685_v43 = vsel %vm994_vm8, %v2677_v9, %v8891_v6  ;;  %v11920_v4 = vld [vmem:[#allocation58_spill] sm:$0xff]  ;;  %v11923_v9 = vld [vmem:[#allocation36_spill] sm:$0xff] }
 0x46d   : > { %v9007_v16 = vpop.permute.xlu1 %2611  ;;  %v2706_v41 = vsel %vm1021_vm5, %v2698_v47, %v2604_v21  ;;  %v2692_v21 = vsel %vm1003_vm9, %v2684_v44, %v8923_v49  ;;  %v2670_v52 = vsel %vm976_vm6, %v2662_v20, %v8824_v62  ;;  %v2664_v11 = vsel %vm326_vm0, %v8717_v23, %v8800_v37  ;;  %v11921_v2 = vld [vmem:[#allocation42_spill] sm:$0xff] }
 0x46e   : > { %2905 = vrot.lane.b32.xlu0 %v8576_v5, %s6362_s24  ;;  %v2693_v6 = vsel %vm1003_vm9, %v2685_v43, %v8921_v56  ;;  %v2700_v49 = vsel %vm1012_vm10, %v2692_v21, %v8961_v8  ;;  %v2671_v46 = vsel %vm976_vm6, %v2663_v25, %v8822_v15 }
 0x46f   : > { %2895 = vrot.lane.b32.xlu1 %v8764_v30, %s6361_s19  ;;  %v2701_v62 = vsel %vm1012_vm10, %v2693_v6, %v8959_v29  ;;  %v2708_v37 = vsel %vm1021_vm5, %v2700_v49, %v2608_v34  ;;  %v2679_v56 = vsel %vm985_vm7, %v2671_v46, %v8865_v53  ;;  %v11916_v53 = vld [vmem:[#allocation30_spill] sm:$0xff]  ;;  %v11927_v6 = vld [vmem:[#allocation47_spill] sm:$0xff]  ;;  %v11928_v46 = vld [vmem:[#allocation33_spill] sm:$0xff] }
 0x470   : > { %v2634_v39 = vpop.permute.xlu0 %2633  ;;  %v2709_v22 = vsel %vm1021_vm5, %v2701_v62, %v8993_v0  ;;  %v2672_v0 = vsel %vm976_vm6, %v2664_v11, %v11917_v13  ;;  %v11926_v11 = vld [vmem:[#allocation51_spill] sm:$0xff]  ;;  %v11936_v13 = vld [vmem:[#allocation18_spill] sm:$0xff] }
 0x471   : > { %v2713_v31 = vsel %vm1030_vm11, %v2705_v19, %v2634_v39  ;;  %v9029_v55 = vpop.permute.xlu1 %2615  ;;  %v2678_v19 = vsel %vm985_vm7, %v2670_v52, %v8867_v32  ;;  %v11914_v32 = vld [vmem:[#allocation28_spill] sm:$0xff]  ;;  %v2680_v20 = vsel %vm985_vm7, %v2672_v0, %v11919_v59  ;;  %v11937_v0 = vld [vmem:[#allocation19_spill] sm:$0xff] }
 0x472   : > { %2909 = vrot.lane.b32.xlu0 %v8587_v28, %s6362_s24  ;;  %6066 = vmatprep.mubr.msk.f32.mxu1 %vm1933_vm12, %v2713_v31  ;;  %v2686_v8 = vsel %vm994_vm8, %v2678_v19, %v11912_v42  ;;  %v11913_v31 = vld [vmem:[#allocation35_spill] sm:$0xff]  ;;  %v2687_v29 = vsel %vm994_vm8, %v2679_v56, %v11914_v32  ;;  %v2688_v35 = vsel %vm994_vm8, %v2680_v20, %v11921_v2  ;;  %v11943_v2 = vld [vmem:[#allocation24_spill] sm:$0xff] }
 0x473   : > { %2907 = vrot.lane.b32.xlu1 %v8570_v33, %s6362_s24  ;;  %v2694_v34 = vsel %vm1003_vm9, %v2686_v8, %v11915_v17  ;;  %v2695_v25 = vsel %vm1003_vm9, %v2687_v29, %v11918_v61  ;;  %v2696_v44 = vsel %vm1003_vm9, %v2688_v35, %v11923_v9  ;;  %v11932_v8 = vld [vmem:[#allocation14_spill] sm:$0xff]  ;;  %v11934_v29 = vld [vmem:[#allocation16_spill] sm:$0xff]  ;;  %v11935_v17 = vld [vmem:[#allocation17_spill] sm:$0xff] }
 0x474   : > { %v2638_v63 = vpop.permute.xlu0 %2637  ;;  %v2702_v38 = vsel %vm1012_vm10, %v2694_v34, %v8973_v12  ;;  %v2703_v47 = vsel %vm1012_vm10, %v2695_v25, %v11920_v4  ;;  %v11940_v4 = vld [vmem:[#allocation22_spill] sm:$0xff]  ;;  %v11944_v35 = vld [vmem:[#allocation5_spill] sm:$0xff] }
 0x475   : > { %v2636_v1 = vpop.permute.xlu1 %2635  ;;  %v2715_v54 = vsel %vm1030_vm11, %v2707_v10, %v2638_v63  ;;  %v2710_v63 = vsel %vm1021_vm5, %v2702_v38, %v9007_v16  ;;  %v11925_v16 = vld [vmem:[#allocation60_spill] sm:$0xff]  ;;  %v11945_v9 = vld [vmem:[#allocation25_spill] sm:$0xff] }
 0x476   : > { %v2714_v27 = vsel %vm1030_vm11, %v2706_v41, %v2636_v1  ;;  %2913 = vrot.lane.b32.xlu0 %v8596_v7, %s6362_s24  ;;  %v2711_v41 = vsel %vm1021_vm5, %v2703_v47, %v9003_v40  ;;  %v11922_v1 = vld [vmem:[#allocation48_spill] sm:$0xff]  ;;  %v2704_v43 = vsel %vm1012_vm10, %v2696_v44, %v11925_v16  ;;  %v11941_v47 = vld [vmem:[#allocation23_spill] sm:$0xff] }
 0x477   : > { %2911 = vrot.lane.b32.xlu1 %v8582_v50, %s6362_s24  ;;  %6067 = vmatmul.mubr.msk.f32.vlgmr.msra.gmra.mrb[16].mxu1 %vm1933_vm12, %v2714_v27  ;;  %v11924_v27 = vld [vmem:[#allocation44_spill] sm:$0xff]  ;;  %v2712_v21 = vsel %vm1021_vm5, %v2704_v43, %v9029_v55  ;;  %v11929_v55 = vld [vmem:[#allocation49_spill] sm:$0xff]  ;;  %v11947_v43 = vld [vmem:[#allocation6_spill] sm:$0xff] }
 0x478   : > { %6069 = vmatprep.mubr.msk.f32.mxu1 %vm1933_vm12, %v2715_v54  ;;  %v2642_v58 = vpop.permute.xlu0 %2641  ;;  %v11938_v38 = vld [vmem:[#allocation20_spill] sm:$0xff] }
 0x479   : > { %v2640_v39 = vpop.permute.xlu1 %2639  ;;  %v2717_v18 = vsel %vm1030_vm11, %v2709_v22, %v2642_v58  ;;  %v9179_v22 = vld [vmem:[#allocation3 + $0x1c2] sm:$0xff] }
 0x47a   : > { %v2716_v15 = vsel %vm1030_vm11, %v2708_v37, %v2640_v39  ;;  %2917 = vrot.lane.b32.xlu0 %v11913_v31, %s6362_s24  ;;  %v11930_v37 = vld [vmem:[#allocation34_spill] sm:$0xff]  ;;  %v11931_v39 = vld [vmem:[#allocation31_spill] sm:$0xff]  ;;  %11933 = vst [vmem:[#allocation38_spill] sm:$0xff] %v9179_v22  ;;  %v11946_v44 = vld [vmem:[#allocation4_spill] sm:$0xff] }
 0x47b   : > { %2915 = vrot.lane.b32.xlu1 %v11916_v53, %s6362_s24  ;;  %6070 = vmatmul.mubr.msk.f32.gmra.mrb[18].mxu1 %vm1933_vm12, %v2716_v15 }
 0x47c   : > { %6072 = vmatprep.mubr.msk.f32.mxu1 %vm1933_vm12, %v2717_v18  ;;  %v2646_v36 = vpop.permute.xlu0 %2645 }
 0x47d   : > { %v2644_v14 = vpop.permute.xlu1 %2643  ;;  %v2719_v10 = vsel %vm1030_vm11, %v2711_v41, %v2646_v36  ;;  %v11939_v36 = vld [vmem:[#allocation21_spill] sm:$0xff] }
 0x47e   : > { %v2718_v12 = vsel %vm1030_vm11, %v2710_v63, %v2644_v14  ;;  %2937 = vrot.lane.b32.xlu0 %v11922_v1, %s6363_s11  ;;  %v11957_v1 = vld [vmem:[#allocation27_spill] sm:$0xff] }
 0x47f   : > { %2919 = vrot.lane.b32.xlu1 %v11924_v27, %s6362_s24  ;;  %6073 = vmatmul.mubr.msk.f32.gmra.mrb[20].mxu1 %vm1933_vm12, %v2718_v12 }
 0x480   : > { %6075 = vmatprep.mubr.msk.f32.mxu1 %vm1933_vm12, %v2719_v10  ;;  %v9147_v40 = vpop.permute.xlu0 %2745 }
 0x481   : > { %v2648_v54 = vpop.permute.xlu1 %2647 }
 0x482   : > { %v2720_v52 = vsel %vm1030_vm11, %v2712_v21, %v2648_v54  ;;  %2941 = vrot.lane.b32.xlu0 %v11926_v11, %s6363_s11  ;;  %v11948_v21 = vld [vmem:[#allocation7_spill] sm:$0xff]  ;;  %v11955_v11 = vld [vmem:[#allocation26_spill] sm:$0xff] }
 0x483   : > { %2939 = vrot.lane.b32.xlu1 %v11927_v6, %s6363_s11  ;;  %6076 = vmatmul.mubr.msk.f32.gmra.mrb[22].mxu1 %vm1933_vm12, %v2720_v52 }
 0x484   : > { %v9157_v49 = vpop.permute.xlu0 %2749 }
 0x485   : > { %v9159_v58 = vpop.permute.xlu1 %2747 }
 0x486   : > { %2945 = vrot.lane.b32.xlu0 %v11928_v46, %s6363_s11  ;;  %v11952_v46 = vld [vmem:[#allocation39_spill] sm:$0xff] }
 0x487   : > { %2943 = vrot.lane.b32.xlu1 %v11929_v55, %s6363_s11 }
 0x488   : > { %v9165_v19 = vpop.permute.xlu0 %2753 }
 0x489   : > { %v9167_v62 = vpop.permute.xlu1 %2751 }
 0x48a   : > { %2949 = vrot.lane.b32.xlu0 %v11930_v37, %s6363_s11  ;;  %v11949_v37 = vld [vmem:[#allocation40_spill] sm:$0xff] }
 0x48b   : > { %2947 = vrot.lane.b32.xlu1 %v11931_v39, %s6363_s11 }
 0x48c   : > { %v9173_v56 = vpop.permute.xlu0 %2757 }
 0x48d   : > { %v9175_v42 = vpop.permute.xlu1 %2755 }
 0x48e   : > { %3051 = vrot.lane.b32.xlu0 %v11932_v8, %s6356_s14 }
 0x48f   : > { %2951 = vrot.lane.b32.xlu1 %v9179_v22, %s6363_s11 }
 0x490   : > { %v9183_v15 = vpop.permute.xlu0 %2777 }
 0x491   : > { %v9185_v32 = vpop.permute.xlu1 %2759 }
 0x492   : > { %3055 = vrot.lane.b32.xlu0 %v11934_v29, %s6356_s14 }
 0x493   : > { %3053 = vrot.lane.b32.xlu1 %v11935_v17, %s6356_s14 }
 0x494   : > { %v9191_v34 = vpop.permute.xlu0 %2781 }
 0x495   : > { %v9193_v18 = vpop.permute.xlu1 %2779 }
 0x496   : > { %3059 = vrot.lane.b32.xlu0 %v11936_v13, %s6356_s14 }
 0x497   : > { %3057 = vrot.lane.b32.xlu1 %v11937_v0, %s6356_s14 }
 0x498   : > { %v9199_v61 = vpop.permute.xlu0 %2785 }
 0x499   : > { %v9201_v25 = vpop.permute.xlu1 %2783 }
 0x49a   : > { %3063 = vrot.lane.b32.xlu0 %v11938_v38, %s6356_s14  ;;  %v11971_v38 = vld [vmem:[#allocation12_spill] sm:$0xff] }
 0x49b   : > { %3061 = vrot.lane.b32.xlu1 %v11939_v36, %s6356_s14 }
 0x49c   : > { %v9207_v59 = vpop.permute.xlu0 %2789 }
 0x49d   : > { %v9209_v20 = vpop.permute.xlu1 %2787 }
 0x49e   : > { %3075 = vrot.lane.b32.xlu0 %v11940_v4, %s6357_s15  ;;  %v11958_v4 = vld [vmem:[#allocation45_spill] sm:$0xff] }
 0x49f   : > { %3065 = vrot.lane.b32.xlu1 %v11941_v47, %s6356_s14 }
 0x4a0   : > { %v9215_v63 = vpop.permute.xlu0 %2801 }
 0x4a1   : > { %v9217_v14 = vpop.permute.xlu1 %2791 }
 0x4a2   : > { %11942 = vst [vmem:[#allocation35_spill] sm:$0xff] %v9217_v14  ;;  %3079 = vrot.lane.b32.xlu0 %v11943_v2, %s6357_s15  ;;  %v6264_v14 = vld [vmem:[#allocation3 + $0x141] sm:$0xff] }
 0x4a3   : > { %3077 = vrot.lane.b32.xlu1 %v11944_v35, %s6357_s15 }
 0x4a4   : > { %v9223_v41 = vpop.permute.xlu0 %2805 }
 0x4a5   : > { %v9225_v12 = vpop.permute.xlu1 %2803 }
 0x4a6   : > { %3083 = vrot.lane.b32.xlu0 %v11945_v9, %s6357_s15 }
 0x4a7   : > { %3081 = vrot.lane.b32.xlu1 %v11946_v44, %s6357_s15 }
 0x4a8   : > { %v9231_v10 = vpop.permute.xlu0 %2809 }
 0x4a9   : > { %v9233_v16 = vpop.permute.xlu1 %2807 }
 0x4aa   : > { %3087 = vrot.lane.b32.xlu0 %v11947_v43, %s6357_s15 }
 0x4ab   : > { %3085 = vrot.lane.b32.xlu1 %v11948_v21, %s6357_s15 }
 0x4ac   : > { %v9239_v54 = vpop.permute.xlu0 %2813 }
 0x4ad   : > { %v9241_v52 = vpop.permute.xlu1 %2811 }
 0x4ae   : > { %3099 = vrot.lane.b32.xlu0 %v8693_v26, %s6358_s16 }
 0x4af   : > { %3089 = vrot.lane.b32.xlu1 %v11949_v37, %s6357_s15 }
 0x4b0   : > { %v9247_v8 = vpop.permute.xlu0 %2825 }
 0x4b1   : > { %v9249_v9 = vpop.permute.xlu1 %2815 }
 0x4b2   : > { %11950 = vst [vmem:[#allocation28_spill] sm:$0xff] %v9249_v9  ;;  %3103 = vrot.lane.b32.xlu0 %v8701_v24, %s6358_s16  ;;  %v11966_v9 = vld [vmem:[#allocation11_spill] sm:$0xff] }
 0x4b3   : > { %3101 = vrot.lane.b32.xlu1 %v8705_v45, %s6358_s16 }
 0x4b4   : > { %v9255_v43 = vpop.permute.xlu0 %2829 }
 0x4b5   : > { %v9257_v22 = vpop.permute.xlu1 %2827 }
 0x4b6   : > { %3107 = vrot.lane.b32.xlu0 %v8709_v3, %s6358_s16  ;;  %v11953_v3 = vld [vmem:[#allocation43_spill] sm:$0xff] }
 0x4b7   : > { %3105 = vrot.lane.b32.xlu1 %v8713_v48, %s6358_s16 }
 0x4b8   : > { %v9263_v26 = vpop.permute.xlu0 %2833 }
 0x4b9   : > { %v9265_v39 = vpop.permute.xlu1 %2831 }
 0x4ba   : > { %3111 = vrot.lane.b32.xlu0 %v8717_v23, %s6358_s16  ;;  %v11956_v23 = vld [vmem:[#allocation50_spill] sm:$0xff] }
 0x4bb   : > { %3109 = vrot.lane.b32.xlu1 %v8721_v51, %s6358_s16 }
 0x4bc   : > { %v9271_v24 = vpop.permute.xlu0 %2837 }
 0x4bd   : > { %11951 = vst [vmem:[#allocation8_spill] sm:$0xff] %v9271_v24  ;;  %v9273_v45 = vpop.permute.xlu1 %2835 }
 0x4be   : > { %3123 = vrot.lane.b32.xlu0 %v11952_v46, %s6359_s17 }
 0x4bf   : > { %3113 = vrot.lane.b32.xlu1 %v11953_v3, %s6358_s16 }
 0x4c0   : > { %v2858_v48 = vpop.permute.xlu0 %2857 }
 0x4c1   : > { %v9279_v55 = vpop.permute.xlu1 %2839 }
 0x4c2   : > { %11954 = vst [vmem:[#allocation30_spill] sm:$0xff] %v9279_v55  ;;  %3127 = vrot.lane.b32.xlu0 %v11955_v11, %s6359_s17 }
 0x4c3   : > { %3125 = vrot.lane.b32.xlu1 %v11956_v23, %s6359_s17 }
 0x4c4   : > { %v9285_v51 = vpop.permute.xlu0 %2861 }
 0x4c5   : > { %v9287_v6 = vpop.permute.xlu1 %2859 }
 0x4c6   : > { %3131 = vrot.lane.b32.xlu0 %v11957_v1, %s6359_s17 }
 0x4c7   : > { %3129 = vrot.lane.b32.xlu1 %v11958_v4, %s6359_s17 }
 0x4c8   : > { %v9293_v3 = vpop.permute.xlu0 %2865 }
 0x4c9   : > { %v9295_v37 = vpop.permute.xlu1 %2863 }
 0x4ca   : > { %3135 = vrot.lane.b32.xlu0 %v8554_v60, %s6359_s17 }
 0x4cb   : > { %3133 = vrot.lane.b32.xlu1 %v8544_v57, %s6359_s17 }
 0x4cc   : > { %v9301_v21 = vpop.permute.xlu0 %2869 }
 0x4cd   : > { %11959 = vst [vmem:[#allocation46_spill] sm:$0xff] %v9301_v21  ;;  %v9303_v2 = vpop.permute.xlu1 %2867 }
 0x4ce   : > { %11960 = vst [vmem:[#allocation52_spill] sm:$0xff] %v9303_v2  ;;  %3147 = vrot.lane.b32.xlu0 %v8576_v5, %s6360_s18  ;;  %v3033_v2 = vld [vmem:[#allocation3 + $0x130] sm:$0xff] }
 0x4cf   : > { %3137 = vrot.lane.b32.xlu1 %v8764_v30, %s6359_s17 }
 0x4d0   : > { %v2882_v44 = vpop.permute.xlu0 %2881 }
 0x4d1   : > { %v9309_v35 = vpop.permute.xlu1 %2871 }
 0x4d2   : > { %11961 = vst [vmem:[#allocation29_spill] sm:$0xff] %v9309_v35  ;;  %3151 = vrot.lane.b32.xlu0 %v8587_v28, %s6360_s18  ;;  %v11964_v35 = vld [vmem:[#allocation9_spill] sm:$0xff] }
 0x4d3   : > { %3149 = vrot.lane.b32.xlu1 %v8570_v33, %s6360_s18 }
 0x4d4   : > { %v9315_v60 = vpop.permute.xlu0 %2885 }
 0x4d5   : > { %v2884_v55 = vpop.permute.xlu1 %2883 }
 0x4d6   : > { %3155 = vrot.lane.b32.xlu0 %v8596_v7, %s6360_s18 }
 0x4d7   : > { %3153 = vrot.lane.b32.xlu1 %v8582_v50, %s6360_s18 }
 0x4d8   : > { %v9321_v5 = vpop.permute.xlu0 %2889 }
 0x4d9   : > { %v9323_v30 = vpop.permute.xlu1 %2887 }
 0x4da   : > { %3159 = vrot.lane.b32.xlu0 %v11913_v31, %s6360_s18  ;;  %v11967_v31 = vld [vmem:[#allocation32_spill] sm:$0xff] }
 0x4db   : > { %3157 = vrot.lane.b32.xlu1 %v11916_v53, %s6360_s18 }
 0x4dc   : > { %v9329_v33 = vpop.permute.xlu0 %2893 }
 0x4dd   : > { %11962 = vst [vmem:[#allocation58_spill] sm:$0xff] %v9329_v33  ;;  %v9331_v28 = vpop.permute.xlu1 %2891  ;;  %v11968_v33 = vld [vmem:[#allocation13_spill] sm:$0xff] }
 0x4de   : > { %11963 = vst [vmem:[#allocation42_spill] sm:$0xff] %v9331_v28  ;;  %3179 = vrot.lane.b32.xlu0 %v11964_v35, %s6361_s19  ;;  %v11969_v28 = vld [vmem:[#allocation10_spill] sm:$0xff] }
 0x4df   : > { %3161 = vrot.lane.b32.xlu1 %v11924_v27, %s6360_s18 }
 0x4e0   : > { %v2906_v50 = vpop.permute.xlu0 %2905 }
 0x4e1   : > { %v9337_v7 = vpop.permute.xlu1 %2895 }
 0x4e2   : > { %11965 = vst [vmem:[#allocation36_spill] sm:$0xff] %v9337_v7  ;;  %3183 = vrot.lane.b32.xlu0 %v11966_v9, %s6361_s19  ;;  %v2961_v7 = vsel %vm326_vm0, %v6264_v14, %v9147_v40  ;;  %v11970_v9 = vld [vmem:[#allocation15_spill] sm:$0xff] }
 0x4e3   : > { %3181 = vrot.lane.b32.xlu1 %v11967_v31, %s6361_s19  ;;  %v2969_v31 = vsel %vm976_vm6, %v2961_v7, %v9183_v15  ;;  %v2962_v15 = vsel %vm326_vm0, %v11952_v46, %v9159_v58  ;;  %v11974_v7 = vld [vmem:[#allocation52_spill] sm:$0xff] }
 0x4e4   : > { %v2910_v53 = vpop.permute.xlu0 %2909  ;;  %v2970_v14 = vsel %vm976_vm6, %v2962_v15, %v9193_v18 }
 0x4e5   : > { %v2908_v21 = vpop.permute.xlu1 %2907  ;;  %v2978_v58 = vsel %vm985_vm7, %v2970_v14, %v9225_v12  ;;  %v2967_v12 = vsel %vm326_vm0, %v8544_v57, %v9173_v56 }
 0x4e6   : > { %3187 = vrot.lane.b32.xlu0 %v11968_v33, %s6361_s19  ;;  %v2977_v33 = vsel %vm985_vm7, %v2969_v31, %v9215_v63  ;;  %v2963_v63 = vsel %vm326_vm0, %v11956_v23, %v9157_v49  ;;  %v2965_v49 = vsel %vm326_vm0, %v11958_v4, %v9165_v19 }
 0x4e7   : > { %3185 = vrot.lane.b32.xlu1 %v11969_v28, %s6361_s19  ;;  %v2985_v24 = vsel %vm994_vm8, %v2977_v33, %v9247_v8  ;;  %v11978_v33 = vld [vmem:[#allocation42_spill] sm:$0xff] }
 0x4e8   : > { %v9347_v35 = vpop.permute.xlu0 %2913  ;;  %v2993_v40 = vsel %vm1003_vm9, %v2985_v24, %v2858_v48  ;;  %v2975_v48 = vsel %vm976_vm6, %v2967_v12, %v9207_v59  ;;  %v11984_v12 = vld [vmem:[#allocation29_spill] sm:$0xff] }
 0x4e9   : > { %v9349_v27 = vpop.permute.xlu1 %2911 }
 0x4ea   : > { %3191 = vrot.lane.b32.xlu0 %v11970_v9, %s6361_s19  ;;  %v11977_v9 = vld [vmem:[#allocation46_spill] sm:$0xff] }
 0x4eb   : > { %3189 = vrot.lane.b32.xlu1 %v11971_v38, %s6361_s19  ;;  %v3001_v38 = vsel %vm1012_vm10, %v2993_v40, %v2882_v44 }
 0x4ec   : > { %v9361_v28 = vpop.permute.xlu0 %2917  ;;  %v3009_v8 = vsel %vm1021_vm5, %v3001_v38, %v2906_v50  ;;  %v11973_v50 = vld [vmem:[#allocation8_spill] sm:$0xff]  ;;  %v9485_v38 = vld [vmem:[#allocation3 + $0x91] sm:$0xff] }
 0x4ed   : > { %v9365_v47 = vpop.permute.xlu1 %2915  ;;  %11979 = vst [vmem:[#allocation44_spill] sm:$0xff] %v9485_v38 }
 0x4ee   : > { %3211 = vrot.lane.b32.xlu0 %v11935_v17, %s6362_s24  ;;  %v2971_v17 = vsel %vm976_vm6, %v2963_v63, %v9191_v34  ;;  %v2964_v34 = vsel %vm326_vm0, %v11955_v11, %v9167_v62  ;;  %v11980_v63 = vld [vmem:[#allocation28_spill] sm:$0xff] }
 0x4ef   : > { %3193 = vrot.lane.b32.xlu1 %v3033_v2, %s6361_s19  ;;  %v2979_v18 = vsel %vm985_vm7, %v2971_v17, %v9223_v41  ;;  %v2986_v2 = vsel %vm994_vm8, %v2978_v58, %v9257_v22  ;;  %v2966_v22 = vsel %vm326_vm0, %v11957_v1, %v9175_v42  ;;  %v2972_v11 = vsel %vm976_vm6, %v2964_v34, %v9201_v25  ;;  %v11983_v34 = vld [vmem:[#allocation5_spill] sm:$0xff] }
 0x4f0   : > { %v2938_v24 = vpop.permute.xlu0 %2937  ;;  %v2987_v19 = vsel %vm994_vm8, %v2979_v18, %v9255_v43  ;;  %v2994_v4 = vsel %vm1003_vm9, %v2986_v2, %v9287_v6  ;;  %v2980_v6 = vsel %vm985_vm7, %v2972_v11, %v9233_v16 }
 0x4f1   : > { %v3017_v46 = vsel %vm1030_vm11, %v3009_v8, %v2938_v24  ;;  %v9386_v44 = vpop.permute.xlu1 %2919  ;;  %v2995_v62 = vsel %vm1003_vm9, %v2987_v19, %v9285_v51  ;;  %v3002_v57 = vsel %vm1012_vm10, %v2994_v4, %v2884_v55  ;;  %v2988_v41 = vsel %vm994_vm8, %v2980_v6, %v9265_v39  ;;  %v9441_v39 = vld [vmem:[#allocation3 + $0x1b1] sm:$0xff] }
 0x4f2   : > { %3215 = vrot.lane.b32.xlu0 %v11937_v0, %s6362_s24  ;;  %6078 = vmatprep.mubr.msk.f32.mxu1 %vm1933_vm12, %v3017_v46  ;;  %v2973_v0 = vsel %vm976_vm6, %v2965_v49, %v9199_v61  ;;  %v3010_v1 = vsel %vm1021_vm5, %v3002_v57, %v2908_v21  ;;  %v2996_v16 = vsel %vm1003_vm9, %v2988_v41, %v9295_v37  ;;  %v11981_v8 = vld [vmem:[#allocation58_spill] sm:$0xff]  ;;  %v11989_v41 = vld [vmem:[#allocation40_spill] sm:$0xff] }
 0x4f3   : > { %3213 = vrot.lane.b32.xlu1 %v11934_v29, %s6362_s24  ;;  %v3003_v29 = vsel %vm1012_vm10, %v2995_v62, %v9315_v60  ;;  %v2981_v25 = vsel %vm985_vm7, %v2973_v0, %v9231_v10  ;;  %v2968_v10 = vsel %vm326_vm0, %v9441_v39, %v9185_v32  ;;  %v3004_v37 = vsel %vm1012_vm10, %v2996_v16, %v9323_v30  ;;  %v11982_v46 = vld [vmem:[#allocation30_spill] sm:$0xff]  ;;  %v11987_v0 = vld [vmem:[#allocation24_spill] sm:$0xff] }
 0x4f4   : > { %v2942_v56 = vpop.permute.xlu0 %2941  ;;  %v3011_v55 = vsel %vm1021_vm5, %v3003_v29, %v2910_v53  ;;  %v2989_v61 = vsel %vm994_vm8, %v2981_v25, %v9263_v26 }
 0x4f5   : > { %v2940_v42 = vpop.permute.xlu1 %2939  ;;  %v3019_v21 = vsel %vm1030_vm11, %v3011_v55, %v2942_v56  ;;  %v2997_v26 = vsel %vm1003_vm9, %v2989_v61, %v9293_v3  ;;  %v2983_v3 = vsel %vm985_vm7, %v2975_v48, %v9239_v54  ;;  %v11975_v54 = vld [vmem:[#allocation20_spill] sm:$0xff]  ;;  %v9535_v55 = vld [vmem:[#allocation3 + $0x111] sm:$0xff] }
 0x4f6   : > { %v3018_v43 = vsel %vm1030_vm11, %v3010_v1, %v2940_v42  ;;  %3219 = vrot.lane.b32.xlu0 %v11939_v36, %s6362_s24  ;;  %v2974_v36 = vsel %vm976_vm6, %v2966_v22, %v9209_v20  ;;  %v3005_v32 = vsel %vm1012_vm10, %v2997_v26, %v9321_v5  ;;  %v3012_v20 = vsel %vm1021_vm5, %v3004_v37, %v9349_v27  ;;  %v11986_v56 = vld [vmem:[#allocation4_spill] sm:$0xff]  ;;  %v11988_v1 = vld [vmem:[#allocation7_spill] sm:$0xff] }
 0x4f7   : > { %3217 = vrot.lane.b32.xlu1 %v11936_v13, %s6362_s24  ;;  %6079 = vmatmul.mubr.msk.f32.gmra.mrb[24].mxu1 %vm1933_vm12, %v3018_v43  ;;  %v2982_v23 = vsel %vm985_vm7, %v2974_v36, %v9241_v52  ;;  %v3013_v30 = vsel %vm1021_vm5, %v3005_v32, %v9347_v35  ;;  %v11972_v52 = vld [vmem:[#allocation23_spill] sm:$0xff]  ;;  %v2991_v5 = vsel %vm994_vm8, %v2983_v3, %v11973_v50  ;;  %v11994_v50 = vld [vmem:[#allocation48_spill] sm:$0xff] }
 0x4f8   : > { %6081 = vmatprep.mubr.msk.f32.mxu1 %vm1933_vm12, %v3019_v21  ;;  %v2946_v13 = vpop.permute.xlu0 %2945  ;;  %v2990_v60 = vsel %vm994_vm8, %v2982_v23, %v9273_v45  ;;  %v11976_v45 = vld [vmem:[#allocation35_spill] sm:$0xff]  ;;  %v2999_v31 = vsel %vm1003_vm9, %v2991_v5, %v11977_v9  ;;  %v11991_v21 = vld [vmem:[#allocation22_spill] sm:$0xff]  ;;  %v6269_v5 = vld [vmem:[#allocation3 + $0x201] sm:$0xff] }
 0x4f9   : > { %v2944_v51 = vpop.permute.xlu1 %2943  ;;  %v2998_v53 = vsel %vm1003_vm9, %v2990_v60, %v11974_v7  ;;  %v3021_v27 = vsel %vm1030_vm11, %v3013_v30, %v2946_v13  ;;  %v2976_v35 = vsel %vm976_vm6, %v2968_v10, %v11976_v45  ;;  %v3007_v24 = vsel %vm1012_vm10, %v2999_v31, %v11981_v8  ;;  %v9525_v42 = vld [vmem:[#allocation3 + $0xf1] sm:$0xff]  ;;  %v11992_v13 = vld [vmem:[#allocation41_spill] sm:$0xff] }
 0x4fa   : > { %v3020_v59 = vsel %vm1030_vm11, %v3012_v20, %v2944_v51  ;;  %3223 = vrot.lane.b32.xlu0 %v11972_v52, %s6362_s24  ;;  %v3006_v40 = vsel %vm1012_vm10, %v2998_v53, %v11978_v33  ;;  %v2984_v14 = vsel %vm985_vm7, %v2976_v35, %v11980_v63  ;;  %v3015_v18 = vsel %vm1021_vm5, %v3007_v24, %v9361_v28  ;;  %v9541_v61 = vld [vmem:[#allocation3 + $0x131] sm:$0xff]  ;;  %v11993_v20 = vld [vmem:[#allocation53_spill] sm:$0xff] }
 0x4fb   : > { %3221 = vrot.lane.b32.xlu1 %v11975_v54, %s6362_s24  ;;  %6082 = vmatmul.mubr.msk.f32.gmra.mrb[26].mxu1 %vm1933_vm12, %v3020_v59  ;;  %v3014_v17 = vsel %vm1021_vm5, %v3006_v40, %v9365_v47  ;;  %v2992_v49 = vsel %vm994_vm8, %v2984_v14, %v11982_v46  ;;  %v11985_v47 = vld [vmem:[#allocation36_spill] sm:$0xff]  ;;  %11990 = vst [vmem:[#allocation60_spill] sm:$0xff] %v9541_v61  ;;  %v6266_v32 = vld [vmem:[#allocation3 + $0x151] sm:$0xff]  ;;  %v11996_v54 = vld [vmem:[#allocation37_spill] sm:$0xff] }
 0x4fc   : > { %6084 = vmatprep.mubr.msk.f32.mxu1 %vm1933_vm12, %v3021_v27  ;;  %v2950_v15 = vpop.permute.xlu0 %2949  ;;  %v3000_v19 = vsel %vm1003_vm9, %v2992_v49, %v11984_v12  ;;  %v6267_v60 = vld [vmem:[#allocation3 + $0x1f1] sm:$0xff]  ;;  %v6268_v30 = vld [vmem:[#allocation3 + $0x161] sm:$0xff] }
 0x4fd   : > { %v2948_v58 = vpop.permute.xlu1 %2947  ;;  %v3023_v4 = vsel %vm1030_vm11, %v3015_v18, %v2950_v15  ;;  %v3008_v22 = vsel %vm1012_vm10, %v3000_v19, %v11985_v47  ;;  %v11995_v27 = vld [vmem:[#allocation47_spill] sm:$0xff]  ;;  %v9599_v31 = vld [vmem:[#allocation3 + $0x21] sm:$0xff] }
 0x4fe   : > { %v3022_v2 = vsel %vm1030_vm11, %v3014_v17, %v2948_v58  ;;  %3243 = vrot.lane.b32.xlu0 %v11983_v34, %s6363_s11  ;;  %v3016_v11 = vsel %vm1021_vm5, %v3008_v22, %v9386_v44  ;;  %v11997_v9 = vld [vmem:[#allocation55_spill] sm:$0xff]  ;;  %11998 = vst [vmem:[#allocation34_spill] sm:$0xff] %v9599_v31  ;;  %v6273_v24 = vld [vmem:[#allocation3 + $0x181] sm:$0xff] }
 0x4ff   : > { %3225 = vrot.lane.b32.xlu1 %v9485_v38, %s6362_s24  ;;  %6085 = vmatmul.mubr.msk.f32.gmra.mrb[28].mxu1 %vm1933_vm12, %v3022_v2  ;;  %v9607_v15 = vld [vmem:[#allocation3 + $0x31] sm:$0xff]  ;;  %v6274_v17 = vld [vmem:[#allocation3 + $0xc1] sm:$0xff] }
 0x500   : > { %6087 = vmatprep.mubr.msk.f32.mxu1 %vm1933_vm12, %v3023_v4  ;;  %v9509_v28 = vpop.permute.xlu0 %3051  ;;  %11999 = vst [vmem:[#allocation14_spill] sm:$0xff] %v9607_v15  ;;  %v6272_v63 = vld [vmem:[#allocation3 + $0x171] sm:$0xff]  ;;  %v6278_v22 = vld [vmem:[#allocation3 + $0x221] sm:$0xff] }
 0x501   : > { %v2952_v62 = vpop.permute.xlu1 %2951  ;;  %v6275_v49 = vld [vmem:[#allocation3 + $0xd1] sm:$0xff]  ;;  %v9745_v38 = vld [vmem:[#allocation3 + $0x61] sm:$0xff] }
 0x502   : > { %v3024_v57 = vsel %vm1030_vm11, %v3016_v11, %v2952_v62  ;;  %3247 = vrot.lane.b32.xlu0 %v11986_v56, %s6363_s11  ;;  %v6276_v18 = vld [vmem:[#allocation3 + $0x211] sm:$0xff] }
 0x503   : > { %3245 = vrot.lane.b32.xlu1 %v11987_v0, %s6363_s11  ;;  %6088 = vmatmul.mubr.msk.f32.gmra.mrb[30].mxu1 %vm1933_vm12, %v3024_v57  ;;  %v6277_v12 = vld [vmem:[#allocation3 + $0xf1] sm:$0xff]  ;;  %v9642_v57 = vld [vmem:[#allocation3 + $0x101] sm:$0xff] }
 0x504   : > { %v9519_v6 = vpop.permute.xlu0 %3055  ;;  %v12000_v47 = vld [vmem:[#allocation51_spill] sm:$0xff] }
 0x505   : > { %v9521_v29 = vpop.permute.xlu1 %3053 }
 0x506   : > { %3251 = vrot.lane.b32.xlu0 %v11988_v1, %s6363_s11  ;;  %v12001_v1 = vld [vmem:[#allocation49_spill] sm:$0xff] }
 0x507   : > { %3249 = vrot.lane.b32.xlu1 %v9525_v42, %s6363_s11 }
 0x508   : > { %v9529_v44 = vpop.permute.xlu0 %3059 }
 0x509   : > { %v9531_v25 = vpop.permute.xlu1 %3057 }
 0x50a   : > { %3255 = vrot.lane.b32.xlu0 %v11989_v41, %s6363_s11  ;;  %v12002_v41 = vld [vmem:[#allocation54_spill] sm:$0xff] }
 0x50b   : > { %3253 = vrot.lane.b32.xlu1 %v9535_v55, %s6363_s11 }
 0x50c   : > { %v9539_v43 = vpop.permute.xlu0 %3063 }
 0x50d   : > { %v9543_v16 = vpop.permute.xlu1 %3061 }
 0x50e   : > { %3339 = vrot.lane.b32.xlu0 %v11991_v21, %s6356_s14 }
 0x50f   : > { %3257 = vrot.lane.b32.xlu1 %v9541_v61, %s6363_s11  ;;  %v12011_v61 = vld [vmem:[#allocation59_spill] sm:$0xff] }
 0x510   : > { %v9549_v10 = vpop.permute.xlu0 %3075 }
 0x511   : > { %v9551_v36 = vpop.permute.xlu1 %3065 }
 0x512   : > { %3343 = vrot.lane.b32.xlu0 %v11987_v0, %s6356_s14 }
 0x513   : > { %3341 = vrot.lane.b32.xlu1 %v11983_v34, %s6356_s14 }
 0x514   : > { %v9557_v26 = vpop.permute.xlu0 %3079 }
 0x515   : > { %v9559_v37 = vpop.permute.xlu1 %3077 }
 0x516   : > { %3363 = vrot.lane.b32.xlu0 %v11992_v13, %s6357_s15  ;;  %v9661_v13 = vld [vmem:[%s11526_s5] ss:$0 sm:$0xff] }
 0x517   : > { %3345 = vrot.lane.b32.xlu1 %v11986_v56, %s6356_s14  ;;  %12003 = vst [vmem:[#allocation16_spill] sm:$0xff] %v9661_v13 }
 0x518   : > { %v9565_v48 = vpop.permute.xlu0 %3083 }
 0x519   : > { %v9567_v23 = vpop.permute.xlu1 %3081 }
 0x51a   : > { %3387 = vrot.lane.b32.xlu0 %v6266_v32, %s6358_s16 }
 0x51b   : > { %3365 = vrot.lane.b32.xlu1 %v11993_v20, %s6357_s15 }
 0x51c   : > { %v9572_v51 = vpop.permute.xlu0 %3087 }
 0x51d   : > { %v9574_v3 = vpop.permute.xlu1 %3085 }
 0x51e   : > { %3411 = vrot.lane.b32.xlu0 %v6267_v60, %s6359_s17  ;;  %v12004_v60 = vld [vmem:[#allocation57_spill] sm:$0xff] }
 0x51f   : > { %3389 = vrot.lane.b32.xlu1 %v6268_v30, %s6358_s16 }
 0x520   : > { %v9578_v59 = vpop.permute.xlu0 %3099 }
 0x521   : > { %v9580_v52 = vpop.permute.xlu1 %3089 }
 0x522   : > { %3435 = vrot.lane.b32.xlu0 %v11994_v50, %s6360_s18  ;;  %v9668_v50 = vld [vmem:[#allocation3 + $0x41] sm:$0xff] }
 0x523   : > { %3413 = vrot.lane.b32.xlu1 %v6269_v5, %s6359_s17  ;;  %12005 = vst [vmem:[#allocation17_spill] sm:$0xff] %v9668_v50 }
 0x524   : > { %v9585_v7 = vpop.permute.xlu0 %3103 }
 0x525   : > { %v9587_v53 = vpop.permute.xlu1 %3101 }
 0x526   : > { %3437 = vrot.lane.b32.xlu0 %v11995_v27, %s6360_s18 }
 0x527   : > { %3367 = vrot.lane.b32.xlu1 %v11996_v54, %s6357_s15 }
 0x528   : > { %v9593_v45 = vpop.permute.xlu0 %3107 }
 0x529   : > { %v9595_v35 = vpop.permute.xlu1 %3105 }
 0x52a   : > { %3369 = vrot.lane.b32.xlu0 %v11997_v9, %s6357_s15 }
 0x52b   : > { %3459 = vrot.lane.b32.xlu1 %v9599_v31, %s6361_s19  ;;  %v6286_v31 = vld [vmem:[#allocation3 + $0x111] sm:$0xff] }
 0x52c   : > { %v9603_v33 = vpop.permute.xlu0 %3111 }
 0x52d   : > { %v9605_v40 = vpop.permute.xlu1 %3109 }
 0x52e   : > { %3461 = vrot.lane.b32.xlu0 %v9607_v15, %s6361_s19 }
 0x52f   : > { %3391 = vrot.lane.b32.xlu1 %v6272_v63, %s6358_s16 }
 0x530   : > { %v9612_v14 = vpop.permute.xlu0 %3123 }
 0x531   : > { %v9614_v8 = vpop.permute.xlu1 %3113 }
 0x532   : > { %3393 = vrot.lane.b32.xlu0 %v6273_v24, %s6358_s16 }
 0x533   : > { %3483 = vrot.lane.b32.xlu1 %v6274_v17, %s6362_s24 }
 0x534   : > { %v9618_v58 = vpop.permute.xlu0 %3127 }
 0x535   : > { %v9620_v46 = vpop.permute.xlu1 %3125 }
 0x536   : > { %3485 = vrot.lane.b32.xlu0 %v6275_v49, %s6362_s24 }
 0x537   : > { %3415 = vrot.lane.b32.xlu1 %v6276_v18, %s6359_s17  ;;  %v9677_v18 = vld [vmem:[#allocation3 + $0x51] sm:$0xff] }
 0x538   : > { %v9624_v2 = vpop.permute.xlu0 %3131  ;;  %12006 = vst [vmem:[#allocation18_spill] sm:$0xff] %v9677_v18 }
 0x539   : > { %v9626_v34 = vpop.permute.xlu1 %3129 }
 0x53a   : > { %3347 = vrot.lane.b32.xlu0 %v6277_v12, %s6356_s14 }
 0x53b   : > { %3515 = vrot.lane.b32.xlu1 %v11993_v20, %s6363_s11 }
 0x53c   : > { %v9631_v19 = vpop.permute.xlu0 %3135 }
 0x53d   : > { %v9633_v4 = vpop.permute.xlu1 %3133 }
 0x53e   : > { %3439 = vrot.lane.b32.xlu0 %v12000_v47, %s6360_s18  ;;  %v6282_v47 = vld [vmem:[#allocation3 + $0x191] sm:$0xff] }
 0x53f   : > { %3417 = vrot.lane.b32.xlu1 %v6278_v22, %s6359_s17 }
 0x540   : > { %v9638_v11 = vpop.permute.xlu0 %3147 }
 0x541   : > { %v9640_v62 = vpop.permute.xlu1 %3137 }
 0x542   : > { %3349 = vrot.lane.b32.xlu0 %v9642_v57, %s6356_s14 }
 0x543   : > { %3517 = vrot.lane.b32.xlu1 %v11996_v54, %s6363_s11 }
 0x544   : > { %v9648_v56 = vpop.permute.xlu0 %3151 }
 0x545   : > { %v9650_v0 = vpop.permute.xlu1 %3149 }
 0x546   : > { %3441 = vrot.lane.b32.xlu0 %v12001_v1, %s6360_s18 }
 0x547   : > { %3371 = vrot.lane.b32.xlu1 %v12002_v41, %s6357_s15 }
 0x548   : > { %v9656_v21 = vpop.permute.xlu0 %3155 }
 0x549   : > { %v9663_v32 = vpop.permute.xlu1 %3153 }
 0x54a   : > { %v6068_v20 = vpop.f32.mrb[16].mxu1  ;;  %3373 = vrot.lane.b32.xlu0 %v12004_v60, %s6357_s15 }
 0x54b   : > { %v3786_v30 = vadd.f32 %v6068_v20, %v9661_v13  ;;  %3463 = vrot.lane.b32.xlu1 %v9668_v50, %s6361_s19  ;;  %v3780_v5 = vpop.f32.mrb[17].mxu1 }
 0x54c   : > { %v3781_v27 = vadd.f32 %v9661_v13, %v3780_v5  ;;  %v9673_v54 = vpop.permute.xlu0 %3159 }
 0x54d   : > { %v3940_v63 = vmax.f32 %v3786_v30, 0.0  ;;  %v9675_v24 = vpop.permute.xlu1 %3157 }
 0x54e   : > { %v3939_v17 = vmax.f32 %v3781_v27, 0.0  ;;  %v6071_v49 = vpop.f32.mrb[18].mxu1  ;;  %3465 = vrot.lane.b32.xlu0 %v9677_v18, %s6361_s19  ;;  %v6283_v18 = vld [vmem:[#allocation3 + $0x1a1] sm:$0xff] }
 0x54f   : > { %3972 = vst.msk [vmem:[#allocation2 + $0x21] sm:$0xff] %vm326_vm0, %v3940_v63  ;;  %v3796_v12 = vadd.f32 %v6071_v49, %v9661_v13  ;;  %3395 = vrot.lane.b32.xlu1 %v6282_v47, %s6358_s16  ;;  %v3790_v22 = vpop.f32.mrb[19].mxu1  ;;  %v6284_v49 = vld [vmem:[#allocation3 + $0xe1] sm:$0xff] }
 0x550   : > { %3971 = vst.msk [vmem:[#allocation2 + $0x11] sm:$0xff] %vm326_vm0, %v3939_v17  ;;  %v3791_v1 = vadd.f32 %v9661_v13, %v3790_v22  ;;  %v9686_v20 = vpop.permute.xlu0 %3179 }
 0x551   : > { %v3942_v60 = vmax.f32 %v3796_v12, 0.0  ;;  %v9688_v30 = vpop.permute.xlu1 %3161 }
 0x552   : > { %v3941_v5 = vmax.f32 %v3791_v1, 0.0  ;;  %v6074_v27 = vpop.f32.mrb[20].mxu1  ;;  %3397 = vrot.lane.b32.xlu0 %v6283_v18, %s6358_s16 }
 0x553   : > { %3974 = vst.msk [vmem:[#allocation2 + $0x41] sm:$0xff] %vm326_vm0, %v3942_v60  ;;  %v3806_v63 = vadd.f32 %v6074_v27, %v9661_v13  ;;  %3487 = vrot.lane.b32.xlu1 %v6284_v49, %s6362_s24  ;;  %v3800_v17 = vpop.f32.mrb[21].mxu1  ;;  %v6285_v60 = vld [vmem:[#allocation3 + $0x231] sm:$0xff] }
 0x554   : > { %3973 = vst.msk [vmem:[#allocation2 + $0x31] sm:$0xff] %vm326_vm0, %v3941_v5  ;;  %v3801_v47 = vadd.f32 %v9661_v13, %v3800_v17  ;;  %v9696_v12 = vpop.permute.xlu0 %3183 }
 0x555   : > { %v3944_v22 = vmax.f32 %v3806_v63, 0.0  ;;  %v9698_v1 = vpop.permute.xlu1 %3181 }
 0x556   : > { %v3943_v50 = vmax.f32 %v3801_v47, 0.0  ;;  %v6077_v15 = vpop.f32.mrb[22].mxu1  ;;  %3489 = vrot.lane.b32.xlu0 %v9525_v42, %s6362_s24 }
 0x557   : > { %3976 = vst.msk [vmem:[#allocation2 + $0x61] sm:$0xff] %vm326_vm0, %v3944_v22  ;;  %v3816_v18 = vadd.f32 %v6077_v15, %v9661_v13  ;;  %3419 = vrot.lane.b32.xlu1 %v6285_v60, %s6359_s17  ;;  %v3810_v5 = vpop.f32.mrb[23].mxu1  ;;  %v6287_v22 = vld [vmem:[#allocation3 + $0x241] sm:$0xff] }
 0x558   : > { %3975 = vst.msk [vmem:[#allocation2 + $0x51] sm:$0xff] %vm326_vm0, %v3943_v50  ;;  %v3811_v27 = vadd.f32 %v9661_v13, %v3810_v5  ;;  %v9707_v63 = vpop.permute.xlu0 %3187  ;;  %v12007_v50 = vld [vmem:[#allocation33_spill] sm:$0xff] }
 0x559   : > { %v3946_v49 = vmax.f32 %v3816_v18, 0.0  ;;  %v9709_v17 = vpop.permute.xlu1 %3185 }
 0x55a   : > { %v3945_v47 = vmax.f32 %v3811_v27, 0.0  ;;  %3351 = vrot.lane.b32.xlu0 %v6286_v31, %s6356_s14  ;;  %v9725_v31 = vld [vmem:[#allocation3 + $0x121] sm:$0xff]  ;;  %v12009_v27 = vld [vmem:[#allocation31_spill] sm:$0xff] }
 0x55b   : > { %3978 = vst.msk [vmem:[#allocation2 + $0x81] sm:$0xff] %vm326_vm0, %v3946_v49  ;;  %3519 = vrot.lane.b32.xlu1 %v11997_v9, %s6363_s11  ;;  %12008 = vst [vmem:[#allocation19_spill] sm:$0xff] %v9725_v31  ;;  %v12010_v49 = vld [vmem:[#allocation56_spill] sm:$0xff] }
 0x55c   : > { %3977 = vst.msk [vmem:[#allocation2 + $0x71] sm:$0xff] %vm326_vm0, %v3945_v47  ;;  %v9716_v42 = vpop.permute.xlu0 %3191 }
 0x55d   : > { %v9718_v15 = vpop.permute.xlu1 %3189 }
 0x55e   : > { %3443 = vrot.lane.b32.xlu0 %v12007_v50, %s6360_s18 }
 0x55f   : > { %3421 = vrot.lane.b32.xlu1 %v6287_v22, %s6359_s17  ;;  %v6289_v22 = vld [vmem:[#allocation3 + $0xb0] sm:$0xff] }
 0x560   : > { %v3212_v18 = vpop.permute.xlu0 %3211  ;;  %v3267_v13 = vsel %vm326_vm0, %v6289_v22, %v9509_v28  ;;  %v9759_v22 = vld [vmem:[#allocation3 + $0x71] sm:$0xff] }
 0x561   : > { %v9723_v60 = vpop.permute.xlu1 %3193  ;;  %12012 = vst [vmem:[#allocation21_spill] sm:$0xff] %v9759_v22 }
 0x562   : > { %3353 = vrot.lane.b32.xlu0 %v9725_v31, %s6356_s14 }
 0x563   : > { %3521 = vrot.lane.b32.xlu1 %v12002_v41, %s6363_s11  ;;  %v3275_v41 = vsel %vm976_vm6, %v3267_v13, %v9549_v10  ;;  %v6292_v10 = vld [vmem:[#allocation3 + $0xc0] sm:$0xff] }
 0x564   : > { %v3216_v9 = vpop.permute.xlu0 %3215  ;;  %v3268_v13 = vsel %vm326_vm0, %v6292_v10, %v9521_v29  ;;  %v6295_v10 = vld [vmem:[#allocation3 + $0x1c1] sm:$0xff] }
 0x565   : > { %v3214_v5 = vpop.permute.xlu1 %3213 }
 0x566   : > { %3445 = vrot.lane.b32.xlu0 %v12009_v27, %s6360_s18  ;;  %v3283_v27 = vsel %vm985_vm7, %v3275_v41, %v9578_v59 }
 0x567   : > { %3375 = vrot.lane.b32.xlu1 %v12010_v49, %s6357_s15  ;;  %v3291_v31 = vsel %vm994_vm8, %v3283_v27, %v9612_v14  ;;  %v6293_v14 = vld [vmem:[#allocation3 + $0xd0] sm:$0xff] }
 0x568   : > { %v9735_v47 = vpop.permute.xlu0 %3219  ;;  %v3269_v41 = vsel %vm326_vm0, %v6293_v14, %v9519_v6 }
 0x569   : > { %v9737_v50 = vpop.permute.xlu1 %3217 }
 0x56a   : > { %3377 = vrot.lane.b32.xlu0 %v12011_v61, %s6357_s15  ;;  %v3299_v61 = vsel %vm1003_vm9, %v3291_v31, %v9638_v11  ;;  %v3276_v11 = vsel %vm976_vm6, %v3268_v13, %v9559_v37  ;;  %v6297_v13 = vld [vmem:[#allocation3 + $0x110] sm:$0xff] }
 0x56b   : > { %3467 = vrot.lane.b32.xlu1 %v9745_v38, %s6361_s19  ;;  %v3307_v59 = vsel %vm1012_vm10, %v3299_v61, %v9686_v20  ;;  %v3284_v29 = vsel %vm985_vm7, %v3276_v11, %v9587_v53 }
 0x56c   : > { %v9751_v49 = vpop.permute.xlu0 %3223  ;;  %v3315_v31 = vsel %vm1021_vm5, %v3307_v59, %v3212_v18  ;;  %v3292_v18 = vsel %vm994_vm8, %v3284_v29, %v9620_v46  ;;  %v3273_v59 = vsel %vm326_vm0, %v6297_v13, %v9539_v43  ;;  %v6298_v46 = vld [vmem:[#allocation3 + $0x100] sm:$0xff]  ;;  %v6302_v13 = vld [vmem:[#allocation3 + $0x1b2] sm:$0xff] }
 0x56d   : > { %v9755_v28 = vpop.permute.xlu1 %3221 }
 0x56e   : > { %3469 = vrot.lane.b32.xlu0 %v9759_v22, %s6361_s19  ;;  %v3277_v22 = vsel %vm976_vm6, %v3269_v41, %v9557_v26  ;;  %v6296_v26 = vld [vmem:[#allocation3 + $0xe0] sm:$0xff] }
 0x56f   : > { %3399 = vrot.lane.b32.xlu1 %v9441_v39, %s6358_s16  ;;  %v6294_v39 = vld [vmem:[#allocation3 + $0xf0] sm:$0xff]  ;;  %v3285_v37 = vsel %vm985_vm7, %v3277_v22, %v9585_v7  ;;  %v3270_v53 = vsel %vm326_vm0, %v6296_v26, %v9531_v25  ;;  %v3300_v7 = vsel %vm1003_vm9, %v3292_v18, %v9650_v0  ;;  %v3272_v22 = vsel %vm326_vm0, %v6298_v46, %v9543_v16 }
 0x570   : > { %v3244_v27 = vpop.permute.xlu0 %3243  ;;  %v3271_v6 = vsel %vm326_vm0, %v6294_v39, %v9529_v44  ;;  %v3293_v44 = vsel %vm994_vm8, %v3285_v37, %v9618_v58  ;;  %v3278_v25 = vsel %vm976_vm6, %v3270_v53, %v9567_v23  ;;  %v3308_v43 = vsel %vm1012_vm10, %v3300_v7, %v9698_v1  ;;  %v12013_v7 = vld [vmem:[#allocation38_spill] sm:$0xff] }
 0x571   : > { %v3323_v20 = vsel %vm1030_vm11, %v3315_v31, %v3244_v27  ;;  %v9779_v61 = vpop.permute.xlu1 %3225  ;;  %v3301_v14 = vsel %vm1003_vm9, %v3293_v44, %v9648_v56  ;;  %v3279_v0 = vsel %vm976_vm6, %v3271_v6, %v9565_v48  ;;  %v3316_v16 = vsel %vm1021_vm5, %v3308_v43, %v3214_v5  ;;  %v6299_v5 = vld [vmem:[#allocation3 + $0x251] sm:$0xff]  ;;  %v6301_v6 = vld [vmem:[#allocation3 + $0x261] sm:$0xff] }
 0x572   : > { %3401 = vrot.lane.b32.xlu0 %v6295_v10, %s6358_s16  ;;  %6090 = vmatprep.mubr.msk.f32.mxu1 %vm1933_vm12, %v3323_v20  ;;  %v3309_v41 = vsel %vm1012_vm10, %v3301_v14, %v9696_v12  ;;  %v3287_v23 = vsel %vm985_vm7, %v3279_v0, %v9593_v45  ;;  %v6300_v45 = vld [vmem:[#allocation3 + $0x120] sm:$0xff]  ;;  %v3281_v27 = vsel %vm976_vm6, %v3273_v59, %v9572_v51 }
 0x573   : > { %3491 = vrot.lane.b32.xlu1 %v9642_v57, %s6362_s24  ;;  %v3286_v57 = vsel %vm985_vm7, %v3278_v25, %v9595_v35  ;;  %v3317_v1 = vsel %vm1021_vm5, %v3309_v41, %v3216_v9  ;;  %v3295_v48 = vsel %vm994_vm8, %v3287_v23, %v9624_v2  ;;  %v3337_v43 = vld [vmem:[#allocation3 + $0x82] sm:$0xff] }
 0x574   : > { %v3248_v58 = vpop.permute.xlu0 %3247  ;;  %v3294_v56 = vsel %vm994_vm8, %v3286_v57, %v9626_v34  ;;  %v3274_v34 = vsel %vm326_vm0, %v6300_v45, %v9551_v36  ;;  %v3303_v2 = vsel %vm1003_vm9, %v3295_v48, %v9656_v21  ;;  %v3289_v21 = vsel %vm985_vm7, %v3281_v27, %v9603_v33  ;;  %v3338_v57 = vld [vmem:[#allocation3 + $0x92] sm:$0xff] }
 0x575   : > { %v3246_v11 = vpop.permute.xlu1 %3245  ;;  %v3302_v35 = vsel %vm1003_vm9, %v3294_v56, %v9663_v32  ;;  %v3325_v12 = vsel %vm1030_vm11, %v3317_v1, %v3248_v58  ;;  %v3311_v36 = vsel %vm1012_vm10, %v3303_v2, %v9707_v63  ;;  %v3297_v63 = vsel %vm994_vm8, %v3289_v21, %v9631_v19  ;;  %v12016_v58 = vld [vmem:[#allocation60_spill] sm:$0xff] }
 0x576   : > { %v3324_v31 = vsel %vm1030_vm11, %v3316_v16, %v3246_v11  ;;  %3493 = vrot.lane.b32.xlu0 %v9535_v55, %s6362_s24  ;;  %v3280_v55 = vsel %vm976_vm6, %v3272_v22, %v9574_v3  ;;  %v3310_v32 = vsel %vm1012_vm10, %v3302_v35, %v9709_v17  ;;  %v3319_v39 = vsel %vm1021_vm5, %v3311_v36, %v9735_v47  ;;  %v12014_v22 = vld [vmem:[#allocation19_spill] sm:$0xff] }
 0x577   : > { %3423 = vrot.lane.b32.xlu1 %v6299_v5, %s6359_s17  ;;  %6091 = vmatmul.mubr.msk.f32.gmra.mrb[32].mxu1 %vm1933_vm12, %v3324_v31  ;;  %v3288_v29 = vsel %vm985_vm7, %v3280_v55, %v9605_v40  ;;  %v3318_v3 = vsel %vm1021_vm5, %v3310_v32, %v9737_v50  ;;  %v3335_v40 = vld [vmem:[#allocation3 + $0x62] sm:$0xff]  ;;  %v3305_v47 = vsel %vm1003_vm9, %v3297_v63, %v9673_v54  ;;  %v6304_v55 = vld [vmem:[#allocation3 + $0x11] sm:$0xff] }
 0x578   : > { %6093 = vmatprep.mubr.msk.f32.mxu1 %vm1933_vm12, %v3325_v12  ;;  %v3252_v9 = vpop.permute.xlu0 %3251  ;;  %v3296_v17 = vsel %vm994_vm8, %v3288_v29, %v9633_v4  ;;  %v3282_v4 = vsel %vm976_vm6, %v3274_v34, %v9580_v52  ;;  %v3313_v18 = vsel %vm1012_vm10, %v3305_v47, %v9716_v42  ;;  %v3336_v52 = vld [vmem:[#allocation3 + $0x72] sm:$0xff] }
 0x579   : > { %v3250_v20 = vpop.permute.xlu1 %3249  ;;  %v3304_v50 = vsel %vm1003_vm9, %v3296_v17, %v9675_v24  ;;  %v3327_v33 = vsel %vm1030_vm11, %v3319_v39, %v3252_v9  ;;  %v3290_v24 = vsel %vm985_vm7, %v3282_v4, %v9614_v8 }
 0x57a   : > { %v3326_v51 = vsel %vm1030_vm11, %v3318_v3, %v3250_v20  ;;  %3425 = vrot.lane.b32.xlu0 %v6301_v6, %s6359_s17  ;;  %v3312_v37 = vsel %vm1012_vm10, %v3304_v50, %v9718_v15  ;;  %v3298_v54 = vsel %vm994_vm8, %v3290_v24, %v9640_v62  ;;  %v3321_v15 = vsel %vm1021_vm5, %v3313_v18, %v9751_v49  ;;  %v12017_v6 = vld [vmem:[#allocation34_spill] sm:$0xff] }
 0x57b   : > { %3523 = vrot.lane.b32.xlu1 %v3335_v40, %s6363_s11  ;;  %6094 = vmatmul.mubr.msk.f32.gmra.mrb[34].mxu1 %vm1933_vm12, %v3326_v51  ;;  %v3320_v10 = vsel %vm1021_vm5, %v3312_v37, %v9755_v28  ;;  %v3306_v8 = vsel %vm1003_vm9, %v3298_v54, %v9688_v30  ;;  %v9891_v30 = vld [vmem:[#allocation3 + $0x81] sm:$0xff] }
 0x57c   : > { %6096 = vmatprep.mubr.msk.f32.mxu1 %vm1933_vm12, %v3327_v33  ;;  %v3256_v19 = vpop.permute.xlu0 %3255  ;;  %v3314_v62 = vsel %vm1012_vm10, %v3306_v8, %v9723_v60 }
 0x57d   : > { %v3254_v26 = vpop.permute.xlu1 %3253  ;;  %v3329_v42 = vsel %vm1030_vm11, %v3321_v15, %v3256_v19  ;;  %v3322_v28 = vsel %vm1021_vm5, %v3314_v62, %v9779_v61  ;;  %v12015_v61 = vld [vmem:[#allocation44_spill] sm:$0xff] }
 0x57e   : > { %v3328_v53 = vsel %vm1030_vm11, %v3320_v10, %v3254_v26  ;;  %3525 = vrot.lane.b32.xlu0 %v3336_v52, %s6363_s11 }
 0x57f   : > { %3447 = vrot.lane.b32.xlu1 %v6302_v13, %s6360_s18  ;;  %6097 = vmatmul.mubr.msk.f32.gmra.mrb[36].mxu1 %vm1933_vm12, %v3328_v53 }
 0x580   : > { %6099 = vmatprep.mubr.msk.f32.mxu1 %vm1933_vm12, %v3329_v42  ;;  %v3340_v49 = vpop.permute.xlu0 %3339 }
 0x581   : > { %v3258_v59 = vpop.permute.xlu1 %3257  ;;  %v3539_v2 = vsel %vm326_vm0, %v6304_v55, %v3340_v49  ;;  %v12018_v49 = vld [vmem:[#allocation14_spill] sm:$0xff] }
 0x582   : > { %v3330_v44 = vsel %vm1030_vm11, %v3322_v28, %v3258_v59  ;;  %3471 = vrot.lane.b32.xlu0 %v9891_v30, %s6361_s19 }
 0x583   : > { %3449 = vrot.lane.b32.xlu1 %v12013_v7, %s6360_s18  ;;  %6100 = vmatmul.mubr.msk.f32.gmra.mrb[38].mxu1 %vm1933_vm12, %v3330_v44 }
 0x584   : > { %v3344_v60 = vpop.permute.xlu0 %3343 }
 0x585   : > { %v3342_v46 = vpop.permute.xlu1 %3341  ;;  %v3541_v28 = vsel %vm326_vm0, %v12018_v49, %v3344_v60 }
 0x586   : > { %3495 = vrot.lane.b32.xlu0 %v12014_v22, %s6362_s24  ;;  %v3540_v40 = vsel %vm326_vm0, %v12017_v6, %v3342_v46 }
 0x587   : > { %3473 = vrot.lane.b32.xlu1 %v12015_v61, %s6361_s19 }
 0x588   : > { %v3364_v25 = vpop.permute.xlu0 %3363 }
 0x589   : > { %v9902_v14 = vpop.permute.xlu1 %3345  ;;  %v3547_v32 = vsel %vm976_vm6, %v3539_v2, %v3364_v25 }
 0x58a   : > { %3527 = vrot.lane.b32.xlu0 %v3337_v43, %s6363_s11  ;;  %v12019_v43 = vld [vmem:[#allocation16_spill] sm:$0xff] }
 0x58b   : > { %3497 = vrot.lane.b32.xlu1 %v12016_v58, %s6362_s24 }
 0x58c   : > { %v3388_v0 = vpop.permute.xlu0 %3387 }
 0x58d   : > { %v3366_v41 = vpop.permute.xlu1 %3365  ;;  %v3555_v27 = vsel %vm985_vm7, %v3547_v32, %v3388_v0 }
 0x58e   : > { %v3548_v63 = vsel %vm976_vm6, %v3540_v40, %v3366_v41 }
 0x58f   : > { %3529 = vrot.lane.b32.xlu1 %v3338_v57, %s6363_s11 }
 0x590   : > { %v3412_v16 = vpop.permute.xlu0 %3411 }
 0x591   : > { %v3390_v11 = vpop.permute.xlu1 %3389  ;;  %v3563_v36 = vsel %vm994_vm8, %v3555_v27, %v3412_v16 }
 0x592   : > { %v3556_v33 = vsel %vm985_vm7, %v3548_v63, %v3390_v11 }
 0x594   : > { %v3436_v23 = vpop.permute.xlu0 %3435 }
 0x595   : > { %v3414_v56 = vpop.permute.xlu1 %3413  ;;  %v3571_v3 = vsel %vm1003_vm9, %v3563_v36, %v3436_v23 }
 0x596   : > { %v3564_v47 = vsel %vm994_vm8, %v3556_v33, %v3414_v56 }
 0x598   : > { %v3438_v1 = vpop.permute.xlu0 %3437 }
 0x599   : > { %v3368_v31 = vpop.permute.xlu1 %3367  ;;  %v3572_v37 = vsel %vm1003_vm9, %v3564_v47, %v3438_v1 }
 0x59a   : > { %v3549_v59 = vsel %vm976_vm6, %v3541_v28, %v3368_v31 }
 0x59c   : > { %v9908_v48 = vpop.permute.xlu0 %3369 }
 0x59d   : > { %v3460_v35 = vpop.permute.xlu1 %3459 }
 0x59e   : > { %v3579_v20 = vsel %vm1012_vm10, %v3571_v3, %v3460_v35  ;;  %v12020_v35 = vld [vmem:[#allocation17_spill] sm:$0xff] }
 0x5a0   : > { %v3462_v12 = vpop.permute.xlu0 %3461 }
 0x5a1   : > { %v3392_v5 = vpop.permute.xlu1 %3391  ;;  %v3580_v19 = vsel %vm1012_vm10, %v3572_v37, %v3462_v12  ;;  %v3542_v12 = vsel %vm326_vm0, %v12020_v35, %v9902_v14 }
 0x5a2   : > { %v3557_v7 = vsel %vm985_vm7, %v3549_v59, %v3392_v5  ;;  %v3550_v55 = vsel %vm976_vm6, %v3542_v12, %v9908_v48 }
 0x5a4   : > { %v9910_v45 = vpop.permute.xlu0 %3393 }
 0x5a5   : > { %v3484_v34 = vpop.permute.xlu1 %3483 }
 0x5a6   : > { %v3587_v17 = vsel %vm1021_vm5, %v3579_v20, %v3484_v34 }
 0x5a8   : > { %v3486_v9 = vpop.permute.xlu0 %3485 }
 0x5a9   : > { %v3416_v29 = vpop.permute.xlu1 %3415  ;;  %v3588_v18 = vsel %vm1021_vm5, %v3580_v19, %v3486_v9  ;;  %v3558_v9 = vsel %vm985_vm7, %v3550_v55, %v9910_v45 }
 0x5aa   : > { %v3565_v22 = vsel %vm994_vm8, %v3557_v7, %v3416_v29  ;;  %v12021_v7 = vld [vmem:[#allocation18_spill] sm:$0xff] }
 0x5ac   : > { %v9918_v21 = vpop.permute.xlu0 %3347 }
 0x5ad   : > { %v3516_v39 = vpop.permute.xlu1 %3515 }
 0x5ae   : > { %v3595_v51 = vsel %vm1030_vm11, %v3587_v17, %v3516_v39  ;;  %v4011_v39 = vld [vmem:[#allocation2 + $0x141] sm:$0xff] }
 0x5af   : > { %6102 = vmatprep.mubr.msk.f32.mxu1 %vm1933_vm12, %v3595_v51  ;;  %4083 = vrot.lane.b32.xlu0 %v4011_v39, %s6356_s14 }
 0x5b0   : > { %v3440_v50 = vpop.permute.xlu0 %3439 }
 0x5b1   : > { %v3418_v4 = vpop.permute.xlu1 %3417  ;;  %v3573_v25 = vsel %vm1003_vm9, %v3565_v22, %v3440_v50  ;;  %v3543_v22 = vsel %vm326_vm0, %v12021_v7, %v9918_v21 }
 0x5b2   : > { %v3566_v29 = vsel %vm994_vm8, %v3558_v9, %v3418_v4 }
 0x5b4   : > { %v9930_v24 = vpop.permute.xlu0 %3349 }
 0x5b5   : > { %v3518_v10 = vpop.permute.xlu1 %3517 }
 0x5b6   : > { %v3596_v26 = vsel %vm1030_vm11, %v3588_v18, %v3518_v10 }
 0x5b7   : > { %6103 = vmatmul.mubr.msk.f32.gmra.mrb[40].mxu1 %vm1933_vm12, %v3596_v26 }
 0x5b8   : > { %v3442_v52 = vpop.permute.xlu0 %3441 }
 0x5b9   : > { %v9935_v54 = vpop.permute.xlu1 %3371  ;;  %v3574_v20 = vsel %vm1003_vm9, %v3566_v29, %v3442_v52 }
 0x5bc   : > { %v9937_v15 = vpop.permute.xlu0 %3373 }
 0x5bd   : > { %v3464_v53 = vpop.permute.xlu1 %3463 }
 0x5be   : > { %v3581_v57 = vsel %vm1012_vm10, %v3573_v25, %v3464_v53 }
 0x5c0   : > { %v3466_v8 = vpop.permute.xlu0 %3465 }
 0x5c1   : > { %v9939_v42 = vpop.permute.xlu1 %3395  ;;  %v3582_v51 = vsel %vm1012_vm10, %v3574_v20, %v3466_v8 }
 0x5c4   : > { %v9941_v13 = vpop.permute.xlu0 %3397 }
 0x5c5   : > { %v3488_v62 = vpop.permute.xlu1 %3487 }
 0x5c6   : > { %v3589_v16 = vsel %vm1021_vm5, %v3581_v57, %v3488_v62  ;;  %v3544_v57 = vsel %vm326_vm0, %v9745_v38, %v9930_v24 }
 0x5c8   : > { %v3490_v44 = vpop.permute.xlu0 %3489 }
 0x5c9   : > { %v9947_v46 = vpop.permute.xlu1 %3419  ;;  %v3590_v40 = vsel %vm1021_vm5, %v3582_v51, %v3490_v44 }
 0x5ca   : > { %v6080_v61 = vpop.f32.mrb[24].mxu1 }
 0x5cb   : > { %v3826_v58 = vadd.f32 %v6080_v61, %v12019_v43  ;;  %v3820_v0 = vpop.f32.mrb[25].mxu1  ;;  %v3551_v61 = vsel %vm976_vm6, %v3543_v22, %v9935_v54 }
 0x5cc   : > { %v3821_v41 = vadd.f32 %v12019_v43, %v3820_v0  ;;  %v9954_v60 = vpop.permute.xlu0 %3351 }
 0x5cd   : > { %v3948_v11 = vmax.f32 %v3826_v58, 0.0  ;;  %v3520_v23 = vpop.permute.xlu1 %3519  ;;  %v3559_v58 = vsel %vm985_vm7, %v3551_v61, %v9939_v42 }
 0x5ce   : > { %v3947_v56 = vmax.f32 %v3821_v41, 0.0  ;;  %v3597_v1 = vsel %vm1030_vm11, %v3589_v16, %v3520_v23  ;;  %v6083_v31 = vpop.f32.mrb[26].mxu1  ;;  %v3567_v41 = vsel %vm994_vm8, %v3559_v58, %v9947_v46  ;;  %v3552_v16 = vsel %vm976_vm6, %v3544_v57, %v9937_v15 }
 0x5cf   : > { %3980 = vst.msk [vmem:[#allocation2 + $0xc1] sm:$0xff] %vm326_vm0, %v3948_v11  ;;  %v3836_v5 = vadd.f32 %v6083_v31, %v12019_v43  ;;  %v3830_v34 = vpop.f32.mrb[27].mxu1  ;;  %6105 = vmatprep.mubr.msk.f32.mxu1 %vm1933_vm12, %v3597_v1  ;;  %v3560_v54 = vsel %vm985_vm7, %v3552_v16, %v9941_v13 }
 0x5d0   : > { %3979 = vst.msk [vmem:[#allocation2 + $0xb1] sm:$0xff] %vm326_vm0, %v3947_v56  ;;  %v3831_v2 = vadd.f32 %v12019_v43, %v3830_v34  ;;  %v3444_v32 = vpop.permute.xlu0 %3443  ;;  %v12022_v34 = vld [vmem:[#allocation21_spill] sm:$0xff] }
 0x5d1   : > { %v3950_v27 = vmax.f32 %v3836_v5, 0.0  ;;  %v3422_v14 = vpop.permute.xlu1 %3421  ;;  %v3575_v21 = vsel %vm1003_vm9, %v3567_v41, %v3444_v32  ;;  %v3545_v55 = vsel %vm326_vm0, %v12022_v34, %v9954_v60 }
 0x5d2   : > { %v3949_v36 = vmax.f32 %v3831_v2, 0.0  ;;  %v6086_v3 = vpop.f32.mrb[28].mxu1  ;;  %v3568_v42 = vsel %vm994_vm8, %v3560_v54, %v3422_v14 }
 0x5d3   : > { %3982 = vst.msk [vmem:[#allocation2 + $0xe1] sm:$0xff] %vm326_vm0, %v3950_v27  ;;  %v3846_v48 = vadd.f32 %v6086_v3, %v12019_v43  ;;  %v3840_v17 = vpop.f32.mrb[29].mxu1 }
 0x5d4   : > { %3981 = vst.msk [vmem:[#allocation2 + $0xd1] sm:$0xff] %vm326_vm0, %v3949_v36  ;;  %v3841_v45 = vadd.f32 %v12019_v43, %v3840_v17  ;;  %v3354_v6 = vpop.permute.xlu0 %3353 }
 0x5d5   : > { %v3952_v63 = vmax.f32 %v3846_v48, 0.0  ;;  %v3522_v50 = vpop.permute.xlu1 %3521  ;;  %v3546_v36 = vsel %vm326_vm0, %v9891_v30, %v3354_v6 }
 0x5d6   : > { %v3951_v33 = vmax.f32 %v3841_v45, 0.0  ;;  %v3598_v4 = vsel %vm1030_vm11, %v3590_v40, %v3522_v50  ;;  %v6089_v47 = vpop.f32.mrb[30].mxu1 }
 0x5d7   : > { %3984 = vst.msk [vmem:[#allocation2 + $0x101] sm:$0xff] %vm326_vm0, %v3952_v63  ;;  %v3856_v37 = vadd.f32 %v6089_v47, %v12019_v43  ;;  %v3850_v19 = vpop.f32.mrb[31].mxu1  ;;  %6106 = vmatmul.mubr.msk.f32.gmra.mrb[42].mxu1 %vm1933_vm12, %v3598_v4 }
 0x5d8   : > { %3983 = vst.msk [vmem:[#allocation2 + $0xf1] sm:$0xff] %vm326_vm0, %v3951_v33  ;;  %v3851_v18 = vadd.f32 %v12019_v43, %v3850_v19  ;;  %v3446_v10 = vpop.permute.xlu0 %3445 }
 0x5d9   : > { %v3954_v26 = vmax.f32 %v3856_v37, 0.0  ;;  %v3376_v52 = vpop.permute.xlu1 %3375  ;;  %v3576_v38 = vsel %vm1003_vm9, %v3568_v42, %v3446_v10 }
 0x5da   : > { %v3953_v53 = vmax.f32 %v3851_v18, 0.0  ;;  %v3553_v2 = vsel %vm976_vm6, %v3545_v55, %v3376_v52 }
 0x5db   : > { %3986 = vst.msk [vmem:[#allocation2 + $0x121] sm:$0xff] %vm326_vm0, %v3954_v26 }
 0x5dc   : > { %3985 = vst.msk [vmem:[#allocation2 + $0x111] sm:$0xff] %vm326_vm0, %v3953_v53  ;;  %v3378_v8 = vpop.permute.xlu0 %3377 }
 0x5dd   : > { %v3468_v62 = vpop.permute.xlu1 %3467  ;;  %v3554_v20 = vsel %vm976_vm6, %v3546_v36, %v3378_v8 }
 0x5de   : > { %v3583_v11 = vsel %vm1012_vm10, %v3575_v21, %v3468_v62 }
 0x5e0   : > { %v3470_v49 = vpop.permute.xlu0 %3469 }
 0x5e1   : > { %v3400_v28 = vpop.permute.xlu1 %3399  ;;  %v3584_v46 = vsel %vm1012_vm10, %v3576_v38, %v3470_v49 }
 0x5e2   : > { %v3561_v32 = vsel %vm985_vm7, %v3553_v2, %v3400_v28 }
 0x5e4   : > { %v3402_v59 = vpop.permute.xlu0 %3401 }
 0x5e5   : > { %v3492_v44 = vpop.permute.xlu1 %3491  ;;  %v3562_v17 = vsel %vm985_vm7, %v3554_v20, %v3402_v59 }
 0x5e6   : > { %v3591_v56 = vsel %vm1021_vm5, %v3583_v11, %v3492_v44 }
 0x5e8   : > { %v3494_v25 = vpop.permute.xlu0 %3493 }
 0x5e9   : > { %v3424_v0 = vpop.permute.xlu1 %3423  ;;  %v3592_v15 = vsel %vm1021_vm5, %v3584_v46, %v3494_v25 }
 0x5ea   : > { %v3569_v27 = vsel %vm994_vm8, %v3561_v32, %v3424_v0 }
 0x5ec   : > { %v3426_v23 = vpop.permute.xlu0 %3425 }
 0x5ed   : > { %v3524_v1 = vpop.permute.xlu1 %3523  ;;  %v3570_v45 = vsel %vm994_vm8, %v3562_v17, %v3426_v23 }
 0x5ee   : > { %v3599_v24 = vsel %vm1030_vm11, %v3591_v56, %v3524_v1  ;;  %v10075_v56 = vld [vmem:[#allocation2 + $0x1e1] sm:$0xff] }
 0x5ef   : > { %6108 = vmatprep.mubr.msk.f32.mxu1 %vm1933_vm12, %v3599_v24 }
 0x5f0   : > { %v3526_v31 = vpop.permute.xlu0 %3525 }
 0x5f1   : > { %v3600_v13 = vsel %vm1030_vm11, %v3592_v15, %v3526_v31  ;;  %v3448_v35 = vpop.permute.xlu1 %3447 }
 0x5f2   : > { %6109 = vmatmul.mubr.msk.f32.gmra.mrb[44].mxu1 %vm1933_vm12, %v3600_v13  ;;  %v3577_v29 = vsel %vm1003_vm9, %v3569_v27, %v3448_v35 }
 0x5f4   : > { %v3472_v12 = vpop.permute.xlu0 %3471 }
 0x5f5   : > { %v3450_v5 = vpop.permute.xlu1 %3449  ;;  %v3585_v3 = vsel %vm1012_vm10, %v3577_v29, %v3472_v12 }
 0x5f6   : > { %v3578_v40 = vsel %vm1003_vm9, %v3570_v45, %v3450_v5 }
 0x5f8   : > { %v3496_v9 = vpop.permute.xlu0 %3495 }
 0x5f9   : > { %v3474_v14 = vpop.permute.xlu1 %3473  ;;  %v3593_v48 = vsel %vm1021_vm5, %v3585_v3, %v3496_v9 }
 0x5fa   : > { %v3586_v30 = vsel %vm1012_vm10, %v3578_v40, %v3474_v14 }
 0x5fc   : > { %v3528_v60 = vpop.permute.xlu0 %3527 }
 0x5fd   : > { %v3601_v39 = vsel %vm1030_vm11, %v3593_v48, %v3528_v60  ;;  %v3498_v51 = vpop.permute.xlu1 %3497 }
 0x5fe   : > { %6111 = vmatprep.mubr.msk.f32.mxu1 %vm1933_vm12, %v3601_v39  ;;  %v3594_v6 = vsel %vm1021_vm5, %v3586_v30, %v3498_v51  ;;  %v4027_v51 = vld [vmem:[#allocation2 + $0xb0] sm:$0xff] }
 0x601   : > { %v3530_v63 = vpop.permute.xlu1 %3529 }
 0x602   : > { %v3602_v50 = vsel %vm1030_vm11, %v3594_v6, %v3530_v63 }
 0x603   : > { %6112 = vmatmul.mubr.msk.f32.gmra.mrb[46].mxu1 %vm1933_vm12, %v3602_v50  ;;  %v10122_v50 = vld [vmem:[#allocation2 + $0xd0] sm:$0xff] }
 0x604   : > { %12030 = vst [vmem:[#allocation45_spill] sm:$0xff] %v10122_v50 }
 0x64a   : > { %v6092_v33 = vpop.f32.mrb[32].mxu1 }
 0x64b   : > { %v3866_v4 = vadd.f32 %v6092_v33, %v12019_v43  ;;  %v3860_v47 = vpop.f32.mrb[33].mxu1 }
 0x64c   : > { %v3861_v37 = vadd.f32 %v12019_v43, %v3860_v47  ;;  %v10132_v47 = vld [vmem:[#allocation2 + $0x110] sm:$0xff] }
 0x64d   : > { %v3956_v19 = vmax.f32 %v3866_v4, 0.0  ;;  %v10128_v4 = vld [vmem:[#allocation2 + $0xf0] sm:$0xff]  ;;  %12032 = vst [vmem:[#allocation11_spill] sm:$0xff] %v10132_v47 }
 0x64e   : > { %v3955_v18 = vmax.f32 %v3861_v37, 0.0  ;;  %v6095_v10 = vpop.f32.mrb[34].mxu1  ;;  %12031 = vst [vmem:[#allocation9_spill] sm:$0xff] %v10128_v4  ;;  %v10140_v37 = vld [vmem:[#allocation2 + $0x11] sm:$0xff] }
 0x64f   : > { %3988 = vst.msk [vmem:[#allocation2 + $0x161] sm:$0xff] %vm326_vm0, %v3956_v19  ;;  %v3876_v26 = vadd.f32 %v6095_v10, %v12019_v43  ;;  %v3870_v52 = vpop.f32.mrb[35].mxu1  ;;  %12034 = vst [vmem:[#allocation13_spill] sm:$0xff] %v10140_v37  ;;  %v10144_v19 = vld [vmem:[#allocation2 + $0xc0] sm:$0xff] }
 0x650   : > { %3987 = vst.msk [vmem:[#allocation2 + $0x151] sm:$0xff] %vm326_vm0, %v3955_v18  ;;  %v3871_v53 = vadd.f32 %v12019_v43, %v3870_v52  ;;  %12035 = vst [vmem:[#allocation10_spill] sm:$0xff] %v10144_v19  ;;  %v10148_v18 = vld [vmem:[#allocation2 + $0x31] sm:$0xff]  ;;  %v10152_v10 = vld [vmem:[#allocation2 + $0xe0] sm:$0xff] }
 0x651   : > { %v3958_v8 = vmax.f32 %v3876_v26, 0.0  ;;  %12036 = vst [vmem:[#allocation15_spill] sm:$0xff] %v10148_v18  ;;  %12037 = vst [vmem:[#allocation12_spill] sm:$0xff] %v10152_v10  ;;  %v10156_v26 = vld [vmem:[#allocation2 + $0x51] sm:$0xff]  ;;  %v10160_v52 = vld [vmem:[#allocation2 + $0x100] sm:$0xff] }
 0x652   : > { %v3957_v62 = vmax.f32 %v3871_v53, 0.0  ;;  %v6098_v49 = vpop.f32.mrb[36].mxu1  ;;  %12038 = vst [vmem:[#allocation23_spill] sm:$0xff] %v10156_v26  ;;  %12039 = vst [vmem:[#allocation8_spill] sm:$0xff] %v10160_v52  ;;  %v10164_v53 = vld [vmem:[#allocation2 + $0x71] sm:$0xff] }
 0x653   : > { %3990 = vst.msk [vmem:[#allocation2 + $0x181] sm:$0xff] %vm326_vm0, %v3958_v8  ;;  %v3886_v28 = vadd.f32 %v6098_v49, %v12019_v43  ;;  %v3880_v59 = vpop.f32.mrb[37].mxu1  ;;  %12040 = vst [vmem:[#allocation52_spill] sm:$0xff] %v10164_v53  ;;  %v4034_v8 = vld [vmem:[#allocation2 + $0x120] sm:$0xff] }
 0x654   : > { %3989 = vst.msk [vmem:[#allocation2 + $0x171] sm:$0xff] %vm326_vm0, %v3957_v62  ;;  %v3881_v44 = vadd.f32 %v12019_v43, %v3880_v59  ;;  %v10169_v62 = vld [vmem:[#allocation2 + $0xb1] sm:$0xff]  ;;  %v10173_v49 = vld [vmem:[#allocation2 + $0x21] sm:$0xff] }
 0x655   : > { %v3960_v7 = vmax.f32 %v3886_v28, 0.0  ;;  %12041 = vst [vmem:[#allocation20_spill] sm:$0xff] %v10169_v62  ;;  %12042 = vst [vmem:[#allocation35_spill] sm:$0xff] %v10173_v49  ;;  %v10177_v28 = vld [vmem:[#allocation2 + $0xd1] sm:$0xff]  ;;  %v10181_v59 = vld [vmem:[#allocation2 + $0x41] sm:$0xff] }
 0x656   : > { %v3959_v22 = vmax.f32 %v3881_v44, 0.0  ;;  %v6101_v61 = vpop.f32.mrb[38].mxu1  ;;  %v10045_v25 = vld [vmem:[#allocation2 + $0x161] sm:$0xff]  ;;  %12043 = vst [vmem:[#allocation46_spill] sm:$0xff] %v10177_v28  ;;  %12044 = vst [vmem:[#allocation42_spill] sm:$0xff] %v10181_v59  ;;  %v10185_v44 = vld [vmem:[#allocation2 + $0xf1] sm:$0xff] }
 0x657   : > { %12023 = vst [vmem:[#allocation25_spill] sm:$0xff] %v10045_v25  ;;  %3992 = vst.msk [vmem:[#allocation2 + $0x1a1] sm:$0xff] %vm326_vm0, %v3960_v7  ;;  %v3896_v58 = vadd.f32 %v6101_v61, %v12019_v43  ;;  %4087 = vrot.lane.b32.xlu0 %v10045_v25, %s6356_s14  ;;  %v3890_v0 = vpop.f32.mrb[39].mxu1  ;;  %v10051_v57 = vld [vmem:[#allocation2 + $0x151] sm:$0xff]  ;;  %v10189_v7 = vld [vmem:[#allocation2 + $0x61] sm:$0xff] }
 0x658   : > { %12024 = vst [vmem:[#allocation6_spill] sm:$0xff] %v10051_v57  ;;  %3991 = vst.msk [vmem:[#allocation2 + $0x191] sm:$0xff] %vm326_vm0, %v3959_v22  ;;  %v3891_v41 = vadd.f32 %v12019_v43, %v3890_v0  ;;  %4085 = vrot.lane.b32.xlu1 %v10051_v57, %s6356_s14  ;;  %v10193_v22 = vld [vmem:[#allocation2 + $0x111] sm:$0xff]  ;;  %v10197_v61 = vld [vmem:[#allocation2 + $0x81] sm:$0xff] }
 0x659   : > { %v3962_v16 = vmax.f32 %v3896_v58, 0.0  ;;  %12045 = vst [vmem:[#allocation28_spill] sm:$0xff] %v10185_v44  ;;  %12046 = vst [vmem:[#allocation58_spill] sm:$0xff] %v10189_v7  ;;  %v10205_v0 = vld [vmem:[#allocation2 + $0xc1] sm:$0xff] }
 0x65a   : > { %v3961_v21 = vmax.f32 %v3891_v41, 0.0  ;;  %v10057_v54 = vld [vmem:[#allocation2 + $0x181] sm:$0xff]  ;;  %12047 = vst [vmem:[#allocation30_spill] sm:$0xff] %v10197_v61  ;;  %12048 = vst [vmem:[#allocation5_spill] sm:$0xff] %v10205_v0 }
 0x65b   : > { %3994 = vst.msk [vmem:[#allocation2 + $0x1c1] sm:$0xff] %vm326_vm0, %v3962_v16  ;;  %4091 = vrot.lane.b32.xlu0 %v10057_v54, %s6356_s14  ;;  %v10062_v11 = vld [vmem:[#allocation2 + $0x171] sm:$0xff]  ;;  %v10213_v16 = vld [vmem:[#allocation2 + $0xe1] sm:$0xff] }
 0x65c   : > { %12025 = vst [vmem:[#allocation39_spill] sm:$0xff] %v10062_v11  ;;  %3993 = vst.msk [vmem:[#allocation2 + $0x1b1] sm:$0xff] %vm326_vm0, %v3961_v21  ;;  %4089 = vrot.lane.b32.xlu1 %v10062_v11, %s6356_s14 }
 0x65d   : > { %12049 = vst [vmem:[#allocation29_spill] sm:$0xff] %v10213_v16 }
 0x65e   : > { %v10067_v23 = vld [vmem:[#allocation2 + $0x1a1] sm:$0xff] }
 0x65f   : > { %4095 = vrot.lane.b32.xlu0 %v10067_v23, %s6356_s14  ;;  %v10071_v42 = vld [vmem:[#allocation2 + $0x191] sm:$0xff] }
 0x660   : > { %4093 = vrot.lane.b32.xlu1 %v10071_v42, %s6356_s14 }
 0x663   : > { %v10077_v1 = vld [vmem:[#allocation2 + $0x1b1] sm:$0xff]  ;;  %4115 = vrot.lane.b32.xlu0 %v10075_v56, %s6357_s15 }
 0x664   : > { %12026 = vst [vmem:[#allocation43_spill] sm:$0xff] %v10077_v1  ;;  %4097 = vrot.lane.b32.xlu1 %v10077_v1, %s6356_s14 }
 0x68a   : > { %v6104_v38 = vpop.f32.mrb[40].mxu1 }
 0x68b   : > { %v3906_v24 = vadd.f32 %v6104_v38, %v12019_v43  ;;  %v3900_v46 = vpop.f32.mrb[41].mxu1  ;;  %v10221_v38 = vld [vmem:[#allocation2 + $0x101] sm:$0xff] }
 0x68c   : > { %v3901_v15 = vadd.f32 %v12019_v43, %v3900_v46  ;;  %12050 = vst [vmem:[#allocation36_spill] sm:$0xff] %v10221_v38  ;;  %v10229_v46 = vld [vmem:[#allocation2 + $0x121] sm:$0xff] }
 0x68d   : > { %v3964_v31 = vmax.f32 %v3906_v24, 0.0 }
 0x68e   : > { %v3963_v13 = vmax.f32 %v3901_v15, 0.0 }
 0x68f   : > { %3996 = vst.msk [vmem:[#allocation2 + $0x201] sm:$0xff] %vm326_vm0, %v3964_v31 }
 0x690   : > { %3995 = vst.msk [vmem:[#allocation2 + $0x1f1] sm:$0xff] %vm326_vm0, %v3963_v13 }
 0x696   : > { %v10087_v35 = vld [vmem:[#allocation2 + $0x201] sm:$0xff] }
 0x697   : > { %12027 = vst [vmem:[#allocation26_spill] sm:$0xff] %v10087_v35  ;;  %4119 = vrot.lane.b32.xlu0 %v10087_v35, %s6357_s15  ;;  %v10091_v12 = vld [vmem:[#allocation2 + $0x1f1] sm:$0xff]  ;;  %v10235_v15 = vld [vmem:[#allocation2 + $0x200] sm:$0xff] }
 0x698   : > { %12028 = vst [vmem:[#allocation50_spill] sm:$0xff] %v10091_v12  ;;  %4117 = vrot.lane.b32.xlu1 %v10091_v12, %s6357_s15  ;;  %v10201_v58 = vld [vmem:[#allocation2 + $0x1f0] sm:$0xff] }
 0x6aa   : > { %v6107_v5 = vpop.f32.mrb[42].mxu1 }
 0x6ab   : > { %v3916_v34 = vadd.f32 %v6107_v5, %v12019_v43  ;;  %v3910_v55 = vpop.f32.mrb[43].mxu1  ;;  %v10249_v5 = vpop.permute.xlu0 %4083 }
 0x6ac   : > { %v3911_v2 = vadd.f32 %v12019_v43, %v3910_v55  ;;  %v5276_v55 = vld [vmem:[%s11527_s6 + $0x8] sm:$0xff] }
 0x6ad   : > { %v3966_v32 = vmax.f32 %v3916_v34, 0.0  ;;  %v5275_v34 = vld [vmem:[%s11527_s6] sm:$0xff] }
 0x6ae   : > { %v3965_v9 = vmax.f32 %v3911_v2, 0.0  ;;  %v6188_v2 = vpack.c.bf16 %v5276_v55, %v5275_v34 }
 0x6af   : > { %3998 = vst.msk [vmem:[#allocation2 + $0x221] sm:$0xff] %vm326_vm0, %v3966_v32 }
 0x6b0   : > { %3997 = vst.msk [vmem:[#allocation2 + $0x211] sm:$0xff] %vm326_vm0, %v3965_v9  ;;  %6189 = vmatprep.subr.bf16.mxu0 %v6188_v2  ;;  %v5277_v9 = vld [vmem:[%s11527_s6 + $0x10] sm:$0xff] }
 0x6b1   : > { %6191 = vmatpush3.bf16.msra.mxu0 %v6188_v2 }
 0x6b6   : > { %v10099_v27 = vld [vmem:[#allocation2 + $0x221] sm:$0xff] }
 0x6b7   : > { %4123 = vrot.lane.b32.xlu0 %v10099_v27, %s6357_s15  ;;  %v10103_v14 = vld [vmem:[#allocation2 + $0x211] sm:$0xff]  ;;  %v10241_v31 = vld [vmem:[#allocation2 + $0x220] sm:$0xff] }
 0x6b8   : > { %12029 = vst [vmem:[#allocation27_spill] sm:$0xff] %v10103_v14  ;;  %4121 = vrot.lane.b32.xlu1 %v10103_v14, %s6357_s15  ;;  %v10209_v41 = vld [vmem:[#allocation2 + $0x210] sm:$0xff] }
 0x6c5   : > { %v6110_v29 = vpop.f32.mrb[44].mxu1 }
 0x6c6   : > { %v3926_v36 = vadd.f32 %v6110_v29, %v12019_v43  ;;  %v3920_v3 = vpop.f32.mrb[45].mxu1  ;;  %v5278_v29 = vld [vmem:[%s11527_s6 + $0x18] sm:$0xff] }
 0x6c7   : > { %v3921_v20 = vadd.f32 %v12019_v43, %v3920_v3 }
 0x6c8   : > { %v3968_v48 = vmax.f32 %v3926_v36, 0.0  ;;  %v6192_v36 = vpack.c.bf16 %v5278_v29, %v5277_v9  ;;  %v10339_v9 = vld [vmem:[#allocation2 + $0x162] sm:$0xff] }
 0x6c9   : > { %v3967_v60 = vmax.f32 %v3921_v20, 0.0  ;;  %v10271_v3 = vpop.permute.xlu0 %4087  ;;  %v5279_v20 = vld [vmem:[%s11527_s6 + $0x20] sm:$0xf]  ;;  %12055 = vst [vmem:[#allocation22_spill] sm:$0xff] %v10339_v9 }
 0x6ca   : > { %4000 = vst.msk [vmem:[#allocation2 + $0x241] sm:$0xff] %vm326_vm0, %v3968_v48  ;;  %6193 = vmatprep.subr.bf16.mxu0 %v6192_v36 }
 0x6cb   : > { %3999 = vst.msk [vmem:[#allocation2 + $0x231] sm:$0xff] %vm326_vm0, %v3967_v60  ;;  %6195 = vmatpush3.bf16.msra.mxu0 %v6192_v36 }
 0x6cc   : > { %6122 = vmatprep.subr.msk.mxu0 %vm2030_vm4, %v5279_v20 }
 0x6cd   : > { %v10283_v48 = vpop.permute.xlu0 %4091 }
 0x6cf   : > { %6123 = vmatpush3.msk.msra.mxu0 %vm2030_vm4, %v5279_v20  ;;  %v10349_v20 = vld [vmem:[#allocation2 + $0x182] sm:$0xff] }
 0x6d0   : > { %12056 = vst [vmem:[#allocation41_spill] sm:$0xff] %v10349_v20 }
 0x6d1   : > { %v10111_v17 = vld [vmem:[#allocation2 + $0x241] sm:$0xff]  ;;  %v10292_v60 = vpop.permute.xlu0 %4095 }
 0x6d2   : > { %4127 = vrot.lane.b32.xlu0 %v10111_v17, %s6357_s15  ;;  %v10115_v39 = vld [vmem:[#allocation2 + $0x231] sm:$0xff]  ;;  %v10247_v13 = vld [vmem:[#allocation2 + $0x240] sm:$0xff] }
 0x6d3   : > { %4125 = vrot.lane.b32.xlu1 %v10115_v39, %s6357_s15  ;;  %v10217_v21 = vld [vmem:[#allocation2 + $0x230] sm:$0xff] }
 0x6d6   : > { %4147 = vrot.lane.b32.xlu0 %v4027_v51, %s6358_s16  ;;  %v6113_v45 = vpop.f32.mrb[46].mxu1  ;;  %v10296_v51 = vld [vmem:[#allocation2 + $0x1c1] sm:$0xff] }
 0x6d7   : > { %v3936_v40 = vadd.f32 %v6113_v45, %v12019_v43  ;;  %v3930_v30 = vpop.f32.mrb[47].mxu1  ;;  %12052 = vst [vmem:[#allocation24_spill] sm:$0xff] %v10296_v51  ;;  %v10298_v45 = vpop.permute.xlu1 %4085 }
 0x6d8   : > { %v3931_v6 = vadd.f32 %v12019_v43, %v3930_v30 }
 0x6d9   : > { %v3970_v63 = vmax.f32 %v3936_v40, 0.0  ;;  %v10302_v40 = vpop.permute.xlu0 %4115 }
 0x6da   : > { %v3969_v33 = vmax.f32 %v3931_v6, 0.0  ;;  %4151 = vrot.lane.b32.xlu0 %v10122_v50, %s6358_s16 }
 0x6db   : > { %4002 = vst.msk [vmem:[#allocation2 + $0x261] sm:$0xff] %vm326_vm0, %v3970_v63  ;;  %v10308_v30 = vpop.permute.xlu1 %4089 }
 0x6dc   : > { %4001 = vst.msk [vmem:[#allocation2 + $0x251] sm:$0xff] %vm326_vm0, %v3969_v33 }
 0x6de   : > { %4155 = vrot.lane.b32.xlu0 %v10128_v4, %s6358_s16 }
 0x6df   : > { %v10318_v63 = vpop.permute.xlu1 %4093 }
 0x6e2   : > { %4159 = vrot.lane.b32.xlu0 %v10132_v47, %s6358_s16  ;;  %v10261_v32 = vld [vmem:[#allocation2 + $0x260] sm:$0xff] }
 0x6e3   : > { %v10136_v43 = vld [vmem:[#allocation2 + $0x251] sm:$0xff]  ;;  %12051 = vst [vmem:[#allocation4_spill] sm:$0xff] %v10261_v32  ;;  %v10332_v55 = vpop.permute.xlu1 %4097 }
 0x6e4   : > { %12033 = vst [vmem:[#allocation32_spill] sm:$0xff] %v10136_v43  ;;  %4129 = vrot.lane.b32.xlu1 %v10136_v43, %s6357_s15  ;;  %v10225_v24 = vld [vmem:[#allocation2 + $0x250] sm:$0xff] }
 0x6e6   : > { %4179 = vrot.lane.b32.xlu0 %v10140_v37, %s6359_s17 }
 0x6e8   : > { %4149 = vrot.lane.b32.xlu1 %v10144_v19, %s6358_s16  ;;  %v10373_v19 = vld [vmem:[#allocation2 + $0x152] sm:$0xff] }
 0x6e9   : > { %12059 = vst [vmem:[#allocation47_spill] sm:$0xff] %v10373_v19 }
 0x6ea   : > { %4183 = vrot.lane.b32.xlu0 %v10148_v18, %s6359_s17 }
 0x6ec   : > { %4153 = vrot.lane.b32.xlu1 %v10152_v10, %s6358_s16 }
 0x6ee   : > { %4187 = vrot.lane.b32.xlu0 %v10156_v26, %s6359_s17 }
 0x6f0   : > { %4157 = vrot.lane.b32.xlu1 %v10160_v52, %s6358_s16 }
 0x6f2   : > { %4191 = vrot.lane.b32.xlu0 %v10164_v53, %s6359_s17 }
 0x6f4   : > { %4161 = vrot.lane.b32.xlu1 %v4034_v8, %s6358_s16  ;;  %v4395_v8 = vld [vmem:[#allocation2 + $0x142] sm:$0xff] }
 0x6f6   : > { %4211 = vrot.lane.b32.xlu0 %v10169_v62, %s6360_s18 }
 0x6f8   : > { %4181 = vrot.lane.b32.xlu1 %v10173_v49, %s6359_s17 }
 0x6fa   : > { %4215 = vrot.lane.b32.xlu0 %v10177_v28, %s6360_s18 }
 0x6fc   : > { %4185 = vrot.lane.b32.xlu1 %v10181_v59, %s6359_s17 }
 0x6fe   : > { %4219 = vrot.lane.b32.xlu0 %v10185_v44, %s6360_s18 }
 0x700   : > { %4189 = vrot.lane.b32.xlu1 %v10189_v7, %s6359_s17 }
 0x702   : > { %4223 = vrot.lane.b32.xlu0 %v10193_v22, %s6360_s18 }
 0x704   : > { %4193 = vrot.lane.b32.xlu1 %v10197_v61, %s6359_s17 }
 0x706   : > { %4243 = vrot.lane.b32.xlu0 %v10201_v58, %s6361_s19 }
 0x708   : > { %4213 = vrot.lane.b32.xlu1 %v10205_v0, %s6360_s18 }
 0x709   : > { %v10312_v6 = vpop.permute.xlu0 %4119 }
 0x70a   : > { %4247 = vrot.lane.b32.xlu0 %v10209_v41, %s6361_s19  ;;  %v10341_v29 = vpop.permute.xlu1 %4117 }
 0x70c   : > { %4217 = vrot.lane.b32.xlu1 %v10213_v16, %s6360_s18 }
 0x70e   : > { %4251 = vrot.lane.b32.xlu0 %v10217_v21, %s6361_s19 }
 0x710   : > { %4221 = vrot.lane.b32.xlu1 %v10221_v38, %s6360_s18 }
 0x712   : > { %4255 = vrot.lane.b32.xlu0 %v10225_v24, %s6361_s19 }
 0x714   : > { %4225 = vrot.lane.b32.xlu1 %v10229_v46, %s6360_s18 }
 0x716   : > { %4275 = vrot.lane.b32.xlu0 %v10051_v57, %s6362_s24 }
 0x718   : > { %4245 = vrot.lane.b32.xlu1 %v10235_v15, %s6361_s19 }
 0x71a   : > { %4279 = vrot.lane.b32.xlu0 %v10062_v11, %s6362_s24 }
 0x71c   : > { %4249 = vrot.lane.b32.xlu1 %v10241_v31, %s6361_s19 }
 0x71e   : > { %4283 = vrot.lane.b32.xlu0 %v10071_v42, %s6362_s24 }
 0x720   : > { %4253 = vrot.lane.b32.xlu1 %v10247_v13, %s6361_s19 }
 0x722   : > { %4287 = vrot.lane.b32.xlu0 %v10077_v1, %s6362_s24 }
 0x724   : > { %4257 = vrot.lane.b32.xlu1 %v10261_v32, %s6361_s19  ;;  %v10359_v32 = vld [vmem:[#allocation2 + $0x1a2] sm:$0xff] }
 0x726   : > { %4307 = vrot.lane.b32.xlu0 %v10091_v12, %s6363_s11 }
 0x728   : > { %4277 = vrot.lane.b32.xlu1 %v10045_v25, %s6362_s24 }
 0x729   : > { %v10320_v33 = vpop.permute.xlu0 %4123 }
 0x72a   : > { %4311 = vrot.lane.b32.xlu0 %v10103_v14, %s6363_s11 }
 0x72c   : > { %4281 = vrot.lane.b32.xlu1 %v10057_v54, %s6362_s24 }
 0x72e   : > { %4315 = vrot.lane.b32.xlu0 %v10115_v39, %s6363_s11 }
 0x730   : > { %4285 = vrot.lane.b32.xlu1 %v10067_v23, %s6362_s24 }
 0x732   : > { %4319 = vrot.lane.b32.xlu0 %v10136_v43, %s6363_s11 }
 0x734   : > { %4289 = vrot.lane.b32.xlu1 %v10296_v51, %s6362_s24  ;;  %v10393_v51 = vld [vmem:[#allocation2 + $0x192] sm:$0xff] }
 0x735   : > { %12061 = vst [vmem:[#allocation55_spill] sm:$0xff] %v10393_v51 }
 0x736   : > { %4419 = vrot.lane.b32.xlu0 %v10075_v56, %s6356_s14  ;;  %v10326_v56 = vld [vmem:[#allocation2 + $0x261] sm:$0xff] }
 0x737   : > { %12053 = vst [vmem:[#allocation7_spill] sm:$0xff] %v10326_v56 }
 0x738   : > { %4309 = vrot.lane.b32.xlu1 %v10087_v35, %s6363_s11 }
 0x73a   : > { %4423 = vrot.lane.b32.xlu0 %v10087_v35, %s6356_s14 }
 0x73c   : > { %4313 = vrot.lane.b32.xlu1 %v10099_v27, %s6363_s11 }
 0x73e   : > { %4427 = vrot.lane.b32.xlu0 %v10099_v27, %s6356_s14 }
 0x740   : > { %4317 = vrot.lane.b32.xlu1 %v10111_v17, %s6363_s11 }
 0x742   : > { %4431 = vrot.lane.b32.xlu0 %v10111_v17, %s6356_s14 }
 0x744   : > { %4321 = vrot.lane.b32.xlu1 %v10326_v56, %s6363_s11  ;;  %v10330_v34 = vpop.permute.xlu0 %4127 }
 0x745   : > { %12054 = vst [vmem:[#allocation40_spill] sm:$0xff] %v10330_v34 }
 0x746   : > { %4451 = vrot.lane.b32.xlu0 %v4395_v8, %s6357_s15  ;;  %v10351_v8 = vpop.permute.xlu1 %4121 }
 0x748   : > { %4421 = vrot.lane.b32.xlu1 %v10091_v12, %s6356_s14  ;;  %v10337_v2 = vpop.permute.xlu0 %4147 }
 0x74a   : > { %4455 = vrot.lane.b32.xlu0 %v10339_v9, %s6357_s15  ;;  %v10361_v47 = vpop.permute.xlu1 %4125 }
 0x74c   : > { %4425 = vrot.lane.b32.xlu1 %v10103_v14, %s6356_s14  ;;  %v10347_v36 = vpop.permute.xlu0 %4151 }
 0x74e   : > { %4459 = vrot.lane.b32.xlu0 %v10349_v20, %s6357_s15 }
 0x750   : > { %4429 = vrot.lane.b32.xlu1 %v10115_v39, %s6356_s14  ;;  %v10357_v52 = vpop.permute.xlu0 %4155 }
 0x752   : > { %4463 = vrot.lane.b32.xlu0 %v10359_v32, %s6357_s15 }
 0x754   : > { %4433 = vrot.lane.b32.xlu1 %v10136_v43, %s6356_s14  ;;  %v10367_v10 = vpop.permute.xlu0 %4159  ;;  %v10383_v43 = vld [vmem:[#allocation2 + $0x172] sm:$0xff] }
 0x755   : > { %12057 = vst [vmem:[#allocation53_spill] sm:$0xff] %v10367_v10  ;;  %12060 = vst [vmem:[#allocation37_spill] sm:$0xff] %v10383_v43  ;;  %v10403_v10 = vld [vmem:[#allocation2 + $0x1b2] sm:$0xff] }
 0x756   : > { %4475 = vrot.lane.b32.xlu0 %v10140_v37, %s6358_s16  ;;  %v10371_v4 = vpop.permute.xlu1 %4129  ;;  %12062 = vst [vmem:[#allocation51_spill] sm:$0xff] %v10403_v10 }
 0x757   : > { %12058 = vst [vmem:[#allocation48_spill] sm:$0xff] %v10371_v4 }
 0x758   : > { %4453 = vrot.lane.b32.xlu1 %v10373_v19, %s6357_s15  ;;  %v10377_v50 = vpop.permute.xlu0 %4179 }
 0x75a   : > { %4479 = vrot.lane.b32.xlu0 %v10148_v18, %s6358_s16  ;;  %v10381_v1 = vpop.permute.xlu1 %4149 }
 0x75c   : > { %4457 = vrot.lane.b32.xlu1 %v10383_v43, %s6357_s15  ;;  %v10387_v56 = vpop.permute.xlu0 %4183 }
 0x75e   : > { %4483 = vrot.lane.b32.xlu0 %v10156_v26, %s6358_s16  ;;  %v10391_v37 = vpop.permute.xlu1 %4153 }
 0x760   : > { %4461 = vrot.lane.b32.xlu1 %v10393_v51, %s6357_s15  ;;  %v10397_v18 = vpop.permute.xlu0 %4187 }
 0x762   : > { %4487 = vrot.lane.b32.xlu0 %v10164_v53, %s6358_s16  ;;  %v10401_v4 = vpop.permute.xlu1 %4157 }
 0x764   : > { %4465 = vrot.lane.b32.xlu1 %v10403_v10, %s6357_s15  ;;  %v10407_v26 = vpop.permute.xlu0 %4191 }
 0x765   : > { %12063 = vst [vmem:[#allocation49_spill] sm:$0xff] %v10407_v26  ;;  %v10431_v26 = vld [vmem:[#allocation2 + $0x12] sm:$0xff] }
 0x766   : > { %4499 = vrot.lane.b32.xlu0 %v10169_v62, %s6359_s17  ;;  %v10411_v34 = vpop.permute.xlu1 %4161  ;;  %12065 = vst [vmem:[#allocation57_spill] sm:$0xff] %v10431_v26 }
 0x767   : > { %12064 = vst [vmem:[#allocation54_spill] sm:$0xff] %v10411_v34 }
 0x768   : > { %4477 = vrot.lane.b32.xlu1 %v10173_v49, %s6358_s16  ;;  %v4212_v51 = vpop.permute.xlu0 %4211 }
 0x76a   : > { %4503 = vrot.lane.b32.xlu0 %v10177_v28, %s6359_s17  ;;  %v10417_v53 = vpop.permute.xlu1 %4181 }
 0x76c   : > { %4481 = vrot.lane.b32.xlu1 %v10181_v59, %s6358_s16  ;;  %v10421_v10 = vpop.permute.xlu0 %4215 }
 0x76e   : > { %4507 = vrot.lane.b32.xlu0 %v10185_v44, %s6359_s17  ;;  %v10425_v62 = vpop.permute.xlu1 %4185 }
 0x770   : > { %4485 = vrot.lane.b32.xlu1 %v10189_v7, %s6358_s16  ;;  %v10429_v34 = vpop.permute.xlu0 %4219 }
 0x772   : > { %4531 = vrot.lane.b32.xlu0 %v10431_v26, %s6360_s18  ;;  %v10435_v28 = vpop.permute.xlu1 %4189 }
 0x774   : > { %4489 = vrot.lane.b32.xlu1 %v10197_v61, %s6358_s16  ;;  %v10439_v59 = vpop.permute.xlu0 %4223 }
 0x775   : > { %12066 = vst [vmem:[#allocation33_spill] sm:$0xff] %v10439_v59  ;;  %v10503_v59 = vld [vmem:[#allocation2 + $0x42] sm:$0xff] }
 0x776   : > { %4555 = vrot.lane.b32.xlu0 %v10051_v57, %s6361_s19  ;;  %v10443_v44 = vpop.permute.xlu1 %4193  ;;  %12073 = vst [vmem:[#allocation60_spill] sm:$0xff] %v10503_v59 }
 0x777   : > { %12067 = vst [vmem:[#allocation31_spill] sm:$0xff] %v10443_v44 }
 0x778   : > { %4501 = vrot.lane.b32.xlu1 %v10205_v0, %s6359_s17  ;;  %v4244_v7 = vpop.permute.xlu0 %4243 }
 0x77a   : > { %v10447_v49 = vpop.permute.xlu1 %4213  ;;  %4579 = vrot.lane.b32.xlu0 %v10091_v12, %s6362_s24  ;;  %v10467_v12 = vld [vmem:[#allocation2 + $0x22] sm:$0xff] }
 0x77b   : > { %12068 = vst [vmem:[#allocation56_spill] sm:$0xff] %v10467_v12 }
 0x77c   : > { %4505 = vrot.lane.b32.xlu1 %v10213_v16, %s6359_s17  ;;  %v10453_v26 = vpop.permute.xlu0 %4247 }
 0x77e   : > { %v10455_v61 = vpop.permute.xlu1 %4217  ;;  %4611 = vrot.lane.b32.xlu0 %v10373_v19, %s6363_s11 }
 0x780   : > { %4509 = vrot.lane.b32.xlu1 %v10221_v38, %s6359_s17  ;;  %v10461_v57 = vpop.permute.xlu0 %4251 }
 0x782   : > { %v10463_v0 = vpop.permute.xlu1 %4221  ;;  %4613 = vrot.lane.b32.xlu0 %v10339_v9, %s6363_s11 }
 0x784   : > { %4533 = vrot.lane.b32.xlu1 %v10467_v12, %s6360_s18  ;;  %v10471_v16 = vpop.permute.xlu0 %4255  ;;  %v4003_v12 = vld [vmem:[#allocation2 + $0x1e0] sm:$0xff] }
 0x785   : > { %12069 = vst [vmem:[#allocation59_spill] sm:$0xff] %v10471_v16 }
 0x786   : > { %v10473_v44 = vpop.permute.xlu1 %4225  ;;  %4559 = vrot.lane.b32.xlu0 %v10062_v11, %s6361_s19  ;;  %v10489_v11 = vld [vmem:[#allocation2 + $0x32] sm:$0xff] }
 0x787   : > { %12070 = vst [vmem:[#allocation38_spill] sm:$0xff] %v10473_v44  ;;  %12071 = vst [vmem:[#allocation19_spill] sm:$0xff] %v10489_v11 }
 0x788   : > { %4557 = vrot.lane.b32.xlu1 %v10045_v25, %s6361_s19  ;;  %v4276_v19 = vpop.permute.xlu0 %4275  ;;  %v4331_v25 = vsel %vm326_vm0, %v4003_v12, %v10249_v5 }
 0x78a   : > { %v4246_v38 = vpop.permute.xlu1 %4245  ;;  %4583 = vrot.lane.b32.xlu0 %v10103_v14, %s6362_s24 }
 0x78c   : > { %4581 = vrot.lane.b32.xlu1 %v10087_v35, %s6362_s24  ;;  %v10483_v9 = vpop.permute.xlu0 %4279  ;;  %v4339_v35 = vsel %vm976_vm6, %v4331_v25, %v10302_v40 }
 0x78e   : > { %v10485_v16 = vpop.permute.xlu1 %4249  ;;  %4615 = vrot.lane.b32.xlu0 %v10383_v43, %s6363_s11  ;;  %v4347_v43 = vsel %vm985_vm7, %v4339_v35, %v10337_v2 }
 0x78f   : > { %v4355_v5 = vsel %vm994_vm8, %v4347_v43, %v10377_v50 }
 0x790   : > { %4535 = vrot.lane.b32.xlu1 %v10489_v11, %s6360_s18  ;;  %v10495_v14 = vpop.permute.xlu0 %4283  ;;  %v4363_v11 = vsel %vm1003_vm9, %v4355_v5, %v4212_v51  ;;  %v10538_v51 = vld [vmem:[#allocation2 + $0x62] sm:$0xff]  ;;  %v4332_v5 = vsel %vm326_vm0, %v10201_v58, %v10298_v45  ;;  %v4335_v45 = vsel %vm326_vm0, %v10241_v31, %v10283_v48 }
 0x791   : > { %v4371_v25 = vsel %vm1012_vm10, %v4363_v11, %v4244_v7  ;;  %v10530_v11 = vld [vmem:[#allocation2 + $0x52] sm:$0xff] }
 0x792   : > { %v10497_v44 = vpop.permute.xlu1 %4253  ;;  %4617 = vrot.lane.b32.xlu0 %v10349_v20, %s6363_s11  ;;  %v4379_v40 = vsel %vm1021_vm5, %v4371_v25, %v4276_v19  ;;  %12074 = vst [vmem:[#allocation34_spill] sm:$0xff] %v10530_v11 }
 0x793   : > { %12072 = vst [vmem:[#allocation44_spill] sm:$0xff] %v10497_v44 }
 0x794   : > { %4537 = vrot.lane.b32.xlu1 %v10503_v59, %s6360_s18  ;;  %v10509_v12 = vpop.permute.xlu0 %4287 }
 0x796   : > { %v10514_v44 = vpop.permute.xlu1 %4257  ;;  %4563 = vrot.lane.b32.xlu0 %v10071_v42, %s6361_s19 }
 0x798   : > { %4561 = vrot.lane.b32.xlu1 %v10057_v54, %s6361_s19  ;;  %v4308_v35 = vpop.permute.xlu0 %4307 }
 0x799   : > { %v4387_v2 = vsel %vm1030_vm11, %v4379_v40, %v4308_v35  ;;  %v4333_v40 = vsel %vm326_vm0, %v10235_v15, %v10271_v3  ;;  %v4340_v35 = vsel %vm976_vm6, %v4332_v5, %v10341_v29 }
 0x79a   : > { %v4278_v20 = vpop.permute.xlu1 %4277  ;;  %4587 = vrot.lane.b32.xlu0 %v10115_v39, %s6362_s24  ;;  %6124 = vmatprep.mubr.msk.f32.mxu0 %vm1933_vm12, %v4387_v2  ;;  %v4341_v2 = vsel %vm976_vm6, %v4333_v40, %v10312_v6  ;;  %v4334_v6 = vsel %vm326_vm0, %v10209_v41, %v10308_v30 }
 0x79b   : > { %v4349_v3 = vsel %vm985_vm7, %v4341_v2, %v10347_v36  ;;  %v4342_v30 = vsel %vm976_vm6, %v4334_v6, %v10351_v8 }
 0x79c   : > { %4585 = vrot.lane.b32.xlu1 %v10099_v27, %s6362_s24  ;;  %v4312_v50 = vpop.permute.xlu0 %4311  ;;  %v4350_v5 = vsel %vm985_vm7, %v4342_v30, %v10391_v37 }
 0x79e   : > { %v4282_v43 = vpop.permute.xlu1 %4281  ;;  %4589 = vrot.lane.b32.xlu0 %v10111_v17, %s6362_s24 }
 0x7a0   : > { %4539 = vrot.lane.b32.xlu1 %v10530_v11, %s6360_s18  ;;  %v4316_v19 = vpop.permute.xlu0 %4315  ;;  %v4348_v11 = vsel %vm985_vm7, %v4340_v35, %v10381_v1  ;;  %v4337_v1 = vsel %vm326_vm0, %v10247_v13, %v10292_v60 }
 0x7a1   : > { %v4356_v29 = vsel %vm994_vm8, %v4348_v11, %v10417_v53  ;;  %v4336_v53 = vsel %vm326_vm0, %v10217_v21, %v10318_v63  ;;  %v10589_v11 = vld [vmem:[#allocation2 + $0x82] sm:$0xff] }
 0x7a2   : > { %v10534_v7 = vpop.permute.xlu1 %4285  ;;  %4513 = vrot.lane.b32.xlu0 %v10229_v46, %s6359_s17  ;;  %v4364_v48 = vsel %vm1003_vm9, %v4356_v29, %v10447_v49  ;;  %12075 = vst [vmem:[#allocation14_spill] sm:$0xff] %v10589_v11  ;;  %v4343_v49 = vsel %vm976_vm6, %v4335_v45, %v10320_v33  ;;  %v12077_v29 = vld [vmem:[#allocation35_spill] sm:$0xff] }
 0x7a4   : > { %4541 = vrot.lane.b32.xlu1 %v10538_v51, %s6360_s18  ;;  %v10545_v25 = vpop.permute.xlu0 %4319 }
 0x7a6   : > { %v10556_v59 = vpop.permute.xlu1 %4289  ;;  %4621 = vrot.lane.b32.xlu0 %v10359_v32, %s6363_s11  ;;  %v4357_v32 = vsel %vm994_vm8, %v4349_v3, %v10387_v56  ;;  %v4372_v56 = vsel %vm1012_vm10, %v4364_v48, %v4246_v38  ;;  %v4358_v38 = vsel %vm994_vm8, %v4350_v5, %v10425_v62  ;;  %v4344_v62 = vsel %vm976_vm6, %v4336_v53, %v10361_v47  ;;  %v12080_v53 = vld [vmem:[#allocation55_spill] sm:$0xff] }
 0x7a7   : > { %v4365_v60 = vsel %vm1003_vm9, %v4357_v32, %v10421_v10  ;;  %v4380_v63 = vsel %vm1021_vm5, %v4372_v56, %v4278_v20  ;;  %v4351_v10 = vsel %vm985_vm7, %v4343_v49, %v10357_v52  ;;  %v4366_v20 = vsel %vm1003_vm9, %v4358_v38, %v10455_v61  ;;  %v12079_v32 = vld [vmem:[#allocation49_spill] sm:$0xff]  ;;  %v12083_v49 = vld [vmem:[#allocation44_spill] sm:$0xff] }
 0x7a8   : > { %4565 = vrot.lane.b32.xlu1 %v10067_v23, %s6361_s19  ;;  %v10579_v36 = vpop.permute.xlu0 %4419  ;;  %v4373_v40 = vsel %vm1012_vm10, %v4365_v60, %v10453_v26  ;;  %v4359_v26 = vsel %vm994_vm8, %v4351_v10, %v10397_v18  ;;  %v4374_v61 = vsel %vm1012_vm10, %v4366_v20, %v10485_v16  ;;  %v4352_v45 = vsel %vm985_vm7, %v4344_v62, %v10401_v4  ;;  %v12082_v60 = vld [vmem:[#allocation33_spill] sm:$0xff]  ;;  %v12086_v38 = vld [vmem:[#allocation24_spill] sm:$0xff]  ;;  %v12089_v62 = vld [vmem:[#allocation38_spill] sm:$0xff] }
 0x7a9   : > { %v4381_v33 = vsel %vm1021_vm5, %v4373_v40, %v10483_v9  ;;  %v4338_v9 = vsel %vm326_vm0, %v10225_v24, %v10332_v55  ;;  %v4367_v18 = vsel %vm1003_vm9, %v4359_v26, %v10429_v34  ;;  %v4382_v3 = vsel %vm1021_vm5, %v4374_v61, %v4282_v43  ;;  %v12078_v34 = vld [vmem:[#allocation53_spill] sm:$0xff]  ;;  %v12085_v40 = vld [vmem:[#allocation59_spill] sm:$0xff] }
 0x7aa   : > { %v4310_v35 = vpop.permute.xlu1 %4309  ;;  %4545 = vrot.lane.b32.xlu0 %v10589_v11, %s6360_s18  ;;  %v4389_v8 = vsel %vm1030_vm11, %v4381_v33, %v4312_v50  ;;  %v12076_v50 = vld [vmem:[#allocation40_spill] sm:$0xff]  ;;  %v4375_v47 = vsel %vm1012_vm10, %v4367_v18, %v10461_v57  ;;  %v4360_v6 = vsel %vm994_vm8, %v4352_v45, %v10435_v28  ;;  %v12087_v33 = vld [vmem:[#allocation31_spill] sm:$0xff]  ;;  %v12091_v45 = vld [vmem:[#allocation13_spill] sm:$0xff] }
 0x7ab   : > { %v4388_v37 = vsel %vm1030_vm11, %v4380_v63, %v4310_v35  ;;  %v4345_v2 = vsel %vm976_vm6, %v4337_v1, %v12076_v50  ;;  %v4383_v1 = vsel %vm1021_vm5, %v4375_v47, %v10495_v14  ;;  %v4368_v43 = vsel %vm1003_vm9, %v4360_v6, %v10463_v0  ;;  %v12081_v28 = vld [vmem:[#allocation48_spill] sm:$0xff]  ;;  %v12084_v0 = vld [vmem:[#allocation54_spill] sm:$0xff] }
 0x7ac   : > { %4511 = vrot.lane.b32.xlu1 %v10193_v22, %s6359_s17  ;;  %6125 = vmatmul.mubr.msk.f32.vlgmr.msra.gmra.mrb[16].mxu0 %vm1933_vm12, %v4388_v37  ;;  %v10615_v52 = vpop.permute.xlu0 %4423  ;;  %v4353_v16 = vsel %vm985_vm7, %v4345_v2, %v12078_v34  ;;  %v4391_v48 = vsel %vm1030_vm11, %v4383_v1, %v4316_v19  ;;  %v4346_v14 = vsel %vm976_vm6, %v4338_v9, %v12081_v28  ;;  %v12090_v2 = vld [vmem:[#allocation5_spill] sm:$0xff] }
 0x7ad   : > { %6127 = vmatprep.mubr.msk.f32.mxu0 %vm1933_vm12, %v4389_v8  ;;  %v4361_v57 = vsel %vm994_vm8, %v4353_v16, %v12079_v32  ;;  %v4376_v5 = vsel %vm1012_vm10, %v4368_v43, %v12083_v49  ;;  %v4354_v19 = vsel %vm985_vm7, %v4346_v14, %v12084_v0  ;;  %v10673_v8 = vld [vmem:[#allocation2 + $0x72] sm:$0xff]  ;;  %v12094_v16 = vld [vmem:[#allocation20_spill] sm:$0xff] }
 0x7ae   : > { %v4314_v55 = vpop.permute.xlu1 %4313  ;;  %4725 = vrot.lane.b32.xlu0 %v12077_v29, %s6356_s14  ;;  %v4369_v56 = vsel %vm1003_vm9, %v4361_v57, %v12082_v60  ;;  %v4384_v35 = vsel %vm1021_vm5, %v4376_v5, %v10534_v7  ;;  %v4362_v37 = vsel %vm994_vm8, %v4354_v19, %v12087_v33  ;;  %12088 = vst [vmem:[#allocation16_spill] sm:$0xff] %v10673_v8  ;;  %v10711_v1 = vld [vmem:[#allocation2 + $0x1c2] sm:$0xff]  ;;  %v12098_v14 = vld [vmem:[#allocation42_spill] sm:$0xff]  ;;  %v12099_v60 = vld [vmem:[#allocation51_spill] sm:$0xff] }
 0x7af   : > { %v4390_v4 = vsel %vm1030_vm11, %v4382_v3, %v4314_v55  ;;  %v4377_v63 = vsel %vm1012_vm10, %v4369_v56, %v12085_v40  ;;  %v4370_v9 = vsel %vm1003_vm9, %v4362_v37, %v12089_v62  ;;  %v12093_v55 = vld [vmem:[#allocation43_spill] sm:$0xff]  ;;  %12095 = vst [vmem:[#allocation17_spill] sm:$0xff] %v10711_v1  ;;  %v12096_v32 = vld [vmem:[#allocation32_spill] sm:$0xff]  ;;  %v12100_v5 = vld [vmem:[#allocation26_spill] sm:$0xff] }
 0x7b0   : > { %4619 = vrot.lane.b32.xlu1 %v12080_v53, %s6363_s11  ;;  %6128 = vmatmul.mubr.msk.f32.gmra.mrb[18].mxu0 %vm1933_vm12, %v4390_v4  ;;  %v10651_v30 = vpop.permute.xlu0 %4427  ;;  %v4385_v26 = vsel %vm1021_vm5, %v4377_v63, %v10509_v12  ;;  %v4378_v12 = vsel %vm1012_vm10, %v4370_v9, %v10514_v44  ;;  %v12092_v44 = vld [vmem:[#allocation7_spill] sm:$0xff]  ;;  %v12101_v0 = vld [vmem:[#allocation6_spill] sm:$0xff]  ;;  %v12102_v40 = vld [vmem:[#allocation29_spill] sm:$0xff] }
 0x7b1   : > { %6130 = vmatprep.mubr.msk.f32.mxu0 %vm1933_vm12, %v4391_v48  ;;  %v4393_v7 = vsel %vm1030_vm11, %v4385_v26, %v10545_v25  ;;  %v4386_v61 = vsel %vm1021_vm5, %v4378_v12, %v10556_v59  ;;  %v12103_v63 = vld [vmem:[#allocation15_spill] sm:$0xff]  ;;  %v12104_v33 = vld [vmem:[#allocation45_spill] sm:$0xff]  ;;  %v12105_v37 = vld [vmem:[#allocation50_spill] sm:$0xff] }
 0x7b2   : > { %v4318_v10 = vpop.permute.xlu1 %4317  ;;  %4569 = vrot.lane.b32.xlu0 %v12086_v38, %s6361_s19  ;;  %v12106_v62 = vld [vmem:[#allocation46_spill] sm:$0xff] }
 0x7b3   : > { %v4392_v20 = vsel %vm1030_vm11, %v4384_v35, %v4318_v10  ;;  %v12107_v12 = vld [vmem:[#allocation10_spill] sm:$0xff] }
 0x7b4   : > { %4543 = vrot.lane.b32.xlu1 %v10673_v8, %s6360_s18  ;;  %6131 = vmatmul.mubr.msk.f32.gmra.mrb[20].mxu0 %vm1933_vm12, %v4392_v20  ;;  %v10682_v18 = vpop.permute.xlu0 %4431 }
 0x7b5   : > { %6133 = vmatprep.mubr.msk.f32.mxu0 %vm1933_vm12, %v4393_v7 }
 0x7b6   : > { %v4322_v50 = vpop.permute.xlu1 %4321  ;;  %4749 = vrot.lane.b32.xlu0 %v12090_v2, %s6357_s15 }
 0x7b7   : > { %v4394_v25 = vsel %vm1030_vm11, %v4386_v61, %v4322_v50 }
 0x7b8   : > { %4723 = vrot.lane.b32.xlu1 %v12091_v45, %s6356_s14  ;;  %6134 = vmatmul.mubr.msk.f32.gmra.mrb[22].mxu0 %vm1933_vm12, %v4394_v25  ;;  %v4452_v47 = vpop.permute.xlu0 %4451  ;;  %v12108_v25 = vld [vmem:[#allocation23_spill] sm:$0xff] }
 0x7ba   : > { %v10695_v3 = vpop.permute.xlu1 %4421  ;;  %4593 = vrot.lane.b32.xlu0 %v12092_v44, %s6362_s24 }
 0x7bc   : > { %4567 = vrot.lane.b32.xlu1 %v12093_v55, %s6361_s19  ;;  %v10701_v59 = vpop.permute.xlu0 %4455  ;;  %v12109_v55 = vld [vmem:[#allocation27_spill] sm:$0xff] }
 0x7be   : > { %v10703_v34 = vpop.permute.xlu1 %4425  ;;  %4773 = vrot.lane.b32.xlu0 %v10235_v15, %s6358_s16  ;;  %v12097_v15 = vld [vmem:[#allocation25_spill] sm:$0xff] }
 0x7c0   : > { %4747 = vrot.lane.b32.xlu1 %v12094_v16, %s6357_s15  ;;  %v10709_v6 = vpop.permute.xlu0 %4459 }
 0x7c2   : > { %v10713_v4 = vpop.permute.xlu1 %4429  ;;  %4625 = vrot.lane.b32.xlu0 %v10711_v1, %s6363_s11  ;;  %v12111_v1 = vld [vmem:[#allocation39_spill] sm:$0xff] }
 0x7c4   : > { %4591 = vrot.lane.b32.xlu1 %v12096_v32, %s6362_s24  ;;  %v10719_v57 = vpop.permute.xlu0 %4463 }
 0x7c6   : > { %v10721_v43 = vpop.permute.xlu1 %4433  ;;  %4797 = vrot.lane.b32.xlu0 %v12097_v15, %s6359_s17 }
 0x7c8   : > { %4771 = vrot.lane.b32.xlu1 %v10201_v58, %s6358_s16  ;;  %v4476_v48 = vpop.permute.xlu0 %4475 }
 0x7ca   : > { %v4454_v28 = vpop.permute.xlu1 %4453  ;;  %4729 = vrot.lane.b32.xlu0 %v12098_v14, %s6356_s14 }
 0x7cc   : > { %4623 = vrot.lane.b32.xlu1 %v12099_v60, %s6363_s11  ;;  %v10731_v56 = vpop.permute.xlu0 %4479  ;;  %v6305_v60 = vld [vmem:[#allocation2 + $0x141] sm:$0xff] }
 0x7ce   : > { %v10733_v49 = vpop.permute.xlu1 %4457  ;;  %4821 = vrot.lane.b32.xlu0 %v12100_v5, %s6360_s18  ;;  %v4635_v5 = vsel %vm326_vm0, %v6305_v60, %v10579_v36 }
 0x7d0   : > { %4795 = vrot.lane.b32.xlu1 %v12101_v0, %s6359_s17  ;;  %v10739_v19 = vpop.permute.xlu0 %4483 }
 0x7d2   : > { %v10741_v58 = vpop.permute.xlu1 %4461  ;;  %4753 = vrot.lane.b32.xlu0 %v12102_v40, %s6357_s15 }
 0x7d4   : > { %4727 = vrot.lane.b32.xlu1 %v12103_v63, %s6356_s14  ;;  %v10747_v35 = vpop.permute.xlu0 %4487 }
 0x7d6   : > { %v10749_v10 = vpop.permute.xlu1 %4465  ;;  %4853 = vrot.lane.b32.xlu0 %v12104_v33, %s6361_s19 }
 0x7d8   : > { %4819 = vrot.lane.b32.xlu1 %v12105_v37, %s6360_s18  ;;  %v4500_v26 = vpop.permute.xlu0 %4499  ;;  %v12110_v37 = vld [vmem:[#allocation58_spill] sm:$0xff] }
 0x7da   : > { %v4478_v20 = vpop.permute.xlu1 %4477  ;;  %4777 = vrot.lane.b32.xlu0 %v10241_v31, %s6358_s16 }
 0x7dc   : > { %4751 = vrot.lane.b32.xlu1 %v12106_v62, %s6357_s15  ;;  %v4504_v9 = vpop.permute.xlu0 %4503 }
 0x7de   : > { %v10759_v7 = vpop.permute.xlu1 %4481  ;;  %4885 = vrot.lane.b32.xlu0 %v12103_v63, %s6362_s24 }
 0x7e0   : > { %4851 = vrot.lane.b32.xlu1 %v12107_v12, %s6361_s19  ;;  %v10765_v61 = vpop.permute.xlu0 %4507 }
 0x7e2   : > { %v10767_v50 = vpop.permute.xlu1 %4485  ;;  %4731 = vrot.lane.b32.xlu0 %v12108_v25, %s6356_s14 }
 0x7e4   : > { %4775 = vrot.lane.b32.xlu1 %v10209_v41, %s6358_s16  ;;  %v4532_v31 = vpop.permute.xlu0 %4531  ;;  %v4643_v41 = vsel %vm976_vm6, %v4635_v5, %v4452_v47 }
 0x7e5   : > { %v4651_v12 = vsel %vm985_vm7, %v4643_v41, %v4476_v48 }
 0x7e6   : > { %v10773_v45 = vpop.permute.xlu1 %4489  ;;  %4823 = vrot.lane.b32.xlu0 %v12109_v55, %s6360_s18  ;;  %v4659_v8 = vsel %vm994_vm8, %v4651_v12, %v4500_v26  ;;  %v12112_v26 = vld [vmem:[#allocation36_spill] sm:$0xff] }
 0x7e7   : > { %v4667_v36 = vsel %vm1003_vm9, %v4659_v8, %v4532_v31  ;;  %v12113_v31 = vld [vmem:[#allocation9_spill] sm:$0xff] }
 0x7e8   : > { %4883 = vrot.lane.b32.xlu1 %v12077_v29, %s6362_s24  ;;  %v4556_v63 = vpop.permute.xlu0 %4555 }
 0x7e9   : > { %v4675_v29 = vsel %vm1012_vm10, %v4667_v36, %v4556_v63 }
 0x7ea   : > { %v4502_v33 = vpop.permute.xlu1 %4501  ;;  %4733 = vrot.lane.b32.xlu0 %v12110_v37, %s6356_s14 }
 0x7ec   : > { %4799 = vrot.lane.b32.xlu1 %v12111_v1, %s6359_s17  ;;  %v4580_v55 = vpop.permute.xlu0 %4579 }
 0x7ed   : > { %v4683_v11 = vsel %vm1021_vm5, %v4675_v29, %v4580_v55  ;;  %v12114_v29 = vld [vmem:[#allocation28_spill] sm:$0xff] }
 0x7ee   : > { %v4506_v60 = vpop.permute.xlu1 %4505  ;;  %4825 = vrot.lane.b32.xlu0 %v10099_v27, %s6360_s18 }
 0x7f0   : > { %4915 = vrot.lane.b32.xlu1 %v12090_v2, %s6363_s11  ;;  %v4612_v47 = vpop.permute.xlu0 %4611 }
 0x7f1   : > { %v4691_v48 = vsel %vm1030_vm11, %v4683_v11, %v4612_v47  ;;  %v4636_v11 = vsel %vm326_vm0, %v12101_v0, %v10695_v3  ;;  %v12115_v0 = vld [vmem:[#allocation12_spill] sm:$0xff] }
 0x7f2   : > { %v10796_v5 = vpop.permute.xlu1 %4509  ;;  %4757 = vrot.lane.b32.xlu0 %v12112_v26, %s6357_s15  ;;  %6136 = vmatprep.mubr.msk.f32.mxu0 %vm1933_vm12, %v4691_v48  ;;  %v4644_v41 = vsel %vm976_vm6, %v4636_v11, %v4454_v28 }
 0x7f3   : > { %v4652_v55 = vsel %vm985_vm7, %v4644_v41, %v4478_v20 }
 0x7f4   : > { %4801 = vrot.lane.b32.xlu1 %v10057_v54, %s6359_s17  ;;  %v4614_v27 = vpop.permute.xlu0 %4613  ;;  %v4660_v36 = vsel %vm994_vm8, %v4652_v55, %v4502_v33 }
 0x7f6   : > { %v4534_v8 = vpop.permute.xlu1 %4533  ;;  %4857 = vrot.lane.b32.xlu0 %v12113_v31, %s6361_s19 }
 0x7f8   : > { %4917 = vrot.lane.b32.xlu1 %v12106_v62, %s6363_s11  ;;  %v4560_v63 = vpop.permute.xlu0 %4559  ;;  %v4668_v62 = vsel %vm1003_vm9, %v4660_v36, %v4534_v8  ;;  %v12117_v36 = vld [vmem:[#allocation30_spill] sm:$0xff] }
 0x7fa   : > { %v4558_v12 = vpop.permute.xlu1 %4557  ;;  %4781 = vrot.lane.b32.xlu0 %v10247_v13, %s6358_s16  ;;  %v4637_v13 = vsel %vm326_vm0, %v12097_v15, %v10615_v52  ;;  %v12116_v52 = vld [vmem:[#allocation52_spill] sm:$0xff] }
 0x7fb   : > { %v4676_v48 = vsel %vm1012_vm10, %v4668_v62, %v4558_v12  ;;  %v4645_v28 = vsel %vm976_vm6, %v4637_v13, %v10701_v59  ;;  %v12118_v13 = vld [vmem:[#allocation11_spill] sm:$0xff] }
 0x7fc   : > { %4755 = vrot.lane.b32.xlu1 %v12114_v29, %s6357_s15  ;;  %v4584_v47 = vpop.permute.xlu0 %4583  ;;  %v4653_v8 = vsel %vm985_vm7, %v4645_v28, %v10731_v56 }
 0x7fe   : > { %v4582_v31 = vpop.permute.xlu1 %4581  ;;  %4889 = vrot.lane.b32.xlu0 %v12108_v25, %s6362_s24  ;;  %v4661_v25 = vsel %vm994_vm8, %v4653_v8, %v4504_v9 }
 0x7ff   : > { %v4684_v3 = vsel %vm1021_vm5, %v4676_v48, %v4582_v31 }
 0x800   : > { %4855 = vrot.lane.b32.xlu1 %v12115_v0, %s6361_s19  ;;  %v4616_v20 = vpop.permute.xlu0 %4615  ;;  %v4692_v33 = vsel %vm1030_vm11, %v4684_v3, %v4614_v27  ;;  %v4639_v3 = vsel %vm326_vm0, %v10057_v54, %v10651_v30  ;;  %v12119_v54 = vld [vmem:[#allocation4_spill] sm:$0xff] }
 0x801   : > { %6137 = vmatmul.mubr.msk.f32.gmra.mrb[24].mxu0 %vm1933_vm12, %v4692_v33 }
 0x802   : > { %v4536_v11 = vpop.permute.xlu1 %4535  ;;  %4735 = vrot.lane.b32.xlu0 %v12116_v52, %s6356_s14 }
 0x803   : > { %v4669_v15 = vsel %vm1003_vm9, %v4661_v25, %v4536_v11 }
 0x804   : > { %v4677_v59 = vsel %vm1012_vm10, %v4669_v15, %v4560_v63  ;;  %4779 = vrot.lane.b32.xlu1 %v10217_v21, %s6358_s16  ;;  %v4618_v41 = vpop.permute.xlu0 %4617  ;;  %v4638_v63 = vsel %vm326_vm0, %v12111_v1, %v10703_v34 }
 0x805   : > { %v4685_v27 = vsel %vm1021_vm5, %v4677_v59, %v4584_v47  ;;  %v4646_v21 = vsel %vm976_vm6, %v4638_v63, %v10733_v49 }
 0x806   : > { %v4538_v12 = vpop.permute.xlu1 %4537  ;;  %4827 = vrot.lane.b32.xlu0 %v10115_v39, %s6360_s18  ;;  %v4693_v56 = vsel %vm1030_vm11, %v4685_v27, %v4616_v20  ;;  %v4654_v39 = vsel %vm985_vm7, %v4646_v21, %v10759_v7 }
 0x807   : > { %6139 = vmatprep.mubr.msk.f32.mxu0 %vm1933_vm12, %v4693_v56  ;;  %v4662_v47 = vsel %vm994_vm8, %v4654_v39, %v4506_v60 }
 0x808   : > { %4887 = vrot.lane.b32.xlu1 %v12098_v14, %s6362_s24  ;;  %v4564_v9 = vpop.permute.xlu0 %4563  ;;  %v4670_v62 = vsel %vm1003_vm9, %v4662_v47, %v4538_v12 }
 0x80a   : > { %v4562_v55 = vpop.permute.xlu1 %4561  ;;  %4737 = vrot.lane.b32.xlu0 %v12117_v36, %s6356_s14  ;;  %v10947_v36 = vld [vmem:[#allocation2 + $0x91] sm:$0xff] }
 0x80b   : > { %v4678_v34 = vsel %vm1012_vm10, %v4670_v62, %v4562_v55  ;;  %v12121_v55 = vld [vmem:[#allocation56_spill] sm:$0xff] }
 0x80c   : > { %4803 = vrot.lane.b32.xlu1 %v10071_v42, %s6359_s17  ;;  %v4588_v14 = vpop.permute.xlu0 %4587 }
 0x80e   : > { %v4586_v1 = vpop.permute.xlu1 %4585  ;;  %4829 = vrot.lane.b32.xlu0 %v10111_v17, %s6360_s18 }
 0x80f   : > { %v4686_v49 = vsel %vm1021_vm5, %v4678_v34, %v4586_v1 }
 0x810   : > { %4919 = vrot.lane.b32.xlu1 %v12102_v40, %s6363_s11  ;;  %v4590_v7 = vpop.permute.xlu0 %4589  ;;  %v4694_v60 = vsel %vm1030_vm11, %v4686_v49, %v4618_v41 }
 0x811   : > { %6140 = vmatmul.mubr.msk.f32.gmra.mrb[26].mxu0 %vm1933_vm12, %v4694_v60 }
 0x812   : > { %v4540_v48 = vpop.permute.xlu1 %4539  ;;  %4761 = vrot.lane.b32.xlu0 %v10229_v46, %s6357_s15  ;;  %v4647_v46 = vsel %vm976_vm6, %v4639_v3, %v10709_v6 }
 0x813   : > { %v4655_v0 = vsel %vm985_vm7, %v4647_v46, %v10739_v19 }
 0x814   : > { %4805 = vrot.lane.b32.xlu1 %v10067_v23, %s6359_s17  ;;  %v10872_v31 = vpop.permute.xlu0 %4513  ;;  %v4640_v23 = vsel %vm326_vm0, %v10071_v42, %v10713_v4  ;;  %v4663_v30 = vsel %vm994_vm8, %v4655_v0, %v10765_v61  ;;  %v10998_v0 = vld [vmem:[#allocation2 + $0x81] sm:$0xff] }
 0x815   : > { %v4648_v20 = vsel %vm976_vm6, %v4640_v23, %v10741_v58  ;;  %v4671_v42 = vsel %vm1003_vm9, %v4663_v30, %v4540_v48  ;;  %v6308_v48 = vld [vmem:[#allocation2 + $0x161] sm:$0xff]  ;;  %v6310_v30 = vld [vmem:[#allocation2 + $0x151] sm:$0xff] }
 0x816   : > { %v4542_v17 = vpop.permute.xlu1 %4541  ;;  %4861 = vrot.lane.b32.xlu0 %v12118_v13, %s6361_s19  ;;  %v4656_v6 = vsel %vm985_vm7, %v4648_v20, %v10767_v50  ;;  %v4679_v61 = vsel %vm1012_vm10, %v4671_v42, %v4564_v9  ;;  %v12120_v50 = vld [vmem:[#allocation8_spill] sm:$0xff]  ;;  %v10987_v13 = vld [vmem:[#allocation2 + $0x131] sm:$0xff] }
 0x817   : > { %v4687_v15 = vsel %vm1021_vm5, %v4679_v61, %v4588_v14  ;;  %v11010_v42 = vld [vmem:[#allocation2 + $0x121] sm:$0xff] }
 0x818   : > { %4921 = vrot.lane.b32.xlu1 %v12114_v29, %s6363_s11  ;;  %v4622_v28 = vpop.permute.xlu0 %4621  ;;  %v4664_v29 = vsel %vm994_vm8, %v4656_v6, %v10796_v5 }
 0x819   : > { %v4672_v19 = vsel %vm1003_vm9, %v4664_v29, %v4542_v17 }
 0x81a   : > { %v4566_v33 = vpop.permute.xlu1 %4565  ;;  %4785 = vrot.lane.b32.xlu0 %v12119_v54, %s6358_s16  ;;  %v6309_v54 = vld [vmem:[#allocation2 + $0x201] sm:$0xff] }
 0x81b   : > { %v4680_v58 = vsel %vm1012_vm10, %v4672_v19, %v4566_v33 }
 0x81c   : > { %4759 = vrot.lane.b32.xlu1 %v10193_v22, %s6357_s15  ;;  %v4546_v4 = vpop.permute.xlu0 %4545  ;;  %v4688_v25 = vsel %vm1021_vm5, %v4680_v58, %v4590_v7  ;;  %v12123_v58 = vld [vmem:[#allocation22_spill] sm:$0xff] }
 0x81d   : > { %v4696_v41 = vsel %vm1030_vm11, %v4688_v25, %v4622_v28  ;;  %v12122_v28 = vld [vmem:[#allocation57_spill] sm:$0xff]  ;;  %v12124_v25 = vld [vmem:[#allocation60_spill] sm:$0xff] }
 0x81e   : > { %v4512_v8 = vpop.permute.xlu1 %4511  ;;  %4893 = vrot.lane.b32.xlu0 %v12116_v52, %s6362_s24 }
 0x820   : > { %4859 = vrot.lane.b32.xlu1 %v12120_v50, %s6361_s19  ;;  %v10908_v5 = vpop.permute.xlu0 %4725 }
 0x822   : > { %v4620_v11 = vpop.permute.xlu1 %4619  ;;  %4809 = vrot.lane.b32.xlu0 %v12086_v38, %s6359_s17 }
 0x823   : > { %v4695_v59 = vsel %vm1030_vm11, %v4687_v15, %v4620_v11 }
 0x824   : > { %4783 = vrot.lane.b32.xlu1 %v10225_v24, %s6358_s16  ;;  %6142 = vmatprep.mubr.msk.f32.mxu0 %vm1933_vm12, %v4695_v59  ;;  %v4570_v52 = vpop.permute.xlu0 %4569  ;;  %v10930_v24 = vld [vmem:[#allocation2 + $0x1b1] sm:$0xff] }
 0x825   : > { %6143 = vmatmul.mubr.msk.f32.gmra.mrb[28].mxu0 %vm1933_vm12, %v4696_v41  ;;  %v4642_v47 = vsel %vm326_vm0, %v10930_v24, %v10721_v43  ;;  %v11028_v59 = vld [vmem:[#allocation2 + $0x31] sm:$0xff] }
 0x826   : > { %v4544_v27 = vpop.permute.xlu1 %4543  ;;  %4925 = vrot.lane.b32.xlu0 %v10193_v22, %s6363_s11  ;;  %v4706_v22 = vld [vmem:[#allocation2 + $0x130] sm:$0xff]  ;;  %v4650_v62 = vsel %vm976_vm6, %v4642_v47, %v10749_v10 }
 0x828   : > { %4891 = vrot.lane.b32.xlu1 %v12110_v37, %s6362_s24  ;;  %v10924_v38 = vpop.permute.xlu0 %4749 }
 0x82a   : > { %v10926_v12 = vpop.permute.xlu1 %4723  ;;  %4833 = vrot.lane.b32.xlu0 %v12092_v44, %s6360_s18 }
 0x82c   : > { %4807 = vrot.lane.b32.xlu1 %v10930_v24, %s6359_s17  ;;  %v4594_v56 = vpop.permute.xlu0 %4593 }
 0x82e   : > { %v4568_v9 = vpop.permute.xlu1 %4567  ;;  %5013 = vrot.lane.b32.xlu0 %v12090_v2, %s6356_s14  ;;  %v10949_v2 = vld [vmem:[#allocation2 + $0x1a1] sm:$0xff] }
 0x830   : > { %4923 = vrot.lane.b32.xlu1 %v12112_v26, %s6363_s11  ;;  %v10938_v37 = vpop.permute.xlu0 %4773  ;;  %v4641_v26 = vsel %vm326_vm0, %v10949_v2, %v10682_v18  ;;  %v4658_v18 = vsel %vm985_vm7, %v4650_v62, %v10773_v45 }
 0x831   : > { %v4666_v43 = vsel %vm994_vm8, %v4658_v18, %v10872_v31  ;;  %v11050_v18 = vld [vmem:[#allocation2 + $0x21] sm:$0xff] }
 0x832   : > { %v10940_v63 = vpop.permute.xlu1 %4747  ;;  %4865 = vrot.lane.b32.xlu0 %v4706_v22, %s6361_s19  ;;  %v4674_v10 = vsel %vm1003_vm9, %v4666_v43, %v4546_v4 }
 0x833   : > { %v4682_v7 = vsel %vm1012_vm10, %v4674_v10, %v4570_v52  ;;  %v12125_v52 = vld [vmem:[#allocation47_spill] sm:$0xff] }
 0x834   : > { %4831 = vrot.lane.b32.xlu1 %v12096_v32, %s6360_s18  ;;  %v4626_v44 = vpop.permute.xlu0 %4625  ;;  %v4649_v32 = vsel %vm976_vm6, %v4641_v26, %v10719_v57  ;;  %v4705_v57 = vld [vmem:[#allocation2 + $0x120] sm:$0xff]  ;;  %v4690_v31 = vsel %vm1021_vm5, %v4682_v7, %v4594_v56 }
 0x835   : > { %v4657_v14 = vsel %vm985_vm7, %v4649_v32, %v10747_v35  ;;  %v4698_v3 = vsel %vm1030_vm11, %v4690_v31, %v4626_v44  ;;  %v6314_v56 = vld [vmem:[#allocation2 + $0x181] sm:$0xff]  ;;  %v12126_v44 = vld [vmem:[#allocation19_spill] sm:$0xff] }
 0x836   : > { %v4592_v21 = vpop.permute.xlu1 %4591  ;;  %5037 = vrot.lane.b32.xlu0 %v12121_v55, %s6357_s15  ;;  %v12127_v31 = vld [vmem:[#allocation37_spill] sm:$0xff] }
 0x838   : > { %5011 = vrot.lane.b32.xlu1 %v12094_v16, %s6356_s14  ;;  %v10956_v39 = vpop.permute.xlu0 %4797  ;;  %v4665_v16 = vsel %vm994_vm8, %v4657_v14, %v4512_v8  ;;  %v6311_v8 = vld [vmem:[#allocation2 + $0x1f1] sm:$0xff] }
 0x839   : > { %v4673_v1 = vsel %vm1003_vm9, %v4665_v16, %v4544_v27 }
 0x83a   : > { %v10967_v34 = vpop.permute.xlu1 %4771  ;;  %4897 = vrot.lane.b32.xlu0 %v10947_v36, %s6362_s24  ;;  %v4681_v49 = vsel %vm1012_vm10, %v4673_v1, %v4568_v9  ;;  %v6315_v9 = vld [vmem:[#allocation2 + $0xb0] sm:$0xff]  ;;  %v6318_v1 = vld [vmem:[#allocation2 + $0xc0] sm:$0xff] }
 0x83b   : > { %v4689_v45 = vsel %vm1021_vm5, %v4681_v49, %v4592_v21  ;;  %v4939_v22 = vsel %vm326_vm0, %v6315_v9, %v10926_v12  ;;  %v4940_v10 = vsel %vm326_vm0, %v6318_v1, %v10908_v5  ;;  %v6319_v49 = vld [vmem:[#allocation2 + $0x171] sm:$0xff] }
 0x83c   : > { %4863 = vrot.lane.b32.xlu1 %v4705_v57, %s6361_s19  ;;  %v10978_v35 = vpop.permute.xlu0 %4729  ;;  %v4947_v26 = vsel %vm976_vm6, %v4939_v22, %v10940_v63 }
 0x83d   : > { %v4955_v32 = vsel %vm985_vm7, %v4947_v26, %v10967_v34  ;;  %v6317_v34 = vld [vmem:[#allocation2 + $0xf1] sm:$0xff] }
 0x83e   : > { %v4624_v60 = vpop.permute.xlu1 %4623  ;;  %5061 = vrot.lane.b32.xlu0 %v6308_v48, %s6358_s16 }
 0x83f   : > { %v4697_v17 = vsel %vm1030_vm11, %v4689_v45, %v4624_v60  ;;  %v4948_v45 = vsel %vm976_vm6, %v4940_v10, %v10924_v38 }
 0x840   : > { %5035 = vrot.lane.b32.xlu1 %v12122_v28, %s6357_s15  ;;  %6145 = vmatprep.mubr.msk.f32.mxu0 %vm1933_vm12, %v4697_v17  ;;  %v10993_v46 = vpop.permute.xlu0 %4821  ;;  %v4956_v60 = vsel %vm985_vm7, %v4948_v45, %v10938_v37 }
 0x841   : > { %6146 = vmatmul.mubr.msk.f32.gmra.mrb[30].mxu0 %vm1933_vm12, %v4698_v3  ;;  %v4964_v5 = vsel %vm994_vm8, %v4956_v60, %v10956_v39  ;;  %v6320_v3 = vld [vmem:[#allocation2 + $0xc1] sm:$0xff]  ;;  %v11160_v60 = vld [vmem:[#allocation2 + $0x111] sm:$0xff] }
 0x842   : > { %v4796_v23 = vpop.permute.xlu1 %4795  ;;  %4929 = vrot.lane.b32.xlu0 %v10987_v13, %s6363_s11  ;;  %v4972_v17 = vsel %vm1003_vm9, %v4964_v5, %v10993_v46 }
 0x843   : > { %v4963_v14 = vsel %vm994_vm8, %v4955_v32, %v4796_v23  ;;  %v12129_v32 = vld [vmem:[#allocation34_spill] sm:$0xff] }
 0x844   : > { %4895 = vrot.lane.b32.xlu1 %v10998_v0, %s6362_s24  ;;  %v11002_v20 = vpop.permute.xlu0 %4753 }
 0x846   : > { %v11004_v33 = vpop.permute.xlu1 %4727  ;;  %5085 = vrot.lane.b32.xlu0 %v6309_v54, %s6359_s17  ;;  %v11083_v54 = vld [vmem:[#allocation2 + $0x101] sm:$0xff] }
 0x848   : > { %5059 = vrot.lane.b32.xlu1 %v6310_v30, %s6358_s16  ;;  %v4854_v6 = vpop.permute.xlu0 %4853  ;;  %v6322_v30 = vld [vmem:[#allocation2 + $0x211] sm:$0xff] }
 0x849   : > { %v4980_v38 = vsel %vm1012_vm10, %v4972_v17, %v4854_v6  ;;  %v12128_v6 = vld [vmem:[#allocation41_spill] sm:$0xff] }
 0x84a   : > { %v4820_v29 = vpop.permute.xlu1 %4819  ;;  %5017 = vrot.lane.b32.xlu0 %v12102_v40, %s6356_s14  ;;  %v6312_v40 = vld [vmem:[#allocation2 + $0xd1] sm:$0xff] }
 0x84b   : > { %v4971_v62 = vsel %vm1003_vm9, %v4963_v14, %v4820_v29 }
 0x84c   : > { %4927 = vrot.lane.b32.xlu1 %v11010_v42, %s6363_s11  ;;  %v11014_v4 = vpop.permute.xlu0 %4777 }
 0x84e   : > { %v11016_v19 = vpop.permute.xlu1 %4751  ;;  %5109 = vrot.lane.b32.xlu0 %v12123_v58, %s6360_s18 }
 0x850   : > { %5083 = vrot.lane.b32.xlu1 %v6311_v8, %s6359_s17  ;;  %v4886_v61 = vpop.permute.xlu0 %4885 }
 0x851   : > { %v4988_v37 = vsel %vm1021_vm5, %v4980_v38, %v4886_v61  ;;  %v6323_v61 = vld [vmem:[#allocation2 + $0x221] sm:$0xff] }
 0x852   : > { %v4852_v50 = vpop.permute.xlu1 %4851  ;;  %5041 = vrot.lane.b32.xlu0 %v12124_v25, %s6357_s15 }
 0x853   : > { %v4979_v16 = vsel %vm1012_vm10, %v4971_v62, %v4852_v50  ;;  %v6326_v62 = vld [vmem:[#allocation2 + $0xe0] sm:$0xff] }
 0x854   : > { %5015 = vrot.lane.b32.xlu1 %v6312_v40, %s6356_s14  ;;  %v11024_v11 = vpop.permute.xlu0 %4731 }
 0x856   : > { %v11026_v15 = vpop.permute.xlu1 %4775  ;;  %5133 = vrot.lane.b32.xlu0 %v11028_v59, %s6361_s19 }
 0x858   : > { %5107 = vrot.lane.b32.xlu1 %v12125_v52, %s6360_s18  ;;  %v11034_v41 = vpop.permute.xlu0 %4823  ;;  %v11107_v52 = vld [vmem:[#allocation2 + $0x51] sm:$0xff] }
 0x85a   : > { %v4884_v27 = vpop.permute.xlu1 %4883  ;;  %5065 = vrot.lane.b32.xlu0 %v6314_v56, %s6358_s16 }
 0x85b   : > { %v4987_v63 = vsel %vm1021_vm5, %v4979_v16, %v4884_v27  ;;  %v6325_v27 = vld [vmem:[#allocation2 + $0xd0] sm:$0xff] }
 0x85c   : > { %5039 = vrot.lane.b32.xlu1 %v12126_v44, %s6357_s15  ;;  %v11041_v21 = vpop.permute.xlu0 %4733  ;;  %v4941_v56 = vsel %vm326_vm0, %v6325_v27, %v11004_v33  ;;  %v11131_v33 = vld [vmem:[%s11528_s7] ss:$0 sm:$0xff]  ;;  %v6330_v27 = vld [vmem:[#allocation2 + $0xe1] sm:$0xff] }
 0x85d   : > { %v4949_v22 = vsel %vm976_vm6, %v4941_v56, %v11016_v19 }
 0x85e   : > { %v4800_v47 = vpop.permute.xlu1 %4799  ;;  %5157 = vrot.lane.b32.xlu0 %v6312_v40, %s6362_s24  ;;  %v4957_v26 = vsel %vm985_vm7, %v4949_v22, %v11026_v15  ;;  %v4942_v15 = vsel %vm326_vm0, %v6326_v62, %v10978_v35 }
 0x85f   : > { %v4965_v14 = vsel %vm994_vm8, %v4957_v26, %v4800_v47  ;;  %v4950_v35 = vsel %vm976_vm6, %v4942_v15, %v11002_v20 }
 0x860   : > { %5131 = vrot.lane.b32.xlu1 %v11050_v18, %s6361_s19  ;;  %v11054_v12 = vpop.permute.xlu0 %4825  ;;  %v4973_v16 = vsel %vm1003_vm9, %v4965_v14, %v11034_v41  ;;  %v4958_v1 = vsel %vm985_vm7, %v4950_v35, %v11014_v4 }
 0x862   : > { %v4916_v57 = vpop.permute.xlu1 %4915  ;;  %5019 = vrot.lane.b32.xlu0 %v6317_v34, %s6356_s14 }
 0x863   : > { %v4995_v43 = vsel %vm1030_vm11, %v4987_v63, %v4916_v57  ;;  %v11142_v63 = vld [vmem:[#allocation2 + $0x41] sm:$0xff] }
 0x864   : > { %5063 = vrot.lane.b32.xlu1 %v6319_v49, %s6358_s16  ;;  %6148 = vmatprep.mubr.msk.f32.mxu0 %vm1933_vm12, %v4995_v43  ;;  %v11064_v7 = vpop.permute.xlu0 %4757 }
 0x866   : > { %v11070_v48 = vpop.permute.xlu1 %4801  ;;  %5111 = vrot.lane.b32.xlu0 %v12127_v31, %s6360_s18 }
 0x867   : > { %v4966_v20 = vsel %vm994_vm8, %v4958_v1, %v11070_v48  ;;  %v6333_v1 = vld [vmem:[#allocation2 + $0x1a2] sm:$0xff] }
 0x868   : > { %5155 = vrot.lane.b32.xlu1 %v6320_v3, %s6362_s24  ;;  %v11079_v28 = vpop.permute.xlu0 %4857  ;;  %v6329_v3 = vld [vmem:[#allocation2 + $0x191] sm:$0xff] }
 0x86a   : > { %v4918_v23 = vpop.permute.xlu1 %4917  ;;  %5021 = vrot.lane.b32.xlu0 %v11083_v54, %s6356_s14 }
 0x86b   : > { %v4996_v39 = vsel %vm1030_vm11, %v4988_v37, %v4918_v23  ;;  %v4974_v23 = vsel %vm1003_vm9, %v4966_v20, %v11054_v12  ;;  %v12130_v20 = vld [vmem:[#allocation14_spill] sm:$0xff] }
 0x86c   : > { %5087 = vrot.lane.b32.xlu1 %v6322_v30, %s6359_s17  ;;  %6149 = vmatmul.mubr.msk.f32.gmra.mrb[32].mxu0 %vm1933_vm12, %v4996_v39  ;;  %v11090_v46 = vpop.permute.xlu0 %4781  ;;  %v4982_v12 = vsel %vm1012_vm10, %v4974_v23, %v11079_v28 }
 0x86e   : > { %v11092_v29 = vpop.permute.xlu1 %4755  ;;  %5113 = vrot.lane.b32.xlu0 %v12128_v6, %s6360_s18 }
 0x870   : > { %5187 = vrot.lane.b32.xlu1 %v12121_v55, %s6363_s11  ;;  %v11098_v58 = vpop.permute.xlu0 %4889 }
 0x871   : > { %v4990_v22 = vsel %vm1021_vm5, %v4982_v12, %v11098_v58 }
 0x872   : > { %v4856_v8 = vpop.permute.xlu1 %4855  ;;  %5045 = vrot.lane.b32.xlu0 %v10538_v51, %s6357_s15 }
 0x873   : > { %v4981_v41 = vsel %vm1012_vm10, %v4973_v16, %v4856_v8 }
 0x874   : > { %5089 = vrot.lane.b32.xlu1 %v6323_v61, %s6359_s17  ;;  %v11103_v50 = vpop.permute.xlu0 %4735 }
 0x876   : > { %v11105_v40 = vpop.permute.xlu1 %4779  ;;  %5137 = vrot.lane.b32.xlu0 %v11107_v52, %s6361_s19 }
 0x878   : > { %5189 = vrot.lane.b32.xlu1 %v12126_v44, %s6363_s11  ;;  %v11113_v55 = vpop.permute.xlu0 %4827 }
 0x87a   : > { %v4888_v9 = vpop.permute.xlu1 %4887  ;;  %5069 = vrot.lane.b32.xlu0 %v10949_v2, %s6358_s16 }
 0x87b   : > { %v4989_v10 = vsel %vm1021_vm5, %v4981_v41, %v4888_v9 }
 0x87c   : > { %5043 = vrot.lane.b32.xlu1 %v12129_v32, %s6357_s15  ;;  %v11125_v44 = vpop.permute.xlu0 %4737 }
 0x87e   : > { %v11134_v2 = vpop.permute.xlu1 %4803  ;;  %5161 = vrot.lane.b32.xlu0 %v6317_v34, %s6362_s24 }
 0x87f   : > { %v6126_v19 = vpop.f32.mrb[16].mxu0 }
 0x880   : > { %v5458_v47 = vadd.f32 %v6126_v19, %v11131_v33  ;;  %5135 = vrot.lane.b32.xlu1 %v11142_v63, %s6361_s19  ;;  %v5452_v57 = vpop.f32.mrb[17].mxu0  ;;  %v11146_v43 = vpop.permute.xlu0 %4829  ;;  %v6331_v19 = vld [vmem:[#allocation2 + $0x121] sm:$0xff] }
 0x881   : > { %v5453_v34 = vadd.f32 %v11131_v33, %v5452_v57 }
 0x882   : > { %v5612_v49 = vmax.f32 %v5458_v47, 0.0  ;;  %v4920_v45 = vpop.permute.xlu1 %4919  ;;  %5023 = vrot.lane.b32.xlu0 %v11160_v60, %s6356_s14  ;;  %v6332_v47 = vld [vmem:[#allocation2 + $0x231] sm:$0xff] }
 0x883   : > { %v5611_v31 = vmax.f32 %v5453_v34, 0.0  ;;  %v4997_v5 = vsel %vm1030_vm11, %v4989_v10, %v4920_v45  ;;  %v6129_v17 = vpop.f32.mrb[18].mxu0 }
 0x884   : > { %5644 = vst.msk [vmem:[%s11151_s22 + $0x8] sm:$0xff] %vm976_vm6, %v5612_v49  ;;  %v5468_v4 = vadd.f32 %v6129_v17, %v11131_v33  ;;  %5067 = vrot.lane.b32.xlu1 %v6329_v3, %s6358_s16  ;;  %v5462_v38 = vpop.f32.mrb[19].mxu0  ;;  %6151 = vmatprep.mubr.msk.f32.mxu0 %vm1933_vm12, %v4997_v5  ;;  %v11172_v37 = vpop.permute.xlu0 %4761  ;;  %v6336_v3 = vld [vmem:[#allocation2 + $0x100] sm:$0xff] }
 0x885   : > { %5643 = vst.msk [vmem:[%s11151_s22] sm:$0xff] %vm976_vm6, %v5611_v31  ;;  %v5463_v48 = vadd.f32 %v11131_v33, %v5462_v38  ;;  %v6334_v31 = vld [vmem:[#allocation2 + $0x241] sm:$0xff]  ;;  %v4944_v38 = vsel %vm326_vm0, %v6336_v3, %v11041_v21 }
 0x886   : > { %v5614_v39 = vmax.f32 %v5468_v4, 0.0  ;;  %v4806_v30 = vpop.permute.xlu1 %4805  ;;  %5115 = vrot.lane.b32.xlu0 %v12080_v53, %s6360_s18  ;;  %v11222_v4 = vld [vmem:[#allocation2 + $0x71] sm:$0xff] }
 0x887   : > { %v5613_v6 = vmax.f32 %v5463_v48, 0.0  ;;  %v6132_v8 = vpop.f32.mrb[20].mxu0  ;;  %v6337_v48 = vld [vmem:[#allocation2 + $0xf0] sm:$0xff] }
 0x888   : > { %5646 = vst.msk [vmem:[%s11151_s22 + $0x18] sm:$0xff] %vm976_vm6, %v5614_v39  ;;  %v5478_v61 = vadd.f32 %v6132_v8, %v11131_v33  ;;  %5159 = vrot.lane.b32.xlu1 %v6330_v27, %s6362_s24  ;;  %v5472_v56 = vpop.f32.mrb[21].mxu0  ;;  %v11185_v9 = vpop.permute.xlu0 %4861  ;;  %v4943_v23 = vsel %vm326_vm0, %v6337_v48, %v11024_v11  ;;  %v4952_v39 = vsel %vm976_vm6, %v4944_v38, %v11064_v7  ;;  %v6338_v8 = vld [vmem:[#allocation2 + $0x1c1] sm:$0xff] }
 0x889   : > { %5645 = vst.msk [vmem:[%s11151_s22 + $0x10] sm:$0xff] %vm976_vm6, %v5613_v6  ;;  %v5473_v53 = vadd.f32 %v11131_v33, %v5472_v56  ;;  %v12131_v11 = vld [vmem:[#allocation16_spill] sm:$0xff] }
 0x88a   : > { %v5616_v26 = vmax.f32 %v5478_v61, 0.0  ;;  %v4922_v14 = vpop.permute.xlu1 %4921  ;;  %5025 = vrot.lane.b32.xlu0 %v6331_v19, %s6356_s14  ;;  %v4960_v61 = vsel %vm985_vm7, %v4952_v39, %v11090_v46 }
 0x88b   : > { %v5615_v62 = vmax.f32 %v5473_v53, 0.0  ;;  %v4998_v15 = vsel %vm1030_vm11, %v4990_v22, %v4922_v14  ;;  %v6135_v16 = vpop.f32.mrb[22].mxu0  ;;  %v4968_v27 = vsel %vm994_vm8, %v4960_v61, %v4806_v30 }
 0x88c   : > { %5648 = vst.msk [vmem:[%s11151_s22 + $0x28] sm:$0xff] %vm976_vm6, %v5616_v26  ;;  %v5488_v28 = vadd.f32 %v6135_v16, %v11131_v33  ;;  %5091 = vrot.lane.b32.xlu1 %v6332_v47, %s6359_s17  ;;  %v5482_v57 = vpop.f32.mrb[23].mxu0  ;;  %6152 = vmatmul.mubr.msk.f32.gmra.mrb[34].mxu0 %vm1933_vm12, %v4998_v15  ;;  %v11201_v58 = vpop.permute.xlu0 %4785  ;;  %v4976_v46 = vsel %vm1003_vm9, %v4968_v27, %v11146_v43  ;;  %v6340_v26 = vld [vmem:[#allocation2 + $0x261] sm:$0xff] }
 0x88d   : > { %5647 = vst.msk [vmem:[%s11151_s22 + $0x20] sm:$0xff] %vm976_vm6, %v5615_v62  ;;  %v5483_v35 = vadd.f32 %v11131_v33, %v5482_v57  ;;  %v6342_v57 = vld [vmem:[#allocation2 + $0x1b2] sm:$0xff] }
 0x88e   : > { %v5618_v41 = vmax.f32 %v5488_v28, 0.0  ;;  %v11206_v34 = vpop.permute.xlu1 %4759  ;;  %5117 = vrot.lane.b32.xlu0 %v6333_v1, %s6360_s18 }
 0x88f   : > { %v5617_v10 = vmax.f32 %v5483_v35, 0.0 }
 0x890   : > { %5650 = vst.msk [vmem:[%s11151_s22 + $0x38] sm:$0xff] %vm976_vm6, %v5618_v41  ;;  %5191 = vrot.lane.b32.xlu1 %v12124_v25, %s6363_s11  ;;  %v4894_v49 = vpop.permute.xlu0 %4893  ;;  %v6343_v41 = vld [vmem:[#allocation2 + $0x110] sm:$0xff] }
 0x891   : > { %5649 = vst.msk [vmem:[%s11151_s22 + $0x30] sm:$0xff] %vm976_vm6, %v5617_v10  ;;  %v4945_v1 = vsel %vm326_vm0, %v6343_v41, %v11103_v50 }
 0x892   : > { %v4860_v45 = vpop.permute.xlu1 %4859  ;;  %5049 = vrot.lane.b32.xlu0 %v12130_v20, %s6357_s15 }
 0x894   : > { %5093 = vrot.lane.b32.xlu1 %v6334_v31, %s6359_s17  ;;  %v11218_v5 = vpop.permute.xlu0 %4809 }
 0x896   : > { %v11220_v17 = vpop.permute.xlu1 %4783  ;;  %5141 = vrot.lane.b32.xlu0 %v11222_v4, %s6361_s19 }
 0x898   : > { %5193 = vrot.lane.b32.xlu1 %v12129_v32, %s6363_s11  ;;  %v4926_v25 = vpop.permute.xlu0 %4925  ;;  %v4951_v32 = vsel %vm976_vm6, %v4943_v23, %v11092_v29 }
 0x899   : > { %v4959_v21 = vsel %vm985_vm7, %v4951_v32, %v11105_v40  ;;  %v11252_v40 = vld [vmem:[#allocation2 + $0x61] sm:$0xff] }
 0x89a   : > { %v4892_v6 = vpop.permute.xlu1 %4891  ;;  %5073 = vrot.lane.b32.xlu0 %v6338_v8, %s6358_s16  ;;  %v4967_v7 = vsel %vm994_vm8, %v4959_v21, %v11134_v2  ;;  %v4984_v2 = vsel %vm1012_vm10, %v4976_v46, %v11185_v9  ;;  %v5010_v8 = vld [vmem:[#allocation2 + $0x92] sm:$0xff] }
 0x89b   : > { %v4975_v29 = vsel %vm1003_vm9, %v4967_v7, %v11113_v55  ;;  %v4992_v55 = vsel %vm1021_vm5, %v4984_v2, %v4894_v49 }
 0x89c   : > { %5047 = vrot.lane.b32.xlu1 %v12131_v11, %s6357_s15  ;;  %v4834_v56 = vpop.permute.xlu0 %4833  ;;  %v4983_v53 = vsel %vm1012_vm10, %v4975_v29, %v4860_v45  ;;  %v5000_v14 = vsel %vm1030_vm11, %v4992_v55, %v4926_v25  ;;  %v4953_v45 = vsel %vm976_vm6, %v4945_v1, %v11206_v34 }
 0x89d   : > { %v4961_v31 = vsel %vm985_vm7, %v4953_v45, %v11220_v17 }
 0x89e   : > { %v4808_v12 = vpop.permute.xlu1 %4807  ;;  %5165 = vrot.lane.b32.xlu0 %v11160_v60, %s6362_s24  ;;  %v4991_v60 = vsel %vm1021_vm5, %v4983_v53, %v4892_v6 }
 0x89f   : > { %v4969_v3 = vsel %vm994_vm8, %v4961_v31, %v4808_v12 }
 0x8a0   : > { %5139 = vrot.lane.b32.xlu1 %v11252_v40, %s6361_s19  ;;  %v11256_v30 = vpop.permute.xlu0 %5013 }
 0x8a2   : > { %v4924_v22 = vpop.permute.xlu1 %4923  ;;  %5097 = vrot.lane.b32.xlu0 %v6340_v26, %s6359_s17 }
 0x8a3   : > { %v4999_v43 = vsel %vm1030_vm11, %v4991_v60, %v4924_v22 }
 0x8a4   : > { %5071 = vrot.lane.b32.xlu1 %v10930_v24, %s6358_s16  ;;  %6154 = vmatprep.mubr.msk.f32.mxu0 %vm1933_vm12, %v4999_v43  ;;  %v4866_v19 = vpop.permute.xlu0 %4865  ;;  %v6341_v24 = vld [vmem:[#allocation2 + $0x251] sm:$0xff] }
 0x8a5   : > { %6155 = vmatmul.mubr.msk.f32.gmra.mrb[36].mxu0 %vm1933_vm12, %v5000_v14 }
 0x8a6   : > { %v4832_v9 = vpop.permute.xlu1 %4831  ;;  %5197 = vrot.lane.b32.xlu0 %v12131_v11, %s6363_s11 }
 0x8a8   : > { %5163 = vrot.lane.b32.xlu1 %v11083_v54, %s6362_s24  ;;  %v11274_v62 = vpop.permute.xlu0 %5037 }
 0x8aa   : > { %v11276_v15 = vpop.permute.xlu1 %5011  ;;  %5143 = vrot.lane.b32.xlu0 %v10998_v0, %s6361_s19 }
 0x8ac   : > { %5095 = vrot.lane.b32.xlu1 %v6341_v24, %s6359_s17  ;;  %v4898_v16 = vpop.permute.xlu0 %4897 }
 0x8ae   : > { %v4864_v28 = vpop.permute.xlu1 %4863  ;;  %5167 = vrot.lane.b32.xlu0 %v11010_v42, %s6362_s24  ;;  %v12132_v42 = vld [vmem:[#allocation17_spill] sm:$0xff] }
 0x8b0   : > { %5195 = vrot.lane.b32.xlu1 %v10538_v51, %s6363_s11  ;;  %v11285_v47 = vpop.permute.xlu0 %5061  ;;  %v6344_v51 = vld [vmem:[#allocation2 + $0x120] sm:$0xff] }
 0x8b1   : > { %v4946_v49 = vsel %vm326_vm0, %v6344_v51, %v11125_v44  ;;  %v4977_v44 = vsel %vm1003_vm9, %v4969_v3, %v4832_v9 }
 0x8b2   : > { %v5036_v54 = vpop.permute.xlu1 %5035  ;;  %5199 = vrot.lane.b32.xlu0 %v12130_v20, %s6363_s11  ;;  %v4954_v20 = vsel %vm976_vm6, %v4946_v49, %v11172_v37  ;;  %v4985_v17 = vsel %vm1012_vm10, %v4977_v44, %v4864_v28 }
 0x8b3   : > { %v4962_v50 = vsel %vm985_vm7, %v4954_v20, %v11201_v58 }
 0x8b4   : > { %5119 = vrot.lane.b32.xlu1 %v6342_v57, %s6360_s18  ;;  %v4930_v0 = vpop.permute.xlu0 %4929  ;;  %v4970_v38 = vsel %vm994_vm8, %v4962_v50, %v11218_v5 }
 0x8b5   : > { %v4978_v37 = vsel %vm1003_vm9, %v4970_v38, %v4834_v56 }
 0x8b6   : > { %v4896_v35 = vpop.permute.xlu1 %4895  ;;  %v4986_v48 = vsel %vm1012_vm10, %v4978_v37, %v4866_v19  ;;  %v6345_v19 = vld [vmem:[#allocation2 + $0x11] sm:$0xff] }
 0x8b7   : > { %v4993_v58 = vsel %vm1021_vm5, %v4985_v17, %v4896_v35  ;;  %v4994_v39 = vsel %vm1021_vm5, %v4986_v48, %v4898_v16  ;;  %v5211_v9 = vsel %vm326_vm0, %v6345_v19, %v11276_v15  ;;  %v5212_v15 = vsel %vm326_vm0, %v11050_v18, %v11256_v30 }
 0x8b8   : > { %5121 = vrot.lane.b32.xlu1 %v12132_v42, %s6360_s18  ;;  %v11294_v10 = vpop.permute.xlu0 %5085  ;;  %v5002_v6 = vsel %vm1030_vm11, %v4994_v39, %v4930_v0  ;;  %v5219_v16 = vsel %vm976_vm6, %v5211_v9, %v5036_v54  ;;  %v5220_v20 = vsel %vm976_vm6, %v5212_v15, %v11274_v62 }
 0x8b9   : > { %v5228_v50 = vsel %vm985_vm7, %v5220_v20, %v11285_v47 }
 0x8ba   : > { %v5060_v25 = vpop.permute.xlu1 %5059  ;;  %v5236_v18 = vsel %vm994_vm8, %v5228_v50, %v11294_v10 }
 0x8bb   : > { %v5227_v28 = vsel %vm985_vm7, %v5219_v16, %v5060_v25 }
 0x8bc   : > { %5145 = vrot.lane.b32.xlu1 %v10947_v36, %s6361_s19  ;;  %v11312_v34 = vpop.permute.xlu0 %5017 }
 0x8be   : > { %v4928_v23 = vpop.permute.xlu1 %4927 }
 0x8bf   : > { %v5001_v5 = vsel %vm1030_vm11, %v4993_v58, %v4928_v23 }
 0x8c0   : > { %5169 = vrot.lane.b32.xlu1 %v10987_v13, %s6362_s24  ;;  %6157 = vmatprep.mubr.msk.f32.mxu0 %vm1933_vm12, %v5001_v5  ;;  %v5110_v36 = vpop.permute.xlu0 %5109 }
 0x8c1   : > { %6158 = vmatmul.mubr.msk.f32.gmra.mrb[38].mxu0 %vm1933_vm12, %v5002_v6  ;;  %v5244_v44 = vsel %vm1003_vm9, %v5236_v18, %v5110_v36 }
 0x8c2   : > { %v5084_v61 = vpop.permute.xlu1 %5083 }
 0x8c3   : > { %v5235_v0 = vsel %vm994_vm8, %v5227_v28, %v5084_v61 }
 0x8c4   : > { %5201 = vrot.lane.b32.xlu1 %v5010_v8, %s6363_s11  ;;  %v11326_v32 = vpop.permute.xlu0 %5041 }
 0x8c6   : > { %v11328_v21 = vpop.permute.xlu1 %5015 }
 0x8c8   : > { %v5134_v27 = vpop.permute.xlu0 %5133 }
 0x8c9   : > { %v5252_v48 = vsel %vm1012_vm10, %v5244_v44, %v5134_v27 }
 0x8ca   : > { %v5108_v11 = vpop.permute.xlu1 %5107 }
 0x8cb   : > { %v5243_v35 = vsel %vm1003_vm9, %v5235_v0, %v5108_v11 }
 0x8cc   : > { %v11330_v56 = vpop.permute.xlu0 %5065 }
 0x8ce   : > { %v11332_v13 = vpop.permute.xlu1 %5039 }
 0x8d0   : > { %v5158_v7 = vpop.permute.xlu0 %5157 }
 0x8d1   : > { %v5260_v62 = vsel %vm1021_vm5, %v5252_v48, %v5158_v7  ;;  %v5213_v7 = vsel %vm326_vm0, %v11028_v59, %v11328_v21  ;;  %v5214_v59 = vsel %vm326_vm0, %v11142_v63, %v11312_v34 }
 0x8d2   : > { %v5132_v12 = vpop.permute.xlu1 %5131 }
 0x8d3   : > { %v5251_v1 = vsel %vm1012_vm10, %v5243_v35, %v5132_v12 }
 0x8d4   : > { %v6138_v46 = vpop.f32.mrb[24].mxu0  ;;  %v11334_v29 = vpop.permute.xlu0 %5019 }
 0x8d5   : > { %v5498_v53 = vadd.f32 %v6138_v46, %v11131_v33  ;;  %v5492_v2 = vpop.f32.mrb[25].mxu0 }
 0x8d6   : > { %v5493_v60 = vadd.f32 %v11131_v33, %v5492_v2  ;;  %v5064_v22 = vpop.permute.xlu1 %5063 }
 0x8d7   : > { %v5620_v26 = vmax.f32 %v5498_v53, 0.0  ;;  %v5221_v53 = vsel %vm976_vm6, %v5213_v7, %v11332_v13 }
 0x8d8   : > { %v5619_v55 = vmax.f32 %v5493_v60, 0.0  ;;  %v11338_v43 = vpop.permute.xlu0 %5111  ;;  %v5229_v60 = vsel %vm985_vm7, %v5221_v53, %v5064_v22  ;;  %v5222_v22 = vsel %vm976_vm6, %v5214_v59, %v11326_v32 }
 0x8d9   : > { %5859 = vst.msk [vmem:[%s11151_s22 + $0x48] sm:$0xff] %vm976_vm6, %v5620_v26  ;;  %v5230_v16 = vsel %vm985_vm7, %v5222_v22, %v11330_v56 }
 0x8da   : > { %5858 = vst.msk [vmem:[%s11151_s22 + $0x40] sm:$0xff] %vm976_vm6, %v5619_v55  ;;  %v5156_v14 = vpop.permute.xlu1 %5155 }
 0x8db   : > { %v5259_v42 = vsel %vm1021_vm5, %v5251_v1, %v5156_v14 }
 0x8dc   : > { %v11346_v24 = vpop.permute.xlu0 %5021 }
 0x8de   : > { %v5088_v57 = vpop.permute.xlu1 %5087 }
 0x8df   : > { %v5237_v14 = vsel %vm994_vm8, %v5229_v60, %v5088_v57 }
 0x8e0   : > { %v5114_v41 = vpop.permute.xlu0 %5113  ;;  %v5245_v21 = vsel %vm1003_vm9, %v5237_v14, %v11338_v43 }
 0x8e2   : > { %v5188_v51 = vpop.permute.xlu1 %5187 }
 0x8e3   : > { %v5267_v49 = vsel %vm1030_vm11, %v5259_v42, %v5188_v51 }
 0x8e4   : > { %v6141_v54 = vpop.f32.mrb[26].mxu0  ;;  %6160 = vmatprep.mubr.msk.f32.mxu0 %vm1933_vm12, %v5267_v49  ;;  %v11359_v45 = vpop.permute.xlu0 %5045 }
 0x8e5   : > { %v5508_v31 = vadd.f32 %v6141_v54, %v11131_v33  ;;  %v5502_v25 = vpop.f32.mrb[27].mxu0 }
 0x8e6   : > { %v5503_v3 = vadd.f32 %v11131_v33, %v5502_v25  ;;  %v5090_v38 = vpop.permute.xlu1 %5089 }
 0x8e7   : > { %v5622_v30 = vmax.f32 %v5508_v31, 0.0  ;;  %v5238_v0 = vsel %vm994_vm8, %v5230_v16, %v5090_v38 }
 0x8e8   : > { %v5621_v37 = vmax.f32 %v5503_v3, 0.0  ;;  %v5138_v17 = vpop.permute.xlu0 %5137  ;;  %v5246_v34 = vsel %vm1003_vm9, %v5238_v0, %v5114_v41 }
 0x8e9   : > { %5861 = vst.msk [vmem:[%s11151_s22 + $0x58] sm:$0xff] %vm976_vm6, %v5622_v30  ;;  %v5254_v1 = vsel %vm1012_vm10, %v5246_v34, %v5138_v17  ;;  %v5215_v17 = vsel %vm326_vm0, %v11107_v52, %v11334_v29 }
 0x8ea   : > { %5860 = vst.msk [vmem:[%s11151_s22 + $0x50] sm:$0xff] %vm976_vm6, %v5621_v37  ;;  %v5190_v47 = vpop.permute.xlu1 %5189  ;;  %v5216_v37 = vsel %vm326_vm0, %v11252_v40, %v11346_v24 }
 0x8eb   : > { %v5268_v58 = vsel %vm1030_vm11, %v5260_v62, %v5190_v47  ;;  %v5224_v48 = vsel %vm976_vm6, %v5216_v37, %v11359_v45 }
 0x8ec   : > { %6161 = vmatmul.mubr.msk.f32.gmra.mrb[40].mxu0 %vm1933_vm12, %v5268_v58  ;;  %v5070_v23 = vpop.permute.xlu0 %5069 }
 0x8ed   : > { %v5232_v47 = vsel %vm985_vm7, %v5224_v48, %v5070_v23 }
 0x8ee   : > { %v5044_v10 = vpop.permute.xlu1 %5043 }
 0x8ef   : > { %v5223_v58 = vsel %vm976_vm6, %v5215_v17, %v5044_v10 }
 0x8f0   : > { %v5162_v39 = vpop.permute.xlu0 %5161 }
 0x8f1   : > { %v5262_v42 = vsel %vm1021_vm5, %v5254_v1, %v5162_v39 }
 0x8f2   : > { %v5136_v5 = vpop.permute.xlu1 %5135 }
 0x8f3   : > { %v5253_v9 = vsel %vm1012_vm10, %v5245_v21, %v5136_v5 }
 0x8f4   : > { %v11378_v6 = vpop.permute.xlu0 %5023 }
 0x8f6   : > { %v5068_v36 = vpop.permute.xlu1 %5067 }
 0x8f7   : > { %v5231_v39 = vsel %vm985_vm7, %v5223_v58, %v5068_v36  ;;  %v5217_v36 = vsel %vm326_vm0, %v11222_v4, %v11378_v6 }
 0x8f8   : > { %v6144_v8 = vpop.f32.mrb[28].mxu0  ;;  %v11380_v61 = vpop.permute.xlu0 %5115 }
 0x8f9   : > { %v5518_v27 = vadd.f32 %v6144_v8, %v11131_v33  ;;  %v5512_v11 = vpop.f32.mrb[29].mxu0 }
 0x8fa   : > { %v5513_v12 = vadd.f32 %v11131_v33, %v5512_v11  ;;  %v5160_v46 = vpop.permute.xlu1 %5159 }
 0x8fb   : > { %v5624_v2 = vmax.f32 %v5518_v27, 0.0  ;;  %v5261_v28 = vsel %vm1021_vm5, %v5253_v9, %v5160_v46 }
 0x8fc   : > { %v5623_v26 = vmax.f32 %v5513_v12, 0.0  ;;  %v11390_v55 = vpop.permute.xlu0 %5025 }
 0x8fd   : > { %5863 = vst.msk [vmem:[%s11151_s22 + $0x68] sm:$0xff] %vm976_vm6, %v5624_v2 }
 0x8fe   : > { %5862 = vst.msk [vmem:[%s11151_s22 + $0x60] sm:$0xff] %vm976_vm6, %v5623_v26  ;;  %v5092_v19 = vpop.permute.xlu1 %5091 }
 0x8ff   : > { %v5239_v24 = vsel %vm994_vm8, %v5231_v39, %v5092_v19 }
 0x900   : > { %v5118_v13 = vpop.permute.xlu0 %5117  ;;  %v5247_v29 = vsel %vm1003_vm9, %v5239_v24, %v11380_v61 }
 0x902   : > { %v5192_v57 = vpop.permute.xlu1 %5191 }
 0x903   : > { %v5269_v35 = vsel %vm1030_vm11, %v5261_v28, %v5192_v57 }
 0x904   : > { %6163 = vmatprep.mubr.msk.f32.mxu0 %vm1933_vm12, %v5269_v35  ;;  %v11411_v63 = vpop.permute.xlu0 %5049 }
 0x906   : > { %v5094_v43 = vpop.permute.xlu1 %5093 }
 0x907   : > { %v5240_v40 = vsel %vm994_vm8, %v5232_v47, %v5094_v43 }
 0x908   : > { %v5142_v32 = vpop.permute.xlu0 %5141  ;;  %v5248_v52 = vsel %vm1003_vm9, %v5240_v40, %v5118_v13  ;;  %v6346_v13 = vld [vmem:[#allocation2 + $0x81] sm:$0xff] }
 0x909   : > { %v5256_v27 = vsel %vm1012_vm10, %v5248_v52, %v5142_v32  ;;  %v5218_v22 = vsel %vm326_vm0, %v6346_v13, %v11390_v55 }
 0x90a   : > { %v5194_v56 = vpop.permute.xlu1 %5193  ;;  %v5226_v9 = vsel %vm976_vm6, %v5218_v22, %v11411_v63 }
 0x90b   : > { %v5270_v51 = vsel %vm1030_vm11, %v5262_v42, %v5194_v56 }
 0x90c   : > { %6164 = vmatmul.mubr.msk.f32.gmra.mrb[42].mxu0 %vm1933_vm12, %v5270_v51  ;;  %v5074_v49 = vpop.permute.xlu0 %5073 }
 0x90d   : > { %v5234_v16 = vsel %vm985_vm7, %v5226_v9, %v5074_v49 }
 0x90e   : > { %v5048_v15 = vpop.permute.xlu1 %5047 }
 0x90f   : > { %v5225_v46 = vsel %vm976_vm6, %v5217_v36, %v5048_v15 }
 0x910   : > { %v5166_v54 = vpop.permute.xlu0 %5165 }
 0x911   : > { %v5264_v11 = vsel %vm1021_vm5, %v5256_v27, %v5166_v54 }
 0x912   : > { %v5140_v20 = vpop.permute.xlu1 %5139 }
 0x913   : > { %v5255_v45 = vsel %vm1012_vm10, %v5247_v29, %v5140_v20 }
 0x914   : > { %v6147_v31 = vpop.f32.mrb[30].mxu0  ;;  %v5098_v25 = vpop.permute.xlu0 %5097 }
 0x915   : > { %v5528_v41 = vadd.f32 %v6147_v31, %v11131_v33  ;;  %v5522_v50 = vpop.f32.mrb[31].mxu0  ;;  %v5242_v57 = vsel %vm994_vm8, %v5234_v16, %v5098_v25 }
 0x916   : > { %v5523_v3 = vadd.f32 %v11131_v33, %v5522_v50  ;;  %v5072_v38 = vpop.permute.xlu1 %5071 }
 0x917   : > { %v5626_v18 = vmax.f32 %v5528_v41, 0.0  ;;  %v5233_v53 = vsel %vm985_vm7, %v5225_v46, %v5072_v38 }
 0x918   : > { %v5625_v30 = vmax.f32 %v5523_v3, 0.0  ;;  %v5198_v44 = vpop.permute.xlu0 %5197 }
 0x919   : > { %5865 = vst.msk [vmem:[%s11151_s22 + $0x78] sm:$0xff] %vm976_vm6, %v5626_v18  ;;  %v5272_v61 = vsel %vm1030_vm11, %v5264_v11, %v5198_v44 }
 0x91a   : > { %5864 = vst.msk [vmem:[%s11151_s22 + $0x70] sm:$0xff] %vm976_vm6, %v5625_v30  ;;  %v5164_v62 = vpop.permute.xlu1 %5163 }
 0x91b   : > { %v5263_v23 = vsel %vm1021_vm5, %v5255_v45, %v5164_v62 }
 0x91c   : > { %v5144_v5 = vpop.permute.xlu0 %5143 }
 0x91e   : > { %v5096_v8 = vpop.permute.xlu1 %5095 }
 0x91f   : > { %v5241_v2 = vsel %vm994_vm8, %v5233_v53, %v5096_v8 }
 0x920   : > { %v5168_v7 = vpop.permute.xlu0 %5167 }
 0x922   : > { %v5196_v10 = vpop.permute.xlu1 %5195 }
 0x923   : > { %v5271_v12 = vsel %vm1030_vm11, %v5263_v23, %v5196_v10 }
 0x924   : > { %6166 = vmatprep.mubr.msk.f32.mxu0 %vm1933_vm12, %v5271_v12  ;;  %v5200_v26 = vpop.permute.xlu0 %5199 }
 0x925   : > { %6167 = vmatmul.mubr.msk.f32.gmra.mrb[44].mxu0 %vm1933_vm12, %v5272_v61 }
 0x926   : > { %v5120_v60 = vpop.permute.xlu1 %5119 }
 0x927   : > { %v5249_v4 = vsel %vm1003_vm9, %v5241_v2, %v5120_v60 }
 0x928   : > { %v5257_v6 = vsel %vm1012_vm10, %v5249_v4, %v5144_v5 }
 0x929   : > { %v5265_v14 = vsel %vm1021_vm5, %v5257_v6, %v5168_v7 }
 0x92a   : > { %v5122_v19 = vpop.permute.xlu1 %5121  ;;  %v5273_v59 = vsel %vm1030_vm11, %v5265_v14, %v5200_v26 }
 0x92b   : > { %6169 = vmatprep.mubr.msk.f32.mxu0 %vm1933_vm12, %v5273_v59  ;;  %v5250_v0 = vsel %vm1003_vm9, %v5242_v57, %v5122_v19 }
 0x92e   : > { %v5146_v21 = vpop.permute.xlu1 %5145 }
 0x92f   : > { %v5258_v35 = vsel %vm1012_vm10, %v5250_v0, %v5146_v21 }
 0x932   : > { %v5170_v28 = vpop.permute.xlu1 %5169 }
 0x933   : > { %v5266_v34 = vsel %vm1021_vm5, %v5258_v35, %v5170_v28 }
 0x936   : > { %v5202_v43 = vpop.permute.xlu1 %5201 }
 0x937   : > { %v5274_v32 = vsel %vm1030_vm11, %v5266_v34, %v5202_v43 }
 0x938   : > { %6170 = vmatmul.mubr.msk.f32.gmra.mrb[46].mxu0 %vm1933_vm12, %v5274_v32 }
 0x93f   : > { %v6150_v55 = vpop.f32.mrb[32].mxu0 }
 0x940   : > { %v5538_v63 = vadd.f32 %v6150_v55, %v11131_v33  ;;  %v5532_v1 = vpop.f32.mrb[33].mxu0 }
 0x941   : > { %v5533_v42 = vadd.f32 %v11131_v33, %v5532_v1 }
 0x942   : > { %v5628_v56 = vmax.f32 %v5538_v63, 0.0 }
 0x943   : > { %v5627_v51 = vmax.f32 %v5533_v42, 0.0 }
 0x944   : > { %5867 = vst.msk [vmem:[%s11151_s22 + $0x88] sm:$0xff] %vm976_vm6, %v5628_v56 }
 0x945   : > { %5866 = vst.msk [vmem:[%s11151_s22 + $0x80] sm:$0xff] %vm976_vm6, %v5627_v51 }
 0x95f   : > { %v6153_v49 = vpop.f32.mrb[34].mxu0 }
 0x960   : > { %v5548_v15 = vadd.f32 %v6153_v49, %v11131_v33  ;;  %v5542_v54 = vpop.f32.mrb[35].mxu0 }
 0x961   : > { %v5543_v20 = vadd.f32 %v11131_v33, %v5542_v54 }
 0x962   : > { %v5630_v31 = vmax.f32 %v5548_v15, 0.0 }
 0x963   : > { %v5629_v25 = vmax.f32 %v5543_v20, 0.0 }
 0x964   : > { %5869 = vst.msk [vmem:[%s11151_s22 + $0x98] sm:$0xff] %vm976_vm6, %v5630_v31 }
 0x965   : > { %5868 = vst.msk [vmem:[%s11151_s22 + $0x90] sm:$0xff] %vm976_vm6, %v5629_v25 }
 0x978   : > { %v6156_v41 = vpop.f32.mrb[36].mxu0 }
 0x979   : > { %v5558_v50 = vadd.f32 %v6156_v41, %v11131_v33  ;;  %v5552_v3 = vpop.f32.mrb[37].mxu0 }
 0x97a   : > { %v5553_v38 = vadd.f32 %v11131_v33, %v5552_v3 }
 0x97b   : > { %v5632_v18 = vmax.f32 %v5558_v50, 0.0 }
 0x97c   : > { %v5631_v30 = vmax.f32 %v5553_v38, 0.0 }
 0x97d   : > { %5871 = vst.msk [vmem:[%s11151_s22 + $0xa8] sm:$0xff] %vm976_vm6, %v5632_v18 }
 0x97e   : > { %5870 = vst.msk [vmem:[%s11151_s22 + $0xa0] sm:$0xff] %vm976_vm6, %v5631_v30 }
 0x994   : > { %v6159_v44 = vpop.f32.mrb[38].mxu0 }
 0x995   : > { %v5568_v37 = vadd.f32 %v6159_v44, %v11131_v33  ;;  %v5562_v17 = vpop.f32.mrb[39].mxu0 }
 0x996   : > { %v5563_v48 = vadd.f32 %v11131_v33, %v5562_v17 }
 0x997   : > { %v5634_v62 = vmax.f32 %v5568_v37, 0.0 }
 0x998   : > { %v5633_v47 = vmax.f32 %v5563_v48, 0.0 }
 0x999   : > { %5873 = vst.msk [vmem:[%s11151_s22 + $0xb8] sm:$0xff] %vm976_vm6, %v5634_v62 }
 0x99a   : > { %5872 = vst.msk [vmem:[%s11151_s22 + $0xb0] sm:$0xff] %vm976_vm6, %v5633_v47 }
 0x9bf   : > { %v6162_v58 = vpop.f32.mrb[40].mxu0 }
 0x9c0   : > { %v5578_v39 = vadd.f32 %v6162_v58, %v11131_v33  ;;  %v5572_v40 = vpop.f32.mrb[41].mxu0 }
 0x9c1   : > { %v5573_v24 = vadd.f32 %v11131_v33, %v5572_v40 }
 0x9c2   : > { %v5636_v5 = vmax.f32 %v5578_v39, 0.0 }
 0x9c3   : > { %v5635_v8 = vmax.f32 %v5573_v24, 0.0 }
 0x9c4   : > { %5875 = vst.msk [vmem:[%s11151_s22 + $0xc8] sm:$0xff] %vm976_vm6, %v5636_v5 }
 0x9c5   : > { %5874 = vst.msk [vmem:[%s11151_s22 + $0xc0] sm:$0xff] %vm976_vm6, %v5635_v8 }
 0x9df   : > { %v6165_v52 = vpop.f32.mrb[42].mxu0 }
 0x9e0   : > { %v5588_v29 = vadd.f32 %v6165_v52, %v11131_v33  ;;  %v5582_v45 = vpop.f32.mrb[43].mxu0 }
 0x9e1   : > { %v5583_v27 = vadd.f32 %v11131_v33, %v5582_v45 }
 0x9e2   : > { %v5638_v23 = vmax.f32 %v5588_v29, 0.0 }
 0x9e3   : > { %v5637_v10 = vmax.f32 %v5583_v27, 0.0 }
 0x9e4   : > { %5877 = vst.msk [vmem:[%s11151_s22 + $0xd8] sm:$0xff] %vm976_vm6, %v5638_v23 }
 0x9e5   : > { %5876 = vst.msk [vmem:[%s11151_s22 + $0xd0] sm:$0xff] %vm976_vm6, %v5637_v10 }
 0x9f8   : > { %v6168_v36 = vpop.f32.mrb[44].mxu0 }
 0x9f9   : > { %v5598_v11 = vadd.f32 %v6168_v36, %v11131_v33  ;;  %v5592_v7 = vpop.f32.mrb[45].mxu0 }
 0x9fa   : > { %v5593_v12 = vadd.f32 %v11131_v33, %v5592_v7 }
 0x9fb   : > { %v5640_v46 = vmax.f32 %v5598_v11, 0.0 }
 0x9fc   : > { %v5639_v61 = vmax.f32 %v5593_v12, 0.0 }
 0x9fd   : > { %5879 = vst.msk [vmem:[%s11151_s22 + $0xe8] sm:$0xff] %vm976_vm6, %v5640_v46 }
 0x9fe   : > { %5878 = vst.msk [vmem:[%s11151_s22 + $0xe0] sm:$0xff] %vm976_vm6, %v5639_v61 }
 0xa0b   : > { %v6171_v53 = vpop.f32.mrb[46].mxu0 }
 0xa0c   : > { %v5608_v2 = vadd.f32 %v6171_v53, %v11131_v33  ;;  %v5602_v60 = vpop.f32.mrb[47].mxu0 }
 0xa0d   : > { %v5603_v4 = vadd.f32 %v11131_v33, %v5602_v60 }
 0xa0e   : > { %v5642_v6 = vmax.f32 %v5608_v2, 0.0 }
 0xa0f   : > { %v5641_v26 = vmax.f32 %v5603_v4, 0.0 }
 0xa10   : > { %5881 = vst.msk [vmem:[%s11151_s22 + $0xf8] sm:$0xff] %vm976_vm6, %v5642_v6 }
 0xa11   : > { %5880 = vst.msk [vmem:[%s11151_s22 + $0xf0] sm:$0xff] %vm976_vm6, %v5641_v26 }
 0xa12 PF: > { %s18_s27 = sadd.s32 1, %s6353_s27  }
 0xa13   : > { %p15_p4 = scmp.ge.s32.totalorder %s18_s27, 4  }
 0xa15   :  { %17 = sbr.rel (!%p15_p4) target bundleno = 1 (0x1), region = 104 }

</bundles_post_ra>
